<compile_context>
chip_gen: v6e
topology: v6e:2x2x1
jax: 0.10.0
libtpu: 0.0.40
codegen_flags: <defaults>
</compile_context>

<pallas_src>
import functools
import jax
import jax.numpy as jnp
from jax.experimental import pallas as pl
from jax.experimental.pallas import tpu as pltpu


# ----------------------------------------------------------------------------
# Pallas kernels
# ----------------------------------------------------------------------------

def _conv_chain_max_kernel(x_ref, w1_ref, t1_ref, w2_ref, t2_ref, w3_ref, t3_ref,
                           o_ref, *, n_points, tn):
    """T-Net conv chain Cin->64->128->1024 (+bias/BN/relu) + masked max over points."""
    nt = pl.program_id(1)
    x = x_ref[0]                                                     # (TN, Cin) bf16
    y = jnp.dot(x, w1_ref[...], preferred_element_type=jnp.float32) + t1_ref[...]
    y = jnp.maximum(y, 0.0)
    y = jnp.dot(y.astype(jnp.bfloat16), w2_ref[...],
                preferred_element_type=jnp.float32) + t2_ref[...]
    y = jnp.maximum(y, 0.0)
    y = jnp.dot(y.astype(jnp.bfloat16), w3_ref[...],
                preferred_element_type=jnp.float32) + t3_ref[...]
    y = jnp.maximum(y, 0.0)                                          # (TN, 1024) >= 0

    # Mask padded rows (beyond N); 0 is neutral for max over relu outputs.
    row = jax.lax.broadcasted_iota(jnp.int32, y.shape, 0) + nt * tn
    y = jnp.where(row < n_points, y, 0.0)
    tile_max = jnp.max(y, axis=0, keepdims=True)                     # (1, 1024)

    @pl.when(nt == 0)
    def _():
        o_ref[...] = jnp.zeros_like(o_ref)
    o_ref[0] = jnp.maximum(o_ref[0], tile_max)


def _tnet_fc_kernel(g_ref, w1_ref, t1_ref, w2_ref, t2_ref, w3_ref, t3_ref, o_ref):
    """T-Net fc head: 1024->512->256->K*K; identity already folded into t3."""
    g = g_ref[...].astype(jnp.bfloat16)                              # (B, 1024)
    y = jnp.dot(g, w1_ref[...], preferred_element_type=jnp.float32) + t1_ref[...]
    y = jnp.maximum(y, 0.0)
    y = jnp.dot(y.astype(jnp.bfloat16), w2_ref[...],
                preferred_element_type=jnp.float32) + t2_ref[...]
    y = jnp.maximum(y, 0.0)
    o_ref[...] = jnp.dot(y.astype(jnp.bfloat16), w3_ref[...],
                         preferred_element_type=jnp.float32) + t3_ref[...]


def _conv12_kernel(x_ref, w1_ref, t1_ref, w2_ref, t2_ref, o_ref):
    """conv1 (input transform folded into per-batch weight) + conv2, both BN+relu."""
    x = x_ref[0]                                                     # (TN, 3) bf16
    y = jnp.dot(x, w1_ref[0], preferred_element_type=jnp.float32) + t1_ref[...]
    y = jnp.maximum(y, 0.0)
    y = jnp.dot(y.astype(jnp.bfloat16), w2_ref[...],
                preferred_element_type=jnp.float32) + t2_ref[...]
    y = jnp.maximum(y, 0.0)
    o_ref[0] = y.astype(o_ref.dtype)


def _conv345_max_kernel(h_ref, w3_ref, t3_ref, w4_ref, t4_ref, w5_ref, t5_ref,
                        o_ref, *, n_points, tn):
    """conv3 (feature transform folded, per-batch weight) + conv4 + conv5 + masked max."""
    nt = pl.program_id(1)
    h = h_ref[0]                                                     # (TN, 64) bf16
    y = jnp.dot(h, w3_ref[0], preferred_element_type=jnp.float32) + t3_ref[...]
    y = jnp.maximum(y, 0.0)
    y = jnp.dot(y.astype(jnp.bfloat16), w4_ref[...],
                preferred_element_type=jnp.float32) + t4_ref[...]
    y = jnp.maximum(y, 0.0)
    y = jnp.dot(y.astype(jnp.bfloat16), w5_ref[...],
                preferred_element_type=jnp.float32) + t5_ref[...]
    y = jnp.maximum(y, 0.0)                                          # (TN, 1024)

    row = jax.lax.broadcasted_iota(jnp.int32, y.shape, 0) + nt * tn
    y = jnp.where(row < n_points, y, 0.0)
    tile_max = jnp.max(y, axis=0, keepdims=True)                     # (1, 1024)

    @pl.when(nt == 0)
    def _():
        o_ref[...] = jnp.zeros_like(o_ref)
    o_ref[0] = jnp.maximum(o_ref[0], tile_max)


def _head_kernel(h_ref, w6_ref, g6_ref, w7_ref, t7_ref, w8_ref, t8_ref,
                 wc_ref, tc_ref, o_ref):
    """conv6 (point-feature half + per-batch global shift) + conv7 + conv8
    + classifier + log_softmax, all on one resident M-tile."""
    h = h_ref[0]                                                     # (TN, 64) bf16
    y = jnp.dot(h, w6_ref[0], preferred_element_type=jnp.float32) + g6_ref[0]
    y = jnp.maximum(y, 0.0)                                          # (TN, 512)
    y = jnp.dot(y.astype(jnp.bfloat16), w7_ref[...],
                preferred_element_type=jnp.float32) + t7_ref[...]
    y = jnp.maximum(y, 0.0)                                          # (TN, 256)
    y = jnp.dot(y.astype(jnp.bfloat16), w8_ref[...],
                preferred_element_type=jnp.float32) + t8_ref[...]
    y = jnp.maximum(y, 0.0)                                          # (TN, 128)
    logits = jnp.dot(y.astype(jnp.bfloat16), wc_ref[...],
                     preferred_element_type=jnp.float32) + tc_ref[...]
    m = jnp.max(logits, axis=-1, keepdims=True)
    s = logits - m
    lse = jnp.log(jnp.sum(jnp.exp(s), axis=-1, keepdims=True))
    o_ref[0] = (s - lse).astype(o_ref.dtype)


# ----------------------------------------------------------------------------
# pallas_call wrappers
# ----------------------------------------------------------------------------

def _choose_tn(n, target=256):
    """Point-tile size: big enough to amortize grid-step overhead, small enough
    to keep per-step VMEM a few MiB on every generation (v7x has 64 MiB)."""
    if n <= target:
        return n
    return max(8, (target // 8) * 8)


def tnet_conv_max(x, c1, c2, c3, tn):
    """(B, N, Cin) -> (B, 1024): fused T-Net conv chain + global max over points."""
    B, N, cin = x.shape
    w1, t1 = c1
    w2, t2 = c2
    w3, t3 = c3
    grid = (B, pl.cdiv(N, tn))
    kern = functools.partial(_conv_chain_max_kernel, n_points=N, tn=tn)
    out = pl.pallas_call(
        kern,
        out_shape=jax.ShapeDtypeStruct((B, 1, 1024), jnp.float32),
        grid=grid,
        in_specs=[
            pl.BlockSpec((1, tn, cin), lambda b, n: (b, n, 0)),
            pl.BlockSpec((cin, 64), lambda b, n: (0, 0)),
            pl.BlockSpec((1, 64), lambda b, n: (0, 0)),
            pl.BlockSpec((64, 128), lambda b, n: (0, 0)),
            pl.BlockSpec((1, 128), lambda b, n: (0, 0)),
            pl.BlockSpec((128, 1024), lambda b, n: (0, 0)),
            pl.BlockSpec((1, 1024), lambda b, n: (0, 0)),
        ],
        out_specs=pl.BlockSpec((1, 1, 1024), lambda b, n: (b, 0, 0)),
        compiler_params=pltpu.CompilerParams(
            dimension_semantics=("parallel", "arbitrary")),
    )(x.astype(jnp.bfloat16), w1.astype(jnp.bfloat16), t1,
      w2.astype(jnp.bfloat16), t2, w3.astype(jnp.bfloat16), t3)
    return out[:, 0, :]


def tnet_fc(g, f1, f2, f3):
    """(B, 1024) -> (B, K*K), identity already folded into f3's shift."""
    B = g.shape[0]
    w1, t1 = f1
    w2, t2 = f2
    w3, t3 = f3
    kk = w3.shape[1]
    return pl.pallas_call(
        _tnet_fc_kernel,
        out_shape=jax.ShapeDtypeStruct((B, kk), jnp.float32),
        grid=(1,),
        in_specs=[
            pl.BlockSpec((B, 1024), lambda i: (0, 0)),
            pl.BlockSpec((1024, 512), lambda i: (0, 0)),
            pl.BlockSpec((1, 512), lambda i: (0, 0)),
            pl.BlockSpec((512, 256), lambda i: (0, 0)),
            pl.BlockSpec((1, 256), lambda i: (0, 0)),
            pl.BlockSpec((256, kk), lambda i: (0, 0)),
            pl.BlockSpec((1, kk), lambda i: (0, 0)),
        ],
        out_specs=pl.BlockSpec((B, kk), lambda i: (0, 0)),
    )(g, w1.astype(jnp.bfloat16), t1, w2.astype(jnp.bfloat16), t2,
      w3.astype(jnp.bfloat16), t3)


def conv12(x, w1_eff, t1, w2, t2, tn):
    B, N, cin = x.shape
    grid = (B, pl.cdiv(N, tn))
    return pl.pallas_call(
        _conv12_kernel,
        out_shape=jax.ShapeDtypeStruct((B, N, 64), jnp.bfloat16),
        grid=grid,
        in_specs=[
            pl.BlockSpec((1, tn, cin), lambda b, n: (b, n, 0)),
            pl.BlockSpec((1, cin, 64), lambda b, n: (b, 0, 0)),
            pl.BlockSpec((1, 64), lambda b, n: (0, 0)),
            pl.BlockSpec((64, 64), lambda b, n: (0, 0)),
            pl.BlockSpec((1, 64), lambda b, n: (0, 0)),
        ],
        out_specs=pl.BlockSpec((1, tn, 64), lambda b, n: (b, n, 0)),
        compiler_params=pltpu.CompilerParams(
            dimension_semantics=("parallel", "parallel")),
    )(x.astype(jnp.bfloat16), w1_eff.astype(jnp.bfloat16), t1,
      w2.astype(jnp.bfloat16), t2)


def conv345_max(h, w3_eff, t3, w4, t4, w5, t5, tn):
    B, N, _ = h.shape
    grid = (B, pl.cdiv(N, tn))
    kern = functools.partial(_conv345_max_kernel, n_points=N, tn=tn)
    flops = 2 * B * N * (64 * 64 + 64 * 128 + 128 * 1024)
    bytes_accessed = B * N * 64 * 2 + B * 1024 * 4 + (64 * 64 * B + 64 * 128 + 128 * 1024) * 2
    out = pl.pallas_call(
        kern,
        out_shape=jax.ShapeDtypeStruct((B, 1, 1024), jnp.float32),
        grid=grid,
        in_specs=[
            pl.BlockSpec((1, tn, 64), lambda b, n: (b, n, 0)),
            pl.BlockSpec((1, 64, 64), lambda b, n: (b, 0, 0)),
            pl.BlockSpec((1, 64), lambda b, n: (0, 0)),
            pl.BlockSpec((64, 128), lambda b, n: (0, 0)),
            pl.BlockSpec((1, 128), lambda b, n: (0, 0)),
            pl.BlockSpec((128, 1024), lambda b, n: (0, 0)),
            pl.BlockSpec((1, 1024), lambda b, n: (0, 0)),
        ],
        out_specs=pl.BlockSpec((1, 1, 1024), lambda b, n: (b, 0, 0)),
        compiler_params=pltpu.CompilerParams(
            dimension_semantics=("parallel", "arbitrary")),
        cost_estimate=pl.CostEstimate(flops=flops, transcendentals=0,
                                      bytes_accessed=bytes_accessed),
    )(h.astype(jnp.bfloat16), w3_eff.astype(jnp.bfloat16), t3,
      w4.astype(jnp.bfloat16), t4, w5.astype(jnp.bfloat16), t5)
    return out[:, 0, :]


def head(h, w6pf_eff, g6_shift, w7, t7, w8, t8, wc, tc, tn):
    B, N, _ = h.shape
    C = wc.shape[1]
    grid = (B, pl.cdiv(N, tn))
    flops = 2 * B * N * (64 * 512 + 512 * 256 + 256 * 128 + 128 * C)
    bytes_accessed = B * N * 64 * 2 + B * N * C * 4 + \
        (B * 64 * 512 + 512 * 256 + 256 * 128 + 128 * C) * 2
    return pl.pallas_call(
        _head_kernel,
        out_shape=jax.ShapeDtypeStruct((B, N, C), jnp.float32),
        grid=grid,
        in_specs=[
            pl.BlockSpec((1, tn, 64), lambda b, n: (b, n, 0)),
            pl.BlockSpec((1, 64, 512), lambda b, n: (b, 0, 0)),
            pl.BlockSpec((1, 1, 512), lambda b, n: (b, 0, 0)),
            pl.BlockSpec((512, 256), lambda b, n: (0, 0)),
            pl.BlockSpec((1, 256), lambda b, n: (0, 0)),
            pl.BlockSpec((256, 128), lambda b, n: (0, 0)),
            pl.BlockSpec((1, 128), lambda b, n: (0, 0)),
            pl.BlockSpec((128, C), lambda b, n: (0, 0)),
            pl.BlockSpec((1, C), lambda b, n: (0, 0)),
        ],
        out_specs=pl.BlockSpec((1, tn, C), lambda b, n: (b, n, 0)),
        compiler_params=pltpu.CompilerParams(
            dimension_semantics=("parallel", "parallel")),
        cost_estimate=pl.CostEstimate(flops=flops,
                                      transcendentals=B * N * (C + 1),
                                      bytes_accessed=bytes_accessed),
    )(h.astype(jnp.bfloat16), w6pf_eff.astype(jnp.bfloat16), g6_shift,
      w7.astype(jnp.bfloat16), t7, w8.astype(jnp.bfloat16), t8,
      wc.astype(jnp.bfloat16), tc)


# ----------------------------------------------------------------------------
# Deterministic parameter construction (synthetic, not a checkpoint load)
# ----------------------------------------------------------------------------

BN_EPS = 1e-5


def _make_layer(key, cin, cout, bn=True):
    """Returns (W_scaled[cin,cout] f32, shift[1,cout] f32) with BN scale folded
    into the weight and bias/BN-beta folded into the shift (eval-mode BN)."""
    kw, kb, kg, kbe = jax.random.split(key, 4)
    w = jax.random.normal(kw, (cin, cout), jnp.float32) / jnp.sqrt(jnp.float32(cin))
    b = 0.02 * jax.random.normal(kb, (cout,), jnp.float32)
    if bn:
        gamma = 1.0 + 0.1 * jax.random.normal(kg, (cout,), jnp.float32)
        beta = 0.1 * jax.random.normal(kbe, (cout,), jnp.float32)
        mean = jnp.zeros((cout,), jnp.float32)
        var = jnp.ones((cout,), jnp.float32)
        scale = gamma / jnp.sqrt(var + BN_EPS)
        shift = beta - mean * scale + b * scale
    else:
        scale = jnp.ones((cout,), jnp.float32)
        shift = b
    w_scaled = w * scale[None, :]
    return w_scaled, shift.reshape(1, cout)


def _make_tnet(key, k_in, k_out):
    ks = jax.random.split(key, 6)
    w3, t3 = _make_layer(ks[5], 256, k_out * k_out, bn=False)
    iden = jnp.eye(k_out, dtype=jnp.float32).reshape(1, k_out * k_out)
    return {
        "c1": _make_layer(ks[0], k_in, 64),
        "c2": _make_layer(ks[1], 64, 128),
        "c3": _make_layer(ks[2], 128, 1024),
        "f1": _make_layer(ks[3], 1024, 512),
        "f2": _make_layer(ks[4], 512, 256),
        "f3": (w3, t3 + iden),        # identity matrix folded into f3's shift
    }


def init_params(key, class_num=2, global_feat=False):
    ks = jax.random.split(key, 12)
    cin6 = 1024 if global_feat else 1088
    w6, t6 = _make_layer(ks[7], cin6, 512)
    if global_feat:
        w6g, w6pf = w6, jnp.zeros((64, 512), jnp.float32)
    else:
        # channel order in the reference concat is [global(1024), pointfeat(64)]
        w6g, w6pf = w6[:1024], w6[1024:]
    return {
        "itn": _make_tnet(ks[0], 3, 3),
        "conv1": _make_layer(ks[1], 3, 64),
        "conv2": _make_layer(ks[2], 64, 64),
        "ftn": _make_tnet(ks[3], 64, 64),
        "conv3": _make_layer(ks[4], 64, 64),
        "conv4": _make_layer(ks[5], 64, 128),
        "conv5": _make_layer(ks[6], 128, 1024),
        "conv6_g": w6g,               # (1024, 512) global-feature half
        "conv6_pf": w6pf,             # (64, 512)  point-feature half
        "conv6_shift": t6,            # (1, 512)
        "conv7": _make_layer(ks[8], 512, 256),
        "conv8": _make_layer(ks[9], 256, 128),
        "classifier": _make_layer(ks[10], 128, class_num, bn=False),
    }


# ----------------------------------------------------------------------------
# Forward pass (tiny per-batch weight folds in JAX, hot path in Pallas kernels)
# ----------------------------------------------------------------------------

def tnet_forward(x_bnc, p, tn):
    """Standard PointNet T-Net: (B, N, Kin) -> (B, K, K)."""
    B = x_bnc.shape[0]
    kk = p["f3"][0].shape[1]
    K = int(round(kk ** 0.5))
    g = tnet_conv_max(x_bnc, p["c1"], p["c2"], p["c3"], tn)      # (B, 1024)
    t = tnet_fc(g, p["f1"], p["f2"], p["f3"])                    # (B, K*K)
    return t.reshape(B, K, K)


def pointnet_segmentation_forward(x_bcn, params):
    """x_bcn: (B, 3, N) matching the PyTorch NCW input convention."""
    B, _, N = x_bcn.shape
    tn = _choose_tn(N)
    x = jnp.transpose(x_bcn, (0, 2, 1)).astype(jnp.bfloat16)     # (B, N, 3)

    # ---- input T-Net; its 3x3 transform is folded into conv1's per-batch weight
    t_in = tnet_forward(x, params["itn"], tn)                    # (B, 3, 3) f32
    w1, t1 = params["conv1"]
    w1_eff = jnp.einsum("bij,jk->bik", t_in, w1)                 # (B, 3, 64), tiny

    w2, t2 = params["conv2"]
    h = conv12(x, w1_eff, t1, w2, t2, tn)                        # (B, N, 64) bf16

    # ---- feature T-Net; folded into conv3 and conv6's point-feature half
    t_feat = tnet_forward(h, params["ftn"], tn)                  # (B, 64, 64) f32
    w3, t3 = params["conv3"]
    w3_eff = jnp.einsum("bij,jk->bik", t_feat, w3)               # (B, 64, 64), tiny

    w4, t4 = params["conv4"]
    w5, t5 = params["conv5"]
    g = conv345_max(h, w3_eff, t3, w4, t4, w5, t5, tn)           # (B, 1024) f32

    # ---- conv6 split weight: global-feature half becomes a per-batch shift,
    #      point-feature half gets the feature transform folded in.
    w6pf_eff = jnp.einsum("bij,jk->bik", t_feat, params["conv6_pf"])   # (B, 64, 512)
    g6_shift = (jnp.dot(g, params["conv6_g"]) + params["conv6_shift"])[:, None, :]  # (B,1,512)

    w7, t7 = params["conv7"]
    w8, t8 = params["conv8"]
    wc, tc = params["classifier"]
    return head(h, w6pf_eff, g6_shift, w7, t7, w8, t8, wc, tc, tn)     # (B, N, class_num)


# ----------------------------------------------------------------------------
if __name__ == "__main__":
    B, C_IN, N_PTS = 2, 3, 16
    key = jax.random.PRNGKey(0)
    kx, kp = jax.random.split(key)

    x = jax.random.normal(kx, (B, C_IN, N_PTS), jnp.float32)     # PyTorch NCW input
    params = init_params(kp, class_num=2, global_feat=False)

    fwd = jax.jit(pointnet_segmentation_forward)
    out = jax.block_until_ready(fwd(x, params))

    assert out.shape == (B, N_PTS, 2), out.shape
    assert bool(jnp.all(jnp.isfinite(out)))
    print("KERNEL_OK")
</pallas_src>

<mosaic_0001>
module attributes {stable_mosaic.version = 11 : i64} {
  func.func @_tnet_fc_kernel(%arg0: i32, %arg1: memref<2x1024xf32, #tpu.memory_space<vmem>>, %arg2: memref<1024x512xbf16, #tpu.memory_space<vmem>>, %arg3: memref<1x512xf32, #tpu.memory_space<vmem>>, %arg4: memref<512x256xbf16, #tpu.memory_space<vmem>>, %arg5: memref<1x256xf32, #tpu.memory_space<vmem>>, %arg6: memref<256x9xbf16, #tpu.memory_space<vmem>>, %arg7: memref<1x9xf32, #tpu.memory_space<vmem>>, %arg8: memref<2x9xf32, #tpu.memory_space<vmem>>) attributes {dimension_semantics = [#tpu.dimension_semantics<arbitrary>], iteration_bounds = array<i64: 1>, scalar_prefetch = 0 : i64, scratch_operands = 0 : i64, tpu.core_type = #tpu.core_type<tc>, window_params = [{pipeline_mode = #tpu.pipeline_mode<synchronous>, transform_indices = @transform_0, window_bounds = array<i64: 2, 1024>}, {pipeline_mode = #tpu.pipeline_mode<synchronous>, transform_indices = @transform_1, window_bounds = array<i64: 1024, 512>}, {pipeline_mode = #tpu.pipeline_mode<synchronous>, transform_indices = @transform_2, window_bounds = array<i64: 1, 512>}, {pipeline_mode = #tpu.pipeline_mode<synchronous>, transform_indices = @transform_3, window_bounds = array<i64: 512, 256>}, {pipeline_mode = #tpu.pipeline_mode<synchronous>, transform_indices = @transform_4, window_bounds = array<i64: 1, 256>}, {pipeline_mode = #tpu.pipeline_mode<synchronous>, transform_indices = @transform_5, window_bounds = array<i64: 256, 9>}, {pipeline_mode = #tpu.pipeline_mode<synchronous>, transform_indices = @transform_6, window_bounds = array<i64: 1, 9>}, {pipeline_mode = #tpu.pipeline_mode<synchronous>, transform_indices = @transform_7, window_bounds = array<i64: 2, 9>}]} {
    %c0 = arith.constant 0 : index
    %c0_0 = arith.constant 0 : index
    %0 = vector.load %arg1[%c0, %c0_0] : memref<2x1024xf32, #tpu.memory_space<vmem>>, vector<2x1024xf32>
    %1 = arith.truncf %0 : vector<2x1024xf32> to vector<2x1024xbf16>
    %c0_1 = arith.constant 0 : index
    %c0_2 = arith.constant 0 : index
    %2 = vector.load %arg2[%c0_1, %c0_2] : memref<1024x512xbf16, #tpu.memory_space<vmem>>, vector<1024x512xbf16>
    %cst = arith.constant dense<0.000000e+00> : vector<2x512xf32>
    %3 = tpu.matmul %1, %2, %cst {dimension_numbers = #tpu.dot_dimension_numbers<[1], [0], [0], [1], [0, 0, 1, 1], [], []>} : vector<2x1024xbf16>, vector<1024x512xbf16>, vector<2x512xf32> -> vector<2x512xf32>
    %c0_3 = arith.constant 0 : index
    %c0_4 = arith.constant 0 : index
    %4 = vector.load %arg3[%c0_3, %c0_4] : memref<1x512xf32, #tpu.memory_space<vmem>>, vector<1x512xf32>
    %5 = vector.broadcast %4 : vector<1x512xf32> to vector<2x512xf32>
    %6 = arith.addf %3, %5 : vector<2x512xf32>
    %cst_5 = arith.constant 0.000000e+00 : f32
    %7 = vector.broadcast %cst_5 : f32 to vector<2x512xf32>
    %8 = arith.maximumf %6, %7 : vector<2x512xf32>
    %9 = arith.truncf %8 : vector<2x512xf32> to vector<2x512xbf16>
    %c0_6 = arith.constant 0 : index
    %c0_7 = arith.constant 0 : index
    %10 = vector.load %arg4[%c0_6, %c0_7] : memref<512x256xbf16, #tpu.memory_space<vmem>>, vector<512x256xbf16>
    %cst_8 = arith.constant dense<0.000000e+00> : vector<2x256xf32>
    %11 = tpu.matmul %9, %10, %cst_8 {dimension_numbers = #tpu.dot_dimension_numbers<[1], [0], [0], [1], [0, 0, 1, 1], [], []>} : vector<2x512xbf16>, vector<512x256xbf16>, vector<2x256xf32> -> vector<2x256xf32>
    %c0_9 = arith.constant 0 : index
    %c0_10 = arith.constant 0 : index
    %12 = vector.load %arg5[%c0_9, %c0_10] : memref<1x256xf32, #tpu.memory_space<vmem>>, vector<1x256xf32>
    %13 = vector.broadcast %12 : vector<1x256xf32> to vector<2x256xf32>
    %14 = arith.addf %11, %13 : vector<2x256xf32>
    %cst_11 = arith.constant 0.000000e+00 : f32
    %15 = vector.broadcast %cst_11 : f32 to vector<2x256xf32>
    %16 = arith.maximumf %14, %15 : vector<2x256xf32>
    %17 = arith.truncf %16 : vector<2x256xf32> to vector<2x256xbf16>
    %c0_12 = arith.constant 0 : index
    %c0_13 = arith.constant 0 : index
    %18 = vector.load %arg6[%c0_12, %c0_13] : memref<256x9xbf16, #tpu.memory_space<vmem>>, vector<256x9xbf16>
    %cst_14 = arith.constant dense<0.000000e+00> : vector<2x9xf32>
    %19 = tpu.matmul %17, %18, %cst_14 {dimension_numbers = #tpu.dot_dimension_numbers<[1], [0], [0], [1], [0, 0, 1, 1], [], []>} : vector<2x256xbf16>, vector<256x9xbf16>, vector<2x9xf32> -> vector<2x9xf32>
    %c0_15 = arith.constant 0 : index
    %c0_16 = arith.constant 0 : index
    %20 = vector.load %arg7[%c0_15, %c0_16] : memref<1x9xf32, #tpu.memory_space<vmem>>, vector<1x9xf32>
    %21 = vector.broadcast %20 : vector<1x9xf32> to vector<2x9xf32>
    %22 = arith.addf %19, %21 : vector<2x9xf32>
    %c0_17 = arith.constant 0 : index
    %c0_18 = arith.constant 0 : index
    %23 = vector.load %arg8[%c0_17, %c0_18] : memref<2x9xf32, #tpu.memory_space<vmem>>, vector<2x9xf32>
    tpu.vector_store %arg8[%c0_17, %c0_18], %22 {strides = array<i32>} : memref<2x9xf32, #tpu.memory_space<vmem>>, vector<2x9xf32>,
    return
  }
  func.func @transform_0(%arg0: i32) -> (i32, i32) {
    %c0_i32 = arith.constant 0 : i32
    %c0_i32_0 = arith.constant 0 : i32
    %c0_i32_1 = arith.constant 0 : i32
    return %c0_i32, %c0_i32_0 : i32, i32
  }
  func.func @transform_1(%arg0: i32) -> (i32, i32) {
    %c0_i32 = arith.constant 0 : i32
    %c0_i32_0 = arith.constant 0 : i32
    %c0_i32_1 = arith.constant 0 : i32
    return %c0_i32, %c0_i32_0 : i32, i32
  }
  func.func @transform_2(%arg0: i32) -> (i32, i32) {
    %c0_i32 = arith.constant 0 : i32
    %c0_i32_0 = arith.constant 0 : i32
    %c0_i32_1 = arith.constant 0 : i32
    return %c0_i32, %c0_i32_0 : i32, i32
  }
  func.func @transform_3(%arg0: i32) -> (i32, i32) {
    %c0_i32 = arith.constant 0 : i32
    %c0_i32_0 = arith.constant 0 : i32
    %c0_i32_1 = arith.constant 0 : i32
    return %c0_i32, %c0_i32_0 : i32, i32
  }
  func.func @transform_4(%arg0: i32) -> (i32, i32) {
    %c0_i32 = arith.constant 0 : i32
    %c0_i32_0 = arith.constant 0 : i32
    %c0_i32_1 = arith.constant 0 : i32
    return %c0_i32, %c0_i32_0 : i32, i32
  }
  func.func @transform_5(%arg0: i32) -> (i32, i32) {
    %c0_i32 = arith.constant 0 : i32
    %c0_i32_0 = arith.constant 0 : i32
    %c0_i32_1 = arith.constant 0 : i32
    return %c0_i32, %c0_i32_0 : i32, i32
  }
  func.func @transform_6(%arg0: i32) -> (i32, i32) {
    %c0_i32 = arith.constant 0 : i32
    %c0_i32_0 = arith.constant 0 : i32
    %c0_i32_1 = arith.constant 0 : i32
    return %c0_i32, %c0_i32_0 : i32, i32
  }
  func.func @transform_7(%arg0: i32) -> (i32, i32) {
    %c0_i32 = arith.constant 0 : i32
    %c0_i32_0 = arith.constant 0 : i32
    %c0_i32_1 = arith.constant 0 : i32
    return %c0_i32, %c0_i32_0 : i32, i32
  }
}

module attributes {stable_mosaic.version = 11 : i64} {
  func.func @_conv_chain_max_kernel(%arg0: i32, %arg1: i32, %arg2: memref<1x16x3xbf16, #tpu.memory_space<vmem>>, %arg3: memref<3x64xbf16, #tpu.memory_space<vmem>>, %arg4: memref<1x64xf32, #tpu.memory_space<vmem>>, %arg5: memref<64x128xbf16, #tpu.memory_space<vmem>>, %arg6: memref<1x128xf32, #tpu.memory_space<vmem>>, %arg7: memref<128x1024xbf16, #tpu.memory_space<vmem>>, %arg8: memref<1x1024xf32, #tpu.memory_space<vmem>>, %arg9: memref<1x1x1024xf32, #tpu.memory_space<vmem>>) attributes {dimension_semantics = [#tpu.dimension_semantics<parallel>, #tpu.dimension_semantics<arbitrary>], iteration_bounds = array<i64: 2, 1>, scalar_prefetch = 0 : i64, scratch_operands = 0 : i64, tpu.core_type = #tpu.core_type<tc>, window_params = [{transform_indices = @transform_0, window_bounds = array<i64: 1, 16, 3>}, {pipeline_mode = #tpu.pipeline_mode<synchronous>, transform_indices = @transform_1, window_bounds = array<i64: 3, 64>}, {pipeline_mode = #tpu.pipeline_mode<synchronous>, transform_indices = @transform_2, window_bounds = array<i64: 1, 64>}, {pipeline_mode = #tpu.pipeline_mode<synchronous>, transform_indices = @transform_3, window_bounds = array<i64: 64, 128>}, {pipeline_mode = #tpu.pipeline_mode<synchronous>, transform_indices = @transform_4, window_bounds = array<i64: 1, 128>}, {pipeline_mode = #tpu.pipeline_mode<synchronous>, transform_indices = @transform_5, window_bounds = array<i64: 128, 1024>}, {pipeline_mode = #tpu.pipeline_mode<synchronous>, transform_indices = @transform_6, window_bounds = array<i64: 1, 1024>}, {transform_indices = @transform_7, window_bounds = array<i64: 1, 1, 1024>}]} {
    %c0 = arith.constant 0 : index
    %c0_0 = arith.constant 0 : index
    %c0_1 = arith.constant 0 : index
    %0 = vector.load %arg2[%c0, %c0_0, %c0_1] : memref<1x16x3xbf16, #tpu.memory_space<vmem>>, vector<1x16x3xbf16>
    %1 = vector.shape_cast %0 : vector<1x16x3xbf16> to vector<16x3xbf16>
    %c0_2 = arith.constant 0 : index
    %c0_3 = arith.constant 0 : index
    %2 = vector.load %arg3[%c0_2, %c0_3] : memref<3x64xbf16, #tpu.memory_space<vmem>>, vector<3x64xbf16>
    %cst = arith.constant dense<0.000000e+00> : vector<16x64xf32>
    %3 = tpu.matmul %1, %2, %cst {dimension_numbers = #tpu.dot_dimension_numbers<[1], [0], [0], [1], [0, 0, 1, 1], [], []>} : vector<16x3xbf16>, vector<3x64xbf16>, vector<16x64xf32> -> vector<16x64xf32>
    %c0_4 = arith.constant 0 : index
    %c0_5 = arith.constant 0 : index
    %4 = vector.load %arg4[%c0_4, %c0_5] : memref<1x64xf32, #tpu.memory_space<vmem>>, vector<1x64xf32>
    %5 = vector.broadcast %4 : vector<1x64xf32> to vector<16x64xf32>
    %6 = arith.addf %3, %5 : vector<16x64xf32>
    %cst_6 = arith.constant 0.000000e+00 : f32
    %7 = vector.broadcast %cst_6 : f32 to vector<16x64xf32>
    %8 = arith.maximumf %6, %7 : vector<16x64xf32>
    %9 = arith.truncf %8 : vector<16x64xf32> to vector<16x64xbf16>
    %c0_7 = arith.constant 0 : index
    %c0_8 = arith.constant 0 : index
    %10 = vector.load %arg5[%c0_7, %c0_8] : memref<64x128xbf16, #tpu.memory_space<vmem>>, vector<64x128xbf16>
    %cst_9 = arith.constant dense<0.000000e+00> : vector<16x128xf32>
    %11 = tpu.matmul %9, %10, %cst_9 {dimension_numbers = #tpu.dot_dimension_numbers<[1], [0], [0], [1], [0, 0, 1, 1], [], []>} : vector<16x64xbf16>, vector<64x128xbf16>, vector<16x128xf32> -> vector<16x128xf32>
    %c0_10 = arith.constant 0 : index
    %c0_11 = arith.constant 0 : index
    %12 = vector.load %arg6[%c0_10, %c0_11] : memref<1x128xf32, #tpu.memory_space<vmem>>, vector<1x128xf32>
    %13 = vector.broadcast %12 : vector<1x128xf32> to vector<16x128xf32>
    %14 = arith.addf %11, %13 : vector<16x128xf32>
    %cst_12 = arith.constant 0.000000e+00 : f32
    %15 = vector.broadcast %cst_12 : f32 to vector<16x128xf32>
    %16 = arith.maximumf %14, %15 : vector<16x128xf32>
    %17 = arith.truncf %16 : vector<16x128xf32> to vector<16x128xbf16>
    %c0_13 = arith.constant 0 : index
    %c0_14 = arith.constant 0 : index
    %18 = vector.load %arg7[%c0_13, %c0_14] : memref<128x1024xbf16, #tpu.memory_space<vmem>>, vector<128x1024xbf16>
    %cst_15 = arith.constant dense<0.000000e+00> : vector<16x1024xf32>
    %19 = tpu.matmul %17, %18, %cst_15 {dimension_numbers = #tpu.dot_dimension_numbers<[1], [0], [0], [1], [0, 0, 1, 1], [], []>} : vector<16x128xbf16>, vector<128x1024xbf16>, vector<16x1024xf32> -> vector<16x1024xf32>
    %c0_16 = arith.constant 0 : index
    %c0_17 = arith.constant 0 : index
    %20 = vector.load %arg8[%c0_16, %c0_17] : memref<1x1024xf32, #tpu.memory_space<vmem>>, vector<1x1024xf32>
    %21 = vector.broadcast %20 : vector<1x1024xf32> to vector<16x1024xf32>
    %22 = arith.addf %19, %21 : vector<16x1024xf32>
    %cst_18 = arith.constant 0.000000e+00 : f32
    %23 = vector.broadcast %cst_18 : f32 to vector<16x1024xf32>
    %24 = arith.maximumf %22, %23 : vector<16x1024xf32>
    %25 = tpu.iota {dimensions = array<i32: 0>} : vector<16x1024xi32>
    %c16_i32 = arith.constant 16 : i32
    %26 = arith.muli %arg1, %c16_i32 : i32
    %27 = vector.broadcast %26 : i32 to vector<16x1024xi32>
    %28 = arith.addi %25, %27 : vector<16x1024xi32>
    %c16_i32_19 = arith.constant 16 : i32
    %29 = vector.broadcast %c16_i32_19 : i32 to vector<16x1024xi32>
    %30 = arith.cmpi slt, %28, %29 : vector<16x1024xi32>
    %cst_20 = arith.constant 0.000000e+00 : f32
    %31 = vector.broadcast %cst_20 : f32 to vector<16x1024xf32>
    %32 = arith.select %30, %24, %31 : vector<16x1024xi1>, vector<16x1024xf32>
    %cst_21 = arith.constant dense<0xFF800000> : vector<1024xf32>
    %33 = vector.multi_reduction <maximumf>, %32, %cst_21 [0] : vector<16x1024xf32> to vector<1024xf32>
    %34 = vector.shape_cast %33 : vector<1024xf32> to vector<1x1024xf32>
    %c0_i32 = arith.constant 0 : i32
    %35 = arith.cmpi eq, %arg1, %c0_i32 : i32
    %36 = arith.extui %35 : i1 to i32
    %c0_i32_22 = arith.constant 0 : i32
    %37 = arith.cmpi ne, %36, %c0_i32_22 : i32
    scf.if %37 {
      %cst_29 = arith.constant 0.000000e+00 : f32
      %44 = vector.broadcast %cst_29 : f32 to vector<1x1x1024xf32>
      %c0_30 = arith.constant 0 : index
      %c0_31 = arith.constant 0 : index
      %c0_32 = arith.constant 0 : index
      %45 = vector.load %arg9[%c0_30, %c0_31, %c0_32] : memref<1x1x1024xf32, #tpu.memory_space<vmem>>, vector<1x1x1024xf32>
      tpu.vector_store %arg9[%c0_30, %c0_31, %c0_32], %44 {strides = array<i32>} : memref<1x1x1024xf32, #tpu.memory_space<vmem>>, vector<1x1x1024xf32>,
    } else {
    }
    %c0_23 = arith.constant 0 : index
    %c0_24 = arith.constant 0 : index
    %c0_25 = arith.constant 0 : index
    %38 = vector.load %arg9[%c0_23, %c0_24, %c0_25] : memref<1x1x1024xf32, #tpu.memory_space<vmem>>, vector<1x1x1024xf32>
    %39 = vector.shape_cast %38 : vector<1x1x1024xf32> to vector<1x1024xf32>
    %40 = arith.maximumf %39, %34 : vector<1x1024xf32>
    %c0_26 = arith.constant 0 : index
    %c0_27 = arith.constant 0 : index
    %c0_28 = arith.constant 0 : index
    %41 = vector.load %arg9[%c0_26, %c0_27, %c0_28] : memref<1x1x1024xf32, #tpu.memory_space<vmem>>, vector<1x1x1024xf32>
    %42 = vector.shape_cast %41 : vector<1x1x1024xf32> to vector<1x1024xf32>
    %43 = vector.shape_cast %40 : vector<1x1024xf32> to vector<1x1x1024xf32>
    tpu.vector_store %arg9[%c0_26, %c0_27, %c0_28], %43 {strides = array<i32>} : memref<1x1x1024xf32, #tpu.memory_space<vmem>>, vector<1x1x1024xf32>,
    return
  }
  func.func @transform_0(%arg0: i32, %arg1: i32) -> (i32, i32, i32) {
    %c0_i32 = arith.constant 0 : i32
    %c0_i32_0 = arith.constant 0 : i32
    return %arg0, %arg1, %c0_i32 : i32, i32, i32
  }
  func.func @transform_1(%arg0: i32, %arg1: i32) -> (i32, i32) {
    %c0_i32 = arith.constant 0 : i32
    %c0_i32_0 = arith.constant 0 : i32
    %c0_i32_1 = arith.constant 0 : i32
    return %c0_i32, %c0_i32_0 : i32, i32
  }
  func.func @transform_2(%arg0: i32, %arg1: i32) -> (i32, i32) {
    %c0_i32 = arith.constant 0 : i32
    %c0_i32_0 = arith.constant 0 : i32
    %c0_i32_1 = arith.constant 0 : i32
    return %c0_i32, %c0_i32_0 : i32, i32
  }
  func.func @transform_3(%arg0: i32, %arg1: i32) -> (i32, i32) {
    %c0_i32 = arith.constant 0 : i32
    %c0_i32_0 = arith.constant 0 : i32
    %c0_i32_1 = arith.constant 0 : i32
    return %c0_i32, %c0_i32_0 : i32, i32
  }
  func.func @transform_4(%arg0: i32, %arg1: i32) -> (i32, i32) {
    %c0_i32 = arith.constant 0 : i32
    %c0_i32_0 = arith.constant 0 : i32
    %c0_i32_1 = arith.constant 0 : i32
    return %c0_i32, %c0_i32_0 : i32, i32
  }
  func.func @transform_5(%arg0: i32, %arg1: i32) -> (i32, i32) {
    %c0_i32 = arith.constant 0 : i32
    %c0_i32_0 = arith.constant 0 : i32
    %c0_i32_1 = arith.constant 0 : i32
    return %c0_i32, %c0_i32_0 : i32, i32
  }
  func.func @transform_6(%arg0: i32, %arg1: i32) -> (i32, i32) {
    %c0_i32 = arith.constant 0 : i32
    %c0_i32_0 = arith.constant 0 : i32
    %c0_i32_1 = arith.constant 0 : i32
    return %c0_i32, %c0_i32_0 : i32, i32
  }
  func.func @transform_7(%arg0: i32, %arg1: i32) -> (i32, i32, i32) {
    %c0_i32 = arith.constant 0 : i32
    %c0_i32_0 = arith.constant 0 : i32
    %c0_i32_1 = arith.constant 0 : i32
    return %arg0, %c0_i32, %c0_i32_0 : i32, i32, i32
  }
}

module attributes {stable_mosaic.version = 11 : i64} {
  func.func @_conv12_kernel(%arg0: i32, %arg1: i32, %arg2: memref<1x16x3xbf16, #tpu.memory_space<vmem>>, %arg3: memref<1x3x64xbf16, #tpu.memory_space<vmem>>, %arg4: memref<1x64xf32, #tpu.memory_space<vmem>>, %arg5: memref<64x64xbf16, #tpu.memory_space<vmem>>, %arg6: memref<1x64xf32, #tpu.memory_space<vmem>>, %arg7: memref<1x16x64xbf16, #tpu.memory_space<vmem>>) attributes {dimension_semantics = [#tpu.dimension_semantics<parallel>, #tpu.dimension_semantics<parallel>], iteration_bounds = array<i64: 2, 1>, scalar_prefetch = 0 : i64, scratch_operands = 0 : i64, tpu.core_type = #tpu.core_type<tc>, window_params = [{transform_indices = @transform_0, window_bounds = array<i64: 1, 16, 3>}, {transform_indices = @transform_1, window_bounds = array<i64: 1, 3, 64>}, {pipeline_mode = #tpu.pipeline_mode<synchronous>, transform_indices = @transform_2, window_bounds = array<i64: 1, 64>}, {pipeline_mode = #tpu.pipeline_mode<synchronous>, transform_indices = @transform_3, window_bounds = array<i64: 64, 64>}, {pipeline_mode = #tpu.pipeline_mode<synchronous>, transform_indices = @transform_4, window_bounds = array<i64: 1, 64>}, {transform_indices = @transform_5, window_bounds = array<i64: 1, 16, 64>}]} {
    %c0 = arith.constant 0 : index
    %c0_0 = arith.constant 0 : index
    %c0_1 = arith.constant 0 : index
    %0 = vector.load %arg2[%c0, %c0_0, %c0_1] : memref<1x16x3xbf16, #tpu.memory_space<vmem>>, vector<1x16x3xbf16>
    %1 = vector.shape_cast %0 : vector<1x16x3xbf16> to vector<16x3xbf16>
    %c0_2 = arith.constant 0 : index
    %c0_3 = arith.constant 0 : index
    %c0_4 = arith.constant 0 : index
    %2 = vector.load %arg3[%c0_2, %c0_3, %c0_4] : memref<1x3x64xbf16, #tpu.memory_space<vmem>>, vector<1x3x64xbf16>
    %3 = vector.shape_cast %2 : vector<1x3x64xbf16> to vector<3x64xbf16>
    %cst = arith.constant dense<0.000000e+00> : vector<16x64xf32>
    %4 = tpu.matmul %1, %3, %cst {dimension_numbers = #tpu.dot_dimension_numbers<[1], [0], [0], [1], [0, 0, 1, 1], [], []>} : vector<16x3xbf16>, vector<3x64xbf16>, vector<16x64xf32> -> vector<16x64xf32>
    %c0_5 = arith.constant 0 : index
    %c0_6 = arith.constant 0 : index
    %5 = vector.load %arg4[%c0_5, %c0_6] : memref<1x64xf32, #tpu.memory_space<vmem>>, vector<1x64xf32>
    %6 = vector.broadcast %5 : vector<1x64xf32> to vector<16x64xf32>
    %7 = arith.addf %4, %6 : vector<16x64xf32>
    %cst_7 = arith.constant 0.000000e+00 : f32
    %8 = vector.broadcast %cst_7 : f32 to vector<16x64xf32>
    %9 = arith.maximumf %7, %8 : vector<16x64xf32>
    %10 = arith.truncf %9 : vector<16x64xf32> to vector<16x64xbf16>
    %c0_8 = arith.constant 0 : index
    %c0_9 = arith.constant 0 : index
    %11 = vector.load %arg5[%c0_8, %c0_9] : memref<64x64xbf16, #tpu.memory_space<vmem>>, vector<64x64xbf16>
    %cst_10 = arith.constant dense<0.000000e+00> : vector<16x64xf32>
    %12 = tpu.matmul %10, %11, %cst_10 {dimension_numbers = #tpu.dot_dimension_numbers<[1], [0], [0], [1], [0, 0, 1, 1], [], []>} : vector<16x64xbf16>, vector<64x64xbf16>, vector<16x64xf32> -> vector<16x64xf32>
    %c0_11 = arith.constant 0 : index
    %c0_12 = arith.constant 0 : index
    %13 = vector.load %arg6[%c0_11, %c0_12] : memref<1x64xf32, #tpu.memory_space<vmem>>, vector<1x64xf32>
    %14 = vector.broadcast %13 : vector<1x64xf32> to vector<16x64xf32>
    %15 = arith.addf %12, %14 : vector<16x64xf32>
    %cst_13 = arith.constant 0.000000e+00 : f32
    %16 = vector.broadcast %cst_13 : f32 to vector<16x64xf32>
    %17 = arith.maximumf %15, %16 : vector<16x64xf32>
    %18 = arith.truncf %17 : vector<16x64xf32> to vector<16x64xbf16>
    %c0_14 = arith.constant 0 : index
    %c0_15 = arith.constant 0 : index
    %c0_16 = arith.constant 0 : index
    %19 = vector.load %arg7[%c0_14, %c0_15, %c0_16] : memref<1x16x64xbf16, #tpu.memory_space<vmem>>, vector<1x16x64xbf16>
    %20 = vector.shape_cast %19 : vector<1x16x64xbf16> to vector<16x64xbf16>
    %21 = vector.shape_cast %18 : vector<16x64xbf16> to vector<1x16x64xbf16>
    tpu.vector_store %arg7[%c0_14, %c0_15, %c0_16], %21 {strides = array<i32>} : memref<1x16x64xbf16, #tpu.memory_space<vmem>>, vector<1x16x64xbf16>,
    return
  }
  func.func @transform_0(%arg0: i32, %arg1: i32) -> (i32, i32, i32) {
    %c0_i32 = arith.constant 0 : i32
    %c0_i32_0 = arith.constant 0 : i32
    return %arg0, %arg1, %c0_i32 : i32, i32, i32
  }
  func.func @transform_1(%arg0: i32, %arg1: i32) -> (i32, i32, i32) {
    %c0_i32 = arith.constant 0 : i32
    %c0_i32_0 = arith.constant 0 : i32
    %c0_i32_1 = arith.constant 0 : i32
    return %arg0, %c0_i32, %c0_i32_0 : i32, i32, i32
  }
  func.func @transform_2(%arg0: i32, %arg1: i32) -> (i32, i32) {
    %c0_i32 = arith.constant 0 : i32
    %c0_i32_0 = arith.constant 0 : i32
    %c0_i32_1 = arith.constant 0 : i32
    return %c0_i32, %c0_i32_0 : i32, i32
  }
  func.func @transform_3(%arg0: i32, %arg1: i32) -> (i32, i32) {
    %c0_i32 = arith.constant 0 : i32
    %c0_i32_0 = arith.constant 0 : i32
    %c0_i32_1 = arith.constant 0 : i32
    return %c0_i32, %c0_i32_0 : i32, i32
  }
  func.func @transform_4(%arg0: i32, %arg1: i32) -> (i32, i32) {
    %c0_i32 = arith.constant 0 : i32
    %c0_i32_0 = arith.constant 0 : i32
    %c0_i32_1 = arith.constant 0 : i32
    return %c0_i32, %c0_i32_0 : i32, i32
  }
  func.func @transform_5(%arg0: i32, %arg1: i32) -> (i32, i32, i32) {
    %c0_i32 = arith.constant 0 : i32
    %c0_i32_0 = arith.constant 0 : i32
    return %arg0, %arg1, %c0_i32 : i32, i32, i32
  }
}

module attributes {stable_mosaic.version = 11 : i64} {
  func.func @_conv_chain_max_kernel(%arg0: i32, %arg1: i32, %arg2: memref<1x16x64xbf16, #tpu.memory_space<vmem>>, %arg3: memref<64x64xbf16, #tpu.memory_space<vmem>>, %arg4: memref<1x64xf32, #tpu.memory_space<vmem>>, %arg5: memref<64x128xbf16, #tpu.memory_space<vmem>>, %arg6: memref<1x128xf32, #tpu.memory_space<vmem>>, %arg7: memref<128x1024xbf16, #tpu.memory_space<vmem>>, %arg8: memref<1x1024xf32, #tpu.memory_space<vmem>>, %arg9: memref<1x1x1024xf32, #tpu.memory_space<vmem>>) attributes {dimension_semantics = [#tpu.dimension_semantics<parallel>, #tpu.dimension_semantics<arbitrary>], iteration_bounds = array<i64: 2, 1>, scalar_prefetch = 0 : i64, scratch_operands = 0 : i64, tpu.core_type = #tpu.core_type<tc>, window_params = [{transform_indices = @transform_0, window_bounds = array<i64: 1, 16, 64>}, {pipeline_mode = #tpu.pipeline_mode<synchronous>, transform_indices = @transform_1, window_bounds = array<i64: 64, 64>}, {pipeline_mode = #tpu.pipeline_mode<synchronous>, transform_indices = @transform_2, window_bounds = array<i64: 1, 64>}, {pipeline_mode = #tpu.pipeline_mode<synchronous>, transform_indices = @transform_3, window_bounds = array<i64: 64, 128>}, {pipeline_mode = #tpu.pipeline_mode<synchronous>, transform_indices = @transform_4, window_bounds = array<i64: 1, 128>}, {pipeline_mode = #tpu.pipeline_mode<synchronous>, transform_indices = @transform_5, window_bounds = array<i64: 128, 1024>}, {pipeline_mode = #tpu.pipeline_mode<synchronous>, transform_indices = @transform_6, window_bounds = array<i64: 1, 1024>}, {transform_indices = @transform_7, window_bounds = array<i64: 1, 1, 1024>}]} {
    %c0 = arith.constant 0 : index
    %c0_0 = arith.constant 0 : index
    %c0_1 = arith.constant 0 : index
    %0 = vector.load %arg2[%c0, %c0_0, %c0_1] : memref<1x16x64xbf16, #tpu.memory_space<vmem>>, vector<1x16x64xbf16>
    %1 = vector.shape_cast %0 : vector<1x16x64xbf16> to vector<16x64xbf16>
    %c0_2 = arith.constant 0 : index
    %c0_3 = arith.constant 0 : index
    %2 = vector.load %arg3[%c0_2, %c0_3] : memref<64x64xbf16, #tpu.memory_space<vmem>>, vector<64x64xbf16>
    %cst = arith.constant dense<0.000000e+00> : vector<16x64xf32>
    %3 = tpu.matmul %1, %2, %cst {dimension_numbers = #tpu.dot_dimension_numbers<[1], [0], [0], [1], [0, 0, 1, 1], [], []>} : vector<16x64xbf16>, vector<64x64xbf16>, vector<16x64xf32> -> vector<16x64xf32>
    %c0_4 = arith.constant 0 : index
    %c0_5 = arith.constant 0 : index
    %4 = vector.load %arg4[%c0_4, %c0_5] : memref<1x64xf32, #tpu.memory_space<vmem>>, vector<1x64xf32>
    %5 = vector.broadcast %4 : vector<1x64xf32> to vector<16x64xf32>
    %6 = arith.addf %3, %5 : vector<16x64xf32>
    %cst_6 = arith.constant 0.000000e+00 : f32
    %7 = vector.broadcast %cst_6 : f32 to vector<16x64xf32>
    %8 = arith.maximumf %6, %7 : vector<16x64xf32>
    %9 = arith.truncf %8 : vector<16x64xf32> to vector<16x64xbf16>
    %c0_7 = arith.constant 0 : index
    %c0_8 = arith.constant 0 : index
    %10 = vector.load %arg5[%c0_7, %c0_8] : memref<64x128xbf16, #tpu.memory_space<vmem>>, vector<64x128xbf16>
    %cst_9 = arith.constant dense<0.000000e+00> : vector<16x128xf32>
    %11 = tpu.matmul %9, %10, %cst_9 {dimension_numbers = #tpu.dot_dimension_numbers<[1], [0], [0], [1], [0, 0, 1, 1], [], []>} : vector<16x64xbf16>, vector<64x128xbf16>, vector<16x128xf32> -> vector<16x128xf32>
    %c0_10 = arith.constant 0 : index
    %c0_11 = arith.constant 0 : index
    %12 = vector.load %arg6[%c0_10, %c0_11] : memref<1x128xf32, #tpu.memory_space<vmem>>, vector<1x128xf32>
    %13 = vector.broadcast %12 : vector<1x128xf32> to vector<16x128xf32>
    %14 = arith.addf %11, %13 : vector<16x128xf32>
    %cst_12 = arith.constant 0.000000e+00 : f32
    %15 = vector.broadcast %cst_12 : f32 to vector<16x128xf32>
    %16 = arith.maximumf %14, %15 : vector<16x128xf32>
    %17 = arith.truncf %16 : vector<16x128xf32> to vector<16x128xbf16>
    %c0_13 = arith.constant 0 : index
    %c0_14 = arith.constant 0 : index
    %18 = vector.load %arg7[%c0_13, %c0_14] : memref<128x1024xbf16, #tpu.memory_space<vmem>>, vector<128x1024xbf16>
    %cst_15 = arith.constant dense<0.000000e+00> : vector<16x1024xf32>
    %19 = tpu.matmul %17, %18, %cst_15 {dimension_numbers = #tpu.dot_dimension_numbers<[1], [0], [0], [1], [0, 0, 1, 1], [], []>} : vector<16x128xbf16>, vector<128x1024xbf16>, vector<16x1024xf32> -> vector<16x1024xf32>
    %c0_16 = arith.constant 0 : index
    %c0_17 = arith.constant 0 : index
    %20 = vector.load %arg8[%c0_16, %c0_17] : memref<1x1024xf32, #tpu.memory_space<vmem>>, vector<1x1024xf32>
    %21 = vector.broadcast %20 : vector<1x1024xf32> to vector<16x1024xf32>
    %22 = arith.addf %19, %21 : vector<16x1024xf32>
    %cst_18 = arith.constant 0.000000e+00 : f32
    %23 = vector.broadcast %cst_18 : f32 to vector<16x1024xf32>
    %24 = arith.maximumf %22, %23 : vector<16x1024xf32>
    %25 = tpu.iota {dimensions = array<i32: 0>} : vector<16x1024xi32>
    %c16_i32 = arith.constant 16 : i32
    %26 = arith.muli %arg1, %c16_i32 : i32
    %27 = vector.broadcast %26 : i32 to vector<16x1024xi32>
    %28 = arith.addi %25, %27 : vector<16x1024xi32>
    %c16_i32_19 = arith.constant 16 : i32
    %29 = vector.broadcast %c16_i32_19 : i32 to vector<16x1024xi32>
    %30 = arith.cmpi slt, %28, %29 : vector<16x1024xi32>
    %cst_20 = arith.constant 0.000000e+00 : f32
    %31 = vector.broadcast %cst_20 : f32 to vector<16x1024xf32>
    %32 = arith.select %30, %24, %31 : vector<16x1024xi1>, vector<16x1024xf32>
    %cst_21 = arith.constant dense<0xFF800000> : vector<1024xf32>
    %33 = vector.multi_reduction <maximumf>, %32, %cst_21 [0] : vector<16x1024xf32> to vector<1024xf32>
    %34 = vector.shape_cast %33 : vector<1024xf32> to vector<1x1024xf32>
    %c0_i32 = arith.constant 0 : i32
    %35 = arith.cmpi eq, %arg1, %c0_i32 : i32
    %36 = arith.extui %35 : i1 to i32
    %c0_i32_22 = arith.constant 0 : i32
    %37 = arith.cmpi ne, %36, %c0_i32_22 : i32
    scf.if %37 {
      %cst_29 = arith.constant 0.000000e+00 : f32
      %44 = vector.broadcast %cst_29 : f32 to vector<1x1x1024xf32>
      %c0_30 = arith.constant 0 : index
      %c0_31 = arith.constant 0 : index
      %c0_32 = arith.constant 0 : index
      %45 = vector.load %arg9[%c0_30, %c0_31, %c0_32] : memref<1x1x1024xf32, #tpu.memory_space<vmem>>, vector<1x1x1024xf32>
      tpu.vector_store %arg9[%c0_30, %c0_31, %c0_32], %44 {strides = array<i32>} : memref<1x1x1024xf32, #tpu.memory_space<vmem>>, vector<1x1x1024xf32>,
    } else {
    }
    %c0_23 = arith.constant 0 : index
    %c0_24 = arith.constant 0 : index
    %c0_25 = arith.constant 0 : index
    %38 = vector.load %arg9[%c0_23, %c0_24, %c0_25] : memref<1x1x1024xf32, #tpu.memory_space<vmem>>, vector<1x1x1024xf32>
    %39 = vector.shape_cast %38 : vector<1x1x1024xf32> to vector<1x1024xf32>
    %40 = arith.maximumf %39, %34 : vector<1x1024xf32>
    %c0_26 = arith.constant 0 : index
    %c0_27 = arith.constant 0 : index
    %c0_28 = arith.constant 0 : index
    %41 = vector.load %arg9[%c0_26, %c0_27, %c0_28] : memref<1x1x1024xf32, #tpu.memory_space<vmem>>, vector<1x1x1024xf32>
    %42 = vector.shape_cast %41 : vector<1x1x1024xf32> to vector<1x1024xf32>
    %43 = vector.shape_cast %40 : vector<1x1024xf32> to vector<1x1x1024xf32>
    tpu.vector_store %arg9[%c0_26, %c0_27, %c0_28], %43 {strides = array<i32>} : memref<1x1x1024xf32, #tpu.memory_space<vmem>>, vector<1x1x1024xf32>,
    return
  }
  func.func @transform_0(%arg0: i32, %arg1: i32) -> (i32, i32, i32) {
    %c0_i32 = arith.constant 0 : i32
    %c0_i32_0 = arith.constant 0 : i32
    return %arg0, %arg1, %c0_i32 : i32, i32, i32
  }
  func.func @transform_1(%arg0: i32, %arg1: i32) -> (i32, i32) {
    %c0_i32 = arith.constant 0 : i32
    %c0_i32_0 = arith.constant 0 : i32
    %c0_i32_1 = arith.constant 0 : i32
    return %c0_i32, %c0_i32_0 : i32, i32
  }
  func.func @transform_2(%arg0: i32, %arg1: i32) -> (i32, i32) {
    %c0_i32 = arith.constant 0 : i32
    %c0_i32_0 = arith.constant 0 : i32
    %c0_i32_1 = arith.constant 0 : i32
    return %c0_i32, %c0_i32_0 : i32, i32
  }
  func.func @transform_3(%arg0: i32, %arg1: i32) -> (i32, i32) {
    %c0_i32 = arith.constant 0 : i32
    %c0_i32_0 = arith.constant 0 : i32
    %c0_i32_1 = arith.constant 0 : i32
    return %c0_i32, %c0_i32_0 : i32, i32
  }
  func.func @transform_4(%arg0: i32, %arg1: i32) -> (i32, i32) {
    %c0_i32 = arith.constant 0 : i32
    %c0_i32_0 = arith.constant 0 : i32
    %c0_i32_1 = arith.constant 0 : i32
    return %c0_i32, %c0_i32_0 : i32, i32
  }
  func.func @transform_5(%arg0: i32, %arg1: i32) -> (i32, i32) {
    %c0_i32 = arith.constant 0 : i32
    %c0_i32_0 = arith.constant 0 : i32
    %c0_i32_1 = arith.constant 0 : i32
    return %c0_i32, %c0_i32_0 : i32, i32
  }
  func.func @transform_6(%arg0: i32, %arg1: i32) -> (i32, i32) {
    %c0_i32 = arith.constant 0 : i32
    %c0_i32_0 = arith.constant 0 : i32
    %c0_i32_1 = arith.constant 0 : i32
    return %c0_i32, %c0_i32_0 : i32, i32
  }
  func.func @transform_7(%arg0: i32, %arg1: i32) -> (i32, i32, i32) {
    %c0_i32 = arith.constant 0 : i32
    %c0_i32_0 = arith.constant 0 : i32
    %c0_i32_1 = arith.constant 0 : i32
    return %arg0, %c0_i32, %c0_i32_0 : i32, i32, i32
  }
}

module attributes {stable_mosaic.version = 11 : i64} {
  func.func @_tnet_fc_kernel(%arg0: i32, %arg1: memref<2x1024xf32, #tpu.memory_space<vmem>>, %arg2: memref<1024x512xbf16, #tpu.memory_space<vmem>>, %arg3: memref<1x512xf32, #tpu.memory_space<vmem>>, %arg4: memref<512x256xbf16, #tpu.memory_space<vmem>>, %arg5: memref<1x256xf32, #tpu.memory_space<vmem>>, %arg6: memref<256x4096xbf16, #tpu.memory_space<vmem>>, %arg7: memref<1x4096xf32, #tpu.memory_space<vmem>>, %arg8: memref<2x4096xf32, #tpu.memory_space<vmem>>) attributes {dimension_semantics = [#tpu.dimension_semantics<arbitrary>], iteration_bounds = array<i64: 1>, scalar_prefetch = 0 : i64, scratch_operands = 0 : i64, tpu.core_type = #tpu.core_type<tc>, window_params = [{pipeline_mode = #tpu.pipeline_mode<synchronous>, transform_indices = @transform_0, window_bounds = array<i64: 2, 1024>}, {pipeline_mode = #tpu.pipeline_mode<synchronous>, transform_indices = @transform_1, window_bounds = array<i64: 1024, 512>}, {pipeline_mode = #tpu.pipeline_mode<synchronous>, transform_indices = @transform_2, window_bounds = array<i64: 1, 512>}, {pipeline_mode = #tpu.pipeline_mode<synchronous>, transform_indices = @transform_3, window_bounds = array<i64: 512, 256>}, {pipeline_mode = #tpu.pipeline_mode<synchronous>, transform_indices = @transform_4, window_bounds = array<i64: 1, 256>}, {pipeline_mode = #tpu.pipeline_mode<synchronous>, transform_indices = @transform_5, window_bounds = array<i64: 256, 4096>}, {pipeline_mode = #tpu.pipeline_mode<synchronous>, transform_indices = @transform_6, window_bounds = array<i64: 1, 4096>}, {pipeline_mode = #tpu.pipeline_mode<synchronous>, transform_indices = @transform_7, window_bounds = array<i64: 2, 4096>}]} {
    %c0 = arith.constant 0 : index
    %c0_0 = arith.constant 0 : index
    %0 = vector.load %arg1[%c0, %c0_0] : memref<2x1024xf32, #tpu.memory_space<vmem>>, vector<2x1024xf32>
    %1 = arith.truncf %0 : vector<2x1024xf32> to vector<2x1024xbf16>
    %c0_1 = arith.constant 0 : index
    %c0_2 = arith.constant 0 : index
    %2 = vector.load %arg2[%c0_1, %c0_2] : memref<1024x512xbf16, #tpu.memory_space<vmem>>, vector<1024x512xbf16>
    %cst = arith.constant dense<0.000000e+00> : vector<2x512xf32>
    %3 = tpu.matmul %1, %2, %cst {dimension_numbers = #tpu.dot_dimension_numbers<[1], [0], [0], [1], [0, 0, 1, 1], [], []>} : vector<2x1024xbf16>, vector<1024x512xbf16>, vector<2x512xf32> -> vector<2x512xf32>
    %c0_3 = arith.constant 0 : index
    %c0_4 = arith.constant 0 : index
    %4 = vector.load %arg3[%c0_3, %c0_4] : memref<1x512xf32, #tpu.memory_space<vmem>>, vector<1x512xf32>
    %5 = vector.broadcast %4 : vector<1x512xf32> to vector<2x512xf32>
    %6 = arith.addf %3, %5 : vector<2x512xf32>
    %cst_5 = arith.constant 0.000000e+00 : f32
    %7 = vector.broadcast %cst_5 : f32 to vector<2x512xf32>
    %8 = arith.maximumf %6, %7 : vector<2x512xf32>
    %9 = arith.truncf %8 : vector<2x512xf32> to vector<2x512xbf16>
    %c0_6 = arith.constant 0 : index
    %c0_7 = arith.constant 0 : index
    %10 = vector.load %arg4[%c0_6, %c0_7] : memref<512x256xbf16, #tpu.memory_space<vmem>>, vector<512x256xbf16>
    %cst_8 = arith.constant dense<0.000000e+00> : vector<2x256xf32>
    %11 = tpu.matmul %9, %10, %cst_8 {dimension_numbers = #tpu.dot_dimension_numbers<[1], [0], [0], [1], [0, 0, 1, 1], [], []>} : vector<2x512xbf16>, vector<512x256xbf16>, vector<2x256xf32> -> vector<2x256xf32>
    %c0_9 = arith.constant 0 : index
    %c0_10 = arith.constant 0 : index
    %12 = vector.load %arg5[%c0_9, %c0_10] : memref<1x256xf32, #tpu.memory_space<vmem>>, vector<1x256xf32>
    %13 = vector.broadcast %12 : vector<1x256xf32> to vector<2x256xf32>
    %14 = arith.addf %11, %13 : vector<2x256xf32>
    %cst_11 = arith.constant 0.000000e+00 : f32
    %15 = vector.broadcast %cst_11 : f32 to vector<2x256xf32>
    %16 = arith.maximumf %14, %15 : vector<2x256xf32>
    %17 = arith.truncf %16 : vector<2x256xf32> to vector<2x256xbf16>
    %c0_12 = arith.constant 0 : index
    %c0_13 = arith.constant 0 : index
    %18 = vector.load %arg6[%c0_12, %c0_13] : memref<256x4096xbf16, #tpu.memory_space<vmem>>, vector<256x4096xbf16>
    %cst_14 = arith.constant dense<0.000000e+00> : vector<2x4096xf32>
    %19 = tpu.matmul %17, %18, %cst_14 {dimension_numbers = #tpu.dot_dimension_numbers<[1], [0], [0], [1], [0, 0, 1, 1], [], []>} : vector<2x256xbf16>, vector<256x4096xbf16>, vector<2x4096xf32> -> vector<2x4096xf32>
    %c0_15 = arith.constant 0 : index
    %c0_16 = arith.constant 0 : index
    %20 = vector.load %arg7[%c0_15, %c0_16] : memref<1x4096xf32, #tpu.memory_space<vmem>>, vector<1x4096xf32>
    %21 = vector.broadcast %20 : vector<1x4096xf32> to vector<2x4096xf32>
    %22 = arith.addf %19, %21 : vector<2x4096xf32>
    %c0_17 = arith.constant 0 : index
    %c0_18 = arith.constant 0 : index
    %23 = vector.load %arg8[%c0_17, %c0_18] : memref<2x4096xf32, #tpu.memory_space<vmem>>, vector<2x4096xf32>
    tpu.vector_store %arg8[%c0_17, %c0_18], %22 {strides = array<i32>} : memref<2x4096xf32, #tpu.memory_space<vmem>>, vector<2x4096xf32>,
    return
  }
  func.func @transform_0(%arg0: i32) -> (i32, i32) {
    %c0_i32 = arith.constant 0 : i32
    %c0_i32_0 = arith.constant 0 : i32
    %c0_i32_1 = arith.constant 0 : i32
    return %c0_i32, %c0_i32_0 : i32, i32
  }
  func.func @transform_1(%arg0: i32) -> (i32, i32) {
    %c0_i32 = arith.constant 0 : i32
    %c0_i32_0 = arith.constant 0 : i32
    %c0_i32_1 = arith.constant 0 : i32
    return %c0_i32, %c0_i32_0 : i32, i32
  }
  func.func @transform_2(%arg0: i32) -> (i32, i32) {
    %c0_i32 = arith.constant 0 : i32
    %c0_i32_0 = arith.constant 0 : i32
    %c0_i32_1 = arith.constant 0 : i32
    return %c0_i32, %c0_i32_0 : i32, i32
  }
  func.func @transform_3(%arg0: i32) -> (i32, i32) {
    %c0_i32 = arith.constant 0 : i32
    %c0_i32_0 = arith.constant 0 : i32
    %c0_i32_1 = arith.constant 0 : i32
    return %c0_i32, %c0_i32_0 : i32, i32
  }
  func.func @transform_4(%arg0: i32) -> (i32, i32) {
    %c0_i32 = arith.constant 0 : i32
    %c0_i32_0 = arith.constant 0 : i32
    %c0_i32_1 = arith.constant 0 : i32
    return %c0_i32, %c0_i32_0 : i32, i32
  }
  func.func @transform_5(%arg0: i32) -> (i32, i32) {
    %c0_i32 = arith.constant 0 : i32
    %c0_i32_0 = arith.constant 0 : i32
    %c0_i32_1 = arith.constant 0 : i32
    return %c0_i32, %c0_i32_0 : i32, i32
  }
  func.func @transform_6(%arg0: i32) -> (i32, i32) {
    %c0_i32 = arith.constant 0 : i32
    %c0_i32_0 = arith.constant 0 : i32
    %c0_i32_1 = arith.constant 0 : i32
    return %c0_i32, %c0_i32_0 : i32, i32
  }
  func.func @transform_7(%arg0: i32) -> (i32, i32) {
    %c0_i32 = arith.constant 0 : i32
    %c0_i32_0 = arith.constant 0 : i32
    %c0_i32_1 = arith.constant 0 : i32
    return %c0_i32, %c0_i32_0 : i32, i32
  }
}

module attributes {stable_mosaic.version = 11 : i64} {
  func.func @_conv345_max_kernel(%arg0: i32, %arg1: i32, %arg2: memref<1x16x64xbf16, #tpu.memory_space<vmem>>, %arg3: memref<1x64x64xbf16, #tpu.memory_space<vmem>>, %arg4: memref<1x64xf32, #tpu.memory_space<vmem>>, %arg5: memref<64x128xbf16, #tpu.memory_space<vmem>>, %arg6: memref<1x128xf32, #tpu.memory_space<vmem>>, %arg7: memref<128x1024xbf16, #tpu.memory_space<vmem>>, %arg8: memref<1x1024xf32, #tpu.memory_space<vmem>>, %arg9: memref<1x1x1024xf32, #tpu.memory_space<vmem>>) attributes {dimension_semantics = [#tpu.dimension_semantics<parallel>, #tpu.dimension_semantics<arbitrary>], iteration_bounds = array<i64: 2, 1>, scalar_prefetch = 0 : i64, scratch_operands = 0 : i64, tpu.core_type = #tpu.core_type<tc>, window_params = [{transform_indices = @transform_0, window_bounds = array<i64: 1, 16, 64>}, {transform_indices = @transform_1, window_bounds = array<i64: 1, 64, 64>}, {pipeline_mode = #tpu.pipeline_mode<synchronous>, transform_indices = @transform_2, window_bounds = array<i64: 1, 64>}, {pipeline_mode = #tpu.pipeline_mode<synchronous>, transform_indices = @transform_3, window_bounds = array<i64: 64, 128>}, {pipeline_mode = #tpu.pipeline_mode<synchronous>, transform_indices = @transform_4, window_bounds = array<i64: 1, 128>}, {pipeline_mode = #tpu.pipeline_mode<synchronous>, transform_indices = @transform_5, window_bounds = array<i64: 128, 1024>}, {pipeline_mode = #tpu.pipeline_mode<synchronous>, transform_indices = @transform_6, window_bounds = array<i64: 1, 1024>}, {transform_indices = @transform_7, window_bounds = array<i64: 1, 1, 1024>}]} {
    %c0 = arith.constant 0 : index
    %c0_0 = arith.constant 0 : index
    %c0_1 = arith.constant 0 : index
    %0 = vector.load %arg2[%c0, %c0_0, %c0_1] : memref<1x16x64xbf16, #tpu.memory_space<vmem>>, vector<1x16x64xbf16>
    %1 = vector.shape_cast %0 : vector<1x16x64xbf16> to vector<16x64xbf16>
    %c0_2 = arith.constant 0 : index
    %c0_3 = arith.constant 0 : index
    %c0_4 = arith.constant 0 : index
    %2 = vector.load %arg3[%c0_2, %c0_3, %c0_4] : memref<1x64x64xbf16, #tpu.memory_space<vmem>>, vector<1x64x64xbf16>
    %3 = vector.shape_cast %2 : vector<1x64x64xbf16> to vector<64x64xbf16>
    %cst = arith.constant dense<0.000000e+00> : vector<16x64xf32>
    %4 = tpu.matmul %1, %3, %cst {dimension_numbers = #tpu.dot_dimension_numbers<[1], [0], [0], [1], [0, 0, 1, 1], [], []>} : vector<16x64xbf16>, vector<64x64xbf16>, vector<16x64xf32> -> vector<16x64xf32>
    %c0_5 = arith.constant 0 : index
    %c0_6 = arith.constant 0 : index
    %5 = vector.load %arg4[%c0_5, %c0_6] : memref<1x64xf32, #tpu.memory_space<vmem>>, vector<1x64xf32>
    %6 = vector.broadcast %5 : vector<1x64xf32> to vector<16x64xf32>
    %7 = arith.addf %4, %6 : vector<16x64xf32>
    %cst_7 = arith.constant 0.000000e+00 : f32
    %8 = vector.broadcast %cst_7 : f32 to vector<16x64xf32>
    %9 = arith.maximumf %7, %8 : vector<16x64xf32>
    %10 = arith.truncf %9 : vector<16x64xf32> to vector<16x64xbf16>
    %c0_8 = arith.constant 0 : index
    %c0_9 = arith.constant 0 : index
    %11 = vector.load %arg5[%c0_8, %c0_9] : memref<64x128xbf16, #tpu.memory_space<vmem>>, vector<64x128xbf16>
    %cst_10 = arith.constant dense<0.000000e+00> : vector<16x128xf32>
    %12 = tpu.matmul %10, %11, %cst_10 {dimension_numbers = #tpu.dot_dimension_numbers<[1], [0], [0], [1], [0, 0, 1, 1], [], []>} : vector<16x64xbf16>, vector<64x128xbf16>, vector<16x128xf32> -> vector<16x128xf32>
    %c0_11 = arith.constant 0 : index
    %c0_12 = arith.constant 0 : index
    %13 = vector.load %arg6[%c0_11, %c0_12] : memref<1x128xf32, #tpu.memory_space<vmem>>, vector<1x128xf32>
    %14 = vector.broadcast %13 : vector<1x128xf32> to vector<16x128xf32>
    %15 = arith.addf %12, %14 : vector<16x128xf32>
    %cst_13 = arith.constant 0.000000e+00 : f32
    %16 = vector.broadcast %cst_13 : f32 to vector<16x128xf32>
    %17 = arith.maximumf %15, %16 : vector<16x128xf32>
    %18 = arith.truncf %17 : vector<16x128xf32> to vector<16x128xbf16>
    %c0_14 = arith.constant 0 : index
    %c0_15 = arith.constant 0 : index
    %19 = vector.load %arg7[%c0_14, %c0_15] : memref<128x1024xbf16, #tpu.memory_space<vmem>>, vector<128x1024xbf16>
    %cst_16 = arith.constant dense<0.000000e+00> : vector<16x1024xf32>
    %20 = tpu.matmul %18, %19, %cst_16 {dimension_numbers = #tpu.dot_dimension_numbers<[1], [0], [0], [1], [0, 0, 1, 1], [], []>} : vector<16x128xbf16>, vector<128x1024xbf16>, vector<16x1024xf32> -> vector<16x1024xf32>
    %c0_17 = arith.constant 0 : index
    %c0_18 = arith.constant 0 : index
    %21 = vector.load %arg8[%c0_17, %c0_18] : memref<1x1024xf32, #tpu.memory_space<vmem>>, vector<1x1024xf32>
    %22 = vector.broadcast %21 : vector<1x1024xf32> to vector<16x1024xf32>
    %23 = arith.addf %20, %22 : vector<16x1024xf32>
    %cst_19 = arith.constant 0.000000e+00 : f32
    %24 = vector.broadcast %cst_19 : f32 to vector<16x1024xf32>
    %25 = arith.maximumf %23, %24 : vector<16x1024xf32>
    %26 = tpu.iota {dimensions = array<i32: 0>} : vector<16x1024xi32>
    %c16_i32 = arith.constant 16 : i32
    %27 = arith.muli %arg1, %c16_i32 : i32
    %28 = vector.broadcast %27 : i32 to vector<16x1024xi32>
    %29 = arith.addi %26, %28 : vector<16x1024xi32>
    %c16_i32_20 = arith.constant 16 : i32
    %30 = vector.broadcast %c16_i32_20 : i32 to vector<16x1024xi32>
    %31 = arith.cmpi slt, %29, %30 : vector<16x1024xi32>
    %cst_21 = arith.constant 0.000000e+00 : f32
    %32 = vector.broadcast %cst_21 : f32 to vector<16x1024xf32>
    %33 = arith.select %31, %25, %32 : vector<16x1024xi1>, vector<16x1024xf32>
    %cst_22 = arith.constant dense<0xFF800000> : vector<1024xf32>
    %34 = vector.multi_reduction <maximumf>, %33, %cst_22 [0] : vector<16x1024xf32> to vector<1024xf32>
    %35 = vector.shape_cast %34 : vector<1024xf32> to vector<1x1024xf32>
    %c0_i32 = arith.constant 0 : i32
    %36 = arith.cmpi eq, %arg1, %c0_i32 : i32
    %37 = arith.extui %36 : i1 to i32
    %c0_i32_23 = arith.constant 0 : i32
    %38 = arith.cmpi ne, %37, %c0_i32_23 : i32
    scf.if %38 {
      %cst_30 = arith.constant 0.000000e+00 : f32
      %45 = vector.broadcast %cst_30 : f32 to vector<1x1x1024xf32>
      %c0_31 = arith.constant 0 : index
      %c0_32 = arith.constant 0 : index
      %c0_33 = arith.constant 0 : index
      %46 = vector.load %arg9[%c0_31, %c0_32, %c0_33] : memref<1x1x1024xf32, #tpu.memory_space<vmem>>, vector<1x1x1024xf32>
      tpu.vector_store %arg9[%c0_31, %c0_32, %c0_33], %45 {strides = array<i32>} : memref<1x1x1024xf32, #tpu.memory_space<vmem>>, vector<1x1x1024xf32>,
    } else {
    }
    %c0_24 = arith.constant 0 : index
    %c0_25 = arith.constant 0 : index
    %c0_26 = arith.constant 0 : index
    %39 = vector.load %arg9[%c0_24, %c0_25, %c0_26] : memref<1x1x1024xf32, #tpu.memory_space<vmem>>, vector<1x1x1024xf32>
    %40 = vector.shape_cast %39 : vector<1x1x1024xf32> to vector<1x1024xf32>
    %41 = arith.maximumf %40, %35 : vector<1x1024xf32>
    %c0_27 = arith.constant 0 : index
    %c0_28 = arith.constant 0 : index
    %c0_29 = arith.constant 0 : index
    %42 = vector.load %arg9[%c0_27, %c0_28, %c0_29] : memref<1x1x1024xf32, #tpu.memory_space<vmem>>, vector<1x1x1024xf32>
    %43 = vector.shape_cast %42 : vector<1x1x1024xf32> to vector<1x1024xf32>
    %44 = vector.shape_cast %41 : vector<1x1024xf32> to vector<1x1x1024xf32>
    tpu.vector_store %arg9[%c0_27, %c0_28, %c0_29], %44 {strides = array<i32>} : memref<1x1x1024xf32, #tpu.memory_space<vmem>>, vector<1x1x1024xf32>,
    return
  }
  func.func @transform_0(%arg0: i32, %arg1: i32) -> (i32, i32, i32) {
    %c0_i32 = arith.constant 0 : i32
    %c0_i32_0 = arith.constant 0 : i32
    return %arg0, %arg1, %c0_i32 : i32, i32, i32
  }
  func.func @transform_1(%arg0: i32, %arg1: i32) -> (i32, i32, i32) {
    %c0_i32 = arith.constant 0 : i32
    %c0_i32_0 = arith.constant 0 : i32
    %c0_i32_1 = arith.constant 0 : i32
    return %arg0, %c0_i32, %c0_i32_0 : i32, i32, i32
  }
  func.func @transform_2(%arg0: i32, %arg1: i32) -> (i32, i32) {
    %c0_i32 = arith.constant 0 : i32
    %c0_i32_0 = arith.constant 0 : i32
    %c0_i32_1 = arith.constant 0 : i32
    return %c0_i32, %c0_i32_0 : i32, i32
  }
  func.func @transform_3(%arg0: i32, %arg1: i32) -> (i32, i32) {
    %c0_i32 = arith.constant 0 : i32
    %c0_i32_0 = arith.constant 0 : i32
    %c0_i32_1 = arith.constant 0 : i32
    return %c0_i32, %c0_i32_0 : i32, i32
  }
  func.func @transform_4(%arg0: i32, %arg1: i32) -> (i32, i32) {
    %c0_i32 = arith.constant 0 : i32
    %c0_i32_0 = arith.constant 0 : i32
    %c0_i32_1 = arith.constant 0 : i32
    return %c0_i32, %c0_i32_0 : i32, i32
  }
  func.func @transform_5(%arg0: i32, %arg1: i32) -> (i32, i32) {
    %c0_i32 = arith.constant 0 : i32
    %c0_i32_0 = arith.constant 0 : i32
    %c0_i32_1 = arith.constant 0 : i32
    return %c0_i32, %c0_i32_0 : i32, i32
  }
  func.func @transform_6(%arg0: i32, %arg1: i32) -> (i32, i32) {
    %c0_i32 = arith.constant 0 : i32
    %c0_i32_0 = arith.constant 0 : i32
    %c0_i32_1 = arith.constant 0 : i32
    return %c0_i32, %c0_i32_0 : i32, i32
  }
  func.func @transform_7(%arg0: i32, %arg1: i32) -> (i32, i32, i32) {
    %c0_i32 = arith.constant 0 : i32
    %c0_i32_0 = arith.constant 0 : i32
    %c0_i32_1 = arith.constant 0 : i32
    return %arg0, %c0_i32, %c0_i32_0 : i32, i32, i32
  }
}

module attributes {stable_mosaic.version = 11 : i64} {
  func.func @_head_kernel(%arg0: i32, %arg1: i32, %arg2: memref<1x16x64xbf16, #tpu.memory_space<vmem>>, %arg3: memref<1x64x512xbf16, #tpu.memory_space<vmem>>, %arg4: memref<1x1x512xf32, #tpu.memory_space<vmem>>, %arg5: memref<512x256xbf16, #tpu.memory_space<vmem>>, %arg6: memref<1x256xf32, #tpu.memory_space<vmem>>, %arg7: memref<256x128xbf16, #tpu.memory_space<vmem>>, %arg8: memref<1x128xf32, #tpu.memory_space<vmem>>, %arg9: memref<128x2xbf16, #tpu.memory_space<vmem>>, %arg10: memref<1x2xf32, #tpu.memory_space<vmem>>, %arg11: memref<1x16x2xf32, #tpu.memory_space<vmem>>) attributes {dimension_semantics = [#tpu.dimension_semantics<parallel>, #tpu.dimension_semantics<parallel>], iteration_bounds = array<i64: 2, 1>, scalar_prefetch = 0 : i64, scratch_operands = 0 : i64, tpu.core_type = #tpu.core_type<tc>, window_params = [{transform_indices = @transform_0, window_bounds = array<i64: 1, 16, 64>}, {transform_indices = @transform_1, window_bounds = array<i64: 1, 64, 512>}, {transform_indices = @transform_2, window_bounds = array<i64: 1, 1, 512>}, {pipeline_mode = #tpu.pipeline_mode<synchronous>, transform_indices = @transform_3, window_bounds = array<i64: 512, 256>}, {pipeline_mode = #tpu.pipeline_mode<synchronous>, transform_indices = @transform_4, window_bounds = array<i64: 1, 256>}, {pipeline_mode = #tpu.pipeline_mode<synchronous>, transform_indices = @transform_5, window_bounds = array<i64: 256, 128>}, {pipeline_mode = #tpu.pipeline_mode<synchronous>, transform_indices = @transform_6, window_bounds = array<i64: 1, 128>}, {pipeline_mode = #tpu.pipeline_mode<synchronous>, transform_indices = @transform_7, window_bounds = array<i64: 128, 2>}, {pipeline_mode = #tpu.pipeline_mode<synchronous>, transform_indices = @transform_8, window_bounds = array<i64: 1, 2>}, {transform_indices = @transform_9, window_bounds = array<i64: 1, 16, 2>}]} {
    %c0 = arith.constant 0 : index
    %c0_0 = arith.constant 0 : index
    %c0_1 = arith.constant 0 : index
    %0 = vector.load %arg2[%c0, %c0_0, %c0_1] : memref<1x16x64xbf16, #tpu.memory_space<vmem>>, vector<1x16x64xbf16>
    %1 = vector.shape_cast %0 : vector<1x16x64xbf16> to vector<16x64xbf16>
    %c0_2 = arith.constant 0 : index
    %c0_3 = arith.constant 0 : index
    %c0_4 = arith.constant 0 : index
    %2 = vector.load %arg3[%c0_2, %c0_3, %c0_4] : memref<1x64x512xbf16, #tpu.memory_space<vmem>>, vector<1x64x512xbf16>
    %3 = vector.shape_cast %2 : vector<1x64x512xbf16> to vector<64x512xbf16>
    %cst = arith.constant dense<0.000000e+00> : vector<16x512xf32>
    %4 = tpu.matmul %1, %3, %cst {dimension_numbers = #tpu.dot_dimension_numbers<[1], [0], [0], [1], [0, 0, 1, 1], [], []>} : vector<16x64xbf16>, vector<64x512xbf16>, vector<16x512xf32> -> vector<16x512xf32>
    %c0_5 = arith.constant 0 : index
    %c0_6 = arith.constant 0 : index
    %c0_7 = arith.constant 0 : index
    %5 = vector.load %arg4[%c0_5, %c0_6, %c0_7] : memref<1x1x512xf32, #tpu.memory_space<vmem>>, vector<1x1x512xf32>
    %6 = vector.shape_cast %5 : vector<1x1x512xf32> to vector<1x512xf32>
    %7 = vector.broadcast %6 : vector<1x512xf32> to vector<16x512xf32>
    %8 = arith.addf %4, %7 : vector<16x512xf32>
    %cst_8 = arith.constant 0.000000e+00 : f32
    %9 = vector.broadcast %cst_8 : f32 to vector<16x512xf32>
    %10 = arith.maximumf %8, %9 : vector<16x512xf32>
    %11 = arith.truncf %10 : vector<16x512xf32> to vector<16x512xbf16>
    %c0_9 = arith.constant 0 : index
    %c0_10 = arith.constant 0 : index
    %12 = vector.load %arg5[%c0_9, %c0_10] : memref<512x256xbf16, #tpu.memory_space<vmem>>, vector<512x256xbf16>
    %cst_11 = arith.constant dense<0.000000e+00> : vector<16x256xf32>
    %13 = tpu.matmul %11, %12, %cst_11 {dimension_numbers = #tpu.dot_dimension_numbers<[1], [0], [0], [1], [0, 0, 1, 1], [], []>} : vector<16x512xbf16>, vector<512x256xbf16>, vector<16x256xf32> -> vector<16x256xf32>
    %c0_12 = arith.constant 0 : index
    %c0_13 = arith.constant 0 : index
    %14 = vector.load %arg6[%c0_12, %c0_13] : memref<1x256xf32, #tpu.memory_space<vmem>>, vector<1x256xf32>
    %15 = vector.broadcast %14 : vector<1x256xf32> to vector<16x256xf32>
    %16 = arith.addf %13, %15 : vector<16x256xf32>
    %cst_14 = arith.constant 0.000000e+00 : f32
    %17 = vector.broadcast %cst_14 : f32 to vector<16x256xf32>
    %18 = arith.maximumf %16, %17 : vector<16x256xf32>
    %19 = arith.truncf %18 : vector<16x256xf32> to vector<16x256xbf16>
    %c0_15 = arith.constant 0 : index
    %c0_16 = arith.constant 0 : index
    %20 = vector.load %arg7[%c0_15, %c0_16] : memref<256x128xbf16, #tpu.memory_space<vmem>>, vector<256x128xbf16>
    %cst_17 = arith.constant dense<0.000000e+00> : vector<16x128xf32>
    %21 = tpu.matmul %19, %20, %cst_17 {dimension_numbers = #tpu.dot_dimension_numbers<[1], [0], [0], [1], [0, 0, 1, 1], [], []>} : vector<16x256xbf16>, vector<256x128xbf16>, vector<16x128xf32> -> vector<16x128xf32>
    %c0_18 = arith.constant 0 : index
    %c0_19 = arith.constant 0 : index
    %22 = vector.load %arg8[%c0_18, %c0_19] : memref<1x128xf32, #tpu.memory_space<vmem>>, vector<1x128xf32>
    %23 = vector.broadcast %22 : vector<1x128xf32> to vector<16x128xf32>
    %24 = arith.addf %21, %23 : vector<16x128xf32>
    %cst_20 = arith.constant 0.000000e+00 : f32
    %25 = vector.broadcast %cst_20 : f32 to vector<16x128xf32>
    %26 = arith.maximumf %24, %25 : vector<16x128xf32>
    %27 = arith.truncf %26 : vector<16x128xf32> to vector<16x128xbf16>
    %c0_21 = arith.constant 0 : index
    %c0_22 = arith.constant 0 : index
    %28 = vector.load %arg9[%c0_21, %c0_22] : memref<128x2xbf16, #tpu.memory_space<vmem>>, vector<128x2xbf16>
    %cst_23 = arith.constant dense<0.000000e+00> : vector<16x2xf32>
    %29 = tpu.matmul %27, %28, %cst_23 {dimension_numbers = #tpu.dot_dimension_numbers<[1], [0], [0], [1], [0, 0, 1, 1], [], []>} : vector<16x128xbf16>, vector<128x2xbf16>, vector<16x2xf32> -> vector<16x2xf32>
    %c0_24 = arith.constant 0 : index
    %c0_25 = arith.constant 0 : index
    %30 = vector.load %arg10[%c0_24, %c0_25] : memref<1x2xf32, #tpu.memory_space<vmem>>, vector<1x2xf32>
    %31 = vector.broadcast %30 : vector<1x2xf32> to vector<16x2xf32>
    %32 = arith.addf %29, %31 : vector<16x2xf32>
    %cst_26 = arith.constant dense<0xFF800000> : vector<16xf32>
    %33 = vector.multi_reduction <maximumf>, %32, %cst_26 [1] : vector<16x2xf32> to vector<16xf32>
    %34 = vector.shape_cast %33 : vector<16xf32> to vector<16x1xf32>
    %35 = vector.broadcast %34 : vector<16x1xf32> to vector<16x2xf32>
    %36 = arith.subf %32, %35 : vector<16x2xf32>
    %37 = math.exp %36 : vector<16x2xf32>
    %cst_27 = arith.constant dense<0.000000e+00> : vector<16xf32>
    %38 = vector.multi_reduction <add>, %37, %cst_27 [1] : vector<16x2xf32> to vector<16xf32>
    %39 = vector.shape_cast %38 : vector<16xf32> to vector<16x1xf32>
    %40 = math.log %39 : vector<16x1xf32>
    %41 = vector.broadcast %40 : vector<16x1xf32> to vector<16x2xf32>
    %42 = arith.subf %36, %41 : vector<16x2xf32>
    %c0_28 = arith.constant 0 : index
    %c0_29 = arith.constant 0 : index
    %c0_30 = arith.constant 0 : index
    %43 = vector.load %arg11[%c0_28, %c0_29, %c0_30] : memref<1x16x2xf32, #tpu.memory_space<vmem>>, vector<1x16x2xf32>
    %44 = vector.shape_cast %43 : vector<1x16x2xf32> to vector<16x2xf32>
    %45 = vector.shape_cast %42 : vector<16x2xf32> to vector<1x16x2xf32>
    tpu.vector_store %arg11[%c0_28, %c0_29, %c0_30], %45 {strides = array<i32>} : memref<1x16x2xf32, #tpu.memory_space<vmem>>, vector<1x16x2xf32>,
    return
  }
  func.func @transform_0(%arg0: i32, %arg1: i32) -> (i32, i32, i32) {
    %c0_i32 = arith.constant 0 : i32
    %c0_i32_0 = arith.constant 0 : i32
    return %arg0, %arg1, %c0_i32 : i32, i32, i32
  }
  func.func @transform_1(%arg0: i32, %arg1: i32) -> (i32, i32, i32) {
    %c0_i32 = arith.constant 0 : i32
    %c0_i32_0 = arith.constant 0 : i32
    %c0_i32_1 = arith.constant 0 : i32
    return %arg0, %c0_i32, %c0_i32_0 : i32, i32, i32
  }
  func.func @transform_2(%arg0: i32, %arg1: i32) -> (i32, i32, i32) {
    %c0_i32 = arith.constant 0 : i32
    %c0_i32_0 = arith.constant 0 : i32
    %c0_i32_1 = arith.constant 0 : i32
    return %arg0, %c0_i32, %c0_i32_0 : i32, i32, i32
  }
  func.func @transform_3(%arg0: i32, %arg1: i32) -> (i32, i32) {
    %c0_i32 = arith.constant 0 : i32
    %c0_i32_0 = arith.constant 0 : i32
    %c0_i32_1 = arith.constant 0 : i32
    return %c0_i32, %c0_i32_0 : i32, i32
  }
  func.func @transform_4(%arg0: i32, %arg1: i32) -> (i32, i32) {
    %c0_i32 = arith.constant 0 : i32
    %c0_i32_0 = arith.constant 0 : i32
    %c0_i32_1 = arith.constant 0 : i32
    return %c0_i32, %c0_i32_0 : i32, i32
  }
  func.func @transform_5(%arg0: i32, %arg1: i32) -> (i32, i32) {
    %c0_i32 = arith.constant 0 : i32
    %c0_i32_0 = arith.constant 0 : i32
    %c0_i32_1 = arith.constant 0 : i32
    return %c0_i32, %c0_i32_0 : i32, i32
  }
  func.func @transform_6(%arg0: i32, %arg1: i32) -> (i32, i32) {
    %c0_i32 = arith.constant 0 : i32
    %c0_i32_0 = arith.constant 0 : i32
    %c0_i32_1 = arith.constant 0 : i32
    return %c0_i32, %c0_i32_0 : i32, i32
  }
  func.func @transform_7(%arg0: i32, %arg1: i32) -> (i32, i32) {
    %c0_i32 = arith.constant 0 : i32
    %c0_i32_0 = arith.constant 0 : i32
    %c0_i32_1 = arith.constant 0 : i32
    return %c0_i32, %c0_i32_0 : i32, i32
  }
  func.func @transform_8(%arg0: i32, %arg1: i32) -> (i32, i32) {
    %c0_i32 = arith.constant 0 : i32
    %c0_i32_0 = arith.constant 0 : i32
    %c0_i32_1 = arith.constant 0 : i32
    return %c0_i32, %c0_i32_0 : i32, i32
  }
  func.func @transform_9(%arg0: i32, %arg1: i32) -> (i32, i32, i32) {
    %c0_i32 = arith.constant 0 : i32
    %c0_i32_0 = arith.constant 0 : i32
    return %arg0, %arg1, %c0_i32 : i32, i32, i32
  }
}

</mosaic_0001>

<bundles_post_ra>
// kernel: pointnet_segmentation_forward.9
= control target key start
LH: loop header
LB: loop body
LE: loop exit
PB: predicated region body
PF: predicated region fallthrough
CT: control target
= control target key end

     0   :  { %s689_s18 = smov 0   ;;  %s691_s19 = smov 0   ;;  %s751_s0 = inlined_call_operand.vmem [shape: bf16[2,16,3], index: 0, kind: input, shape index: {}]   ;;  %s752_s1 = inlined_call_operand.vmem [shape: bf16[2,3,64], index: 1, kind: input, shape index: {}]   ;;  %s753_s2 = inlined_call_operand.vmem [shape: f32[1,64], index: 2, kind: input, shape index: {}]   ;;  %s754_s3 = inlined_call_operand.vmem [shape: bf16[64,64], index: 3, kind: input, shape index: {}]   ;;  %s755_s4 = inlined_call_operand.vmem [shape: f32[1,64], index: 4, kind: input, shape index: {}]   ;;  %s756_s5 = inlined_call_operand.vmem [shape: bf16[2,16,64], index: 5, kind: output, shape index: {}]  }
   0x1   :  { %s693_s20 = smov 0  }
   0x2 LB: > { %s27_s21 = sadd.s32 1, %s650_s19  ;;  %p552_p0 = scmp.ge.s32.totalorder %s654_s20, 1  ;;  %s654_s20 = sphi %s693_s20, %s15_s20   ;;  %s650_s19 = sphi %s691_s19, %s758_s19   ;;  %s646_s18 = sphi %s689_s18, %s757_s18  }
   0x3   : > { %p29_p1 = scmp.ge.s32.totalorder %s27_s21, 2  ;;  %p217_p2 = scmp.lt.s32.totalorder %s654_s20, 3 }
   0x5   : > { %s760_s21 = smov (%p29_p1, %s27_s21), 0  ;;  %p218_p3 = pnand %p552_p0, %p217_p2 }
   0x6   : > { %p258_p4 = scmp.lt.s32.totalorder (!%p218_p3), %s646_s18, 1 }
   0x7   : > { %221 = sbr.rel (%p218_p3) target bundleno = 428 (0x1ac), region = 40 }
   0xc   : > { %vm301_vm0 = vcmask 1040384   ;;  %vm302_vm1 = vcmask 1041408   ;;  %v628_v0 = vld [vmem:[%s754_s3 + $0x18] sm:$0xff]   ;;  %v656_v1 = vmov 0.0   ;;  %v657_v2 = vmov 65535   ;;  %s762_s18 = smov (!%p258_p4, %s646_s18), 1 }
   0xd   : > { %582 = vmatprep.subr.bf16.mxu0 %v656_v1  ;;  %v303_v3 = vsel %vm301_vm0, 4294967295, %v657_v2  ;;  %588 = vmatprep.subr.bf16.mxu1 %v656_v1  ;;  %vm658_vm2 = vmmov 0   ;;  %s571_s24 = sshll.u32 %s762_s18, 3  ;;  %s555_s25 = sshll.u32 %s762_s18, 1  ;;  %vm297_vm3 = vcmask 23552   ;;  %v629_v8 = vld [vmem:[%s754_s3 + $0x10] sm:$0xff]  }
   0xe   : > { %v304_v4 = vsel %vm302_vm1, %v303_v3, 0  ;;  %584 = vmatprep.mubr.msk.bf16.mxu0 %vm658_vm2, %v656_v1  ;;  %589 = vmatpush3.bf16.msra.mxu1 %v628_v0  ;;  %s265_s28 = scalar_lea.vmem %s751_s0, %s571_s24  ;;  %s270_s6 = scalar_lea.vmem %s752_s1, %s555_s25  ;;  %v630_v9 = vld [vmem:[%s754_s3 + $0x8] sm:$0xff]   ;;  %v631_v10 = vld [vmem:[%s754_s3] sm:$0xff]   ;;  %vm391_vm4 = vcmask 523264   ;;  %vm446_vm5 = vcmask 519168  }
   0xf   : > { %590 = vmatprep.subr.bf16.mxu1 %v656_v1  ;;  %596 = vmatprep.mubr.msk.bf16.mxu1 %vm658_vm2, %v656_v1  ;;  %v284_v5 = vld [vmem:[%s270_s6] sm:$0x3]  ;;  %s279_s23 = scalar_lea.vmem %s756_s5, %s571_s24 }
  0x10   : > { %v306_v6 = vand.u32 %v304_v4, %v284_v5  ;;  %v627_v7 = vld [vmem:[%s265_s28] sm:$0xff]  }
  0x11   : > { %v558_v11 = vld [vmem:[%s753_s2] ss:$0 sm:$0xff] }
  0x12   : > { %583 = vmatpush3.bf16.msra.mxu0 %v306_v6  ;;  %591 = vmatpush3.bf16.msra.mxu1 %v629_v8  ;;  %v561_v21 = vld [vmem:[%s755_s4] ss:$0 sm:$0xff] }
  0x13   : > { %592 = vmatprep.subr.bf16.mxu1 %v656_v1 }
  0x15   : > { %585 = vmatmul.mubr.msk.bf16.vlgmr.msra.gmra.mxu0 %vm297_vm3, %v627_v7 }
  0x16   : > { %593 = vmatpush3.bf16.msra.mxu1 %v630_v9 }
  0x17   : > { %594 = vmatprep.subr.bf16.mxu1 %v656_v1 }
  0x1a   : > { %595 = vmatpush3.bf16.msra.mxu1 %v631_v10 }
  0xd5   : > { %v342_v12 = vpop.f32.mrf.mxu0 }
  0xd6   : > { %v343_v14 = vadd.f32 %v558_v11, %v342_v12 }
  0xd7   : > { %v586_v13 = vpop.f32.mrf.mxu0 }
  0xd8   : > { %v349_v18 = vmax.f32 %v343_v14, 0.0 }
  0xd9   : > { %v345_v15 = vpop.f32.mrf.mxu0 }
  0xda   : > { %v346_v16 = vadd.f32 %v558_v11, %v345_v15 }
  0xdb   : > { %v587_v17 = vpop.f32.mrf.mxu0 }
  0xdc   : > { %v350_v19 = vmax.f32 %v346_v16, 0.0 }
  0xde   : > { %v351_v20 = vpack.c.bf16 %v350_v19, %v349_v18 }
  0xe0   : > { %597 = vmatmul.mubr.msk.bf16.vlgmr.msra.gmra.mxu1 %vm391_vm4, %v351_v20 }
 0x1a0   : > { %v429_v22 = vpop.f32.mrf.mxu1 }
 0x1a1   : > { %v430_v23 = vadd.f32 %v561_v21, %v429_v22 }
 0x1a2   : > { %v598_v24 = vpop.f32.mrf.mxu1 }
 0x1a3   : > { %v436_v25 = vmax.f32 %v430_v23, 0.0 }
 0x1a4   : > { %v432_v26 = vpop.f32.mrf.mxu1 }
 0x1a5   : > { %v573_v27 = vpack.c.bf16 %v436_v25, %v436_v25  ;;  %v433_v28 = vadd.f32 %v561_v21, %v432_v26 }
 0x1a6   : > { %v599_v29 = vpop.f32.mrf.mxu1 }
 0x1a7   : > { %447 = vst.msk [vmem:[%s279_s23] sm:$0xf] %vm446_vm5, %v573_v27  ;;  %v437_v30 = vmax.f32 %v433_v28, 0.0 }
 0x1a9   : > { %v574_v31 = vpack.c.bf16 %v437_v30, %v437_v30 }
 0x1ab   : > { %448 = vst.msk [vmem:[%s279_s23 + $0x4] sm:$0xf] %vm446_vm5, %v574_v31 }
 0x1ac PF: > { %s15_s20 = sadd.s32 1, %s654_s20   ;;  %s757_s18 = smov %s650_s19 }
 0x1ad   : > { %p12_p5 = scmp.ge.s32.totalorder %s15_s20, 4   ;;  %s758_s19 = smov %s760_s21 }
 0x1af   :  { %14 = sbr.rel (!%p12_p5) target bundleno = 2 (0x2), region = 73 }

// kernel: pointnet_segmentation_forward.7
= control target key start
LH: loop header
LB: loop body
LE: loop exit
PB: predicated region body
PF: predicated region fallthrough
CT: control target
= control target key end

     0   :  { %12 = vsyncpa [#allocation3], 0  ;;  %s2026_s0 = inlined_call_operand.vmem [shape: bf16[2,16,3], index: 0, kind: input, shape index: {}]   ;;  %s2027_s1 = inlined_call_operand.vmem [shape: bf16[3,64], index: 1, kind: input, shape index: {}]   ;;  %s2028_s2 = inlined_call_operand.hbm [shape: f32[1,64], index: 2, kind: input, shape index: {}]   ;;  %s2029_s3 = inlined_call_operand.vmem [shape: bf16[64,128], index: 3, kind: input, shape index: {}]   ;;  %s2030_s4 = inlined_call_operand.hbm [shape: f32[1,128], index: 4, kind: input, shape index: {}]   ;;  %s2031_s5 = inlined_call_operand.vmem [shape: bf16[128,1024], index: 5, kind: input, shape index: {}]   ;;  %s2032_s6 = inlined_call_operand.hbm [shape: f32[1,1024], index: 6, kind: input, shape index: {}]   ;;  %s2033_s7 = inlined_call_operand.vmem [shape: f32[2,1,1024], index: 7, kind: output, shape index: {}]  }
   0x1   :  { %13 = vsyncpa [#allocation5], 0  ;;  %s1699_s24 = smov 0   ;;  %s1701_s25 = smov 0  }
   0x2   :  { %s1703_s26 = smov 0  }
   0x3 LB: > { %s1651_s27 = smov [#allocation4]   ;;  %s1361_s29 = sadd.s32 4294967295, %s1649_s26   ;;  %s1649_s26 = sphi %s1703_s26, %s19_s26   ;;  %s1645_s25 = sphi %s1701_s25, %s2039_s25   ;;  %s1641_s24 = sphi %s1699_s24, %s2038_s24  }
   0x4   : > { %s246_s28 = sshll.u32 %s1651_s27, 4  ;;  %p1363_p0 = scmp.ge.s32.totalorder %s1649_s26, 1  ;;  %s247_s28 = int_to_ptr.vmem [resolvable:$true] %s246_s28 }
   0x5   : > { %p216_p1 = scmp.lt.s32.totalorder %s1649_s26, 3  ;;  %p1717_p2 = scmp.eq.s32.totalorder %s1361_s29, 0 }
   0x6   : > { %s31_s9 = sadd.s32 1, %s1645_s25  ;;  %s1652_s12 = smov [#allocation2]  }
   0x7   : > { %p1721_p3 = pnand %p1363_p0, %p216_p1  ;;  %p1734_p6 = scmp.ge.s32.totalorder %s31_s9, 2 }
   0x8   : > { %s232_s13 = sshll.u32 %s1652_s12, 4  ;;  %s1552_s14 = scalar_lea.vmem %s247_s28, 16  ;;  %s233_s13 = int_to_ptr.vmem [resolvable:$true] %s232_s13 }
   0x9   : > { %p1488_p4 = pneg %p1721_p3  ;;  %p1553_p8 = scmp.ne.s32.totalorder %s247_s28, %s1552_s14 }
   0xa   : > { %s1559_s15 = scalar_lea.vmem %s247_s28, 32  ;;  %p1560_p11 = scmp.lt.s32.totalorder %s247_s28, %s247_s28 }
   0xb   : > { %p1730_p5 = pnand %p1717_p2, %p1488_p4  ;;  %p1561_p12 = scmp.lt.s32.totalorder %s1559_s15, %s1552_s14 }
   0xd   : > { %p1543_p7 = pneg %p1730_p5  ;;  %p1562_p13 = por %p1561_p12, %p1560_p11 }
   0xf   : > { %p1555_p9 = pnand %p1553_p8, %p1543_p7 }
  0x11   : > { %p1556_p10 = pneg %p1555_p9 }
  0x13   : > { %p1563_p0 = pnand %p1562_p13, %p1556_p10 }
  0x15   : > { %1566 = shalt.err (!%p1563_p0)
}
  0x16   : > { %1494 = dma.hbm_to_vmem [thread:$0]  (!%p1730_p5), %s2030_s4, 16, %s247_s28, [#allocation5]  }
  0x17   : > { %s2041_s9 = smov (%p1734_p6, %s31_s9), 0  ;;  %s1578_s18 = scalar_lea.vmem %s233_s13, 16 }
  0x18   : > { %p1579_p1 = scmp.ne.s32.totalorder %s233_s13, %s1578_s18  ;;  %s1585_s19 = scalar_lea.vmem %s233_s13, 32 }
  0x19   : > { %p1586_p9 = scmp.lt.s32.totalorder %s233_s13, %s233_s13  ;;  %p1587_p10 = scmp.lt.s32.totalorder %s1585_s19, %s1578_s18 }
  0x1a   : > { %p1581_p4 = pnand %p1579_p1, %p1543_p7 }
  0x1b   : > { %p1588_p11 = por %p1587_p10, %p1586_p9 }
  0x1c   : > { %p1582_p8 = pneg %p1581_p4 }
  0x1e   : > { %p1589_p12 = pnand %p1588_p11, %p1582_p8 }
  0x20   : > { %1592 = shalt.err (!%p1589_p12)
}
  0x21   : > { %1491 = dma.hbm_to_vmem [thread:$0]  (!%p1730_p5), %s2028_s2, 16, %s233_s13, [#allocation3]  }
  0x22   : > { %s1653_s22 = smov [#allocation6]  }
  0x23   : > { %s260_s23 = sshll.u32 %s1653_s22, 4  ;;  %s261_s23 = int_to_ptr.vmem [resolvable:$true] %s260_s23 }
  0x24   : > { %s1604_s27 = scalar_lea.vmem %s261_s23, 128  ;;  %p1612_p1 = scmp.lt.s32.totalorder %s261_s23, %s261_s23 }
  0x25   : > { %p1605_p6 = scmp.ne.s32.totalorder %s261_s23, %s1604_s27  ;;  %p1613_p4 = scmp.lt.s32.totalorder %s1604_s27, %s1604_s27 }
  0x27   : > { %p1607_p13 = pnand %p1605_p6, %p1543_p7  ;;  %p1614_p8 = por %p1613_p4, %p1612_p1 }
  0x29   : > { %p1608_p0 = pneg %p1607_p13 }
  0x2b   : > { %p1615_p9 = pnand %p1614_p8, %p1608_p0 }
  0x2d   : > { %1618 = shalt.err (!%p1615_p9)
}
  0x2e   : > { %1497 = dma.hbm_to_vmem [thread:$0]  (!%p1730_p5), %s2032_s6, 128, %s261_s23, [#allocation5]  }
  0x2f   : > { %286 = sbr.rel (%p1721_p3) target bundleno = 732 (0x2dc), region = 48 }
  0x34   : > { %1632 = dma.done.wait (%p1717_p2), [#allocation3], 16  }
  0x35   : > { %1634 = vsyncadd (%p1717_p2), [#allocation3], 4294967280 }
  0x36   : > { %1636 = dma.done.wait (%p1717_p2), [#allocation5], 144  }
  0x37   : > { %1638 = vsyncadd (%p1717_p2), [#allocation5], 4294967152  ;;  %vm363_vm0 = vcmask 1040384   ;;  %v1654_v0 = vmov 0.0   ;;  %p330_p5 = scmp.lt.s32.totalorder %s1641_s24, 1  ;;  %vm364_vm1 = vcmask 1041408  }
  0x38   : > { %1458 = vmatprep.subr.bf16.mxu0 %v1654_v0  ;;  %1464 = vmatprep.subr.bf16.mxu1 %v1654_v0  ;;  %v1655_v1 = vmov 65535   ;;  %vm1656_vm2 = vmmov 0   ;;  %v346_v4 = vld [vmem:[%s2027_s1] sm:$0x3]  ;;  %vm359_vm3 = vcmask 23552   ;;  %v1537_v7 = vld [vmem:[%s2029_s3 + $0x18] sm:$0xff]  }
  0x39   : > { %v365_v2 = vsel %vm363_vm0, 4294967295, %v1655_v1  ;;  %1460 = vmatprep.mubr.msk.bf16.mxu0 %vm1656_vm2, %v1654_v0  ;;  %1472 = vmatprep.mubr.msk.bf16.mxu1 %vm1656_vm2, %v1654_v0  ;;  %s2043_s24 = smov (!%p330_p5, %s1641_s24), 1  ;;  %v1538_v8 = vld [vmem:[%s2029_s3 + $0x10] sm:$0xff]   ;;  %v1539_v9 = vld [vmem:[%s2029_s3 + $0x8] sm:$0xff]   ;;  %v1540_v10 = vld [vmem:[%s2029_s3] sm:$0xff]   ;;  %vm453_vm4 = vcmask 523264  }
  0x3a   : > { %v366_v3 = vsel %vm364_vm1, %v365_v2, 0  ;;  %s1450_s30 = sshll.u32 %s2043_s24, 3  ;;  %1465 = vmatpush3.bf16.msra.mxu1 %v1537_v7  ;;  %v557_v11 = vld [vmem:[%s2031_s5 + $0x1c0] sm:$0xff]  ;;  %v558_v13 = vld [vmem:[%s2031_s5 + $0x1c8] sm:$0xff] }
  0x3b   : > { %s337_s11 = scalar_lea.vmem %s2026_s0, %s1450_s30  ;;  %v368_v5 = vand.u32 %v366_v3, %v346_v4  ;;  %1466 = vmatprep.subr.bf16.mxu1 %v1654_v0  ;;  %v561_v12 = vld [vmem:[%s2031_s5 + $0x1e0] sm:$0xff]  ;;  %v562_v16 = vld [vmem:[%s2031_s5 + $0x1e8] sm:$0xff]  ;;  %s342_s29 = scalar_lea.vmem %s2033_s7, %s1450_s30 }
  0x3c   : > { %v1536_v6 = vld [vmem:[%s337_s11] sm:$0xff]   ;;  %v1440_v14 = vcombine.low %v557_v11, %v561_v12  ;;  %v1441_v15 = vcombine.high %v557_v11, %v561_v12  ;;  %v1442_v19 = vcombine.low %v558_v13, %v562_v16  ;;  %v1443_v20 = vcombine.high %v558_v13, %v562_v16  ;;  %v550_v46 = vld [vmem:[%s2031_s5 + $0x188] sm:$0xff] }
  0x3d   : > { %1459 = vmatpush3.bf16.msra.mxu0 %v368_v5  ;;  %v549_v17 = vld [vmem:[%s2031_s5 + $0x180] sm:$0xff]  ;;  %v554_v47 = vld [vmem:[%s2031_s5 + $0x1a8] sm:$0xff] }
  0x3e   : > { %1467 = vmatpush3.bf16.msra.mxu1 %v1538_v8  ;;  %v553_v18 = vld [vmem:[%s2031_s5 + $0x1a0] sm:$0xff]  ;;  %927 = vmatprep.subr.bf16.mxu0 %v1441_v15  ;;  %v1435_v51 = vcombine.high %v550_v46, %v554_v47  ;;  %v542_v52 = vld [vmem:[%s2031_s5 + $0x148] sm:$0xff]  ;;  %v1434_v54 = vcombine.low %v550_v46, %v554_v47  ;;  %v543_v46 = vld [vmem:[%s2031_s5 + $0x150] sm:$0xff] }
  0x3f   : > { %1468 = vmatprep.subr.bf16.mxu1 %v1654_v0  ;;  %v1433_v21 = vcombine.high %v549_v17, %v553_v18  ;;  %v1432_v22 = vcombine.low %v549_v17, %v553_v18  ;;  %v541_v23 = vld [vmem:[%s2031_s5 + $0x140] sm:$0xff]  ;;  %v546_v53 = vld [vmem:[%s2031_s5 + $0x168] sm:$0xff]  ;;  %v547_v47 = vld [vmem:[%s2031_s5 + $0x170] sm:$0xff] }
  0x40   : > { %1461 = vmatmul.mubr.msk.bf16.vlgmr.msra.gmra.mxu0 %vm359_vm3, %v1536_v6  ;;  %v545_v24 = vld [vmem:[%s2031_s5 + $0x160] sm:$0xff]  ;;  %v1427_v55 = vcombine.high %v542_v52, %v546_v53  ;;  %v534_v56 = vld [vmem:[%s2031_s5 + $0x108] sm:$0xff]  ;;  %v1426_v58 = vcombine.low %v542_v52, %v546_v53  ;;  %v1429_v52 = vcombine.high %v543_v46, %v547_v47 }
  0x41   : > { %928 = vmatpush1.bf16.msra.mxu0 %v1440_v14  ;;  %v1425_v25 = vcombine.high %v541_v23, %v545_v24  ;;  %v1424_v26 = vcombine.low %v541_v23, %v545_v24  ;;  %v533_v27 = vld [vmem:[%s2031_s5 + $0x100] sm:$0xff]  ;;  %v538_v57 = vld [vmem:[%s2031_s5 + $0x128] sm:$0xff]  ;;  %v560_v23 = vld [vmem:[%s2031_s5 + $0x1d8] sm:$0xff] }
  0x42   : > { %1469 = vmatpush3.bf16.msra.mxu1 %v1539_v9  ;;  %929 = vmatprep.subr.bf16.mxu0 %v1433_v21  ;;  %v537_v28 = vld [vmem:[%s2031_s5 + $0x120] sm:$0xff]  ;;  %v1419_v59 = vcombine.high %v534_v56, %v538_v57  ;;  %v526_v60 = vld [vmem:[%s2031_s5 + $0xc8] sm:$0xff]  ;;  %v1418_v62 = vcombine.low %v534_v56, %v538_v57  ;;  %v559_v21 = vld [vmem:[%s2031_s5 + $0x1d0] sm:$0xff] }
  0x43   : > { %1470 = vmatprep.subr.bf16.mxu1 %v1654_v0  ;;  %v1417_v29 = vcombine.high %v533_v27, %v537_v28  ;;  %v1416_v30 = vcombine.low %v533_v27, %v537_v28  ;;  %v525_v31 = vld [vmem:[%s2031_s5 + $0xc0] sm:$0xff]  ;;  %v530_v61 = vld [vmem:[%s2031_s5 + $0xe8] sm:$0xff]  ;;  %v536_v56 = vld [vmem:[%s2031_s5 + $0x118] sm:$0xff] }
  0x44   : > { %v529_v32 = vld [vmem:[%s2031_s5 + $0xe0] sm:$0xff]  ;;  %v1411_v63 = vcombine.high %v526_v60, %v530_v61  ;;  %v518_v0 = vld [vmem:[%s2031_s5 + $0x88] sm:$0xff]  ;;  %v1410_v2 = vcombine.low %v526_v60, %v530_v61  ;;  %v540_v57 = vld [vmem:[%s2031_s5 + $0x138] sm:$0xff] }
  0x45   : > { %930 = vmatpush1.bf16.msra.mxu0 %v1432_v22  ;;  %v1409_v33 = vcombine.high %v525_v31, %v529_v32  ;;  %v1408_v34 = vcombine.low %v525_v31, %v529_v32  ;;  %v517_v35 = vld [vmem:[%s2031_s5 + $0x80] sm:$0xff]  ;;  %v522_v1 = vld [vmem:[%s2031_s5 + $0xa8] sm:$0xff]  ;;  %v563_v22 = vld [vmem:[%s2031_s5 + $0x1f0] sm:$0xff]  ;;  %v1423_v61 = vcombine.high %v536_v56, %v540_v57 }
  0x46   : > { %1471 = vmatpush3.bf16.msra.mxu1 %v1540_v10  ;;  %931 = vmatprep.subr.bf16.mxu0 %v1425_v25  ;;  %v521_v36 = vld [vmem:[%s2031_s5 + $0xa0] sm:$0xff]  ;;  %v1403_v3 = vcombine.high %v518_v0, %v522_v1  ;;  %v1402_v4 = vcombine.low %v518_v0, %v522_v1  ;;  %v510_v7 = vld [vmem:[%s2031_s5 + $0x48] sm:$0xff]  ;;  %v1445_v24 = vcombine.high %v559_v21, %v563_v22  ;;  %v564_v25 = vld [vmem:[%s2031_s5 + $0x1f8] sm:$0xff] }
  0x47   : > { %970 = vmatprep.subr.bf16.mxu1 %v1443_v20  ;;  %v1401_v37 = vcombine.high %v517_v35, %v521_v36  ;;  %v1400_v38 = vcombine.low %v517_v35, %v521_v36  ;;  %v1375_v39 = vld [vmem:[#allocation2] ss:$0 sm:$0xff]  ;;  %v514_v9 = vld [vmem:[%s2031_s5 + $0x68] sm:$0xff]  ;;  %v1446_v27 = vcombine.low %v560_v23, %v564_v25  ;;  %v1447_v28 = vcombine.high %v560_v23, %v564_v25  ;;  %v551_v36 = vld [vmem:[%s2031_s5 + $0x190] sm:$0xff] }
  0x48   : > { %v509_v5 = vld [vmem:[%s2031_s5 + $0x40] sm:$0xff]  ;;  %v1394_v11 = vcombine.low %v510_v7, %v514_v9  ;;  %v1395_v12 = vcombine.high %v510_v7, %v514_v9  ;;  %v502_v15 = vld [vmem:[%s2031_s5 + $0x8] sm:$0xff]  ;;  %v528_v0 = vld [vmem:[%s2031_s5 + $0xd8] sm:$0xff] }
  0x49   : > { %932 = vmatpush1.bf16.msra.mxu0 %v1424_v26  ;;  %v513_v6 = vld [vmem:[%s2031_s5 + $0x60] sm:$0xff]  ;;  %v506_v17 = vld [vmem:[%s2031_s5 + $0x28] sm:$0xff]  ;;  %v1444_v26 = vcombine.low %v559_v21, %v563_v22  ;;  %v532_v1 = vld [vmem:[%s2031_s5 + $0xf8] sm:$0xff] }
  0x4a   : > { %933 = vmatprep.subr.bf16.mxu0 %v1417_v29  ;;  %v1393_v8 = vcombine.high %v509_v5, %v513_v6  ;;  %v1392_v10 = vcombine.low %v509_v5, %v513_v6  ;;  %v501_v13 = vld [vmem:[%s2031_s5] sm:$0xff]  ;;  %v1387_v20 = vcombine.high %v502_v15, %v506_v17  ;;  %v1657_v29 = vmov 0   ;;  %v519_v6 = vld [vmem:[%s2031_s5 + $0x90] sm:$0xff]  ;;  %v524_v9 = vld [vmem:[%s2031_s5 + $0xb8] sm:$0xff] }
  0x4b   : > { %v505_v14 = vld [vmem:[%s2031_s5 + $0x20] sm:$0xff]  ;;  %959 = vmatprep.mubr.bf16.mxu0 %v1657_v29  ;;  %v1415_v5 = vcombine.high %v528_v0, %v532_v1  ;;  %v523_v7 = vld [vmem:[%s2031_s5 + $0xb0] sm:$0xff]  ;;  %v508_v25 = vld [vmem:[%s2031_s5 + $0x38] sm:$0xff] }
  0x4c   : > { %v1385_v16 = vcombine.high %v501_v13, %v505_v14  ;;  %v1384_v18 = vcombine.low %v501_v13, %v505_v14  ;;  %v511_v14 = vld [vmem:[%s2031_s5 + $0x50] sm:$0xff] }
  0x4d   : > { %934 = vmatpush1.bf16.msra.mxu0 %v1416_v30  ;;  %v1378_v30 = vld [vmem:[#allocation4] ss:$0 sm:$0xff]  ;;  %v503_v22 = vld [vmem:[%s2031_s5 + $0x10] sm:$0xff] }
  0x4e   : > { %935 = vmatprep.subr.bf16.mxu0 %v1409_v33  ;;  %v507_v23 = vld [vmem:[%s2031_s5 + $0x30] sm:$0xff] }
  0x51   : > { %936 = vmatpush1.bf16.msra.mxu0 %v1408_v34 }
  0x52   : > { %937 = vmatprep.subr.bf16.mxu0 %v1401_v37 }
  0x55   : > { %938 = vmatpush1.bf16.msra.mxu0 %v1400_v38  ;;  %v555_v38 = vld [vmem:[%s2031_s5 + $0x1b0] sm:$0xff] }
  0x56   : > { %939 = vmatprep.subr.bf16.mxu0 %v1393_v8  ;;  %v520_v8 = vld [vmem:[%s2031_s5 + $0x98] sm:$0xff] }
  0x57   : > { %v1407_v13 = vcombine.high %v520_v8, %v524_v9 }
  0x59   : > { %940 = vmatpush1.bf16.msra.mxu0 %v1392_v10 }
  0x5a   : > { %941 = vmatprep.subr.bf16.mxu0 %v1385_v16  ;;  %v512_v16 = vld [vmem:[%s2031_s5 + $0x58] sm:$0xff] }
  0x5d   : > { %942 = vmatpush1.bf16.msra.mxu0 %v1384_v18  ;;  %v1404_v18 = vcombine.low %v519_v6, %v523_v7 }
  0x5e   : > { %1013 = vmatprep.subr.bf16.mxu0 %v1445_v24  ;;  %v504_v24 = vld [vmem:[%s2031_s5 + $0x18] sm:$0xff] }
 0x100   : > { %v404_v40 = vpop.f32.mrf.mxu0 }
 0x101   : > { %v405_v42 = vadd.f32 %v1375_v39, %v404_v40  ;;  %v556_v40 = vld [vmem:[%s2031_s5 + $0x1b8] sm:$0xff] }
 0x102   : > { %v1462_v41 = vpop.f32.mrf.mxu0 }
 0x103   : > { %v411_v48 = vmax.f32 %v405_v42, 0.0 }
 0x104   : > { %v407_v43 = vpop.f32.mrf.mxu0 }
 0x105   : > { %v408_v44 = vadd.f32 %v1375_v39, %v407_v43  ;;  %v552_v39 = vld [vmem:[%s2031_s5 + $0x198] sm:$0xff] }
 0x106   : > { %v1463_v45 = vpop.f32.mrf.mxu0 }
 0x107   : > { %v412_v49 = vmax.f32 %v408_v44, 0.0  ;;  %v1437_v44 = vcombine.high %v551_v36, %v555_v38  ;;  %v1439_v45 = vcombine.high %v552_v39, %v556_v40 }
 0x109   : > { %v413_v50 = vpack.c.bf16 %v412_v49, %v411_v48  ;;  %v544_v48 = vld [vmem:[%s2031_s5 + $0x158] sm:$0xff] }
 0x10a   : > { %v548_v49 = vld [vmem:[%s2031_s5 + $0x178] sm:$0xff] }
 0x10b   : > { %1473 = vmatmul.mubr.msk.bf16.vlgmr.msra.gmra.mxu1 %vm453_vm4, %v413_v50  ;;  %v1436_v50 = vcombine.low %v551_v36, %v555_v38  ;;  %v1431_v53 = vcombine.high %v544_v48, %v548_v49 }
 0x10c   : > { %971 = vmatpush1.bf16.msra.mxu1 %v1442_v19  ;;  %v1386_v19 = vcombine.low %v502_v15, %v506_v17  ;;  %1002 = vmatprep.mubr.bf16.mxu1 %v1657_v29  ;;  %v515_v15 = vld [vmem:[%s2031_s5 + $0x70] sm:$0xff]  ;;  %v516_v17 = vld [vmem:[%s2031_s5 + $0x78] sm:$0xff] }
 0x10d   : > { %972 = vmatprep.subr.bf16.mxu1 %v1435_v51  ;;  %v1438_v51 = vcombine.low %v552_v39, %v556_v40  ;;  %v1399_v21 = vcombine.high %v512_v16, %v516_v17 }
 0x110   : > { %973 = vmatpush1.bf16.msra.mxu1 %v1434_v54  ;;  %v535_v54 = vld [vmem:[%s2031_s5 + $0x110] sm:$0xff] }
 0x111   : > { %974 = vmatprep.subr.bf16.mxu1 %v1427_v55  ;;  %v539_v55 = vld [vmem:[%s2031_s5 + $0x130] sm:$0xff] }
 0x112   : > { %v1421_v60 = vcombine.high %v535_v54, %v539_v55 }
 0x114   : > { %975 = vmatpush1.bf16.msra.mxu1 %v1426_v58  ;;  %v1428_v58 = vcombine.low %v543_v46, %v547_v47 }
 0x115   : > { %976 = vmatprep.subr.bf16.mxu1 %v1419_v59  ;;  %v1430_v59 = vcombine.low %v544_v48, %v548_v49 }
 0x118   : > { %977 = vmatpush1.bf16.msra.mxu1 %v1418_v62  ;;  %v527_v62 = vld [vmem:[%s2031_s5 + $0xd0] sm:$0xff] }
 0x119   : > { %978 = vmatprep.subr.bf16.mxu1 %v1411_v63  ;;  %v531_v63 = vld [vmem:[%s2031_s5 + $0xf0] sm:$0xff] }
 0x11a   : > { %v1412_v10 = vcombine.low %v527_v62, %v531_v63 }
 0x11c   : > { %979 = vmatpush1.bf16.msra.mxu1 %v1410_v2  ;;  %v1420_v2 = vcombine.low %v535_v54, %v539_v55 }
 0x11d   : > { %980 = vmatprep.subr.bf16.mxu1 %v1403_v3  ;;  %v1422_v3 = vcombine.low %v536_v56, %v540_v57 }
 0x120   : > { %981 = vmatpush1.bf16.msra.mxu1 %v1402_v4  ;;  %v1413_v4 = vcombine.high %v527_v62, %v531_v63 }
 0x121   : > { %982 = vmatprep.subr.bf16.mxu1 %v1395_v12  ;;  %v1405_v12 = vcombine.high %v519_v6, %v523_v7 }
 0x124   : > { %983 = vmatpush1.bf16.msra.mxu1 %v1394_v11  ;;  %v1414_v11 = vcombine.low %v528_v0, %v532_v1 }
 0x125   : > { %984 = vmatprep.subr.bf16.mxu1 %v1387_v20  ;;  %v1397_v20 = vcombine.high %v511_v14, %v515_v15 }
 0x128   : > { %985 = vmatpush1.bf16.msra.mxu1 %v1386_v19  ;;  %v1406_v19 = vcombine.low %v520_v8, %v524_v9 }
 0x129   : > { %1056 = vmatprep.subr.bf16.mxu1 %v1447_v28  ;;  %v1389_v28 = vcombine.high %v503_v22, %v507_v23 }
 0x1cb   : > { %v491_v31 = vpop.f32.mrf.mxu1 }
 0x1cc   : > { %v492_v33 = vadd.f32 %v1378_v30, %v491_v31  ;;  %v1390_v31 = vcombine.low %v504_v24, %v508_v25 }
 0x1cd   : > { %v1474_v32 = vpop.f32.mrf.mxu1 }
 0x1ce   : > { %v498_v41 = vmax.f32 %v492_v33, 0.0 }
 0x1cf   : > { %v494_v34 = vpop.f32.mrf.mxu1 }
 0x1d0   : > { %v495_v35 = vadd.f32 %v1378_v30, %v494_v34  ;;  %v1388_v30 = vcombine.low %v503_v22, %v507_v23  ;;  %v567_v34 = vlaneseq }
 0x1d1   : > { %v1475_v37 = vpop.f32.mrf.mxu1 }
 0x1d2   : > { %v499_v42 = vmax.f32 %v495_v35, 0.0  ;;  %v2001_v37 = vshrl.u32 %v567_v34, 7 }
 0x1d4   : > { %v1923_v43 = vpack.c.bf16 %v499_v42, %v498_v41  ;;  %v573_v40 = vsub.s32 1, %v2001_v37  ;;  %v581_v41 = vsub.s32 3, %v2001_v37  ;;  %v569_v42 = vsub.s32 0, %v2001_v37 }
 0x1d5   : > { %v585_v9 = vsub.s32 4, %v2001_v37 }
 0x1d6   : > { %960 = vmatmul.mubr.bf16.vlgmr.msra.gmra.mxu0 %v1923_v43  ;;  %1003 = vmatmul.mubr.bf16.vlgmr.msra.gmra.mxu1 %v1923_v43 }
 0x1d7   : > { %1014 = vmatpush1.bf16.msra.mxu0 %v1444_v26  ;;  %1057 = vmatpush1.bf16.msra.mxu1 %v1446_v27  ;;  %v1396_v26 = vcombine.low %v511_v14, %v515_v15  ;;  %v1398_v27 = vcombine.low %v512_v16, %v516_v17  ;;  %v597_v14 = vsub.s32 7, %v2001_v37 }
 0x1d8   : > { %1015 = vmatprep.subr.bf16.mxu0 %v1437_v44  ;;  %1058 = vmatprep.subr.bf16.mxu1 %v1439_v45  ;;  %v577_v44 = vsub.s32 2, %v2001_v37  ;;  %v565_v45 = vld [vmem:[#allocation6] sm:$0xff] }
 0x1d9   : > { %1045 = vmatprep.mubr.bf16.mxu0 %v1657_v29  ;;  %1088 = vmatprep.mubr.bf16.mxu1 %v1657_v29  ;;  %v1391_v29 = vcombine.high %v504_v24, %v508_v25  ;;  %v574_v47 = vrot.slane %v565_v45, %v573_v40  ;;  %v582_v48 = vrot.slane %v565_v45, %v581_v41 }
 0x1da   : > { %v570_v49 = vrot.slane %v565_v45, %v569_v42  ;;  %v586_v17 = vrot.slane %v565_v45, %v585_v9  ;;  %v598_v24 = vrot.slane %v565_v45, %v597_v14 }
 0x1db   : > { %1016 = vmatpush1.bf16.msra.mxu0 %v1436_v50  ;;  %1059 = vmatpush1.bf16.msra.mxu1 %v1438_v51  ;;  %v578_v50 = vrot.slane %v565_v45, %v577_v44 }
 0x1dc   : > { %1017 = vmatprep.subr.bf16.mxu0 %v1429_v52  ;;  %1060 = vmatprep.subr.bf16.mxu1 %v1431_v53 }
 0x1df   : > { %1018 = vmatpush1.bf16.msra.mxu0 %v1428_v58  ;;  %1061 = vmatpush1.bf16.msra.mxu1 %v1430_v59 }
 0x1e0   : > { %1019 = vmatprep.subr.bf16.mxu0 %v1421_v60  ;;  %1062 = vmatprep.subr.bf16.mxu1 %v1423_v61 }
 0x1e3   : > { %1020 = vmatpush1.bf16.msra.mxu0 %v1420_v2  ;;  %1063 = vmatpush1.bf16.msra.mxu1 %v1422_v3 }
 0x1e4   : > { %1021 = vmatprep.subr.bf16.mxu0 %v1413_v4  ;;  %1064 = vmatprep.subr.bf16.mxu1 %v1415_v5 }
 0x1e7   : > { %1022 = vmatpush1.bf16.msra.mxu0 %v1412_v10  ;;  %1065 = vmatpush1.bf16.msra.mxu1 %v1414_v11  ;;  %v593_v10 = vsub.s32 6, %v2001_v37 }
 0x1e8   : > { %1023 = vmatprep.subr.bf16.mxu0 %v1405_v12  ;;  %1066 = vmatprep.subr.bf16.mxu1 %v1407_v13  ;;  %v589_v13 = vsub.s32 5, %v2001_v37 }
 0x1ea   : > { %v590_v23 = vrot.slane %v565_v45, %v589_v13 }
 0x1eb   : > { %1024 = vmatpush1.bf16.msra.mxu0 %v1404_v18  ;;  %1067 = vmatpush1.bf16.msra.mxu1 %v1406_v19  ;;  %v594_v18 = vrot.slane %v565_v45, %v593_v10 }
 0x1ec   : > { %1025 = vmatprep.subr.bf16.mxu0 %v1397_v20  ;;  %1068 = vmatprep.subr.bf16.mxu1 %v1399_v21 }
 0x1ef   : > { %1026 = vmatpush1.bf16.msra.mxu0 %v1396_v26  ;;  %1069 = vmatpush1.bf16.msra.mxu1 %v1398_v27 }
 0x1f0   : > { %1027 = vmatprep.subr.bf16.mxu0 %v1389_v28  ;;  %1070 = vmatprep.subr.bf16.mxu1 %v1391_v29 }
 0x1f3   : > { %1028 = vmatpush1.bf16.msra.mxu0 %v1388_v30  ;;  %1071 = vmatpush1.bf16.msra.mxu1 %v1390_v31 }
 0x1f6   : > { %1046 = vmatmul.mubr.bf16.vlgmr.msra.gmra.mxu0 %v1923_v43  ;;  %1089 = vmatmul.mubr.bf16.vlgmr.msra.gmra.mxu1 %v1923_v43 }
 0x296   : > { %v961_v32 = vpop.f32.mrf.mxu0  ;;  %v1004_v33 = vpop.f32.mrf.mxu1 }
 0x297   : > { %v962_v57 = vadd.f32 %v961_v32, %v570_v49  ;;  %v1005_v58 = vadd.f32 %v1004_v33, %v578_v50 }
 0x298   : > { %v963_v35 = vpop.f32.mrf.mxu0  ;;  %v1006_v36 = vpop.f32.mrf.mxu1 }
 0x299   : > { %v964_v53 = vadd.f32 %v963_v35, %v574_v47  ;;  %v1007_v54 = vadd.f32 %v1006_v36, %v582_v48  ;;  %v1099_v1 = vmax.f32 %v962_v57, 0.0  ;;  %v1101_v2 = vmax.f32 %v1005_v58, 0.0 }
 0x29a   : > { %v965_v38 = vpop.f32.mrf.mxu0  ;;  %v1008_v39 = vpop.f32.mrf.mxu1 }
 0x29b   : > { %v966_v55 = vadd.f32 %v965_v38, %v570_v49  ;;  %v1009_v56 = vadd.f32 %v1008_v39, %v578_v50  ;;  %v1100_v61 = vmax.f32 %v964_v53, 0.0  ;;  %v1102_v62 = vmax.f32 %v1007_v54, 0.0 }
 0x29c   : > { %v967_v46 = vpop.f32.mrf.mxu0  ;;  %v1010_v43 = vpop.f32.mrf.mxu1 }
 0x29d   : > { %v968_v51 = vadd.f32 %v967_v46, %v574_v47  ;;  %v1011_v52 = vadd.f32 %v1010_v43, %v582_v48  ;;  %v1107_v63 = vmax.f32 %v966_v55, 0.0  ;;  %v1109_v0 = vmax.f32 %v1009_v56, 0.0 }
 0x29f   : > { %v1108_v59 = vmax.f32 %v968_v51, 0.0  ;;  %v1110_v60 = vmax.f32 %v1011_v52, 0.0  ;;  %v1140_v5 = vmax.f32 %v1099_v1, %v1107_v63  ;;  %v1154_v6 = vmax.f32 %v1101_v2, %v1109_v0 }
 0x2a1   : > { %v1147_v3 = vmax.f32 %v1100_v61, %v1108_v59  ;;  %v1161_v4 = vmax.f32 %v1102_v62, %v1110_v60  ;;  %v1141_v11 = vrot.slane %v1140_v5, 4  ;;  %v1155_v12 = vrot.slane %v1154_v6, 4 }
 0x2a2   : > { %v1658_v59 = vmov 1966171168  }
 0x2a3   : > { %v1148_v7 = vrot.slane %v1147_v3, 4  ;;  %v1162_v8 = vrot.slane %v1161_v4, 4  ;;  %v1142_v19 = vmax.f32 %v1140_v5, %v1141_v11  ;;  %v1156_v20 = vmax.f32 %v1154_v6, %v1155_v12 }
 0x2a4   : > { %v1215_v60 = vunpack.c.l.s4 %v1658_v59 }
 0x2a5   : > { %v1149_v15 = vmax.f32 %v1147_v3, %v1148_v7  ;;  %v1163_v16 = vmax.f32 %v1161_v4, %v1162_v8  ;;  %v1143_v31 = vrot.slane %v1142_v19, 2  ;;  %v1157_v32 = vrot.slane %v1156_v20, 2 }
 0x2a6   : > { %v1216_v9 = vunpack.c.0.s8 %v1215_v60 }
 0x2a7   : > { %v1150_v25 = vrot.slane %v1149_v15, 2  ;;  %v1164_v26 = vrot.slane %v1163_v16, 2  ;;  %v1144_v50 = vmax.f32 %v1142_v19, %v1143_v31  ;;  %v1158_v51 = vmax.f32 %v1156_v20, %v1157_v32 }
 0x2a9   : > { %v1151_v40 = vmax.f32 %v1149_v15, %v1150_v25  ;;  %v1165_v41 = vmax.f32 %v1163_v16, %v1164_v26  ;;  %v1145_v2 = vrot.slane %v1144_v50, 1  ;;  %v1159_v3 = vrot.slane %v1158_v51, 1 }
 0x2ab   : > { %v1152_v58 = vrot.slane %v1151_v40, 1  ;;  %v1166_v61 = vrot.slane %v1165_v41, 1  ;;  %v1146_v15 = vmax.f32 %v1144_v50, %v1145_v2  ;;  %v1160_v16 = vmax.f32 %v1158_v51, %v1159_v3 }
 0x2ad   : > { %v1153_v8 = vmax.f32 %v1151_v40, %v1152_v58  ;;  %v1167_v10 = vmax.f32 %v1165_v41, %v1166_v61 }
 0x2b6   : > { %v1047_v21 = vpop.f32.mrf.mxu0  ;;  %v1090_v22 = vpop.f32.mrf.mxu1 }
 0x2b7   : > { %v1048_v27 = vadd.f32 %v1047_v21, %v586_v17  ;;  %v1091_v28 = vadd.f32 %v1090_v22, %v594_v18  ;;  %v1210_v21 = vcombine.low %v1146_v15, %v1153_v8  ;;  %v1219_v22 = vsub.s32 %v1216_v9, %v2001_v37 }
 0x2b8   : > { %v1049_v29 = vpop.f32.mrf.mxu0  ;;  %v1092_v30 = vpop.f32.mrf.mxu1 }
 0x2b9   : > { %v1050_v33 = vadd.f32 %v1049_v29, %v590_v23  ;;  %v1093_v34 = vadd.f32 %v1092_v30, %v598_v24  ;;  %v1103_v42 = vmax.f32 %v1048_v27, 0.0  ;;  %v1105_v44 = vmax.f32 %v1091_v28, 0.0 }
 0x2ba   : > { %v1051_v35 = vpop.f32.mrf.mxu0  ;;  %v1094_v36 = vpop.f32.mrf.mxu1  ;;  %v1220_v30 = vrot.slane %v1210_v21, %v1219_v22 }
 0x2bb   : > { %v1052_v38 = vadd.f32 %v1051_v35, %v586_v17  ;;  %v1095_v39 = vadd.f32 %v1094_v36, %v594_v18  ;;  %v1104_v52 = vmax.f32 %v1050_v33, 0.0  ;;  %v1106_v53 = vmax.f32 %v1093_v34, 0.0 }
 0x2bc   : > { %v1053_v46 = vpop.f32.mrf.mxu0  ;;  %v1096_v45 = vpop.f32.mrf.mxu1 }
 0x2bd   : > { %v1111_v43 = vmax.f32 %v1052_v38, 0.0  ;;  %v1113_v47 = vmax.f32 %v1095_v39, 0.0  ;;  %v1054_v48 = vadd.f32 %v1053_v46, %v590_v23  ;;  %v1097_v49 = vadd.f32 %v1096_v45, %v598_v24 }
 0x2be   : > { %v1211_v23 = vcombine.low %v1160_v16, %v1167_v10 }
 0x2bf   : > { %v1168_v54 = vmax.f32 %v1103_v42, %v1111_v43  ;;  %v1182_v55 = vmax.f32 %v1105_v44, %v1113_v47  ;;  %v1112_v56 = vmax.f32 %v1054_v48, 0.0  ;;  %v1114_v57 = vmax.f32 %v1097_v49, 0.0 }
 0x2c0   : > { %v1227_v31 = vrot.slane %v1211_v23, %v1219_v22 }
 0x2c1   : > { %v1169_v62 = vrot.slane %v1168_v54, 4  ;;  %v1183_v63 = vrot.slane %v1182_v55, 4  ;;  %v1175_v0 = vmax.f32 %v1104_v52, %v1112_v56  ;;  %v1189_v1 = vmax.f32 %v1106_v53, %v1114_v57 }
 0x2c2   : > { %v1242_v39 = vcombine.low %v1220_v30, %v1227_v31 }
 0x2c3   : > { %v1170_v4 = vmax.f32 %v1168_v54, %v1169_v62  ;;  %v1184_v5 = vmax.f32 %v1182_v55, %v1183_v63  ;;  %v1176_v6 = vrot.slane %v1175_v0, 4  ;;  %v1190_v7 = vrot.slane %v1189_v1, 4 }
 0x2c4   : > { %v1250_v42 = vrot.slane %v1242_v39, %v1219_v22 }
 0x2c5   : > { %v1171_v11 = vrot.slane %v1170_v4, 2  ;;  %v1185_v12 = vrot.slane %v1184_v5, 2  ;;  %v1177_v13 = vmax.f32 %v1175_v0, %v1176_v6  ;;  %v1191_v14 = vmax.f32 %v1189_v1, %v1190_v7 }
 0x2c7   : > { %v1172_v17 = vmax.f32 %v1170_v4, %v1171_v11  ;;  %v1186_v18 = vmax.f32 %v1184_v5, %v1185_v12  ;;  %v1178_v19 = vrot.slane %v1177_v13, 2  ;;  %v1192_v20 = vrot.slane %v1191_v14, 2 }
 0x2c9   : > { %v1173_v24 = vrot.slane %v1172_v17, 1  ;;  %v1187_v25 = vrot.slane %v1186_v18, 1  ;;  %v1179_v26 = vmax.f32 %v1177_v13, %v1178_v19  ;;  %v1193_v27 = vmax.f32 %v1191_v14, %v1192_v20 }
 0x2cb   : > { %v1180_v28 = vrot.slane %v1179_v26, 1  ;;  %v1194_v29 = vrot.slane %v1193_v27, 1  ;;  %v1174_v32 = vmax.f32 %v1172_v17, %v1173_v24  ;;  %v1188_v33 = vmax.f32 %v1186_v18, %v1187_v25 }
 0x2cd   : > { %v1181_v34 = vmax.f32 %v1179_v26, %v1180_v28  ;;  %v1195_v35 = vmax.f32 %v1193_v27, %v1194_v29 }
 0x2cf   : > { %v1212_v36 = vcombine.low %v1174_v32, %v1181_v34  ;;  %v1213_v38 = vcombine.low %v1188_v33, %v1195_v35 }
 0x2d1   : > { %v1234_v40 = vrot.slane %v1212_v36, %v1219_v22  ;;  %v1241_v41 = vrot.slane %v1213_v38, %v1219_v22 }
 0x2d3   : > { %v1243_v37 = vcombine.low %v1234_v40, %v1241_v41 }
 0x2d5   : > { %v1257_v44 = vrot.slane %v1243_v37, %v1219_v22 }
 0x2d7   : > { %v1258_v46 = vcombine.low %v1250_v42, %v1257_v44 }
 0x2d9   : > { %v1260_v45 = vmax.f32 %v1258_v46, 0.0 }
 0x2db   : > { %1261 = vst [vmem:[%s342_s29] sm:$0xff] %v1260_v45 }
 0x2dc PF: > { %s19_s26 = sadd.s32 1, %s1649_s26   ;;  %s2038_s24 = smov %s1645_s25 }
 0x2dd   : > { %p16_p2 = scmp.ge.s32.totalorder %s19_s26, 4   ;;  %s2039_s25 = smov %s2041_s9 }
 0x2df   :  { %18 = sbr.rel (!%p16_p2) target bundleno = 3 (0x3), region = 95 }
 0x2e4   :  { %1281 = vsyncpa [#allocation3], 1 }
 0x2e5   :  { %1283 = vsyncpa [#allocation3 + $0x1], 1 }
 0x2e6   :  { %1284 = vsyncpa [#allocation5], 1 }

// kernel: pointnet_segmentation_forward.8
= control target key start
LH: loop header
LB: loop body
LE: loop exit
PB: predicated region body
PF: predicated region fallthrough
CT: control target
= control target key end

     0   :  { %v3496_v36 = vmov 1983009808   ;;  %v35_v38 = vlaneseq  ;;  %vm2632_vm0 = vcmask 66560   ;;  %s4640_s1 = inlined_call_operand.vmem [shape: bf16[1024,512], index: 1, kind: input, shape index: {}]   ;;  %s4641_s0 = inlined_call_operand.vmem [shape: f32[2,1024], index: 0, kind: input, shape index: {}]   ;;  %s4642_s3 = inlined_call_operand.vmem [shape: bf16[512,256], index: 3, kind: input, shape index: {}]   ;;  %s4643_s2 = inlined_call_operand.vmem [shape: f32[1,512], index: 2, kind: input, shape index: {}]   ;;  %s4644_s5 = inlined_call_operand.vmem [shape: bf16[256,9], index: 5, kind: input, shape index: {}]   ;;  %s4645_s4 = inlined_call_operand.vmem [shape: f32[1,256], index: 4, kind: input, shape index: {}]   ;;  %s4646_s6 = inlined_call_operand.vmem [shape: f32[1,9], index: 6, kind: input, shape index: {}]   ;;  %s4647_s7 = inlined_call_operand.vmem [shape: f32[2,9], index: 7, kind: output, shape index: {}]  }
   0x1   :  { %v2998_v0 = vld [vmem:[%s4640_s1 + $0xe4] ss:$16 sps:$4 sm:$0xff]   ;;  %v3002_v2 = vld [vmem:[%s4640_s1 + $0xe0] ss:$16 sps:$4 sm:$0xff]   ;;  %v33_v37 = vunpack.c.l.s4 %v3496_v36 }
   0x2   :  { %v3000_v1 = vld [vmem:[%s4640_s1 + $0x2e4] ss:$16 sps:$4 sm:$0xff]   ;;  %1639 = vmatprep.subr.bf16.mxu0 %v2998_v0  ;;  %v3003_v3 = vld [vmem:[%s4640_s1 + $0x2e0] ss:$16 sps:$4 sm:$0xff]   ;;  %v3654_v43 = vshrl.u32 %v35_v38, 7 }
   0x3   :  { %1680 = vmatprep.subr.bf16.mxu1 %v3000_v1  ;;  %v3004_v4 = vld [vmem:[%s4640_s1 + $0xc4] ss:$16 sps:$4 sm:$0xff]   ;;  %1640 = vmatpush1.bf16.msra.mxu0 %v3002_v2  ;;  %v3008_v6 = vld [vmem:[%s4640_s1 + $0xc0] ss:$16 sps:$4 sm:$0xff]   ;;  %v34_v42 = vunpack.c.0.s8 %v33_v37 }
   0x4   :  { %1681 = vmatpush1.bf16.msra.mxu1 %v3003_v3  ;;  %v3006_v5 = vld [vmem:[%s4640_s1 + $0x2c4] ss:$16 sps:$4 sm:$0xff]   ;;  %1641 = vmatprep.subr.bf16.mxu0 %v3004_v4  ;;  %v3009_v7 = vld [vmem:[%s4640_s1 + $0x2c0] ss:$16 sps:$4 sm:$0xff]   ;;  %v28_v4 = vld [vmem:[%s4641_s0 + $0x8] sm:$0xff] }
   0x5   :  { %1682 = vmatprep.subr.bf16.mxu1 %v3006_v5  ;;  %v3010_v8 = vld [vmem:[%s4640_s1 + $0xa4] ss:$16 sps:$4 sm:$0xff]   ;;  %v3014_v10 = vld [vmem:[%s4640_s1 + $0xa0] ss:$16 sps:$4 sm:$0xff]   ;;  %v37_v49 = vsub.s32 %v34_v42, %v3654_v43 }
   0x6   :  { %v3012_v9 = vld [vmem:[%s4640_s1 + $0x2a4] ss:$16 sps:$4 sm:$0xff]   ;;  %v3015_v11 = vld [vmem:[%s4640_s1 + $0x2a0] ss:$16 sps:$4 sm:$0xff]  }
   0x7   :  { %1642 = vmatpush1.bf16.msra.mxu0 %v3008_v6  ;;  %v3016_v12 = vld [vmem:[%s4640_s1 + $0x84] ss:$16 sps:$4 sm:$0xff]   ;;  %v3020_v14 = vld [vmem:[%s4640_s1 + $0x80] ss:$16 sps:$4 sm:$0xff]  }
   0x8   :  { %1683 = vmatpush1.bf16.msra.mxu1 %v3009_v7  ;;  %1643 = vmatprep.subr.bf16.mxu0 %v3010_v8  ;;  %v3018_v13 = vld [vmem:[%s4640_s1 + $0x284] ss:$16 sps:$4 sm:$0xff]   ;;  %v3021_v15 = vld [vmem:[%s4640_s1 + $0x280] ss:$16 sps:$4 sm:$0xff]  }
   0x9   :  { %1684 = vmatprep.subr.bf16.mxu1 %v3012_v9  ;;  %v3022_v16 = vld [vmem:[%s4640_s1 + $0x64] ss:$16 sps:$4 sm:$0xff]   ;;  %v3026_v18 = vld [vmem:[%s4640_s1 + $0x60] ss:$16 sps:$4 sm:$0xff]   ;;  %v48_v9 = vcombine.high %v28_v4, %v28_v4 }
   0xa   :  { %v3024_v17 = vld [vmem:[%s4640_s1 + $0x264] ss:$16 sps:$4 sm:$0xff]   ;;  %v3027_v19 = vld [vmem:[%s4640_s1 + $0x260] ss:$16 sps:$4 sm:$0xff]  }
   0xb   :  { %1644 = vmatpush1.bf16.msra.mxu0 %v3014_v10  ;;  %v3028_v20 = vld [vmem:[%s4640_s1 + $0x44] ss:$16 sps:$4 sm:$0xff]   ;;  %v3032_v22 = vld [vmem:[%s4640_s1 + $0x40] ss:$16 sps:$4 sm:$0xff]  }
   0xc   :  { %1685 = vmatpush1.bf16.msra.mxu1 %v3015_v11  ;;  %1645 = vmatprep.subr.bf16.mxu0 %v3016_v12  ;;  %v3030_v21 = vld [vmem:[%s4640_s1 + $0x244] ss:$16 sps:$4 sm:$0xff]   ;;  %v3033_v23 = vld [vmem:[%s4640_s1 + $0x240] ss:$16 sps:$4 sm:$0xff]  }
   0xd   :  { %1686 = vmatprep.subr.bf16.mxu1 %v3018_v13  ;;  %v3034_v24 = vld [vmem:[%s4640_s1 + $0x24] ss:$16 sps:$4 sm:$0xff]   ;;  %v3038_v26 = vld [vmem:[%s4640_s1 + $0x20] ss:$16 sps:$4 sm:$0xff]  }
   0xe   :  { %v3036_v25 = vld [vmem:[%s4640_s1 + $0x224] ss:$16 sps:$4 sm:$0xff]   ;;  %v3039_v27 = vld [vmem:[%s4640_s1 + $0x220] ss:$16 sps:$4 sm:$0xff]  }
   0xf   :  { %1646 = vmatpush1.bf16.msra.mxu0 %v3020_v14  ;;  %v3040_v28 = vld [vmem:[%s4640_s1 + $0x4] ss:$16 sps:$4 sm:$0xff]   ;;  %v3044_v30 = vld [vmem:[%s4640_s1] ss:$16 sps:$4 sm:$0xff]   ;;  %v3738_v14 = vrot.slane %v28_v4, %v37_v49 }
  0x10   :  { %1687 = vmatpush1.bf16.msra.mxu1 %v3021_v15  ;;  %1647 = vmatprep.subr.bf16.mxu0 %v3022_v16  ;;  %v3042_v29 = vld [vmem:[%s4640_s1 + $0x204] ss:$16 sps:$4 sm:$0xff]   ;;  %v3045_v31 = vld [vmem:[%s4640_s1 + $0x200] ss:$16 sps:$4 sm:$0xff]   ;;  %v3740_v15 = vrot.slane %v48_v9, %v37_v49 }
  0x11   :  { %1688 = vmatprep.subr.bf16.mxu1 %v3024_v17  ;;  %v3046_v32 = vld [vmem:[%s4640_s1 + $0x1e4] ss:$16 sps:$4 sm:$0xff]   ;;  %v3050_v34 = vld [vmem:[%s4640_s1 + $0x1e0] ss:$16 sps:$4 sm:$0xff]  }
  0x12   :  { %v3048_v33 = vld [vmem:[%s4640_s1 + $0x3e4] ss:$16 sps:$4 sm:$0xff]   ;;  %v3051_v35 = vld [vmem:[%s4640_s1 + $0x3e0] ss:$16 sps:$4 sm:$0xff]  }
  0x13   :  { %1648 = vmatpush1.bf16.msra.mxu0 %v3026_v18  ;;  %v3052_v39 = vld [vmem:[%s4640_s1 + $0x1c4] ss:$16 sps:$4 sm:$0xff]   ;;  %v3056_v41 = vld [vmem:[%s4640_s1 + $0x1c0] ss:$16 sps:$4 sm:$0xff]  }
  0x14   :  { %1689 = vmatpush1.bf16.msra.mxu1 %v3027_v19  ;;  %1649 = vmatprep.subr.bf16.mxu0 %v3028_v20  ;;  %v3054_v40 = vld [vmem:[%s4640_s1 + $0x3c4] ss:$16 sps:$4 sm:$0xff]   ;;  %v3057_v44 = vld [vmem:[%s4640_s1 + $0x3c0] ss:$16 sps:$4 sm:$0xff]   ;;  %v63_v20 = vcombine.high %v3738_v14, %v3738_v14 }
  0x15   :  { %1690 = vmatprep.subr.bf16.mxu1 %v3030_v21  ;;  %v3058_v45 = vld [vmem:[%s4640_s1 + $0x1a4] ss:$16 sps:$4 sm:$0xff]   ;;  %v3062_v47 = vld [vmem:[%s4640_s1 + $0x1a0] ss:$16 sps:$4 sm:$0xff]   ;;  %v64_v21 = vcombine.high %v3740_v15, %v3740_v15 }
  0x16   :  { %v3060_v46 = vld [vmem:[%s4640_s1 + $0x3a4] ss:$16 sps:$4 sm:$0xff]   ;;  %v3063_v48 = vld [vmem:[%s4640_s1 + $0x3a0] ss:$16 sps:$4 sm:$0xff]  }
  0x17   :  { %1650 = vmatpush1.bf16.msra.mxu0 %v3032_v22  ;;  %v3064_v50 = vld [vmem:[%s4640_s1 + $0x184] ss:$16 sps:$4 sm:$0xff]   ;;  %v3068_v55 = vld [vmem:[%s4640_s1 + $0x180] ss:$16 sps:$4 sm:$0xff]  }
  0x18   :  { %1691 = vmatpush1.bf16.msra.mxu1 %v3033_v23  ;;  %1651 = vmatprep.subr.bf16.mxu0 %v3034_v24  ;;  %v3066_v51 = vld [vmem:[%s4640_s1 + $0x384] ss:$16 sps:$4 sm:$0xff]   ;;  %v3069_v56 = vld [vmem:[%s4640_s1 + $0x380] ss:$16 sps:$4 sm:$0xff]  }
  0x19   :  { %1692 = vmatprep.subr.bf16.mxu1 %v3036_v25  ;;  %v27_v52 = vld [vmem:[%s4641_s0] sm:$0xff] }
  0x1a   :  { %v38_v53 = vrot.slane %v27_v52, %v37_v49  ;;  %v31_v54 = vcombine.high %v27_v52, %v27_v52  ;;  %v3070_v57 = vld [vmem:[%s4640_s1 + $0x164] ss:$16 sps:$4 sm:$0xff]   ;;  %v3074_v63 = vld [vmem:[%s4640_s1 + $0x160] ss:$16 sps:$4 sm:$0xff]  }
  0x1b   :  { %1652 = vmatpush1.bf16.msra.mxu0 %v3038_v26  ;;  %v3072_v58 = vld [vmem:[%s4640_s1 + $0x364] ss:$16 sps:$4 sm:$0xff]   ;;  %v3075_v0 = vld [vmem:[%s4640_s1 + $0x360] ss:$16 sps:$4 sm:$0xff]  }
  0x1c   :  { %1693 = vmatpush1.bf16.msra.mxu1 %v3039_v27  ;;  %1653 = vmatprep.subr.bf16.mxu0 %v3040_v28  ;;  %v46_v59 = vcombine.high %v38_v53, %v38_v53  ;;  %v45_v60 = vrot.slane %v31_v54, %v37_v49  ;;  %v3076_v1 = vld [vmem:[%s4640_s1 + $0x144] ss:$16 sps:$4 sm:$0xff]   ;;  %v3080_v5 = vld [vmem:[%s4640_s1 + $0x140] ss:$16 sps:$4 sm:$0xff]   ;;  %v3758_v22 = vpack.c.bf16 %v38_v53, %v38_v53 }
  0x1d   :  { %1694 = vmatprep.subr.bf16.mxu1 %v3042_v29  ;;  %v3078_v2 = vld [vmem:[%s4640_s1 + $0x344] ss:$16 sps:$4 sm:$0xff]   ;;  %v3081_v6 = vld [vmem:[%s4640_s1 + $0x340] ss:$16 sps:$4 sm:$0xff]   ;;  %v3774_v28 = vpack.c.bf16 %v63_v20, %v63_v20  ;;  %v3776_v29 = vpack.c.bf16 %v64_v21, %v64_v21 }
  0x1e   :  { %v3693_v61 = vpack.c.bf16 %v46_v59, %v46_v59  ;;  %v47_v62 = vcombine.high %v45_v60, %v45_v60  ;;  %v3082_v7 = vld [vmem:[%s4640_s1 + $0x124] ss:$16 sps:$4 sm:$0xff]   ;;  %v3086_v10 = vld [vmem:[%s4640_s1 + $0x120] ss:$16 sps:$4 sm:$0xff]   ;;  %v3760_v23 = vpack.c.bf16 %v45_v60, %v45_v60 }
  0x1f   :  { %1654 = vmatpush1.bf16.msra.mxu0 %v3044_v30  ;;  %v3084_v8 = vld [vmem:[%s4640_s1 + $0x324] ss:$16 sps:$4 sm:$0xff]   ;;  %v3087_v11 = vld [vmem:[%s4640_s1 + $0x320] ss:$16 sps:$4 sm:$0xff]  }
  0x20   :  { %1695 = vmatpush1.bf16.msra.mxu1 %v3045_v31  ;;  %1655 = vmatprep.subr.bf16.mxu0 %v3046_v32  ;;  %v3707_v3 = vpack.c.bf16 %v47_v62, %v47_v62  ;;  %v3088_v12 = vld [vmem:[%s4640_s1 + $0x104] ss:$16 sps:$4 sm:$0xff]   ;;  %v3092_v16 = vld [vmem:[%s4640_s1 + $0x100] ss:$16 sps:$4 sm:$0xff]  }
  0x21   :  { %1696 = vmatprep.subr.bf16.mxu1 %v3048_v33  ;;  %1671 = vmatprep.mubr.bf16.mxu0 %v3693_v61  ;;  %v3090_v13 = vld [vmem:[%s4640_s1 + $0x304] ss:$16 sps:$4 sm:$0xff]   ;;  %v3093_v17 = vld [vmem:[%s4640_s1 + $0x300] ss:$16 sps:$4 sm:$0xff]  }
  0x22   :  { %1712 = vmatprep.mubr.bf16.mxu1 %v3707_v3  ;;  %v3098_v18 = vld [vmem:[%s4640_s1 + $0x4e4] ss:$16 sps:$4 sm:$0xff]   ;;  %v3096_v24 = vld [vmem:[%s4640_s1 + $0x4e0] ss:$16 sps:$4 sm:$0xff]  }
  0x23   :  { %1656 = vmatpush2.bf16.msra.mxu0 %v3050_v34  ;;  %v3101_v19 = vld [vmem:[%s4640_s1 + $0x6e4] ss:$16 sps:$4 sm:$0xff]   ;;  %v3099_v25 = vld [vmem:[%s4640_s1 + $0x6e0] ss:$16 sps:$4 sm:$0xff]  }
  0x24   :  { %1697 = vmatpush2.bf16.msra.mxu1 %v3051_v35  ;;  %1657 = vmatprep.subr.bf16.mxu0 %v3052_v39  ;;  %v3104_v26 = vld [vmem:[%s4640_s1 + $0x4c4] ss:$16 sps:$4 sm:$0xff]   ;;  %v3102_v30 = vld [vmem:[%s4640_s1 + $0x4c0] ss:$16 sps:$4 sm:$0xff]  }
  0x25   :  { %1698 = vmatprep.subr.bf16.mxu1 %v3054_v40  ;;  %v3107_v27 = vld [vmem:[%s4640_s1 + $0x6c4] ss:$16 sps:$4 sm:$0xff]   ;;  %v3105_v31 = vld [vmem:[%s4640_s1 + $0x6c0] ss:$16 sps:$4 sm:$0xff]  }
  0x26   :  { %v3110_v32 = vld [vmem:[%s4640_s1 + $0x4a4] ss:$16 sps:$4 sm:$0xff]   ;;  %v3108_v34 = vld [vmem:[%s4640_s1 + $0x4a0] ss:$16 sps:$4 sm:$0xff]  }
  0x27   :  { %1658 = vmatpush2.bf16.msra.mxu0 %v3056_v41  ;;  %v3113_v33 = vld [vmem:[%s4640_s1 + $0x6a4] ss:$16 sps:$4 sm:$0xff]   ;;  %v3111_v35 = vld [vmem:[%s4640_s1 + $0x6a0] ss:$16 sps:$4 sm:$0xff]  }
  0x28   :  { %1699 = vmatpush2.bf16.msra.mxu1 %v3057_v44  ;;  %1659 = vmatprep.subr.bf16.mxu0 %v3058_v45  ;;  %v3116_v36 = vld [vmem:[%s4640_s1 + $0x484] ss:$16 sps:$4 sm:$0xff]   ;;  %v3114_v38 = vld [vmem:[%s4640_s1 + $0x480] ss:$16 sps:$4 sm:$0xff]  }
  0x29   :  { %1700 = vmatprep.subr.bf16.mxu1 %v3060_v46  ;;  %v3119_v37 = vld [vmem:[%s4640_s1 + $0x684] ss:$16 sps:$4 sm:$0xff]   ;;  %v3117_v39 = vld [vmem:[%s4640_s1 + $0x680] ss:$16 sps:$4 sm:$0xff]  }
  0x2a   :  { %v3122_v40 = vld [vmem:[%s4640_s1 + $0x464] ss:$16 sps:$4 sm:$0xff]   ;;  %v3120_v42 = vld [vmem:[%s4640_s1 + $0x460] ss:$16 sps:$4 sm:$0xff]  }
  0x2b   :  { %1660 = vmatpush2.bf16.msra.mxu0 %v3062_v47  ;;  %v3125_v41 = vld [vmem:[%s4640_s1 + $0x664] ss:$16 sps:$4 sm:$0xff]   ;;  %v3123_v44 = vld [vmem:[%s4640_s1 + $0x660] ss:$16 sps:$4 sm:$0xff]  }
  0x2c   :  { %1701 = vmatpush2.bf16.msra.mxu1 %v3063_v48  ;;  %1661 = vmatprep.subr.bf16.mxu0 %v3064_v50  ;;  %v3128_v45 = vld [vmem:[%s4640_s1 + $0x444] ss:$16 sps:$4 sm:$0xff]   ;;  %v3126_v47 = vld [vmem:[%s4640_s1 + $0x440] ss:$16 sps:$4 sm:$0xff]  }
  0x2d   :  { %1702 = vmatprep.subr.bf16.mxu1 %v3066_v51  ;;  %v3131_v46 = vld [vmem:[%s4640_s1 + $0x644] ss:$16 sps:$4 sm:$0xff]   ;;  %v3129_v48 = vld [vmem:[%s4640_s1 + $0x640] ss:$16 sps:$4 sm:$0xff]  }
  0x2e   :  { %v3134_v49 = vld [vmem:[%s4640_s1 + $0x424] ss:$16 sps:$4 sm:$0xff]   ;;  %v3132_v51 = vld [vmem:[%s4640_s1 + $0x420] ss:$16 sps:$4 sm:$0xff]  }
  0x2f   :  { %1662 = vmatpush2.bf16.msra.mxu0 %v3068_v55  ;;  %v3137_v50 = vld [vmem:[%s4640_s1 + $0x624] ss:$16 sps:$4 sm:$0xff]   ;;  %v3135_v52 = vld [vmem:[%s4640_s1 + $0x620] ss:$16 sps:$4 sm:$0xff]  }
  0x30   :  { %1703 = vmatpush2.bf16.msra.mxu1 %v3069_v56  ;;  %1663 = vmatprep.subr.bf16.mxu0 %v3070_v57  ;;  %v3140_v53 = vld [vmem:[%s4640_s1 + $0x404] ss:$16 sps:$4 sm:$0xff]   ;;  %v3138_v55 = vld [vmem:[%s4640_s1 + $0x400] ss:$16 sps:$4 sm:$0xff]  }
  0x31   :  { %1704 = vmatprep.subr.bf16.mxu1 %v3072_v58  ;;  %v3143_v54 = vld [vmem:[%s4640_s1 + $0x604] ss:$16 sps:$4 sm:$0xff]   ;;  %v3141_v56 = vld [vmem:[%s4640_s1 + $0x600] ss:$16 sps:$4 sm:$0xff]  }
  0x32   :  { %v3146_v57 = vld [vmem:[%s4640_s1 + $0x5e4] ss:$16 sps:$4 sm:$0xff]   ;;  %v3144_v59 = vld [vmem:[%s4640_s1 + $0x5e0] ss:$16 sps:$4 sm:$0xff]  }
  0x33   :  { %1664 = vmatpush2.bf16.msra.mxu0 %v3074_v63  ;;  %v3149_v58 = vld [vmem:[%s4640_s1 + $0x7e4] ss:$16 sps:$4 sm:$0xff]   ;;  %v3147_v60 = vld [vmem:[%s4640_s1 + $0x7e0] ss:$16 sps:$4 sm:$0xff]  }
  0x34   :  { %1705 = vmatpush2.bf16.msra.mxu1 %v3075_v0  ;;  %1665 = vmatprep.subr.bf16.mxu0 %v3076_v1  ;;  %v3152_v62 = vld [vmem:[%s4640_s1 + $0x5c4] ss:$16 sps:$4 sm:$0xff]   ;;  %v3150_v0 = vld [vmem:[%s4640_s1 + $0x5c0] ss:$16 sps:$4 sm:$0xff]  }
  0x35   :  { %1706 = vmatprep.subr.bf16.mxu1 %v3078_v2  ;;  %v3155_v63 = vld [vmem:[%s4640_s1 + $0x7c4] ss:$16 sps:$4 sm:$0xff]   ;;  %v3153_v1 = vld [vmem:[%s4640_s1 + $0x7c0] ss:$16 sps:$4 sm:$0xff]  }
  0x36   :  { %v3158_v2 = vld [vmem:[%s4640_s1 + $0x5a4] ss:$16 sps:$4 sm:$0xff]   ;;  %v3162_v9 = vld [vmem:[%s4640_s1 + $0x580] ss:$16 sps:$4 sm:$0xff]  }
  0x37   :  { %1666 = vmatpush2.bf16.msra.mxu0 %v3080_v5  ;;  %v3161_v4 = vld [vmem:[%s4640_s1 + $0x7a4] ss:$16 sps:$4 sm:$0xff]   ;;  %v3156_v5 = vld [vmem:[%s4640_s1 + $0x5a0] ss:$16 sps:$4 sm:$0xff]  }
  0x38   :  { %1707 = vmatpush2.bf16.msra.mxu1 %v3081_v6  ;;  %1667 = vmatprep.subr.bf16.mxu0 %v3082_v7  ;;  %v3159_v6 = vld [vmem:[%s4640_s1 + $0x7a0] ss:$16 sps:$4 sm:$0xff]   ;;  %v3164_v7 = vld [vmem:[%s4640_s1 + $0x584] ss:$16 sps:$4 sm:$0xff]  }
  0x39   :  { %1708 = vmatprep.subr.bf16.mxu1 %v3084_v8  ;;  %v3167_v8 = vld [vmem:[%s4640_s1 + $0x784] ss:$16 sps:$4 sm:$0xff]   ;;  %v3177_v20 = vld [vmem:[%s4640_s1 + $0x740] ss:$16 sps:$4 sm:$0xff]  }
  0x3a   :  { %v3182_v21 = vld [vmem:[%s4640_s1 + $0x524] ss:$16 sps:$4 sm:$0xff]  }
  0x3b   :  { %1668 = vmatpush2.bf16.msra.mxu0 %v3086_v10  ;;  %v3165_v10 = vld [vmem:[%s4640_s1 + $0x780] ss:$16 sps:$4 sm:$0xff]  }
  0x3c   :  { %1709 = vmatpush2.bf16.msra.mxu1 %v3087_v11  ;;  %1669 = vmatprep.subr.bf16.mxu0 %v3088_v12  ;;  %v3170_v11 = vld [vmem:[%s4640_s1 + $0x564] ss:$16 sps:$4 sm:$0xff]  }
  0x3d   :  { %1710 = vmatprep.subr.bf16.mxu1 %v3090_v13  ;;  %v3173_v12 = vld [vmem:[%s4640_s1 + $0x764] ss:$16 sps:$4 sm:$0xff]   ;;  %v3168_v13 = vld [vmem:[%s4640_s1 + $0x560] ss:$16 sps:$4 sm:$0xff]  }
  0x3f   :  { %1670 = vmatpush2.bf16.msra.mxu0 %v3092_v16  ;;  %v3171_v16 = vld [vmem:[%s4640_s1 + $0x760] ss:$16 sps:$4 sm:$0xff]  }
  0x40   :  { %1711 = vmatpush2.bf16.msra.mxu1 %v3093_v17  ;;  %1721 = vmatprep.subr.bf16.mxu0 %v3098_v18  ;;  %v3176_v17 = vld [vmem:[%s4640_s1 + $0x544] ss:$16 sps:$4 sm:$0xff]  }
  0x41   :  { %1762 = vmatprep.subr.bf16.mxu1 %v3101_v19  ;;  %v3179_v18 = vld [vmem:[%s4640_s1 + $0x744] ss:$16 sps:$4 sm:$0xff]   ;;  %v3174_v19 = vld [vmem:[%s4640_s1 + $0x540] ss:$16 sps:$4 sm:$0xff]  }
  0x42   :  { %1672 = vmatmul.mubr.bf16.vlgmr.msra.gmra.mxu0 %v3758_v22 }
  0x43   :  { %1713 = vmatmul.mubr.bf16.vlgmr.msra.gmra.mxu1 %v3760_v23  ;;  %1722 = vmatpush1.bf16.msra.mxu0 %v3096_v24  ;;  %v3185_v24 = vld [vmem:[%s4640_s1 + $0x724] ss:$16 sps:$4 sm:$0xff]  }
  0x44   :  { %1763 = vmatpush1.bf16.msra.mxu1 %v3099_v25  ;;  %1723 = vmatprep.subr.bf16.mxu0 %v3104_v26  ;;  %v3180_v25 = vld [vmem:[%s4640_s1 + $0x520] ss:$16 sps:$4 sm:$0xff]  }
  0x45   :  { %1764 = vmatprep.subr.bf16.mxu1 %v3107_v27  ;;  %1753 = vmatprep.mubr.bf16.mxu0 %v3774_v28  ;;  %v3183_v26 = vld [vmem:[%s4640_s1 + $0x720] ss:$16 sps:$4 sm:$0xff]   ;;  %v3188_v27 = vld [vmem:[%s4640_s1 + $0x504] ss:$16 sps:$4 sm:$0xff]  }
  0x46   :  { %1794 = vmatprep.mubr.bf16.mxu1 %v3776_v29 }
  0x47   :  { %1724 = vmatpush1.bf16.msra.mxu0 %v3102_v30  ;;  %v3191_v30 = vld [vmem:[%s4640_s1 + $0x704] ss:$16 sps:$4 sm:$0xff]  }
  0x48   :  { %1765 = vmatpush1.bf16.msra.mxu1 %v3105_v31  ;;  %1725 = vmatprep.subr.bf16.mxu0 %v3110_v32  ;;  %v3186_v31 = vld [vmem:[%s4640_s1 + $0x500] ss:$16 sps:$4 sm:$0xff]  }
  0x49   :  { %1766 = vmatprep.subr.bf16.mxu1 %v3113_v33  ;;  %v3189_v32 = vld [vmem:[%s4640_s1 + $0x700] ss:$16 sps:$4 sm:$0xff]   ;;  %v3194_v33 = vld [vmem:[%s4640_s1 + $0xec] ss:$16 sps:$4 sm:$0xff]  }
  0x4b   :  { %1726 = vmatpush1.bf16.msra.mxu0 %v3108_v34  ;;  %v3197_v34 = vld [vmem:[%s4640_s1 + $0x2ec] ss:$16 sps:$4 sm:$0xff]  }
  0x4c   :  { %1767 = vmatpush1.bf16.msra.mxu1 %v3111_v35  ;;  %1727 = vmatprep.subr.bf16.mxu0 %v3116_v36  ;;  %v3964_v35 = vpack.c.bf16 %v3738_v14, %v3738_v14  ;;  %v3968_v36 = vpack.c.bf16 %v3740_v15, %v3740_v15  ;;  %v3200_v14 = vld [vmem:[%s4640_s1 + $0xcc] ss:$16 sps:$4 sm:$0xff]  }
  0x4d   :  { %1768 = vmatprep.subr.bf16.mxu1 %v3119_v37  ;;  %v3192_v37 = vld [vmem:[%s4640_s1 + $0xe8] ss:$16 sps:$4 sm:$0xff]   ;;  %v3203_v15 = vld [vmem:[%s4640_s1 + $0x2cc] ss:$16 sps:$4 sm:$0xff]  }
  0x4f   :  { %1728 = vmatpush1.bf16.msra.mxu0 %v3114_v38  ;;  %v3195_v38 = vld [vmem:[%s4640_s1 + $0x2e8] ss:$16 sps:$4 sm:$0xff]  }
  0x50   :  { %1769 = vmatpush1.bf16.msra.mxu1 %v3117_v39  ;;  %1729 = vmatprep.subr.bf16.mxu0 %v3122_v40  ;;  %v3198_v39 = vld [vmem:[%s4640_s1 + $0xc8] ss:$16 sps:$4 sm:$0xff]  }
  0x51   :  { %1770 = vmatprep.subr.bf16.mxu1 %v3125_v41  ;;  %v3201_v40 = vld [vmem:[%s4640_s1 + $0x2c8] ss:$16 sps:$4 sm:$0xff]   ;;  %v3206_v41 = vld [vmem:[%s4640_s1 + $0xac] ss:$16 sps:$4 sm:$0xff]  }
  0x53   :  { %1730 = vmatpush1.bf16.msra.mxu0 %v3120_v42  ;;  %v3209_v42 = vld [vmem:[%s4640_s1 + $0x2ac] ss:$16 sps:$4 sm:$0xff]  }
  0x54   :  { %1771 = vmatpush1.bf16.msra.mxu1 %v3123_v44  ;;  %1731 = vmatprep.subr.bf16.mxu0 %v3128_v45  ;;  %v3204_v44 = vld [vmem:[%s4640_s1 + $0xa8] ss:$16 sps:$4 sm:$0xff]  }
  0x55   :  { %1772 = vmatprep.subr.bf16.mxu1 %v3131_v46  ;;  %v3207_v45 = vld [vmem:[%s4640_s1 + $0x2a8] ss:$16 sps:$4 sm:$0xff]   ;;  %v3212_v46 = vld [vmem:[%s4640_s1 + $0x8c] ss:$16 sps:$4 sm:$0xff]  }
  0x57   :  { %1732 = vmatpush1.bf16.msra.mxu0 %v3126_v47  ;;  %v3213_v47 = vld [vmem:[%s4640_s1 + $0x288] ss:$16 sps:$4 sm:$0xff]  }
  0x58   :  { %1773 = vmatpush1.bf16.msra.mxu1 %v3129_v48  ;;  %1733 = vmatprep.subr.bf16.mxu0 %v3134_v49  ;;  %v3218_v48 = vld [vmem:[%s4640_s1 + $0x6c] ss:$16 sps:$4 sm:$0xff]  }
  0x59   :  { %1774 = vmatprep.subr.bf16.mxu1 %v3137_v50  ;;  %v3221_v49 = vld [vmem:[%s4640_s1 + $0x26c] ss:$16 sps:$4 sm:$0xff]   ;;  %v3216_v50 = vld [vmem:[%s4640_s1 + $0x68] ss:$16 sps:$4 sm:$0xff]  }
  0x5b   :  { %1734 = vmatpush1.bf16.msra.mxu0 %v3132_v51  ;;  %v3219_v51 = vld [vmem:[%s4640_s1 + $0x268] ss:$16 sps:$4 sm:$0xff]  }
  0x5c   :  { %1775 = vmatpush1.bf16.msra.mxu1 %v3135_v52  ;;  %1735 = vmatprep.subr.bf16.mxu0 %v3140_v53  ;;  %v3224_v52 = vld [vmem:[%s4640_s1 + $0x4c] ss:$16 sps:$4 sm:$0xff]  }
  0x5d   :  { %1776 = vmatprep.subr.bf16.mxu1 %v3143_v54  ;;  %v3227_v53 = vld [vmem:[%s4640_s1 + $0x24c] ss:$16 sps:$4 sm:$0xff]   ;;  %v3222_v54 = vld [vmem:[%s4640_s1 + $0x48] ss:$16 sps:$4 sm:$0xff]  }
  0x5f   :  { %1736 = vmatpush1.bf16.msra.mxu0 %v3138_v55  ;;  %v3225_v55 = vld [vmem:[%s4640_s1 + $0x248] ss:$16 sps:$4 sm:$0xff]  }
  0x60   :  { %1777 = vmatpush1.bf16.msra.mxu1 %v3141_v56  ;;  %1737 = vmatprep.subr.bf16.mxu0 %v3146_v57  ;;  %v3230_v56 = vld [vmem:[%s4640_s1 + $0x2c] ss:$16 sps:$4 sm:$0xff]  }
  0x61   :  { %1778 = vmatprep.subr.bf16.mxu1 %v3149_v58  ;;  %v3233_v57 = vld [vmem:[%s4640_s1 + $0x22c] ss:$16 sps:$4 sm:$0xff]   ;;  %v3228_v58 = vld [vmem:[%s4640_s1 + $0x28] ss:$16 sps:$4 sm:$0xff]  }
  0x63   :  { %1738 = vmatpush2.bf16.msra.mxu0 %v3144_v59  ;;  %v3231_v59 = vld [vmem:[%s4640_s1 + $0x228] ss:$16 sps:$4 sm:$0xff]  }
  0x64   :  { %1779 = vmatpush2.bf16.msra.mxu1 %v3147_v60  ;;  %1739 = vmatprep.subr.bf16.mxu0 %v3152_v62  ;;  %v3236_v60 = vld [vmem:[%s4640_s1 + $0xc] ss:$16 sps:$4 sm:$0xff]  }
  0x65   :  { %1780 = vmatprep.subr.bf16.mxu1 %v3155_v63  ;;  %v3239_v62 = vld [vmem:[%s4640_s1 + $0x20c] ss:$16 sps:$4 sm:$0xff]   ;;  %v3234_v63 = vld [vmem:[%s4640_s1 + $0x8] ss:$16 sps:$4 sm:$0xff]  }
  0x67   :  { %1740 = vmatpush2.bf16.msra.mxu0 %v3150_v0  ;;  %v3237_v0 = vld [vmem:[%s4640_s1 + $0x208] ss:$16 sps:$4 sm:$0xff]  }
  0x68   :  { %1781 = vmatpush2.bf16.msra.mxu1 %v3153_v1  ;;  %1741 = vmatprep.subr.bf16.mxu0 %v3158_v2  ;;  %v3242_v1 = vld [vmem:[%s4640_s1 + $0x1ec] ss:$16 sps:$4 sm:$0xff]  }
  0x69   :  { %1782 = vmatprep.subr.bf16.mxu1 %v3161_v4  ;;  %v3245_v2 = vld [vmem:[%s4640_s1 + $0x3ec] ss:$16 sps:$4 sm:$0xff]   ;;  %v3240_v4 = vld [vmem:[%s4640_s1 + $0x1e8] ss:$16 sps:$4 sm:$0xff]  }
  0x6b   :  { %1742 = vmatpush2.bf16.msra.mxu0 %v3156_v5  ;;  %v3243_v5 = vld [vmem:[%s4640_s1 + $0x3e8] ss:$16 sps:$4 sm:$0xff]  }
  0x6c   :  { %1783 = vmatpush2.bf16.msra.mxu1 %v3159_v6  ;;  %1743 = vmatprep.subr.bf16.mxu0 %v3164_v7  ;;  %v3248_v6 = vld [vmem:[%s4640_s1 + $0x1cc] ss:$16 sps:$4 sm:$0xff]  }
  0x6d   :  { %1784 = vmatprep.subr.bf16.mxu1 %v3167_v8  ;;  %v3251_v7 = vld [vmem:[%s4640_s1 + $0x3cc] ss:$16 sps:$4 sm:$0xff]   ;;  %v3246_v8 = vld [vmem:[%s4640_s1 + $0x1c8] ss:$16 sps:$4 sm:$0xff]  }
  0x6f   :  { %1744 = vmatpush2.bf16.msra.mxu0 %v3162_v9  ;;  %v3249_v9 = vld [vmem:[%s4640_s1 + $0x3c8] ss:$16 sps:$4 sm:$0xff]  }
  0x70   :  { %1785 = vmatpush2.bf16.msra.mxu1 %v3165_v10  ;;  %1745 = vmatprep.subr.bf16.mxu0 %v3170_v11  ;;  %v3254_v10 = vld [vmem:[%s4640_s1 + $0x1ac] ss:$16 sps:$4 sm:$0xff]  }
  0x71   :  { %1786 = vmatprep.subr.bf16.mxu1 %v3173_v12  ;;  %v3257_v11 = vld [vmem:[%s4640_s1 + $0x3ac] ss:$16 sps:$4 sm:$0xff]   ;;  %v3252_v12 = vld [vmem:[%s4640_s1 + $0x1a8] ss:$16 sps:$4 sm:$0xff]  }
  0x73   :  { %1746 = vmatpush2.bf16.msra.mxu0 %v3168_v13  ;;  %v3255_v13 = vld [vmem:[%s4640_s1 + $0x3a8] ss:$16 sps:$4 sm:$0xff]  }
  0x74   :  { %1787 = vmatpush2.bf16.msra.mxu1 %v3171_v16  ;;  %1747 = vmatprep.subr.bf16.mxu0 %v3176_v17  ;;  %v3260_v16 = vld [vmem:[%s4640_s1 + $0x18c] ss:$16 sps:$4 sm:$0xff]  }
  0x75   :  { %1788 = vmatprep.subr.bf16.mxu1 %v3179_v18  ;;  %v3263_v17 = vld [vmem:[%s4640_s1 + $0x38c] ss:$16 sps:$4 sm:$0xff]   ;;  %v3258_v18 = vld [vmem:[%s4640_s1 + $0x188] ss:$16 sps:$4 sm:$0xff]  }
  0x77   :  { %1748 = vmatpush2.bf16.msra.mxu0 %v3174_v19  ;;  %v3261_v19 = vld [vmem:[%s4640_s1 + $0x388] ss:$16 sps:$4 sm:$0xff]  }
  0x78   :  { %1789 = vmatpush2.bf16.msra.mxu1 %v3177_v20  ;;  %1749 = vmatprep.subr.bf16.mxu0 %v3182_v21  ;;  %v3266_v20 = vld [vmem:[%s4640_s1 + $0x16c] ss:$16 sps:$4 sm:$0xff]  }
  0x79   :  { %1790 = vmatprep.subr.bf16.mxu1 %v3185_v24  ;;  %v3269_v21 = vld [vmem:[%s4640_s1 + $0x36c] ss:$16 sps:$4 sm:$0xff]   ;;  %v3264_v24 = vld [vmem:[%s4640_s1 + $0x168] ss:$16 sps:$4 sm:$0xff]  }
  0x7b   :  { %1750 = vmatpush2.bf16.msra.mxu0 %v3180_v25  ;;  %v3267_v25 = vld [vmem:[%s4640_s1 + $0x368] ss:$16 sps:$4 sm:$0xff]  }
  0x7c   :  { %1791 = vmatpush2.bf16.msra.mxu1 %v3183_v26  ;;  %1751 = vmatprep.subr.bf16.mxu0 %v3188_v27  ;;  %v3272_v26 = vld [vmem:[%s4640_s1 + $0x14c] ss:$16 sps:$4 sm:$0xff]  }
  0x7d   :  { %1792 = vmatprep.subr.bf16.mxu1 %v3191_v30  ;;  %v3275_v27 = vld [vmem:[%s4640_s1 + $0x34c] ss:$16 sps:$4 sm:$0xff]   ;;  %v3270_v30 = vld [vmem:[%s4640_s1 + $0x148] ss:$16 sps:$4 sm:$0xff]  }
  0x7f   :  { %1752 = vmatpush2.bf16.msra.mxu0 %v3186_v31  ;;  %v3273_v31 = vld [vmem:[%s4640_s1 + $0x348] ss:$16 sps:$4 sm:$0xff]  }
  0x80   :  { %1793 = vmatpush2.bf16.msra.mxu1 %v3189_v32  ;;  %1803 = vmatprep.subr.bf16.mxu0 %v3194_v33  ;;  %v3278_v32 = vld [vmem:[%s4640_s1 + $0x12c] ss:$16 sps:$4 sm:$0xff]  }
  0x81   :  { %1844 = vmatprep.subr.bf16.mxu1 %v3197_v34  ;;  %v3281_v33 = vld [vmem:[%s4640_s1 + $0x32c] ss:$16 sps:$4 sm:$0xff]   ;;  %v3276_v34 = vld [vmem:[%s4640_s1 + $0x128] ss:$16 sps:$4 sm:$0xff]  }
  0x82   :  { %1754 = vmatmul.mubr.bf16.vlgmr.msra.gmra.mxu0 %v3964_v35 }
  0x83   :  { %1795 = vmatmul.mubr.bf16.vlgmr.msra.gmra.mxu1 %v3968_v36  ;;  %1804 = vmatpush1.bf16.msra.mxu0 %v3192_v37  ;;  %v3279_v37 = vld [vmem:[%s4640_s1 + $0x328] ss:$16 sps:$4 sm:$0xff]  }
  0x84   :  { %1845 = vmatpush1.bf16.msra.mxu1 %v3195_v38  ;;  %1805 = vmatprep.subr.bf16.mxu0 %v3200_v14  ;;  %v3284_v38 = vld [vmem:[%s4640_s1 + $0x10c] ss:$16 sps:$4 sm:$0xff]  }
  0x85   :  { %1846 = vmatprep.subr.bf16.mxu1 %v3203_v15  ;;  %1835 = vmatprep.mubr.bf16.mxu0 %v3693_v61  ;;  %v3215_v61 = vld [vmem:[%s4640_s1 + $0x28c] ss:$16 sps:$4 sm:$0xff]   ;;  %v3282_v15 = vld [vmem:[%s4640_s1 + $0x108] ss:$16 sps:$4 sm:$0xff]  }
  0x86   :  { %1876 = vmatprep.mubr.bf16.mxu1 %v3707_v3  ;;  %v3210_v3 = vld [vmem:[%s4640_s1 + $0x88] ss:$16 sps:$4 sm:$0xff]   ;;  %v3287_v14 = vld [vmem:[%s4640_s1 + $0x30c] ss:$16 sps:$4 sm:$0xff]  }
  0x87   :  { %1806 = vmatpush1.bf16.msra.mxu0 %v3198_v39  ;;  %v3285_v39 = vld [vmem:[%s4640_s1 + $0x308] ss:$16 sps:$4 sm:$0xff]  }
  0x88   :  { %1847 = vmatpush1.bf16.msra.mxu1 %v3201_v40  ;;  %1807 = vmatprep.subr.bf16.mxu0 %v3206_v41  ;;  %v3290_v40 = vld [vmem:[%s4640_s1 + $0x4ec] ss:$16 sps:$4 sm:$0xff]  }
  0x89   :  { %1848 = vmatprep.subr.bf16.mxu1 %v3209_v42  ;;  %v3293_v41 = vld [vmem:[%s4640_s1 + $0x6ec] ss:$16 sps:$4 sm:$0xff]   ;;  %v3288_v42 = vld [vmem:[%s4640_s1 + $0x4e8] ss:$16 sps:$4 sm:$0xff]  }
  0x8b   :  { %1808 = vmatpush1.bf16.msra.mxu0 %v3204_v44  ;;  %v3291_v44 = vld [vmem:[%s4640_s1 + $0x6e8] ss:$16 sps:$4 sm:$0xff]  }
  0x8c   :  { %1849 = vmatpush1.bf16.msra.mxu1 %v3207_v45  ;;  %1809 = vmatprep.subr.bf16.mxu0 %v3212_v46  ;;  %v3296_v45 = vld [vmem:[%s4640_s1 + $0x4cc] ss:$16 sps:$4 sm:$0xff]  }
  0x8d   :  { %1850 = vmatprep.subr.bf16.mxu1 %v3215_v61  ;;  %v3299_v46 = vld [vmem:[%s4640_s1 + $0x6cc] ss:$16 sps:$4 sm:$0xff]   ;;  %v3294_v61 = vld [vmem:[%s4640_s1 + $0x4c8] ss:$16 sps:$4 sm:$0xff]  }
  0x8f   :  { %1810 = vmatpush1.bf16.msra.mxu0 %v3210_v3  ;;  %v3297_v3 = vld [vmem:[%s4640_s1 + $0x6c8] ss:$16 sps:$4 sm:$0xff]  }
  0x90   :  { %1851 = vmatpush1.bf16.msra.mxu1 %v3213_v47  ;;  %1811 = vmatprep.subr.bf16.mxu0 %v3218_v48  ;;  %v3302_v47 = vld [vmem:[%s4640_s1 + $0x4ac] ss:$16 sps:$4 sm:$0xff]  }
  0x91   :  { %1852 = vmatprep.subr.bf16.mxu1 %v3221_v49  ;;  %v3305_v48 = vld [vmem:[%s4640_s1 + $0x6ac] ss:$16 sps:$4 sm:$0xff]   ;;  %v3300_v49 = vld [vmem:[%s4640_s1 + $0x4a8] ss:$16 sps:$4 sm:$0xff]  }
  0x93   :  { %1812 = vmatpush1.bf16.msra.mxu0 %v3216_v50  ;;  %v3311_v50 = vld [vmem:[%s4640_s1 + $0x68c] ss:$16 sps:$4 sm:$0xff]  }
  0x94   :  { %1853 = vmatpush1.bf16.msra.mxu1 %v3219_v51  ;;  %1813 = vmatprep.subr.bf16.mxu0 %v3224_v52  ;;  %v3314_v51 = vld [vmem:[%s4640_s1 + $0x46c] ss:$16 sps:$4 sm:$0xff]  }
  0x95   :  { %1854 = vmatprep.subr.bf16.mxu1 %v3227_v53  ;;  %v3317_v52 = vld [vmem:[%s4640_s1 + $0x66c] ss:$16 sps:$4 sm:$0xff]   ;;  %v3312_v53 = vld [vmem:[%s4640_s1 + $0x468] ss:$16 sps:$4 sm:$0xff]  }
  0x97   :  { %1814 = vmatpush1.bf16.msra.mxu0 %v3222_v54  ;;  %v3315_v54 = vld [vmem:[%s4640_s1 + $0x668] ss:$16 sps:$4 sm:$0xff]  }
  0x98   :  { %1855 = vmatpush1.bf16.msra.mxu1 %v3225_v55  ;;  %1815 = vmatprep.subr.bf16.mxu0 %v3230_v56  ;;  %v3320_v55 = vld [vmem:[%s4640_s1 + $0x44c] ss:$16 sps:$4 sm:$0xff]  }
  0x99   :  { %1856 = vmatprep.subr.bf16.mxu1 %v3233_v57  ;;  %v3323_v56 = vld [vmem:[%s4640_s1 + $0x64c] ss:$16 sps:$4 sm:$0xff]   ;;  %v3318_v57 = vld [vmem:[%s4640_s1 + $0x448] ss:$16 sps:$4 sm:$0xff]  }
  0x9b   :  { %1816 = vmatpush1.bf16.msra.mxu0 %v3228_v58  ;;  %v3321_v58 = vld [vmem:[%s4640_s1 + $0x648] ss:$16 sps:$4 sm:$0xff]  }
  0x9c   :  { %1857 = vmatpush1.bf16.msra.mxu1 %v3231_v59  ;;  %1817 = vmatprep.subr.bf16.mxu0 %v3236_v60  ;;  %v3326_v59 = vld [vmem:[%s4640_s1 + $0x42c] ss:$16 sps:$4 sm:$0xff]  }
  0x9d   :  { %1858 = vmatprep.subr.bf16.mxu1 %v3239_v62  ;;  %v3329_v60 = vld [vmem:[%s4640_s1 + $0x62c] ss:$16 sps:$4 sm:$0xff]   ;;  %v3324_v62 = vld [vmem:[%s4640_s1 + $0x428] ss:$16 sps:$4 sm:$0xff]  }
  0x9f   :  { %1818 = vmatpush1.bf16.msra.mxu0 %v3234_v63  ;;  %v3327_v63 = vld [vmem:[%s4640_s1 + $0x628] ss:$16 sps:$4 sm:$0xff]  }
  0xa0   :  { %1859 = vmatpush1.bf16.msra.mxu1 %v3237_v0  ;;  %1819 = vmatprep.subr.bf16.mxu0 %v3242_v1  ;;  %v3332_v0 = vld [vmem:[%s4640_s1 + $0x40c] ss:$16 sps:$4 sm:$0xff]  }
  0xa1   :  { %1860 = vmatprep.subr.bf16.mxu1 %v3245_v2  ;;  %v3335_v1 = vld [vmem:[%s4640_s1 + $0x60c] ss:$16 sps:$4 sm:$0xff]   ;;  %v3330_v2 = vld [vmem:[%s4640_s1 + $0x408] ss:$16 sps:$4 sm:$0xff]  }
  0xa3   :  { %1820 = vmatpush2.bf16.msra.mxu0 %v3240_v4  ;;  %v3333_v4 = vld [vmem:[%s4640_s1 + $0x608] ss:$16 sps:$4 sm:$0xff]  }
  0xa4   :  { %1861 = vmatpush2.bf16.msra.mxu1 %v3243_v5  ;;  %1821 = vmatprep.subr.bf16.mxu0 %v3248_v6  ;;  %v3338_v5 = vld [vmem:[%s4640_s1 + $0x5ec] ss:$16 sps:$4 sm:$0xff]  }
  0xa5   :  { %1862 = vmatprep.subr.bf16.mxu1 %v3251_v7  ;;  %v3341_v6 = vld [vmem:[%s4640_s1 + $0x7ec] ss:$16 sps:$4 sm:$0xff]   ;;  %v3336_v7 = vld [vmem:[%s4640_s1 + $0x5e8] ss:$16 sps:$4 sm:$0xff]  }
  0xa7   :  { %1822 = vmatpush2.bf16.msra.mxu0 %v3246_v8  ;;  %v3339_v8 = vld [vmem:[%s4640_s1 + $0x7e8] ss:$16 sps:$4 sm:$0xff]  }
  0xa8   :  { %1863 = vmatpush2.bf16.msra.mxu1 %v3249_v9  ;;  %1823 = vmatprep.subr.bf16.mxu0 %v3254_v10  ;;  %v3344_v9 = vld [vmem:[%s4640_s1 + $0x5cc] ss:$16 sps:$4 sm:$0xff]  }
  0xa9   :  { %1864 = vmatprep.subr.bf16.mxu1 %v3257_v11  ;;  %v3347_v10 = vld [vmem:[%s4640_s1 + $0x7cc] ss:$16 sps:$4 sm:$0xff]   ;;  %v3342_v11 = vld [vmem:[%s4640_s1 + $0x5c8] ss:$16 sps:$4 sm:$0xff]  }
  0xab   :  { %1824 = vmatpush2.bf16.msra.mxu0 %v3252_v12  ;;  %v3345_v12 = vld [vmem:[%s4640_s1 + $0x7c8] ss:$16 sps:$4 sm:$0xff]  }
  0xac   :  { %1865 = vmatpush2.bf16.msra.mxu1 %v3255_v13  ;;  %1825 = vmatprep.subr.bf16.mxu0 %v3260_v16  ;;  %v3350_v13 = vld [vmem:[%s4640_s1 + $0x5ac] ss:$16 sps:$4 sm:$0xff]  }
  0xad   :  { %1866 = vmatprep.subr.bf16.mxu1 %v3263_v17  ;;  %v3353_v16 = vld [vmem:[%s4640_s1 + $0x7ac] ss:$16 sps:$4 sm:$0xff]   ;;  %v3348_v17 = vld [vmem:[%s4640_s1 + $0x5a8] ss:$16 sps:$4 sm:$0xff]  }
  0xaf   :  { %1826 = vmatpush2.bf16.msra.mxu0 %v3258_v18  ;;  %v3351_v18 = vld [vmem:[%s4640_s1 + $0x7a8] ss:$16 sps:$4 sm:$0xff]  }
  0xb0   :  { %1867 = vmatpush2.bf16.msra.mxu1 %v3261_v19  ;;  %1827 = vmatprep.subr.bf16.mxu0 %v3266_v20  ;;  %v3356_v19 = vld [vmem:[%s4640_s1 + $0x58c] ss:$16 sps:$4 sm:$0xff]  }
  0xb1   :  { %1868 = vmatprep.subr.bf16.mxu1 %v3269_v21  ;;  %v3359_v20 = vld [vmem:[%s4640_s1 + $0x78c] ss:$16 sps:$4 sm:$0xff]   ;;  %v3354_v21 = vld [vmem:[%s4640_s1 + $0x588] ss:$16 sps:$4 sm:$0xff]  }
  0xb3   :  { %1828 = vmatpush2.bf16.msra.mxu0 %v3264_v24  ;;  %v3357_v24 = vld [vmem:[%s4640_s1 + $0x788] ss:$16 sps:$4 sm:$0xff]  }
  0xb4   :  { %1869 = vmatpush2.bf16.msra.mxu1 %v3267_v25  ;;  %1829 = vmatprep.subr.bf16.mxu0 %v3272_v26  ;;  %v3362_v25 = vld [vmem:[%s4640_s1 + $0x56c] ss:$16 sps:$4 sm:$0xff]  }
  0xb5   :  { %1870 = vmatprep.subr.bf16.mxu1 %v3275_v27  ;;  %v3365_v26 = vld [vmem:[%s4640_s1 + $0x76c] ss:$16 sps:$4 sm:$0xff]   ;;  %v3360_v27 = vld [vmem:[%s4640_s1 + $0x568] ss:$16 sps:$4 sm:$0xff]  }
  0xb7   :  { %1830 = vmatpush2.bf16.msra.mxu0 %v3270_v30  ;;  %v3363_v30 = vld [vmem:[%s4640_s1 + $0x768] ss:$16 sps:$4 sm:$0xff]  }
  0xb8   :  { %1871 = vmatpush2.bf16.msra.mxu1 %v3273_v31  ;;  %1831 = vmatprep.subr.bf16.mxu0 %v3278_v32  ;;  %v3368_v31 = vld [vmem:[%s4640_s1 + $0x54c] ss:$16 sps:$4 sm:$0xff]  }
  0xb9   :  { %1872 = vmatprep.subr.bf16.mxu1 %v3281_v33  ;;  %v3371_v32 = vld [vmem:[%s4640_s1 + $0x74c] ss:$16 sps:$4 sm:$0xff]   ;;  %v3366_v33 = vld [vmem:[%s4640_s1 + $0x548] ss:$16 sps:$4 sm:$0xff]  }
  0xbb   :  { %1832 = vmatpush2.bf16.msra.mxu0 %v3276_v34  ;;  %v3369_v34 = vld [vmem:[%s4640_s1 + $0x748] ss:$16 sps:$4 sm:$0xff]  }
  0xbc   :  { %1873 = vmatpush2.bf16.msra.mxu1 %v3279_v37  ;;  %1833 = vmatprep.subr.bf16.mxu0 %v3284_v38  ;;  %v3374_v37 = vld [vmem:[%s4640_s1 + $0x52c] ss:$16 sps:$4 sm:$0xff]  }
  0xbd   :  { %1874 = vmatprep.subr.bf16.mxu1 %v3287_v14  ;;  %v3377_v38 = vld [vmem:[%s4640_s1 + $0x72c] ss:$16 sps:$4 sm:$0xff]   ;;  %v3372_v14 = vld [vmem:[%s4640_s1 + $0x528] ss:$16 sps:$4 sm:$0xff]  }
  0xbf   :  { %1834 = vmatpush2.bf16.msra.mxu0 %v3282_v15  ;;  %v3375_v15 = vld [vmem:[%s4640_s1 + $0x728] ss:$16 sps:$4 sm:$0xff]  }
  0xc0   :  { %1875 = vmatpush2.bf16.msra.mxu1 %v3285_v39  ;;  %1885 = vmatprep.subr.bf16.mxu0 %v3290_v40  ;;  %v3380_v39 = vld [vmem:[%s4640_s1 + $0x50c] ss:$16 sps:$4 sm:$0xff]  }
  0xc1   :  { %1926 = vmatprep.subr.bf16.mxu1 %v3293_v41  ;;  %v3383_v40 = vld [vmem:[%s4640_s1 + $0x70c] ss:$16 sps:$4 sm:$0xff]   ;;  %v3378_v41 = vld [vmem:[%s4640_s1 + $0x508] ss:$16 sps:$4 sm:$0xff]  }
  0xc2   :  { %1836 = vmatmul.mubr.bf16.vlgmr.msra.gmra.mxu0 %v3758_v22  ;;  %v3303_v22 = vld [vmem:[%s4640_s1 + $0x6a8] ss:$16 sps:$4 sm:$0xff]  }
  0xc3   :  { %1877 = vmatmul.mubr.bf16.vlgmr.msra.gmra.mxu1 %v3760_v23  ;;  %1886 = vmatpush1.bf16.msra.mxu0 %v3288_v42  ;;  %v3308_v23 = vld [vmem:[%s4640_s1 + $0x48c] ss:$16 sps:$4 sm:$0xff]   ;;  %v3381_v42 = vld [vmem:[%s4640_s1 + $0x708] ss:$16 sps:$4 sm:$0xff]  }
  0xc4   :  { %1927 = vmatpush1.bf16.msra.mxu1 %v3291_v44  ;;  %1887 = vmatprep.subr.bf16.mxu0 %v3296_v45  ;;  %v3386_v44 = vld [vmem:[%s4642_s3 + $0x74] ss:$8 sps:$4 sm:$0xff]   ;;  %v3384_v45 = vld [vmem:[%s4642_s3 + $0x70] ss:$8 sps:$4 sm:$0xff]  }
  0xc5   :  { %1928 = vmatprep.subr.bf16.mxu1 %v3299_v46  ;;  %1917 = vmatprep.mubr.bf16.mxu0 %v3774_v28  ;;  %v3306_v28 = vld [vmem:[%s4640_s1 + $0x488] ss:$16 sps:$4 sm:$0xff]   ;;  %v3389_v46 = vld [vmem:[%s4642_s3 + $0x64] ss:$8 sps:$4 sm:$0xff]  }
  0xc6   :  { %1958 = vmatprep.mubr.bf16.mxu1 %v3776_v29  ;;  %v3309_v29 = vld [vmem:[%s4640_s1 + $0x688] ss:$16 sps:$4 sm:$0xff]  }
  0xc7   :  { %1888 = vmatpush1.bf16.msra.mxu0 %v3294_v61 }
  0xc8   :  { %1929 = vmatpush1.bf16.msra.mxu1 %v3297_v3  ;;  %1889 = vmatprep.subr.bf16.mxu0 %v3302_v47  ;;  %v3387_v47 = vld [vmem:[%s4642_s3 + $0x60] ss:$8 sps:$4 sm:$0xff]  }
  0xc9   :  { %1930 = vmatprep.subr.bf16.mxu1 %v3305_v48 }
  0xcb   :  { %1890 = vmatpush1.bf16.msra.mxu0 %v3300_v49 }
  0xcc   :  { %1931 = vmatpush1.bf16.msra.mxu1 %v3303_v22  ;;  %1891 = vmatprep.subr.bf16.mxu0 %v3308_v23  ;;  %v3392_v22 = vld [vmem:[%s4642_s3 + $0x54] ss:$8 sps:$4 sm:$0xff]  }
  0xcd   :  { %1932 = vmatprep.subr.bf16.mxu1 %v3311_v50 }
  0xcf   :  { %1892 = vmatpush1.bf16.msra.mxu0 %v3306_v28 }
  0xd0   :  { %1933 = vmatpush1.bf16.msra.mxu1 %v3309_v29  ;;  %1893 = vmatprep.subr.bf16.mxu0 %v3314_v51  ;;  %v3395_v29 = vld [vmem:[%s4642_s3 + $0x44] ss:$8 sps:$4 sm:$0xff]   ;;  %v3432_v51 = vld [vmem:[%s4642_s3 + $0x170] ss:$8 sps:$4 sm:$0xff]  }
  0xd1   :  { %1934 = vmatprep.subr.bf16.mxu1 %v3317_v52  ;;  %v3434_v52 = vld [vmem:[%s4642_s3 + $0x174] ss:$8 sps:$4 sm:$0xff]  }
  0xd3   :  { %1894 = vmatpush1.bf16.msra.mxu0 %v3312_v53  ;;  %v3437_v53 = vld [vmem:[%s4642_s3 + $0x164] ss:$8 sps:$4 sm:$0xff]  }
  0xd4   :  { %1935 = vmatpush1.bf16.msra.mxu1 %v3315_v54  ;;  %1895 = vmatprep.subr.bf16.mxu0 %v3320_v55  ;;  %v3393_v54 = vld [vmem:[%s4642_s3 + $0x40] ss:$8 sps:$4 sm:$0xff]  }
  0xd5   :  { %1936 = vmatprep.subr.bf16.mxu1 %v3323_v56  ;;  %v3435_v55 = vld [vmem:[%s4642_s3 + $0x160] ss:$8 sps:$4 sm:$0xff]   ;;  %v3398_v56 = vld [vmem:[%s4642_s3 + $0x34] ss:$8 sps:$4 sm:$0xff]  }
  0xd7   :  { %1896 = vmatpush1.bf16.msra.mxu0 %v3318_v57  ;;  %v3440_v57 = vld [vmem:[%s4642_s3 + $0x154] ss:$8 sps:$4 sm:$0xff]  }
  0xd8   :  { %1937 = vmatpush1.bf16.msra.mxu1 %v3321_v58  ;;  %1897 = vmatprep.subr.bf16.mxu0 %v3326_v59  ;;  %v3396_v58 = vld [vmem:[%s4642_s3 + $0x30] ss:$8 sps:$4 sm:$0xff]  }
  0xd9   :  { %1938 = vmatprep.subr.bf16.mxu1 %v3329_v60  ;;  %v3438_v59 = vld [vmem:[%s4642_s3 + $0x150] ss:$8 sps:$4 sm:$0xff]   ;;  %v3401_v60 = vld [vmem:[%s4642_s3 + $0x24] ss:$8 sps:$4 sm:$0xff]  }
  0xdb   :  { %1898 = vmatpush1.bf16.msra.mxu0 %v3324_v62  ;;  %v3443_v62 = vld [vmem:[%s4642_s3 + $0x144] ss:$8 sps:$4 sm:$0xff]  }
  0xdc   :  { %1939 = vmatpush1.bf16.msra.mxu1 %v3327_v63  ;;  %1899 = vmatprep.subr.bf16.mxu0 %v3332_v0  ;;  %v3399_v63 = vld [vmem:[%s4642_s3 + $0x20] ss:$8 sps:$4 sm:$0xff]  }
  0xdd   :  { %1940 = vmatprep.subr.bf16.mxu1 %v3335_v1  ;;  %v3441_v0 = vld [vmem:[%s4642_s3 + $0x140] ss:$8 sps:$4 sm:$0xff]   ;;  %v3404_v1 = vld [vmem:[%s4642_s3 + $0x14] ss:$8 sps:$4 sm:$0xff]  }
  0xdf   :  { %1900 = vmatpush1.bf16.msra.mxu0 %v3330_v2  ;;  %v3446_v2 = vld [vmem:[%s4642_s3 + $0x134] ss:$8 sps:$4 sm:$0xff]  }
  0xe0   :  { %1941 = vmatpush1.bf16.msra.mxu1 %v3333_v4  ;;  %1901 = vmatprep.subr.bf16.mxu0 %v3338_v5  ;;  %v3402_v4 = vld [vmem:[%s4642_s3 + $0x10] ss:$8 sps:$4 sm:$0xff]  }
  0xe1   :  { %1942 = vmatprep.subr.bf16.mxu1 %v3341_v6  ;;  %v3444_v5 = vld [vmem:[%s4642_s3 + $0x130] ss:$8 sps:$4 sm:$0xff]   ;;  %v3407_v6 = vld [vmem:[%s4642_s3 + $0x4] ss:$8 sps:$4 sm:$0xff]  }
  0xe3   :  { %1902 = vmatpush2.bf16.msra.mxu0 %v3336_v7  ;;  %v3449_v7 = vld [vmem:[%s4642_s3 + $0x124] ss:$8 sps:$4 sm:$0xff]  }
  0xe4   :  { %1943 = vmatpush2.bf16.msra.mxu1 %v3339_v8  ;;  %1903 = vmatprep.subr.bf16.mxu0 %v3344_v9  ;;  %v3405_v8 = vld [vmem:[%s4642_s3] ss:$8 sps:$4 sm:$0xff]  }
  0xe5   :  { %1944 = vmatprep.subr.bf16.mxu1 %v3347_v10  ;;  %v3447_v9 = vld [vmem:[%s4642_s3 + $0x120] ss:$8 sps:$4 sm:$0xff]   ;;  %v3410_v10 = vld [vmem:[%s4642_s3 + $0xf4] ss:$8 sps:$4 sm:$0xff]  }
  0xe7   :  { %1904 = vmatpush2.bf16.msra.mxu0 %v3342_v11  ;;  %v3452_v11 = vld [vmem:[%s4642_s3 + $0x114] ss:$8 sps:$4 sm:$0xff]  }
  0xe8   :  { %1945 = vmatpush2.bf16.msra.mxu1 %v3345_v12  ;;  %1905 = vmatprep.subr.bf16.mxu0 %v3350_v13  ;;  %v3408_v12 = vld [vmem:[%s4642_s3 + $0xf0] ss:$8 sps:$4 sm:$0xff]  }
  0xe9   :  { %1946 = vmatprep.subr.bf16.mxu1 %v3353_v16  ;;  %v3450_v13 = vld [vmem:[%s4642_s3 + $0x110] ss:$8 sps:$4 sm:$0xff]   ;;  %v3413_v16 = vld [vmem:[%s4642_s3 + $0xe4] ss:$8 sps:$4 sm:$0xff]  }
  0xeb   :  { %1906 = vmatpush2.bf16.msra.mxu0 %v3348_v17  ;;  %v3455_v17 = vld [vmem:[%s4642_s3 + $0x104] ss:$8 sps:$4 sm:$0xff]  }
  0xec   :  { %1947 = vmatpush2.bf16.msra.mxu1 %v3351_v18  ;;  %1907 = vmatprep.subr.bf16.mxu0 %v3356_v19  ;;  %v3411_v18 = vld [vmem:[%s4642_s3 + $0xe0] ss:$8 sps:$4 sm:$0xff]  }
  0xed   :  { %1948 = vmatprep.subr.bf16.mxu1 %v3359_v20  ;;  %v3453_v19 = vld [vmem:[%s4642_s3 + $0x100] ss:$8 sps:$4 sm:$0xff]   ;;  %v3416_v20 = vld [vmem:[%s4642_s3 + $0xd4] ss:$8 sps:$4 sm:$0xff]  }
  0xef   :  { %1908 = vmatpush2.bf16.msra.mxu0 %v3354_v21  ;;  %v3458_v21 = vld [vmem:[%s4642_s3 + $0x1f4] ss:$8 sps:$4 sm:$0xff]  }
  0xf0   :  { %1949 = vmatpush2.bf16.msra.mxu1 %v3357_v24  ;;  %1909 = vmatprep.subr.bf16.mxu0 %v3362_v25  ;;  %v3414_v24 = vld [vmem:[%s4642_s3 + $0xd0] ss:$8 sps:$4 sm:$0xff]  }
  0xf1   :  { %1950 = vmatprep.subr.bf16.mxu1 %v3365_v26  ;;  %v3456_v25 = vld [vmem:[%s4642_s3 + $0x1f0] ss:$8 sps:$4 sm:$0xff]   ;;  %v3419_v26 = vld [vmem:[%s4642_s3 + $0xc4] ss:$8 sps:$4 sm:$0xff]  }
  0xf3   :  { %1910 = vmatpush2.bf16.msra.mxu0 %v3360_v27  ;;  %v3461_v27 = vld [vmem:[%s4642_s3 + $0x1e4] ss:$8 sps:$4 sm:$0xff]  }
  0xf4   :  { %1951 = vmatpush2.bf16.msra.mxu1 %v3363_v30  ;;  %1911 = vmatprep.subr.bf16.mxu0 %v3368_v31  ;;  %v3417_v30 = vld [vmem:[%s4642_s3 + $0xc0] ss:$8 sps:$4 sm:$0xff]  }
  0xf5   :  { %1952 = vmatprep.subr.bf16.mxu1 %v3371_v32  ;;  %v3459_v31 = vld [vmem:[%s4642_s3 + $0x1e0] ss:$8 sps:$4 sm:$0xff]   ;;  %v3422_v32 = vld [vmem:[%s4642_s3 + $0xb4] ss:$8 sps:$4 sm:$0xff]  }
  0xf7   :  { %1912 = vmatpush2.bf16.msra.mxu0 %v3366_v33  ;;  %v3464_v33 = vld [vmem:[%s4642_s3 + $0x1d4] ss:$8 sps:$4 sm:$0xff]  }
  0xf8   :  { %1953 = vmatpush2.bf16.msra.mxu1 %v3369_v34  ;;  %1913 = vmatprep.subr.bf16.mxu0 %v3374_v37  ;;  %v3420_v34 = vld [vmem:[%s4642_s3 + $0xb0] ss:$8 sps:$4 sm:$0xff]  }
  0xf9   :  { %1954 = vmatprep.subr.bf16.mxu1 %v3377_v38  ;;  %v3462_v37 = vld [vmem:[%s4642_s3 + $0x1d0] ss:$8 sps:$4 sm:$0xff]   ;;  %v3425_v38 = vld [vmem:[%s4642_s3 + $0xa4] ss:$8 sps:$4 sm:$0xff]  }
  0xfb   :  { %1914 = vmatpush2.bf16.msra.mxu0 %v3372_v14  ;;  %v3467_v14 = vld [vmem:[%s4642_s3 + $0x1c4] ss:$8 sps:$4 sm:$0xff]  }
  0xfc   :  { %1955 = vmatpush2.bf16.msra.mxu1 %v3375_v15  ;;  %1915 = vmatprep.subr.bf16.mxu0 %v3380_v39  ;;  %v3423_v15 = vld [vmem:[%s4642_s3 + $0xa0] ss:$8 sps:$4 sm:$0xff]  }
  0xfd   :  { %1956 = vmatprep.subr.bf16.mxu1 %v3383_v40  ;;  %v3465_v39 = vld [vmem:[%s4642_s3 + $0x1c0] ss:$8 sps:$4 sm:$0xff]   ;;  %v3428_v40 = vld [vmem:[%s4642_s3 + $0x94] ss:$8 sps:$4 sm:$0xff]  }
  0xff   :  { %1916 = vmatpush2.bf16.msra.mxu0 %v3378_v41  ;;  %v3470_v41 = vld [vmem:[%s4642_s3 + $0x1b4] ss:$8 sps:$4 sm:$0xff]  }
 0x100   :  { %1957 = vmatpush2.bf16.msra.mxu1 %v3381_v42  ;;  %2371 = vmatprep.subr.bf16.mxu0 %v3386_v44  ;;  %v341_v42 = vsub.s32 0, %v3654_v43  ;;  %v4532_v44 = vld [vmem:[%s4643_s2] sm:$0xf] }
 0x101   :  { %2412 = vmatprep.subr.bf16.mxu1 %v3434_v52  ;;  %v3471_v52 = vld [vmem:[%s4642_s3 + $0x1a0] ss:$8 sps:$4 sm:$0xff]  }
 0x102   :  { %v4365_v61 = vpop.f32.mrf.mxu0  ;;  %1918 = vmatmul.mubr.bf16.vlgmr.msra.gmra.mxu0 %v3964_v35  ;;  %v3390_v35 = vld [vmem:[%s4642_s3 + $0x50] ss:$8 sps:$4 sm:$0xff]  }
 0x103   :  { %v4367_v3 = vpop.f32.mrf.mxu1  ;;  %1959 = vmatmul.mubr.bf16.vlgmr.msra.gmra.mxu1 %v3968_v36  ;;  %2372 = vmatpush1.bf16.msra.mxu0 %v3384_v45  ;;  %v345_v45 = vsub.s32 1, %v3654_v43 }
 0x104   :  { %v4374_v48 = vpop.f32.mrf.mxu0  ;;  %2373 = vmatprep.subr.bf16.mxu0 %v3389_v46  ;;  %2413 = vmatpush1.bf16.msra.mxu1 %v3432_v51  ;;  %v3426_v46 = vld [vmem:[%s4642_s3 + $0x90] ss:$8 sps:$4 sm:$0xff]  }
 0x105   :  { %v4376_v49 = vpop.f32.mrf.mxu1  ;;  %2414 = vmatprep.subr.bf16.mxu1 %v3437_v53 }
 0x106   :  { %v1677_v23 = vpop.f32.mrf.mxu0 }
 0x107   :  { %v1718_v50 = vpop.f32.mrf.mxu1  ;;  %2374 = vmatpush1.bf16.msra.mxu0 %v3387_v47  ;;  %v3468_v47 = vld [vmem:[%s4642_s3 + $0x1b0] ss:$8 sps:$4 sm:$0xff]   ;;  %v342_v23 = vrot.slane %v4532_v44, %v341_v42 }
 0x108   :  { %v1678_v36 = vpop.f32.mrf.mxu0  ;;  %2375 = vmatprep.subr.bf16.mxu0 %v3392_v22  ;;  %2415 = vmatpush1.bf16.msra.mxu1 %v3435_v55  ;;  %v3431_v22 = vld [vmem:[%s4642_s3 + $0x84] ss:$8 sps:$4 sm:$0xff]   ;;  %v346_v50 = vrot.slane %v4532_v44, %v345_v45 }
 0x109   :  { %v1719_v28 = vpop.f32.mrf.mxu1  ;;  %2416 = vmatprep.subr.bf16.mxu1 %v3440_v57  ;;  %v1674_v36 = vadd.f32 %v4365_v61, %v342_v23  ;;  %v3476_v57 = vld [vmem:[%s4642_s3 + $0x194] ss:$8 sps:$4 sm:$0xff]  }
 0x10a   :  { %v1676_v28 = vadd.f32 %v4374_v48, %v346_v50 }
 0x10b   :  { %2376 = vmatpush1.bf16.msra.mxu0 %v3390_v35  ;;  %v3429_v35 = vld [vmem:[%s4642_s3 + $0x80] ss:$8 sps:$4 sm:$0xff]   ;;  %v1715_v51 = vadd.f32 %v4367_v3, %v1674_v36  ;;  %v3474_v3 = vld [vmem:[%s4642_s3 + $0x190] ss:$8 sps:$4 sm:$0xff]  }
 0x10c   :  { %2377 = vmatprep.subr.bf16.mxu0 %v3395_v29  ;;  %2417 = vmatpush1.bf16.msra.mxu1 %v3438_v59  ;;  %v3473_v29 = vld [vmem:[%s4642_s3 + $0x1a4] ss:$8 sps:$4 sm:$0xff]   ;;  %v1717_v55 = vadd.f32 %v4376_v49, %v1676_v28 }
 0x10d   :  { %2418 = vmatprep.subr.bf16.mxu1 %v3443_v62 }
 0x10f   :  { %2378 = vmatpush1.bf16.msra.mxu0 %v3393_v54 }
 0x110   :  { %2379 = vmatprep.subr.bf16.mxu0 %v3398_v56  ;;  %2419 = vmatpush1.bf16.msra.mxu1 %v3441_v0 }
 0x111   :  { %2420 = vmatprep.subr.bf16.mxu1 %v3446_v2  ;;  %v3479_v2 = vld [vmem:[%s4642_s3 + $0x184] ss:$8 sps:$4 sm:$0xff]  }
 0x113   :  { %2380 = vmatpush1.bf16.msra.mxu0 %v3396_v58 }
 0x114   :  { %2381 = vmatprep.subr.bf16.mxu0 %v3401_v60  ;;  %2421 = vmatpush1.bf16.msra.mxu1 %v3444_v5  ;;  %v3477_v5 = vld [vmem:[%s4642_s3 + $0x180] ss:$8 sps:$4 sm:$0xff]  }
 0x115   :  { %2422 = vmatprep.subr.bf16.mxu1 %v3449_v7 }
 0x117   :  { %2382 = vmatpush1.bf16.msra.mxu0 %v3399_v63 }
 0x118   :  { %2383 = vmatprep.subr.bf16.mxu0 %v3404_v1  ;;  %2423 = vmatpush1.bf16.msra.mxu1 %v3447_v9 }
 0x119   :  { %2424 = vmatprep.subr.bf16.mxu1 %v3452_v11 }
 0x11b   :  { %2384 = vmatpush1.bf16.msra.mxu0 %v3402_v4 }
 0x11c   :  { %2385 = vmatprep.subr.bf16.mxu0 %v3407_v6  ;;  %2425 = vmatpush1.bf16.msra.mxu1 %v3450_v13 }
 0x11d   :  { %2426 = vmatprep.subr.bf16.mxu1 %v3455_v17 }
 0x11f   :  { %2386 = vmatpush1.bf16.msra.mxu0 %v3405_v8 }
 0x120   :  { %2387 = vmatprep.subr.bf16.mxu0 %v3410_v10  ;;  %2427 = vmatpush1.bf16.msra.mxu1 %v3453_v19  ;;  %v3481_v19 = vld [vmem:[%s4644_s5 + $0x38] sm:$0xff]  }
 0x121   :  { %2428 = vmatprep.subr.bf16.mxu1 %v3458_v21  ;;  %v3483_v21 = vld [vmem:[%s4644_s5 + $0x30] sm:$0xff]  }
 0x123   :  { %2388 = vmatpush2.bf16.msra.mxu0 %v3408_v12 }
 0x124   :  { %2389 = vmatprep.subr.bf16.mxu0 %v3413_v16  ;;  %2429 = vmatpush2.bf16.msra.mxu1 %v3456_v25  ;;  %v3485_v25 = vld [vmem:[%s4644_s5 + $0x28] sm:$0xff]  }
 0x125   :  { %2430 = vmatprep.subr.bf16.mxu1 %v3461_v27  ;;  %v3487_v27 = vld [vmem:[%s4644_s5 + $0x20] sm:$0xff]  }
 0x127   :  { %2390 = vmatpush2.bf16.msra.mxu0 %v3411_v18  ;;  %v3480_v18 = vld [vmem:[%s4644_s5 + $0x78] sm:$0xff]  }
 0x128   :  { %2391 = vmatprep.subr.bf16.mxu0 %v3416_v20  ;;  %2431 = vmatpush2.bf16.msra.mxu1 %v3459_v31  ;;  %v3482_v20 = vld [vmem:[%s4644_s5 + $0x70] sm:$0xff]   ;;  %v3489_v31 = vld [vmem:[%s4644_s5 + $0x18] sm:$0xff]  }
 0x129   :  { %2432 = vmatprep.subr.bf16.mxu1 %v3464_v33  ;;  %v3491_v33 = vld [vmem:[%s4644_s5 + $0x10] sm:$0xff]  }
 0x12b   :  { %2392 = vmatpush2.bf16.msra.mxu0 %v3414_v24  ;;  %v3484_v24 = vld [vmem:[%s4644_s5 + $0x68] sm:$0xff]  }
 0x12c   :  { %2393 = vmatprep.subr.bf16.mxu0 %v3419_v26  ;;  %2433 = vmatpush2.bf16.msra.mxu1 %v3462_v37  ;;  %v3486_v26 = vld [vmem:[%s4644_s5 + $0x60] sm:$0xff]   ;;  %v353_v37 = vsub.s32 3, %v3654_v43 }
 0x12d   :  { %2434 = vmatprep.subr.bf16.mxu1 %v3467_v14 }
 0x12e   :  { %v354_v14 = vrot.slane %v4532_v44, %v353_v37 }
 0x12f   :  { %2394 = vmatpush2.bf16.msra.mxu0 %v3417_v30  ;;  %v3488_v30 = vld [vmem:[%s4644_s5 + $0x58] sm:$0xff]  }
 0x130   :  { %2395 = vmatprep.subr.bf16.mxu0 %v3422_v32  ;;  %2435 = vmatpush2.bf16.msra.mxu1 %v3465_v39  ;;  %v3490_v32 = vld [vmem:[%s4644_s5 + $0x50] sm:$0xff]  }
 0x131   :  { %2436 = vmatprep.subr.bf16.mxu1 %v3470_v41 }
 0x133   :  { %2396 = vmatpush2.bf16.msra.mxu0 %v3420_v34  ;;  %v349_v34 = vsub.s32 2, %v3654_v43  ;;  %v2958_v43 = vld [vmem:[%s4646_s6] ss:$0 sm:$0xff] }
 0x134   :  { %2397 = vmatprep.subr.bf16.mxu0 %v3425_v38  ;;  %2437 = vmatpush2.bf16.msra.mxu1 %v3468_v47 }
 0x135   :  { %2438 = vmatprep.subr.bf16.mxu1 %v3473_v29  ;;  %v350_v38 = vrot.slane %v4532_v44, %v349_v34 }
 0x137   :  { %2398 = vmatpush2.bf16.msra.mxu0 %v3423_v15 }
 0x138   :  { %2399 = vmatprep.subr.bf16.mxu0 %v3428_v40  ;;  %2439 = vmatpush2.bf16.msra.mxu1 %v3471_v52 }
 0x139   :  { %2440 = vmatprep.subr.bf16.mxu1 %v3476_v57  ;;  %v3493_v57 = vld [vmem:[%s4644_s5 + $0x8] sm:$0xff]  }
 0x13b   :  { %2400 = vmatpush2.bf16.msra.mxu0 %v3426_v46 }
 0x13c   :  { %2401 = vmatprep.subr.bf16.mxu0 %v3431_v22  ;;  %2441 = vmatpush2.bf16.msra.mxu1 %v3474_v3  ;;  %v3494_v3 = vld [vmem:[%s4644_s5 + $0x40] sm:$0xff]  }
 0x13d   :  { %2442 = vmatprep.subr.bf16.mxu1 %v3479_v2 }
 0x13f   :  { %2402 = vmatpush2.bf16.msra.mxu0 %v3429_v35 }
 0x140   :  { %2443 = vmatpush2.bf16.msra.mxu1 %v3477_v5  ;;  %2975 = vmatprep.subr.bf16.mxu0 %v3480_v18 }
 0x142   :  { %v1755_v53 = vpop.f32.mrf.mxu0 }
 0x143   :  { %v1796_v54 = vpop.f32.mrf.mxu1  ;;  %v1756_v56 = vadd.f32 %v1755_v53, %v1715_v51 }
 0x144   :  { %v1757_v61 = vpop.f32.mrf.mxu0 }
 0x145   :  { %v1798_v48 = vpop.f32.mrf.mxu1  ;;  %v1797_v58 = vadd.f32 %v1796_v54, %v1756_v56  ;;  %v1758_v59 = vadd.f32 %v1757_v61, %v1717_v55 }
 0x146   :  { %v1759_v60 = vpop.f32.mrf.mxu0 }
 0x147   :  { %v1800_v62 = vpop.f32.mrf.mxu1  ;;  %v1799_v63 = vadd.f32 %v1798_v48, %v1758_v59  ;;  %v1967_v49 = vmax.f32 %v1797_v58, 0.0  ;;  %v3492_v48 = vld [vmem:[%s4644_s5 + $0x48] sm:$0xff]   ;;  %v3495_v60 = vld [vmem:[%s4644_s5] sm:$0xff]  }
 0x148   :  { %v1760_v0 = vpop.f32.mrf.mxu0 }
 0x149   :  { %v1801_v1 = vpop.f32.mrf.mxu1  ;;  %v1968_v4 = vmax.f32 %v1799_v63, 0.0  ;;  %v1971_v7 = vpack.c.bf16 %v1967_v49, %v1967_v49  ;;  %v2039_v63 = vld [vmem:[%s4645_s4] sm:$0x3] }
 0x14a   :  { %v2044_v49 = vrot.slane %v2039_v63, %v341_v42  ;;  %v2048_v0 = vrot.slane %v2039_v63, %v345_v45 }
 0x14b   :  { %v1972_v6 = vpack.c.bf16 %v1968_v4, %v1968_v4 }
 0x14d   :  { %2403 = vmatprep.mubr.bf16.mxu0 %v1972_v6 }
 0x14e   :  { %2404 = vmatmul.mubr.bf16.vlgmr.msra.gmra.mxu0 %v1971_v7 }
 0x14f   :  { %2976 = vmatpush3.bf16.msra.mxu0 %v3481_v19 }
 0x150   :  { %2977 = vmatprep.subr.bf16.mxu0 %v3482_v20 }
 0x153   :  { %2978 = vmatpush3.bf16.msra.mxu0 %v3483_v21 }
 0x154   :  { %2979 = vmatprep.subr.bf16.mxu0 %v3484_v24 }
 0x157   :  { %2980 = vmatpush3.bf16.msra.mxu0 %v3485_v25 }
 0x158   :  { %2981 = vmatprep.subr.bf16.mxu0 %v3486_v26 }
 0x15b   :  { %2982 = vmatpush3.bf16.msra.mxu0 %v3487_v27 }
 0x15c   :  { %2983 = vmatprep.subr.bf16.mxu0 %v3488_v30 }
 0x15f   :  { %2984 = vmatpush3.bf16.msra.mxu0 %v3489_v31 }
 0x160   :  { %2985 = vmatprep.subr.bf16.mxu0 %v3490_v32 }
 0x163   :  { %2986 = vmatpush3.bf16.msra.mxu0 %v3491_v33 }
 0x164   :  { %2987 = vmatprep.subr.bf16.mxu0 %v3492_v48 }
 0x167   :  { %2988 = vmatpush3.bf16.msra.mxu0 %v3493_v57 }
 0x168   :  { %2989 = vmatprep.subr.bf16.mxu0 %v3494_v3 }
 0x16b   :  { %2990 = vmatpush3.bf16.msra.mxu0 %v3495_v60 }
 0x182   :  { %v1837_v8 = vpop.f32.mrf.mxu0 }
 0x183   :  { %v1878_v9 = vpop.f32.mrf.mxu1  ;;  %v1838_v15 = vadd.f32 %v1837_v8, %v350_v38 }
 0x184   :  { %v1839_v10 = vpop.f32.mrf.mxu0 }
 0x185   :  { %v1880_v11 = vpop.f32.mrf.mxu1  ;;  %v1840_v39 = vadd.f32 %v1839_v10, %v354_v14  ;;  %v1879_v40 = vadd.f32 %v1878_v9, %v1838_v15 }
 0x186   :  { %v1841_v12 = vpop.f32.mrf.mxu0 }
 0x187   :  { %v1882_v13 = vpop.f32.mrf.mxu1  ;;  %v1881_v47 = vadd.f32 %v1880_v11, %v1840_v39 }
 0x188   :  { %v1842_v16 = vpop.f32.mrf.mxu0 }
 0x189   :  { %v1883_v17 = vpop.f32.mrf.mxu1 }
 0x1c2   :  { %v1919_v41 = vpop.f32.mrf.mxu0 }
 0x1c3   :  { %v1960_v46 = vpop.f32.mrf.mxu1  ;;  %v1920_v22 = vadd.f32 %v1919_v41, %v1879_v40 }
 0x1c4   :  { %v1921_v23 = vpop.f32.mrf.mxu0 }
 0x1c5   :  { %v1962_v50 = vpop.f32.mrf.mxu1  ;;  %v1961_v35 = vadd.f32 %v1960_v46, %v1920_v22  ;;  %v1922_v36 = vadd.f32 %v1921_v23, %v1881_v47 }
 0x1c6   :  { %v1923_v28 = vpop.f32.mrf.mxu0 }
 0x1c7   :  { %v1964_v29 = vpop.f32.mrf.mxu1  ;;  %v1963_v51 = vadd.f32 %v1962_v50, %v1922_v36  ;;  %v1969_v52 = vmax.f32 %v1961_v35, 0.0 }
 0x1c8   :  { %v1924_v53 = vpop.f32.mrf.mxu0 }
 0x1c9   :  { %v1965_v54 = vpop.f32.mrf.mxu1  ;;  %v1970_v55 = vmax.f32 %v1963_v51, 0.0  ;;  %v1973_v44 = vpack.c.bf16 %v1969_v52, %v1969_v52 }
 0x1cb   :  { %v1974_v56 = vpack.c.bf16 %v1970_v55, %v1970_v55 }
 0x1cd   :  { %2444 = vmatprep.mubr.bf16.mxu1 %v1974_v56 }
 0x1ce   :  { %2445 = vmatmul.mubr.bf16.vlgmr.msra.gmra.mxu1 %v1973_v44 }
 0x20e   :  { %v2405_v61 = vpop.f32.mrf.mxu0 }
 0x20f   :  { %v2406_v1 = vadd.f32 %v2405_v61, %v2044_v49 }
 0x210   :  { %v2407_v58 = vpop.f32.mrf.mxu0 }
 0x211   :  { %v2408_v4 = vadd.f32 %v2407_v58, %v2048_v0 }
 0x212   :  { %v2409_v59 = vpop.f32.mrf.mxu0 }
 0x214   :  { %v2410_v62 = vpop.f32.mrf.mxu0 }
 0x28e   :  { %v2446_v2 = vpop.f32.mrf.mxu1 }
 0x28f   :  { %v2447_v5 = vadd.f32 %v2446_v2, %v2406_v1 }
 0x290   :  { %v2448_v6 = vpop.f32.mrf.mxu1 }
 0x291   :  { %v2449_v7 = vadd.f32 %v2448_v6, %v2408_v4  ;;  %v2453_v8 = vmax.f32 %v2447_v5, 0.0 }
 0x292   :  { %v2450_v9 = vpop.f32.mrf.mxu1 }
 0x293   :  { %v2454_v10 = vmax.f32 %v2449_v7, 0.0  ;;  %v2455_v13 = vpack.c.bf16 %v2453_v8, %v2453_v8 }
 0x294   :  { %v2451_v11 = vpop.f32.mrf.mxu1 }
 0x295   :  { %v2456_v12 = vpack.c.bf16 %v2454_v10, %v2454_v10 }
 0x297   :  { %2624 = vmatprep.mubr.bf16.mxu0 %v2456_v12 }
 0x298   :  { %2625 = vmatmul.mubr.bf16.vlgmr.msra.gmra.mxu0 %v2455_v13 }
 0x358   :  { %v2991_v16 = vpop.f32.mrf.mxu0 }
 0x35a   :  { %v2992_v42 = vpop.f32.mrf.mxu0 }
 0x35b   :  { %v2993_v45 = vadd.f32 %v2992_v42, %v2991_v16 }
 0x35c   :  { %v2994_v17 = vpop.f32.mrf.mxu0 }
 0x35d   :  { %v2627_v18 = vadd.f32 %v2993_v45, %v2958_v43 }
 0x35e   :  { %v2995_v19 = vpop.f32.mrf.mxu0 }
 0x35f   :  { %2633 = vst.msk [vmem:[%s4647_s7] sm:$0x3] %vm2632_vm0, %v2627_v18 }

// kernel: pointnet_segmentation_forward.10
= control target key start
LH: loop header
LB: loop body
LE: loop exit
PB: predicated region body
PF: predicated region fallthrough
CT: control target
= control target key end

     0   :  { %s1541_s24 = smov 0   ;;  %s1543_s25 = smov 0   ;;  %s1825_s0 = inlined_call_operand.vmem [shape: bf16[2,16,64], index: 0, kind: input, shape index: {}]   ;;  %s1826_s1 = inlined_call_operand.vmem [shape: bf16[64,64], index: 1, kind: input, shape index: {}]   ;;  %s1827_s2 = inlined_call_operand.vmem [shape: f32[1,64], index: 2, kind: input, shape index: {}]   ;;  %s1828_s3 = inlined_call_operand.vmem [shape: bf16[64,128], index: 3, kind: input, shape index: {}]   ;;  %s1829_s4 = inlined_call_operand.vmem [shape: f32[1,128], index: 4, kind: input, shape index: {}]   ;;  %s1830_s5 = inlined_call_operand.vmem [shape: bf16[128,1024], index: 5, kind: input, shape index: {}]   ;;  %s1831_s6 = inlined_call_operand.vmem [shape: f32[1,1024], index: 6, kind: input, shape index: {}]   ;;  %s1832_s7 = inlined_call_operand.vmem [shape: f32[2,1,1024], index: 7, kind: output, shape index: {}]  }
   0x1   :  { %s1545_s26 = smov 0  }
   0x2 LB: > { %s29_s27 = sadd.s32 1, %s1491_s25  ;;  %p1318_p0 = scmp.ge.s32.totalorder %s1495_s26, 1  ;;  %s1495_s26 = sphi %s1545_s26, %s17_s26   ;;  %s1491_s25 = sphi %s1543_s25, %s1834_s25   ;;  %s1487_s24 = sphi %s1541_s24, %s1833_s24  }
   0x3   : > { %p31_p1 = scmp.ge.s32.totalorder %s29_s27, 2  ;;  %p256_p2 = scmp.lt.s32.totalorder %s1495_s26, 3 }
   0x5   : > { %s1836_s27 = smov (%p31_p1, %s29_s27), 0  ;;  %p257_p3 = pnand %p1318_p0, %p256_p2 }
   0x6   : > { %p292_p4 = scmp.lt.s32.totalorder (!%p257_p3), %s1487_s24, 1 }
   0x7   : > { %260 = sbr.rel (%p257_p3) target bundleno = 697 (0x2b9), region = 48 }
   0xc   : > { %v1464_v0 = vld [vmem:[%s1826_s1 + $0x18] sm:$0xff]   ;;  %v1497_v1 = vmov 0.0   ;;  %v1465_v2 = vld [vmem:[%s1826_s1 + $0x10] sm:$0xff]   ;;  %vm1498_vm0 = vmmov 0   ;;  %s1838_s24 = smov (!%p292_p4, %s1487_s24), 1  ;;  %v1466_v4 = vld [vmem:[%s1826_s1 + $0x8] sm:$0xff]  }
   0xd   : > { %1412 = vmatprep.subr.bf16.mxu0 %v1497_v1  ;;  %1424 = vmatprep.subr.bf16.mxu1 %v1497_v1  ;;  %v1469_v3 = vld [vmem:[%s1828_s3 + $0x18] sm:$0xff]   ;;  %s1401_s13 = sshll.u32 %s1838_s24, 3  ;;  %v1467_v5 = vld [vmem:[%s1826_s1] sm:$0xff]   ;;  %vm352_vm1 = vcmask 523264   ;;  %v1470_v7 = vld [vmem:[%s1828_s3 + $0x10] sm:$0xff]  }
   0xe   : > { %1413 = vmatpush3.bf16.msra.mxu0 %v1464_v0  ;;  %1420 = vmatprep.mubr.msk.bf16.mxu0 %vm1498_vm0, %v1497_v1  ;;  %s299_s16 = scalar_lea.vmem %s1825_s0, %s1401_s13  ;;  %v1471_v8 = vld [vmem:[%s1828_s3 + $0x8] sm:$0xff]   ;;  %v1472_v9 = vld [vmem:[%s1828_s3] sm:$0xff]   ;;  %s304_s17 = scalar_lea.vmem %s1832_s7, %s1401_s13 }
   0xf   : > { %1414 = vmatprep.subr.bf16.mxu0 %v1497_v1  ;;  %1432 = vmatprep.mubr.msk.bf16.mxu1 %vm1498_vm0, %v1497_v1  ;;  %v1468_v6 = vld [vmem:[%s299_s16] sm:$0xff]   ;;  %v543_v12 = vld [vmem:[%s1830_s5 + $0x1c8] sm:$0xff] }
  0x10   : > { %1425 = vmatpush3.bf16.msra.mxu1 %v1469_v3  ;;  %v542_v10 = vld [vmem:[%s1830_s5 + $0x1c0] sm:$0xff]  ;;  %v547_v15 = vld [vmem:[%s1830_s5 + $0x1e8] sm:$0xff] }
  0x11   : > { %1426 = vmatprep.subr.bf16.mxu1 %v1497_v1  ;;  %v546_v11 = vld [vmem:[%s1830_s5 + $0x1e0] sm:$0xff]  ;;  %v1393_v18 = vcombine.low %v543_v12, %v547_v15  ;;  %v1394_v19 = vcombine.high %v543_v12, %v547_v15  ;;  %v535_v45 = vld [vmem:[%s1830_s5 + $0x188] sm:$0xff] }
  0x12   : > { %1415 = vmatpush3.bf16.msra.mxu0 %v1465_v2  ;;  %v1391_v13 = vcombine.low %v542_v10, %v546_v11  ;;  %v1392_v14 = vcombine.high %v542_v10, %v546_v11  ;;  %v534_v16 = vld [vmem:[%s1830_s5 + $0x180] sm:$0xff]  ;;  %v539_v46 = vld [vmem:[%s1830_s5 + $0x1a8] sm:$0xff] }
  0x13   : > { %1416 = vmatprep.subr.bf16.mxu0 %v1497_v1  ;;  %v538_v17 = vld [vmem:[%s1830_s5 + $0x1a0] sm:$0xff]  ;;  %v1386_v50 = vcombine.high %v535_v45, %v539_v46  ;;  %v527_v51 = vld [vmem:[%s1830_s5 + $0x148] sm:$0xff]  ;;  %v1385_v53 = vcombine.low %v535_v45, %v539_v46  ;;  %v528_v45 = vld [vmem:[%s1830_s5 + $0x150] sm:$0xff] }
  0x14   : > { %1427 = vmatpush3.bf16.msra.mxu1 %v1470_v7  ;;  %v1384_v20 = vcombine.high %v534_v16, %v538_v17  ;;  %v1383_v21 = vcombine.low %v534_v16, %v538_v17  ;;  %v526_v22 = vld [vmem:[%s1830_s5 + $0x140] sm:$0xff]  ;;  %v531_v52 = vld [vmem:[%s1830_s5 + $0x168] sm:$0xff]  ;;  %v532_v46 = vld [vmem:[%s1830_s5 + $0x170] sm:$0xff] }
  0x15   : > { %1428 = vmatprep.subr.bf16.mxu1 %v1497_v1  ;;  %v530_v23 = vld [vmem:[%s1830_s5 + $0x160] sm:$0xff]  ;;  %v1378_v54 = vcombine.high %v527_v51, %v531_v52  ;;  %v519_v55 = vld [vmem:[%s1830_s5 + $0x108] sm:$0xff]  ;;  %v1377_v57 = vcombine.low %v527_v51, %v531_v52  ;;  %v1380_v51 = vcombine.high %v528_v45, %v532_v46 }
  0x16   : > { %1417 = vmatpush3.bf16.msra.mxu0 %v1466_v4  ;;  %v1376_v24 = vcombine.high %v526_v22, %v530_v23  ;;  %v1375_v25 = vcombine.low %v526_v22, %v530_v23  ;;  %v518_v26 = vld [vmem:[%s1830_s5 + $0x100] sm:$0xff]  ;;  %v523_v56 = vld [vmem:[%s1830_s5 + $0x128] sm:$0xff]  ;;  %v545_v22 = vld [vmem:[%s1830_s5 + $0x1d8] sm:$0xff] }
  0x17   : > { %1418 = vmatprep.subr.bf16.mxu0 %v1497_v1  ;;  %v522_v27 = vld [vmem:[%s1830_s5 + $0x120] sm:$0xff]  ;;  %v1370_v58 = vcombine.high %v519_v55, %v523_v56  ;;  %v511_v59 = vld [vmem:[%s1830_s5 + $0xc8] sm:$0xff]  ;;  %v1369_v61 = vcombine.low %v519_v55, %v523_v56  ;;  %v521_v55 = vld [vmem:[%s1830_s5 + $0x118] sm:$0xff] }
  0x18   : > { %1429 = vmatpush3.bf16.msra.mxu1 %v1471_v8  ;;  %v1368_v28 = vcombine.high %v518_v26, %v522_v27  ;;  %v1367_v29 = vcombine.low %v518_v26, %v522_v27  ;;  %v510_v30 = vld [vmem:[%s1830_s5 + $0xc0] sm:$0xff]  ;;  %v515_v60 = vld [vmem:[%s1830_s5 + $0xe8] sm:$0xff]  ;;  %v525_v56 = vld [vmem:[%s1830_s5 + $0x138] sm:$0xff] }
  0x19   : > { %1430 = vmatprep.subr.bf16.mxu1 %v1497_v1  ;;  %v514_v31 = vld [vmem:[%s1830_s5 + $0xe0] sm:$0xff]  ;;  %v1362_v62 = vcombine.high %v511_v59, %v515_v60  ;;  %v503_v63 = vld [vmem:[%s1830_s5 + $0x88] sm:$0xff]  ;;  %v1361_v1 = vcombine.low %v511_v59, %v515_v60  ;;  %v1374_v60 = vcombine.high %v521_v55, %v525_v56 }
  0x1a   : > { %1419 = vmatpush3.bf16.msra.mxu0 %v1467_v5  ;;  %v1360_v32 = vcombine.high %v510_v30, %v514_v31  ;;  %v1359_v33 = vcombine.low %v510_v30, %v514_v31  ;;  %v502_v34 = vld [vmem:[%s1830_s5 + $0x80] sm:$0xff]  ;;  %v507_v0 = vld [vmem:[%s1830_s5 + $0xa8] sm:$0xff] }
  0x1b   : > { %912 = vmatprep.subr.bf16.mxu0 %v1392_v14  ;;  %v506_v35 = vld [vmem:[%s1830_s5 + $0xa0] sm:$0xff]  ;;  %v1354_v2 = vcombine.high %v503_v63, %v507_v0  ;;  %v1353_v3 = vcombine.low %v503_v63, %v507_v0  ;;  %v499_v8 = vld [vmem:[%s1830_s5 + $0x68] sm:$0xff]  ;;  %v513_v63 = vld [vmem:[%s1830_s5 + $0xd8] sm:$0xff] }
  0x1c   : > { %1431 = vmatpush3.bf16.msra.mxu1 %v1472_v9  ;;  %v1352_v36 = vcombine.high %v502_v34, %v506_v35  ;;  %v1351_v37 = vcombine.low %v502_v34, %v506_v35  ;;  %v1322_v38 = vld [vmem:[%s1827_s2] ss:$0 sm:$0xff]  ;;  %v487_v14 = vld [vmem:[%s1830_s5 + $0x8] sm:$0xff]  ;;  %v536_v35 = vld [vmem:[%s1830_s5 + $0x190] sm:$0xff] }
  0x1d   : > { %1421 = vmatmul.mubr.msk.bf16.vlgmr.msra.gmra.mxu0 %vm352_vm1, %v1468_v6  ;;  %955 = vmatprep.subr.bf16.mxu1 %v1394_v19  ;;  %v494_v4 = vld [vmem:[%s1830_s5 + $0x40] sm:$0xff]  ;;  %v495_v6 = vld [vmem:[%s1830_s5 + $0x48] sm:$0xff]  ;;  %v517_v0 = vld [vmem:[%s1830_s5 + $0xf8] sm:$0xff] }
  0x1e   : > { %913 = vmatpush1.bf16.msra.mxu0 %v1391_v13  ;;  %v498_v5 = vld [vmem:[%s1830_s5 + $0x60] sm:$0xff]  ;;  %v1345_v10 = vcombine.low %v495_v6, %v499_v8  ;;  %v1346_v11 = vcombine.high %v495_v6, %v499_v8  ;;  %v491_v16 = vld [vmem:[%s1830_s5 + $0x28] sm:$0xff]  ;;  %v508_v6 = vld [vmem:[%s1830_s5 + $0xb0] sm:$0xff] }
  0x1f   : > { %914 = vmatprep.subr.bf16.mxu0 %v1384_v20  ;;  %v1344_v7 = vcombine.high %v494_v4, %v498_v5  ;;  %v1343_v9 = vcombine.low %v494_v4, %v498_v5  ;;  %v486_v12 = vld [vmem:[%s1830_s5] sm:$0xff]  ;;  %v1338_v19 = vcombine.high %v487_v14, %v491_v16  ;;  %v544_v20 = vld [vmem:[%s1830_s5 + $0x1d0] sm:$0xff]  ;;  %v1366_v4 = vcombine.high %v513_v63, %v517_v0  ;;  %v509_v8 = vld [vmem:[%s1830_s5 + $0xb8] sm:$0xff] }
  0x20   : > { %v490_v13 = vld [vmem:[%s1830_s5 + $0x20] sm:$0xff]  ;;  %v504_v5 = vld [vmem:[%s1830_s5 + $0x90] sm:$0xff] }
  0x21   : > { %v1336_v15 = vcombine.high %v486_v12, %v490_v13  ;;  %v1335_v17 = vcombine.low %v486_v12, %v490_v13  ;;  %v496_v13 = vld [vmem:[%s1830_s5 + $0x50] sm:$0xff] }
  0x22   : > { %915 = vmatpush1.bf16.msra.mxu0 %v1383_v21  ;;  %v548_v21 = vld [vmem:[%s1830_s5 + $0x1f0] sm:$0xff] }
  0x23   : > { %916 = vmatprep.subr.bf16.mxu0 %v1376_v24  ;;  %v1396_v23 = vcombine.high %v544_v20, %v548_v21  ;;  %v549_v24 = vld [vmem:[%s1830_s5 + $0x1f8] sm:$0xff] }
  0x24   : > { %v1397_v26 = vcombine.low %v545_v22, %v549_v24  ;;  %v1398_v27 = vcombine.high %v545_v22, %v549_v24  ;;  %v492_v22 = vld [vmem:[%s1830_s5 + $0x30] sm:$0xff]  ;;  %v493_v24 = vld [vmem:[%s1830_s5 + $0x38] sm:$0xff] }
  0x26   : > { %917 = vmatpush1.bf16.msra.mxu0 %v1375_v25  ;;  %v1395_v25 = vcombine.low %v544_v20, %v548_v21  ;;  %v488_v21 = vld [vmem:[%s1830_s5 + $0x10] sm:$0xff] }
  0x27   : > { %918 = vmatprep.subr.bf16.mxu0 %v1368_v28  ;;  %v1499_v28 = vmov 0  }
  0x28   : > { %944 = vmatprep.mubr.bf16.mxu0 %v1499_v28 }
  0x2a   : > { %919 = vmatpush1.bf16.msra.mxu0 %v1367_v29  ;;  %v1329_v29 = vld [vmem:[%s1829_s4] ss:$0 sm:$0xff] }
  0x2b   : > { %920 = vmatprep.subr.bf16.mxu0 %v1360_v32 }
  0x2e   : > { %921 = vmatpush1.bf16.msra.mxu0 %v1359_v33 }
  0x2f   : > { %922 = vmatprep.subr.bf16.mxu0 %v1352_v36 }
  0x32   : > { %923 = vmatpush1.bf16.msra.mxu0 %v1351_v37  ;;  %v540_v37 = vld [vmem:[%s1830_s5 + $0x1b0] sm:$0xff] }
  0x33   : > { %924 = vmatprep.subr.bf16.mxu0 %v1344_v7  ;;  %v505_v7 = vld [vmem:[%s1830_s5 + $0x98] sm:$0xff] }
  0x34   : > { %v1358_v12 = vcombine.high %v505_v7, %v509_v8 }
  0x36   : > { %925 = vmatpush1.bf16.msra.mxu0 %v1343_v9 }
  0x37   : > { %926 = vmatprep.subr.bf16.mxu0 %v1336_v15  ;;  %v497_v15 = vld [vmem:[%s1830_s5 + $0x58] sm:$0xff] }
  0x3a   : > { %927 = vmatpush1.bf16.msra.mxu0 %v1335_v17  ;;  %v1355_v17 = vcombine.low %v504_v5, %v508_v6 }
  0x3b   : > { %998 = vmatprep.subr.bf16.mxu0 %v1396_v23  ;;  %v489_v23 = vld [vmem:[%s1830_s5 + $0x18] sm:$0xff] }
  0xdd   : > { %v390_v39 = vpop.f32.mrf.mxu0 }
  0xde   : > { %v391_v41 = vadd.f32 %v1322_v38, %v390_v39  ;;  %v541_v39 = vld [vmem:[%s1830_s5 + $0x1b8] sm:$0xff] }
  0xdf   : > { %v1422_v40 = vpop.f32.mrf.mxu0 }
  0xe0   : > { %v397_v47 = vmax.f32 %v391_v41, 0.0 }
  0xe1   : > { %v393_v42 = vpop.f32.mrf.mxu0 }
  0xe2   : > { %v394_v43 = vadd.f32 %v1322_v38, %v393_v42  ;;  %v537_v38 = vld [vmem:[%s1830_s5 + $0x198] sm:$0xff] }
  0xe3   : > { %v1423_v44 = vpop.f32.mrf.mxu0 }
  0xe4   : > { %v398_v48 = vmax.f32 %v394_v43, 0.0  ;;  %v1388_v43 = vcombine.high %v536_v35, %v540_v37  ;;  %v1390_v44 = vcombine.high %v537_v38, %v541_v39 }
  0xe6   : > { %v399_v49 = vpack.c.bf16 %v398_v48, %v397_v47  ;;  %v529_v47 = vld [vmem:[%s1830_s5 + $0x158] sm:$0xff] }
  0xe7   : > { %v533_v48 = vld [vmem:[%s1830_s5 + $0x178] sm:$0xff] }
  0xe8   : > { %1433 = vmatmul.mubr.msk.bf16.vlgmr.msra.gmra.mxu1 %vm352_vm1, %v399_v49  ;;  %v1387_v49 = vcombine.low %v536_v35, %v540_v37  ;;  %v1382_v52 = vcombine.high %v529_v47, %v533_v48 }
  0xe9   : > { %956 = vmatpush1.bf16.msra.mxu1 %v1393_v18  ;;  %v1337_v18 = vcombine.low %v487_v14, %v491_v16  ;;  %987 = vmatprep.mubr.bf16.mxu1 %v1499_v28  ;;  %v500_v14 = vld [vmem:[%s1830_s5 + $0x70] sm:$0xff]  ;;  %v501_v16 = vld [vmem:[%s1830_s5 + $0x78] sm:$0xff] }
  0xea   : > { %957 = vmatprep.subr.bf16.mxu1 %v1386_v50  ;;  %v1389_v50 = vcombine.low %v537_v38, %v541_v39  ;;  %v1350_v20 = vcombine.high %v497_v15, %v501_v16 }
  0xed   : > { %958 = vmatpush1.bf16.msra.mxu1 %v1385_v53  ;;  %v520_v53 = vld [vmem:[%s1830_s5 + $0x110] sm:$0xff] }
  0xee   : > { %959 = vmatprep.subr.bf16.mxu1 %v1378_v54  ;;  %v524_v54 = vld [vmem:[%s1830_s5 + $0x130] sm:$0xff] }
  0xef   : > { %v1372_v59 = vcombine.high %v520_v53, %v524_v54 }
  0xf1   : > { %960 = vmatpush1.bf16.msra.mxu1 %v1377_v57  ;;  %v1379_v57 = vcombine.low %v528_v45, %v532_v46 }
  0xf2   : > { %961 = vmatprep.subr.bf16.mxu1 %v1370_v58  ;;  %v1381_v58 = vcombine.low %v529_v47, %v533_v48 }
  0xf5   : > { %962 = vmatpush1.bf16.msra.mxu1 %v1369_v61  ;;  %v512_v61 = vld [vmem:[%s1830_s5 + $0xd0] sm:$0xff] }
  0xf6   : > { %963 = vmatprep.subr.bf16.mxu1 %v1362_v62  ;;  %v516_v62 = vld [vmem:[%s1830_s5 + $0xf0] sm:$0xff] }
  0xf7   : > { %v1363_v9 = vcombine.low %v512_v61, %v516_v62 }
  0xf9   : > { %964 = vmatpush1.bf16.msra.mxu1 %v1361_v1  ;;  %v1371_v1 = vcombine.low %v520_v53, %v524_v54 }
  0xfa   : > { %965 = vmatprep.subr.bf16.mxu1 %v1354_v2  ;;  %v1373_v2 = vcombine.low %v521_v55, %v525_v56 }
  0xfd   : > { %966 = vmatpush1.bf16.msra.mxu1 %v1353_v3  ;;  %v1364_v3 = vcombine.high %v512_v61, %v516_v62 }
  0xfe   : > { %967 = vmatprep.subr.bf16.mxu1 %v1346_v11  ;;  %v1356_v11 = vcombine.high %v504_v5, %v508_v6 }
 0x101   : > { %968 = vmatpush1.bf16.msra.mxu1 %v1345_v10  ;;  %v1365_v10 = vcombine.low %v513_v63, %v517_v0 }
 0x102   : > { %969 = vmatprep.subr.bf16.mxu1 %v1338_v19  ;;  %v1348_v19 = vcombine.high %v496_v13, %v500_v14 }
 0x105   : > { %970 = vmatpush1.bf16.msra.mxu1 %v1337_v18  ;;  %v1357_v18 = vcombine.low %v505_v7, %v509_v8 }
 0x106   : > { %1041 = vmatprep.subr.bf16.mxu1 %v1398_v27  ;;  %v1340_v27 = vcombine.high %v488_v21, %v492_v22 }
 0x1a8   : > { %v476_v30 = vpop.f32.mrf.mxu1 }
 0x1a9   : > { %v477_v32 = vadd.f32 %v1329_v29, %v476_v30  ;;  %v1341_v30 = vcombine.low %v489_v23, %v493_v24 }
 0x1aa   : > { %v1434_v31 = vpop.f32.mrf.mxu1 }
 0x1ab   : > { %v483_v40 = vmax.f32 %v477_v32, 0.0 }
 0x1ac   : > { %v479_v33 = vpop.f32.mrf.mxu1 }
 0x1ad   : > { %v480_v34 = vadd.f32 %v1329_v29, %v479_v33  ;;  %v1339_v29 = vcombine.low %v488_v21, %v492_v22  ;;  %v552_v33 = vlaneseq }
 0x1ae   : > { %v1435_v36 = vpop.f32.mrf.mxu1 }
 0x1af   : > { %v484_v41 = vmax.f32 %v480_v34, 0.0  ;;  %v1797_v36 = vshrl.u32 %v552_v33, 7 }
 0x1b1   : > { %v1719_v42 = vpack.c.bf16 %v484_v41, %v483_v40  ;;  %v558_v39 = vsub.s32 1, %v1797_v36  ;;  %v566_v40 = vsub.s32 3, %v1797_v36  ;;  %v554_v41 = vsub.s32 0, %v1797_v36 }
 0x1b2   : > { %v570_v8 = vsub.s32 4, %v1797_v36 }
 0x1b3   : > { %945 = vmatmul.mubr.bf16.vlgmr.msra.gmra.mxu0 %v1719_v42  ;;  %988 = vmatmul.mubr.bf16.vlgmr.msra.gmra.mxu1 %v1719_v42 }
 0x1b4   : > { %999 = vmatpush1.bf16.msra.mxu0 %v1395_v25  ;;  %1042 = vmatpush1.bf16.msra.mxu1 %v1397_v26  ;;  %v1347_v25 = vcombine.low %v496_v13, %v500_v14  ;;  %v1349_v26 = vcombine.low %v497_v15, %v501_v16  ;;  %v582_v13 = vsub.s32 7, %v1797_v36 }
 0x1b5   : > { %1000 = vmatprep.subr.bf16.mxu0 %v1388_v43  ;;  %1043 = vmatprep.subr.bf16.mxu1 %v1390_v44  ;;  %v562_v43 = vsub.s32 2, %v1797_v36 }
 0x1b6   : > { %1030 = vmatprep.mubr.bf16.mxu0 %v1499_v28  ;;  %1073 = vmatprep.mubr.bf16.mxu1 %v1499_v28  ;;  %v1342_v28 = vcombine.high %v489_v23, %v493_v24 }
 0x1b8   : > { %1001 = vmatpush1.bf16.msra.mxu0 %v1387_v49  ;;  %1044 = vmatpush1.bf16.msra.mxu1 %v1389_v50 }
 0x1b9   : > { %1002 = vmatprep.subr.bf16.mxu0 %v1380_v51  ;;  %1045 = vmatprep.subr.bf16.mxu1 %v1382_v52 }
 0x1bc   : > { %1003 = vmatpush1.bf16.msra.mxu0 %v1379_v57  ;;  %1046 = vmatpush1.bf16.msra.mxu1 %v1381_v58 }
 0x1bd   : > { %1004 = vmatprep.subr.bf16.mxu0 %v1372_v59  ;;  %1047 = vmatprep.subr.bf16.mxu1 %v1374_v60 }
 0x1c0   : > { %1005 = vmatpush1.bf16.msra.mxu0 %v1371_v1  ;;  %1048 = vmatpush1.bf16.msra.mxu1 %v1373_v2 }
 0x1c1   : > { %1006 = vmatprep.subr.bf16.mxu0 %v1364_v3  ;;  %1049 = vmatprep.subr.bf16.mxu1 %v1366_v4 }
 0x1c4   : > { %1007 = vmatpush1.bf16.msra.mxu0 %v1363_v9  ;;  %1050 = vmatpush1.bf16.msra.mxu1 %v1365_v10  ;;  %v578_v9 = vsub.s32 6, %v1797_v36 }
 0x1c5   : > { %1008 = vmatprep.subr.bf16.mxu0 %v1356_v11  ;;  %1051 = vmatprep.subr.bf16.mxu1 %v1358_v12  ;;  %v574_v12 = vsub.s32 5, %v1797_v36 }
 0x1c8   : > { %1009 = vmatpush1.bf16.msra.mxu0 %v1355_v17  ;;  %1052 = vmatpush1.bf16.msra.mxu1 %v1357_v18 }
 0x1c9   : > { %1010 = vmatprep.subr.bf16.mxu0 %v1348_v19  ;;  %1053 = vmatprep.subr.bf16.mxu1 %v1350_v20 }
 0x1cc   : > { %1011 = vmatpush1.bf16.msra.mxu0 %v1347_v25  ;;  %1054 = vmatpush1.bf16.msra.mxu1 %v1349_v26 }
 0x1cd   : > { %1012 = vmatprep.subr.bf16.mxu0 %v1340_v27  ;;  %1055 = vmatprep.subr.bf16.mxu1 %v1342_v28 }
 0x1d0   : > { %1013 = vmatpush1.bf16.msra.mxu0 %v1339_v29  ;;  %1056 = vmatpush1.bf16.msra.mxu1 %v1341_v30 }
 0x1d3   : > { %1031 = vmatmul.mubr.bf16.vlgmr.msra.gmra.mxu0 %v1719_v42  ;;  %1074 = vmatmul.mubr.bf16.vlgmr.msra.gmra.mxu1 %v1719_v42  ;;  %v550_v42 = vld [vmem:[%s1831_s6] sm:$0xff] }
 0x1d4   : > { %v559_v46 = vrot.slane %v550_v42, %v558_v39  ;;  %v567_v47 = vrot.slane %v550_v42, %v566_v40  ;;  %v555_v48 = vrot.slane %v550_v42, %v554_v41  ;;  %v563_v49 = vrot.slane %v550_v42, %v562_v43 }
 0x1d5   : > { %v571_v16 = vrot.slane %v550_v42, %v570_v8  ;;  %v579_v17 = vrot.slane %v550_v42, %v578_v9  ;;  %v575_v22 = vrot.slane %v550_v42, %v574_v12  ;;  %v583_v23 = vrot.slane %v550_v42, %v582_v13 }
 0x273   : > { %v946_v31 = vpop.f32.mrf.mxu0  ;;  %v989_v32 = vpop.f32.mrf.mxu1 }
 0x274   : > { %v947_v56 = vadd.f32 %v946_v31, %v555_v48  ;;  %v990_v57 = vadd.f32 %v989_v32, %v563_v49 }
 0x275   : > { %v948_v34 = vpop.f32.mrf.mxu0  ;;  %v991_v35 = vpop.f32.mrf.mxu1 }
 0x276   : > { %v949_v52 = vadd.f32 %v948_v34, %v559_v46  ;;  %v992_v53 = vadd.f32 %v991_v35, %v567_v47  ;;  %v1084_v0 = vmax.f32 %v947_v56, 0.0  ;;  %v1086_v1 = vmax.f32 %v990_v57, 0.0 }
 0x277   : > { %v950_v37 = vpop.f32.mrf.mxu0  ;;  %v993_v38 = vpop.f32.mrf.mxu1 }
 0x278   : > { %v951_v54 = vadd.f32 %v950_v37, %v555_v48  ;;  %v994_v55 = vadd.f32 %v993_v38, %v563_v49  ;;  %v1085_v60 = vmax.f32 %v949_v52, 0.0  ;;  %v1087_v61 = vmax.f32 %v992_v53, 0.0 }
 0x279   : > { %v952_v44 = vpop.f32.mrf.mxu0  ;;  %v995_v45 = vpop.f32.mrf.mxu1 }
 0x27a   : > { %v953_v50 = vadd.f32 %v952_v44, %v559_v46  ;;  %v996_v51 = vadd.f32 %v995_v45, %v567_v47  ;;  %v1092_v62 = vmax.f32 %v951_v54, 0.0  ;;  %v1094_v63 = vmax.f32 %v994_v55, 0.0 }
 0x27c   : > { %v1093_v58 = vmax.f32 %v953_v50, 0.0  ;;  %v1095_v59 = vmax.f32 %v996_v51, 0.0  ;;  %v1125_v4 = vmax.f32 %v1084_v0, %v1092_v62  ;;  %v1139_v5 = vmax.f32 %v1086_v1, %v1094_v63 }
 0x27e   : > { %v1132_v2 = vmax.f32 %v1085_v60, %v1093_v58  ;;  %v1146_v3 = vmax.f32 %v1087_v61, %v1095_v59  ;;  %v1126_v10 = vrot.slane %v1125_v4, 4  ;;  %v1140_v11 = vrot.slane %v1139_v5, 4 }
 0x27f   : > { %v1500_v58 = vmov 1966171168  }
 0x280   : > { %v1133_v6 = vrot.slane %v1132_v2, 4  ;;  %v1147_v7 = vrot.slane %v1146_v3, 4  ;;  %v1127_v18 = vmax.f32 %v1125_v4, %v1126_v10  ;;  %v1141_v19 = vmax.f32 %v1139_v5, %v1140_v11 }
 0x281   : > { %v1200_v59 = vunpack.c.l.s4 %v1500_v58 }
 0x282   : > { %v1134_v14 = vmax.f32 %v1132_v2, %v1133_v6  ;;  %v1148_v15 = vmax.f32 %v1146_v3, %v1147_v7  ;;  %v1128_v30 = vrot.slane %v1127_v18, 2  ;;  %v1142_v31 = vrot.slane %v1141_v19, 2 }
 0x283   : > { %v1201_v8 = vunpack.c.0.s8 %v1200_v59 }
 0x284   : > { %v1135_v24 = vrot.slane %v1134_v14, 2  ;;  %v1149_v25 = vrot.slane %v1148_v15, 2  ;;  %v1129_v49 = vmax.f32 %v1127_v18, %v1128_v30  ;;  %v1143_v50 = vmax.f32 %v1141_v19, %v1142_v31 }
 0x286   : > { %v1136_v39 = vmax.f32 %v1134_v14, %v1135_v24  ;;  %v1150_v40 = vmax.f32 %v1148_v15, %v1149_v25  ;;  %v1130_v1 = vrot.slane %v1129_v49, 1  ;;  %v1144_v2 = vrot.slane %v1143_v50, 1 }
 0x288   : > { %v1137_v57 = vrot.slane %v1136_v39, 1  ;;  %v1151_v60 = vrot.slane %v1150_v40, 1  ;;  %v1131_v14 = vmax.f32 %v1129_v49, %v1130_v1  ;;  %v1145_v15 = vmax.f32 %v1143_v50, %v1144_v2 }
 0x28a   : > { %v1138_v7 = vmax.f32 %v1136_v39, %v1137_v57  ;;  %v1152_v9 = vmax.f32 %v1150_v40, %v1151_v60 }
 0x293   : > { %v1032_v20 = vpop.f32.mrf.mxu0  ;;  %v1075_v21 = vpop.f32.mrf.mxu1 }
 0x294   : > { %v1033_v26 = vadd.f32 %v1032_v20, %v571_v16  ;;  %v1076_v27 = vadd.f32 %v1075_v21, %v579_v17  ;;  %v1195_v20 = vcombine.low %v1131_v14, %v1138_v7  ;;  %v1204_v21 = vsub.s32 %v1201_v8, %v1797_v36 }
 0x295   : > { %v1034_v28 = vpop.f32.mrf.mxu0  ;;  %v1077_v29 = vpop.f32.mrf.mxu1 }
 0x296   : > { %v1035_v32 = vadd.f32 %v1034_v28, %v575_v22  ;;  %v1078_v33 = vadd.f32 %v1077_v29, %v583_v23  ;;  %v1088_v41 = vmax.f32 %v1033_v26, 0.0  ;;  %v1090_v43 = vmax.f32 %v1076_v27, 0.0 }
 0x297   : > { %v1036_v34 = vpop.f32.mrf.mxu0  ;;  %v1079_v35 = vpop.f32.mrf.mxu1  ;;  %v1205_v29 = vrot.slane %v1195_v20, %v1204_v21 }
 0x298   : > { %v1037_v37 = vadd.f32 %v1036_v34, %v571_v16  ;;  %v1080_v38 = vadd.f32 %v1079_v35, %v579_v17  ;;  %v1089_v51 = vmax.f32 %v1035_v32, 0.0  ;;  %v1091_v52 = vmax.f32 %v1078_v33, 0.0 }
 0x299   : > { %v1038_v44 = vpop.f32.mrf.mxu0  ;;  %v1081_v42 = vpop.f32.mrf.mxu1 }
 0x29a   : > { %v1096_v45 = vmax.f32 %v1037_v37, 0.0  ;;  %v1098_v46 = vmax.f32 %v1080_v38, 0.0  ;;  %v1039_v47 = vadd.f32 %v1038_v44, %v575_v22  ;;  %v1082_v48 = vadd.f32 %v1081_v42, %v583_v23 }
 0x29b   : > { %v1196_v22 = vcombine.low %v1145_v15, %v1152_v9 }
 0x29c   : > { %v1153_v53 = vmax.f32 %v1088_v41, %v1096_v45  ;;  %v1167_v54 = vmax.f32 %v1090_v43, %v1098_v46  ;;  %v1097_v55 = vmax.f32 %v1039_v47, 0.0  ;;  %v1099_v56 = vmax.f32 %v1082_v48, 0.0 }
 0x29d   : > { %v1212_v30 = vrot.slane %v1196_v22, %v1204_v21 }
 0x29e   : > { %v1154_v61 = vrot.slane %v1153_v53, 4  ;;  %v1168_v62 = vrot.slane %v1167_v54, 4  ;;  %v1160_v63 = vmax.f32 %v1089_v51, %v1097_v55  ;;  %v1174_v0 = vmax.f32 %v1091_v52, %v1099_v56 }
 0x29f   : > { %v1227_v38 = vcombine.low %v1205_v29, %v1212_v30 }
 0x2a0   : > { %v1155_v3 = vmax.f32 %v1153_v53, %v1154_v61  ;;  %v1169_v4 = vmax.f32 %v1167_v54, %v1168_v62  ;;  %v1161_v5 = vrot.slane %v1160_v63, 4  ;;  %v1175_v6 = vrot.slane %v1174_v0, 4 }
 0x2a1   : > { %v1235_v41 = vrot.slane %v1227_v38, %v1204_v21 }
 0x2a2   : > { %v1156_v10 = vrot.slane %v1155_v3, 2  ;;  %v1170_v11 = vrot.slane %v1169_v4, 2  ;;  %v1162_v12 = vmax.f32 %v1160_v63, %v1161_v5  ;;  %v1176_v13 = vmax.f32 %v1174_v0, %v1175_v6 }
 0x2a4   : > { %v1157_v16 = vmax.f32 %v1155_v3, %v1156_v10  ;;  %v1171_v17 = vmax.f32 %v1169_v4, %v1170_v11  ;;  %v1163_v18 = vrot.slane %v1162_v12, 2  ;;  %v1177_v19 = vrot.slane %v1176_v13, 2 }
 0x2a6   : > { %v1158_v23 = vrot.slane %v1157_v16, 1  ;;  %v1172_v24 = vrot.slane %v1171_v17, 1  ;;  %v1164_v25 = vmax.f32 %v1162_v12, %v1163_v18  ;;  %v1178_v26 = vmax.f32 %v1176_v13, %v1177_v19 }
 0x2a8   : > { %v1165_v27 = vrot.slane %v1164_v25, 1  ;;  %v1179_v28 = vrot.slane %v1178_v26, 1  ;;  %v1159_v31 = vmax.f32 %v1157_v16, %v1158_v23  ;;  %v1173_v32 = vmax.f32 %v1171_v17, %v1172_v24 }
 0x2aa   : > { %v1166_v33 = vmax.f32 %v1164_v25, %v1165_v27  ;;  %v1180_v34 = vmax.f32 %v1178_v26, %v1179_v28 }
 0x2ac   : > { %v1197_v35 = vcombine.low %v1159_v31, %v1166_v33  ;;  %v1198_v37 = vcombine.low %v1173_v32, %v1180_v34 }
 0x2ae   : > { %v1219_v39 = vrot.slane %v1197_v35, %v1204_v21  ;;  %v1226_v40 = vrot.slane %v1198_v37, %v1204_v21 }
 0x2b0   : > { %v1228_v36 = vcombine.low %v1219_v39, %v1226_v40 }
 0x2b2   : > { %v1242_v43 = vrot.slane %v1228_v36, %v1204_v21 }
 0x2b4   : > { %v1243_v44 = vcombine.low %v1235_v41, %v1242_v43 }
 0x2b6   : > { %v1245_v42 = vmax.f32 %v1243_v44, 0.0 }
 0x2b8   : > { %1246 = vst [vmem:[%s304_s17] sm:$0xff] %v1245_v42 }
 0x2b9 PF: > { %s17_s26 = sadd.s32 1, %s1495_s26   ;;  %s1833_s24 = smov %s1491_s25 }
 0x2ba   : > { %p14_p5 = scmp.ge.s32.totalorder %s17_s26, 4   ;;  %s1834_s25 = smov %s1836_s27 }
 0x2bc   :  { %16 = sbr.rel (!%p14_p5) target bundleno = 2 (0x2), region = 82 }

// kernel: pointnet_segmentation_forward.12
= control target key start
LH: loop header
LB: loop body
LE: loop exit
PB: predicated region body
PF: predicated region fallthrough
CT: control target
= control target key end

     0   :  { %s1576_s24 = smov 0   ;;  %s1578_s25 = smov 0   ;;  %s1852_s0 = inlined_call_operand.vmem [shape: bf16[2,16,64], index: 0, kind: input, shape index: {}]   ;;  %s1853_s1 = inlined_call_operand.vmem [shape: bf16[2,64,64], index: 1, kind: input, shape index: {}]   ;;  %s1854_s2 = inlined_call_operand.vmem [shape: f32[1,64], index: 2, kind: input, shape index: {}]   ;;  %s1855_s3 = inlined_call_operand.vmem [shape: bf16[64,128], index: 3, kind: input, shape index: {}]   ;;  %s1856_s4 = inlined_call_operand.vmem [shape: f32[1,128], index: 4, kind: input, shape index: {}]   ;;  %s1857_s5 = inlined_call_operand.vmem [shape: bf16[128,1024], index: 5, kind: input, shape index: {}]   ;;  %s1858_s6 = inlined_call_operand.vmem [shape: f32[1,1024], index: 6, kind: input, shape index: {}]   ;;  %s1859_s7 = inlined_call_operand.vmem [shape: f32[2,1,1024], index: 7, kind: output, shape index: {}]  }
   0x1   :  { %s1580_s26 = smov 0  }
   0x2 LB: > { %s29_s27 = sadd.s32 1, %s1526_s25  ;;  %p1350_p0 = scmp.ge.s32.totalorder %s1530_s26, 1  ;;  %s1530_s26 = sphi %s1580_s26, %s17_s26   ;;  %s1526_s25 = sphi %s1578_s25, %s1861_s25   ;;  %s1522_s24 = sphi %s1576_s24, %s1860_s24  }
   0x3   : > { %p31_p1 = scmp.ge.s32.totalorder %s29_s27, 2  ;;  %p266_p2 = scmp.lt.s32.totalorder %s1530_s26, 3 }
   0x5   : > { %s1863_s27 = smov (%p31_p1, %s29_s27), 0  ;;  %p267_p3 = pnand %p1350_p0, %p266_p2 }
   0x6   : > { %p307_p4 = scmp.lt.s32.totalorder (!%p267_p3), %s1522_s24, 1 }
   0x7   : > { %270 = sbr.rel (%p267_p3) target bundleno = 699 (0x2bb), region = 48 }
   0xc   : > { %v1532_v0 = vmov 0.0   ;;  %vm1533_vm0 = vmmov 0   ;;  %v1504_v1 = vld [vmem:[%s1855_s3 + $0x18] sm:$0xff]   ;;  %s1865_s24 = smov (!%p307_p4, %s1522_s24), 1  ;;  %vm372_vm1 = vcmask 523264   ;;  %v1505_v7 = vld [vmem:[%s1855_s3 + $0x10] sm:$0xff]  }
   0xd   : > { %1447 = vmatprep.subr.bf16.mxu0 %v1532_v0  ;;  %1455 = vmatprep.mubr.msk.bf16.mxu0 %vm1533_vm0, %v1532_v0  ;;  %s1436_s30 = sshll.u32 %s1865_s24, 5  ;;  %s1435_s11 = sshll.u32 %s1865_s24, 3  ;;  %v1506_v8 = vld [vmem:[%s1855_s3 + $0x8] sm:$0xff]   ;;  %v1507_v9 = vld [vmem:[%s1855_s3] sm:$0xff]  }
   0xe   : > { %1459 = vmatprep.subr.bf16.mxu1 %v1532_v0  ;;  %1467 = vmatprep.mubr.msk.bf16.mxu1 %vm1533_vm0, %v1532_v0  ;;  %s320_s10 = scalar_lea.vmem %s1853_s1, %s1436_s30  ;;  %s314_s14 = scalar_lea.vmem %s1852_s0, %s1435_s11  ;;  %v562_v10 = vld [vmem:[%s1857_s5 + $0x1c0] sm:$0xff]  ;;  %v563_v12 = vld [vmem:[%s1857_s5 + $0x1c8] sm:$0xff] }
   0xf   : > { %1460 = vmatpush3.bf16.msra.mxu1 %v1504_v1  ;;  %v1499_v2 = vld [vmem:[%s320_s10 + $0x18] sm:$0xff]   ;;  %v1500_v3 = vld [vmem:[%s320_s10 + $0x10] sm:$0xff]   ;;  %v1501_v4 = vld [vmem:[%s320_s10 + $0x8] sm:$0xff]   ;;  %s324_s13 = scalar_lea.vmem %s1859_s7, %s1435_s11 }
  0x10   : > { %1461 = vmatprep.subr.bf16.mxu1 %v1532_v0  ;;  %1448 = vmatpush3.bf16.msra.mxu0 %v1499_v2  ;;  %v1502_v5 = vld [vmem:[%s320_s10] sm:$0xff]   ;;  %v567_v15 = vld [vmem:[%s1857_s5 + $0x1e8] sm:$0xff] }
  0x11   : > { %1449 = vmatprep.subr.bf16.mxu0 %v1532_v0  ;;  %v1503_v6 = vld [vmem:[%s314_s14] sm:$0xff]   ;;  %v1427_v18 = vcombine.low %v563_v12, %v567_v15  ;;  %v1428_v19 = vcombine.high %v563_v12, %v567_v15  ;;  %v555_v45 = vld [vmem:[%s1857_s5 + $0x188] sm:$0xff] }
  0x12   : > { %v566_v11 = vld [vmem:[%s1857_s5 + $0x1e0] sm:$0xff]  ;;  %v559_v46 = vld [vmem:[%s1857_s5 + $0x1a8] sm:$0xff] }
  0x13   : > { %1462 = vmatpush3.bf16.msra.mxu1 %v1505_v7  ;;  %v1425_v13 = vcombine.low %v562_v10, %v566_v11  ;;  %v1426_v14 = vcombine.high %v562_v10, %v566_v11  ;;  %v554_v16 = vld [vmem:[%s1857_s5 + $0x180] sm:$0xff]  ;;  %v1420_v50 = vcombine.high %v555_v45, %v559_v46  ;;  %v547_v51 = vld [vmem:[%s1857_s5 + $0x148] sm:$0xff]  ;;  %v1419_v53 = vcombine.low %v555_v45, %v559_v46  ;;  %v548_v45 = vld [vmem:[%s1857_s5 + $0x150] sm:$0xff] }
  0x14   : > { %1450 = vmatpush3.bf16.msra.mxu0 %v1500_v3  ;;  %1463 = vmatprep.subr.bf16.mxu1 %v1532_v0  ;;  %v558_v17 = vld [vmem:[%s1857_s5 + $0x1a0] sm:$0xff]  ;;  %v551_v52 = vld [vmem:[%s1857_s5 + $0x168] sm:$0xff]  ;;  %v552_v46 = vld [vmem:[%s1857_s5 + $0x170] sm:$0xff] }
  0x15   : > { %1451 = vmatprep.subr.bf16.mxu0 %v1532_v0  ;;  %v1418_v20 = vcombine.high %v554_v16, %v558_v17  ;;  %v1417_v21 = vcombine.low %v554_v16, %v558_v17  ;;  %v546_v22 = vld [vmem:[%s1857_s5 + $0x140] sm:$0xff]  ;;  %v1412_v54 = vcombine.high %v547_v51, %v551_v52  ;;  %v539_v55 = vld [vmem:[%s1857_s5 + $0x108] sm:$0xff]  ;;  %v1411_v57 = vcombine.low %v547_v51, %v551_v52 }
  0x16   : > { %v550_v23 = vld [vmem:[%s1857_s5 + $0x160] sm:$0xff]  ;;  %v543_v56 = vld [vmem:[%s1857_s5 + $0x128] sm:$0xff]  ;;  %v1414_v51 = vcombine.high %v548_v45, %v552_v46 }
  0x17   : > { %1464 = vmatpush3.bf16.msra.mxu1 %v1506_v8  ;;  %v1410_v24 = vcombine.high %v546_v22, %v550_v23  ;;  %v1409_v25 = vcombine.low %v546_v22, %v550_v23  ;;  %v538_v26 = vld [vmem:[%s1857_s5 + $0x100] sm:$0xff]  ;;  %v1404_v58 = vcombine.high %v539_v55, %v543_v56  ;;  %v531_v59 = vld [vmem:[%s1857_s5 + $0xc8] sm:$0xff]  ;;  %v1403_v61 = vcombine.low %v539_v55, %v543_v56  ;;  %v565_v22 = vld [vmem:[%s1857_s5 + $0x1d8] sm:$0xff] }
  0x18   : > { %1452 = vmatpush3.bf16.msra.mxu0 %v1501_v4  ;;  %1465 = vmatprep.subr.bf16.mxu1 %v1532_v0  ;;  %v542_v27 = vld [vmem:[%s1857_s5 + $0x120] sm:$0xff]  ;;  %v535_v60 = vld [vmem:[%s1857_s5 + $0xe8] sm:$0xff]  ;;  %v541_v55 = vld [vmem:[%s1857_s5 + $0x118] sm:$0xff] }
  0x19   : > { %1453 = vmatprep.subr.bf16.mxu0 %v1532_v0  ;;  %v1402_v28 = vcombine.high %v538_v26, %v542_v27  ;;  %v1401_v29 = vcombine.low %v538_v26, %v542_v27  ;;  %v530_v30 = vld [vmem:[%s1857_s5 + $0xc0] sm:$0xff]  ;;  %v1396_v62 = vcombine.high %v531_v59, %v535_v60  ;;  %v523_v63 = vld [vmem:[%s1857_s5 + $0x88] sm:$0xff]  ;;  %v1395_v1 = vcombine.low %v531_v59, %v535_v60  ;;  %v545_v56 = vld [vmem:[%s1857_s5 + $0x138] sm:$0xff] }
  0x1a   : > { %v534_v31 = vld [vmem:[%s1857_s5 + $0xe0] sm:$0xff]  ;;  %v527_v0 = vld [vmem:[%s1857_s5 + $0xa8] sm:$0xff]  ;;  %v1408_v60 = vcombine.high %v541_v55, %v545_v56 }
  0x1b   : > { %1466 = vmatpush3.bf16.msra.mxu1 %v1507_v9  ;;  %v1394_v32 = vcombine.high %v530_v30, %v534_v31  ;;  %v1393_v33 = vcombine.low %v530_v30, %v534_v31  ;;  %v522_v34 = vld [vmem:[%s1857_s5 + $0x80] sm:$0xff]  ;;  %v1388_v2 = vcombine.high %v523_v63, %v527_v0  ;;  %v1387_v3 = vcombine.low %v523_v63, %v527_v0  ;;  %v519_v8 = vld [vmem:[%s1857_s5 + $0x68] sm:$0xff]  ;;  %v533_v63 = vld [vmem:[%s1857_s5 + $0xd8] sm:$0xff] }
  0x1c   : > { %1454 = vmatpush3.bf16.msra.mxu0 %v1502_v5  ;;  %975 = vmatprep.subr.bf16.mxu1 %v1428_v19  ;;  %v526_v35 = vld [vmem:[%s1857_s5 + $0xa0] sm:$0xff]  ;;  %v511_v16 = vld [vmem:[%s1857_s5 + $0x28] sm:$0xff]  ;;  %v537_v0 = vld [vmem:[%s1857_s5 + $0xf8] sm:$0xff] }
  0x1d   : > { %932 = vmatprep.subr.bf16.mxu0 %v1426_v14  ;;  %v1386_v36 = vcombine.high %v522_v34, %v526_v35  ;;  %v1385_v37 = vcombine.low %v522_v34, %v526_v35  ;;  %v1356_v38 = vld [vmem:[%s1854_s2] ss:$0 sm:$0xff]  ;;  %v507_v14 = vld [vmem:[%s1857_s5 + $0x8] sm:$0xff]  ;;  %v556_v35 = vld [vmem:[%s1857_s5 + $0x190] sm:$0xff] }
  0x1e   : > { %v514_v4 = vld [vmem:[%s1857_s5 + $0x40] sm:$0xff]  ;;  %v1372_v19 = vcombine.high %v507_v14, %v511_v16 }
  0x1f   : > { %1456 = vmatmul.mubr.msk.bf16.vlgmr.msra.gmra.mxu0 %vm372_vm1, %v1503_v6  ;;  %v518_v5 = vld [vmem:[%s1857_s5 + $0x60] sm:$0xff]  ;;  %v515_v6 = vld [vmem:[%s1857_s5 + $0x48] sm:$0xff] }
  0x20   : > { %933 = vmatpush1.bf16.msra.mxu0 %v1425_v13  ;;  %v1378_v7 = vcombine.high %v514_v4, %v518_v5  ;;  %v1377_v9 = vcombine.low %v514_v4, %v518_v5  ;;  %v1379_v10 = vcombine.low %v515_v6, %v519_v8  ;;  %v1380_v11 = vcombine.high %v515_v6, %v519_v8  ;;  %v506_v12 = vld [vmem:[%s1857_s5] sm:$0xff]  ;;  %v524_v5 = vld [vmem:[%s1857_s5 + $0x90] sm:$0xff]  ;;  %v529_v8 = vld [vmem:[%s1857_s5 + $0xb8] sm:$0xff] }
  0x21   : > { %934 = vmatprep.subr.bf16.mxu0 %v1418_v20  ;;  %v510_v13 = vld [vmem:[%s1857_s5 + $0x20] sm:$0xff]  ;;  %v564_v20 = vld [vmem:[%s1857_s5 + $0x1d0] sm:$0xff]  ;;  %v1400_v4 = vcombine.high %v533_v63, %v537_v0 }
  0x22   : > { %v1370_v15 = vcombine.high %v506_v12, %v510_v13  ;;  %v1369_v17 = vcombine.low %v506_v12, %v510_v13  ;;  %v528_v6 = vld [vmem:[%s1857_s5 + $0xb0] sm:$0xff] }
  0x23   : > { %v516_v13 = vld [vmem:[%s1857_s5 + $0x50] sm:$0xff] }
  0x24   : > { %935 = vmatpush1.bf16.msra.mxu0 %v1417_v21  ;;  %v568_v21 = vld [vmem:[%s1857_s5 + $0x1f0] sm:$0xff] }
  0x25   : > { %936 = vmatprep.subr.bf16.mxu0 %v1410_v24  ;;  %v1430_v23 = vcombine.high %v564_v20, %v568_v21  ;;  %v569_v24 = vld [vmem:[%s1857_s5 + $0x1f8] sm:$0xff] }
  0x26   : > { %v1431_v26 = vcombine.low %v565_v22, %v569_v24  ;;  %v1432_v27 = vcombine.high %v565_v22, %v569_v24  ;;  %v512_v22 = vld [vmem:[%s1857_s5 + $0x30] sm:$0xff]  ;;  %v513_v24 = vld [vmem:[%s1857_s5 + $0x38] sm:$0xff] }
  0x28   : > { %937 = vmatpush1.bf16.msra.mxu0 %v1409_v25  ;;  %v1429_v25 = vcombine.low %v564_v20, %v568_v21  ;;  %v508_v21 = vld [vmem:[%s1857_s5 + $0x10] sm:$0xff] }
  0x29   : > { %938 = vmatprep.subr.bf16.mxu0 %v1402_v28  ;;  %v1534_v28 = vmov 0  }
  0x2a   : > { %964 = vmatprep.mubr.bf16.mxu0 %v1534_v28 }
  0x2c   : > { %939 = vmatpush1.bf16.msra.mxu0 %v1401_v29  ;;  %v1363_v29 = vld [vmem:[%s1856_s4] ss:$0 sm:$0xff] }
  0x2d   : > { %940 = vmatprep.subr.bf16.mxu0 %v1394_v32 }
  0x30   : > { %941 = vmatpush1.bf16.msra.mxu0 %v1393_v33 }
  0x31   : > { %942 = vmatprep.subr.bf16.mxu0 %v1386_v36 }
  0x34   : > { %943 = vmatpush1.bf16.msra.mxu0 %v1385_v37  ;;  %v560_v37 = vld [vmem:[%s1857_s5 + $0x1b0] sm:$0xff] }
  0x35   : > { %944 = vmatprep.subr.bf16.mxu0 %v1378_v7  ;;  %v525_v7 = vld [vmem:[%s1857_s5 + $0x98] sm:$0xff] }
  0x36   : > { %v1392_v12 = vcombine.high %v525_v7, %v529_v8 }
  0x38   : > { %945 = vmatpush1.bf16.msra.mxu0 %v1377_v9 }
  0x39   : > { %946 = vmatprep.subr.bf16.mxu0 %v1370_v15  ;;  %v517_v15 = vld [vmem:[%s1857_s5 + $0x58] sm:$0xff] }
  0x3c   : > { %947 = vmatpush1.bf16.msra.mxu0 %v1369_v17  ;;  %v1389_v17 = vcombine.low %v524_v5, %v528_v6 }
  0x3d   : > { %1018 = vmatprep.subr.bf16.mxu0 %v1430_v23  ;;  %v509_v23 = vld [vmem:[%s1857_s5 + $0x18] sm:$0xff] }
  0xdf   : > { %v410_v39 = vpop.f32.mrf.mxu0 }
  0xe0   : > { %v411_v41 = vadd.f32 %v1356_v38, %v410_v39  ;;  %v561_v39 = vld [vmem:[%s1857_s5 + $0x1b8] sm:$0xff] }
  0xe1   : > { %v1457_v40 = vpop.f32.mrf.mxu0 }
  0xe2   : > { %v417_v47 = vmax.f32 %v411_v41, 0.0 }
  0xe3   : > { %v413_v42 = vpop.f32.mrf.mxu0 }
  0xe4   : > { %v414_v43 = vadd.f32 %v1356_v38, %v413_v42  ;;  %v557_v38 = vld [vmem:[%s1857_s5 + $0x198] sm:$0xff] }
  0xe5   : > { %v1458_v44 = vpop.f32.mrf.mxu0 }
  0xe6   : > { %v418_v48 = vmax.f32 %v414_v43, 0.0  ;;  %v1422_v43 = vcombine.high %v556_v35, %v560_v37  ;;  %v1424_v44 = vcombine.high %v557_v38, %v561_v39 }
  0xe8   : > { %v419_v49 = vpack.c.bf16 %v418_v48, %v417_v47  ;;  %v549_v47 = vld [vmem:[%s1857_s5 + $0x158] sm:$0xff] }
  0xe9   : > { %v553_v48 = vld [vmem:[%s1857_s5 + $0x178] sm:$0xff] }
  0xea   : > { %1468 = vmatmul.mubr.msk.bf16.vlgmr.msra.gmra.mxu1 %vm372_vm1, %v419_v49  ;;  %v1421_v49 = vcombine.low %v556_v35, %v560_v37  ;;  %v1416_v52 = vcombine.high %v549_v47, %v553_v48 }
  0xeb   : > { %976 = vmatpush1.bf16.msra.mxu1 %v1427_v18  ;;  %v1371_v18 = vcombine.low %v507_v14, %v511_v16  ;;  %1007 = vmatprep.mubr.bf16.mxu1 %v1534_v28  ;;  %v520_v14 = vld [vmem:[%s1857_s5 + $0x70] sm:$0xff]  ;;  %v521_v16 = vld [vmem:[%s1857_s5 + $0x78] sm:$0xff] }
  0xec   : > { %977 = vmatprep.subr.bf16.mxu1 %v1420_v50  ;;  %v1423_v50 = vcombine.low %v557_v38, %v561_v39  ;;  %v1384_v20 = vcombine.high %v517_v15, %v521_v16 }
  0xef   : > { %978 = vmatpush1.bf16.msra.mxu1 %v1419_v53  ;;  %v540_v53 = vld [vmem:[%s1857_s5 + $0x110] sm:$0xff] }
  0xf0   : > { %979 = vmatprep.subr.bf16.mxu1 %v1412_v54  ;;  %v544_v54 = vld [vmem:[%s1857_s5 + $0x130] sm:$0xff] }
  0xf1   : > { %v1406_v59 = vcombine.high %v540_v53, %v544_v54 }
  0xf3   : > { %980 = vmatpush1.bf16.msra.mxu1 %v1411_v57  ;;  %v1413_v57 = vcombine.low %v548_v45, %v552_v46 }
  0xf4   : > { %981 = vmatprep.subr.bf16.mxu1 %v1404_v58  ;;  %v1415_v58 = vcombine.low %v549_v47, %v553_v48 }
  0xf7   : > { %982 = vmatpush1.bf16.msra.mxu1 %v1403_v61  ;;  %v532_v61 = vld [vmem:[%s1857_s5 + $0xd0] sm:$0xff] }
  0xf8   : > { %983 = vmatprep.subr.bf16.mxu1 %v1396_v62  ;;  %v536_v62 = vld [vmem:[%s1857_s5 + $0xf0] sm:$0xff] }
  0xf9   : > { %v1397_v9 = vcombine.low %v532_v61, %v536_v62 }
  0xfb   : > { %984 = vmatpush1.bf16.msra.mxu1 %v1395_v1  ;;  %v1405_v1 = vcombine.low %v540_v53, %v544_v54 }
  0xfc   : > { %985 = vmatprep.subr.bf16.mxu1 %v1388_v2  ;;  %v1407_v2 = vcombine.low %v541_v55, %v545_v56 }
  0xff   : > { %986 = vmatpush1.bf16.msra.mxu1 %v1387_v3  ;;  %v1398_v3 = vcombine.high %v532_v61, %v536_v62 }
 0x100   : > { %987 = vmatprep.subr.bf16.mxu1 %v1380_v11  ;;  %v1390_v11 = vcombine.high %v524_v5, %v528_v6 }
 0x103   : > { %988 = vmatpush1.bf16.msra.mxu1 %v1379_v10  ;;  %v1399_v10 = vcombine.low %v533_v63, %v537_v0 }
 0x104   : > { %989 = vmatprep.subr.bf16.mxu1 %v1372_v19  ;;  %v1382_v19 = vcombine.high %v516_v13, %v520_v14 }
 0x107   : > { %990 = vmatpush1.bf16.msra.mxu1 %v1371_v18  ;;  %v1391_v18 = vcombine.low %v525_v7, %v529_v8 }
 0x108   : > { %1061 = vmatprep.subr.bf16.mxu1 %v1432_v27  ;;  %v1374_v27 = vcombine.high %v508_v21, %v512_v22 }
 0x1aa   : > { %v496_v30 = vpop.f32.mrf.mxu1 }
 0x1ab   : > { %v497_v32 = vadd.f32 %v1363_v29, %v496_v30  ;;  %v1375_v30 = vcombine.low %v509_v23, %v513_v24 }
 0x1ac   : > { %v1469_v31 = vpop.f32.mrf.mxu1 }
 0x1ad   : > { %v503_v40 = vmax.f32 %v497_v32, 0.0 }
 0x1ae   : > { %v499_v33 = vpop.f32.mrf.mxu1 }
 0x1af   : > { %v500_v34 = vadd.f32 %v1363_v29, %v499_v33  ;;  %v1373_v29 = vcombine.low %v508_v21, %v512_v22  ;;  %v572_v33 = vlaneseq }
 0x1b0   : > { %v1470_v36 = vpop.f32.mrf.mxu1 }
 0x1b1   : > { %v504_v41 = vmax.f32 %v500_v34, 0.0  ;;  %v1824_v36 = vshrl.u32 %v572_v33, 7 }
 0x1b3   : > { %v1746_v42 = vpack.c.bf16 %v504_v41, %v503_v40  ;;  %v578_v39 = vsub.s32 1, %v1824_v36  ;;  %v586_v40 = vsub.s32 3, %v1824_v36  ;;  %v574_v41 = vsub.s32 0, %v1824_v36 }
 0x1b4   : > { %v590_v8 = vsub.s32 4, %v1824_v36 }
 0x1b5   : > { %965 = vmatmul.mubr.bf16.vlgmr.msra.gmra.mxu0 %v1746_v42  ;;  %1008 = vmatmul.mubr.bf16.vlgmr.msra.gmra.mxu1 %v1746_v42 }
 0x1b6   : > { %1019 = vmatpush1.bf16.msra.mxu0 %v1429_v25  ;;  %1062 = vmatpush1.bf16.msra.mxu1 %v1431_v26  ;;  %v1381_v25 = vcombine.low %v516_v13, %v520_v14  ;;  %v1383_v26 = vcombine.low %v517_v15, %v521_v16  ;;  %v602_v13 = vsub.s32 7, %v1824_v36 }
 0x1b7   : > { %1020 = vmatprep.subr.bf16.mxu0 %v1422_v43  ;;  %1063 = vmatprep.subr.bf16.mxu1 %v1424_v44  ;;  %v582_v43 = vsub.s32 2, %v1824_v36 }
 0x1b8   : > { %1050 = vmatprep.mubr.bf16.mxu0 %v1534_v28  ;;  %1093 = vmatprep.mubr.bf16.mxu1 %v1534_v28  ;;  %v1376_v28 = vcombine.high %v509_v23, %v513_v24 }
 0x1ba   : > { %1021 = vmatpush1.bf16.msra.mxu0 %v1421_v49  ;;  %1064 = vmatpush1.bf16.msra.mxu1 %v1423_v50 }
 0x1bb   : > { %1022 = vmatprep.subr.bf16.mxu0 %v1414_v51  ;;  %1065 = vmatprep.subr.bf16.mxu1 %v1416_v52 }
 0x1be   : > { %1023 = vmatpush1.bf16.msra.mxu0 %v1413_v57  ;;  %1066 = vmatpush1.bf16.msra.mxu1 %v1415_v58 }
 0x1bf   : > { %1024 = vmatprep.subr.bf16.mxu0 %v1406_v59  ;;  %1067 = vmatprep.subr.bf16.mxu1 %v1408_v60 }
 0x1c2   : > { %1025 = vmatpush1.bf16.msra.mxu0 %v1405_v1  ;;  %1068 = vmatpush1.bf16.msra.mxu1 %v1407_v2 }
 0x1c3   : > { %1026 = vmatprep.subr.bf16.mxu0 %v1398_v3  ;;  %1069 = vmatprep.subr.bf16.mxu1 %v1400_v4 }
 0x1c6   : > { %1027 = vmatpush1.bf16.msra.mxu0 %v1397_v9  ;;  %1070 = vmatpush1.bf16.msra.mxu1 %v1399_v10  ;;  %v598_v9 = vsub.s32 6, %v1824_v36 }
 0x1c7   : > { %1028 = vmatprep.subr.bf16.mxu0 %v1390_v11  ;;  %1071 = vmatprep.subr.bf16.mxu1 %v1392_v12  ;;  %v594_v12 = vsub.s32 5, %v1824_v36 }
 0x1ca   : > { %1029 = vmatpush1.bf16.msra.mxu0 %v1389_v17  ;;  %1072 = vmatpush1.bf16.msra.mxu1 %v1391_v18 }
 0x1cb   : > { %1030 = vmatprep.subr.bf16.mxu0 %v1382_v19  ;;  %1073 = vmatprep.subr.bf16.mxu1 %v1384_v20 }
 0x1ce   : > { %1031 = vmatpush1.bf16.msra.mxu0 %v1381_v25  ;;  %1074 = vmatpush1.bf16.msra.mxu1 %v1383_v26 }
 0x1cf   : > { %1032 = vmatprep.subr.bf16.mxu0 %v1374_v27  ;;  %1075 = vmatprep.subr.bf16.mxu1 %v1376_v28 }
 0x1d2   : > { %1033 = vmatpush1.bf16.msra.mxu0 %v1373_v29  ;;  %1076 = vmatpush1.bf16.msra.mxu1 %v1375_v30 }
 0x1d5   : > { %1051 = vmatmul.mubr.bf16.vlgmr.msra.gmra.mxu0 %v1746_v42  ;;  %1094 = vmatmul.mubr.bf16.vlgmr.msra.gmra.mxu1 %v1746_v42  ;;  %v570_v42 = vld [vmem:[%s1858_s6] sm:$0xff] }
 0x1d6   : > { %v579_v46 = vrot.slane %v570_v42, %v578_v39  ;;  %v587_v47 = vrot.slane %v570_v42, %v586_v40  ;;  %v575_v48 = vrot.slane %v570_v42, %v574_v41  ;;  %v583_v49 = vrot.slane %v570_v42, %v582_v43 }
 0x1d7   : > { %v591_v16 = vrot.slane %v570_v42, %v590_v8  ;;  %v599_v17 = vrot.slane %v570_v42, %v598_v9  ;;  %v595_v22 = vrot.slane %v570_v42, %v594_v12  ;;  %v603_v23 = vrot.slane %v570_v42, %v602_v13 }
 0x275   : > { %v966_v31 = vpop.f32.mrf.mxu0  ;;  %v1009_v32 = vpop.f32.mrf.mxu1 }
 0x276   : > { %v967_v56 = vadd.f32 %v966_v31, %v575_v48  ;;  %v1010_v57 = vadd.f32 %v1009_v32, %v583_v49 }
 0x277   : > { %v968_v34 = vpop.f32.mrf.mxu0  ;;  %v1011_v35 = vpop.f32.mrf.mxu1 }
 0x278   : > { %v969_v52 = vadd.f32 %v968_v34, %v579_v46  ;;  %v1012_v53 = vadd.f32 %v1011_v35, %v587_v47  ;;  %v1104_v0 = vmax.f32 %v967_v56, 0.0  ;;  %v1106_v1 = vmax.f32 %v1010_v57, 0.0 }
 0x279   : > { %v970_v37 = vpop.f32.mrf.mxu0  ;;  %v1013_v38 = vpop.f32.mrf.mxu1 }
 0x27a   : > { %v971_v54 = vadd.f32 %v970_v37, %v575_v48  ;;  %v1014_v55 = vadd.f32 %v1013_v38, %v583_v49  ;;  %v1105_v60 = vmax.f32 %v969_v52, 0.0  ;;  %v1107_v61 = vmax.f32 %v1012_v53, 0.0 }
 0x27b   : > { %v972_v44 = vpop.f32.mrf.mxu0  ;;  %v1015_v45 = vpop.f32.mrf.mxu1 }
 0x27c   : > { %v973_v50 = vadd.f32 %v972_v44, %v579_v46  ;;  %v1016_v51 = vadd.f32 %v1015_v45, %v587_v47  ;;  %v1112_v62 = vmax.f32 %v971_v54, 0.0  ;;  %v1114_v63 = vmax.f32 %v1014_v55, 0.0 }
 0x27e   : > { %v1113_v58 = vmax.f32 %v973_v50, 0.0  ;;  %v1115_v59 = vmax.f32 %v1016_v51, 0.0  ;;  %v1145_v4 = vmax.f32 %v1104_v0, %v1112_v62  ;;  %v1159_v5 = vmax.f32 %v1106_v1, %v1114_v63 }
 0x280   : > { %v1152_v2 = vmax.f32 %v1105_v60, %v1113_v58  ;;  %v1166_v3 = vmax.f32 %v1107_v61, %v1115_v59  ;;  %v1146_v10 = vrot.slane %v1145_v4, 4  ;;  %v1160_v11 = vrot.slane %v1159_v5, 4 }
 0x281   : > { %v1535_v58 = vmov 1966171168  }
 0x282   : > { %v1153_v6 = vrot.slane %v1152_v2, 4  ;;  %v1167_v7 = vrot.slane %v1166_v3, 4  ;;  %v1147_v18 = vmax.f32 %v1145_v4, %v1146_v10  ;;  %v1161_v19 = vmax.f32 %v1159_v5, %v1160_v11 }
 0x283   : > { %v1220_v59 = vunpack.c.l.s4 %v1535_v58 }
 0x284   : > { %v1154_v14 = vmax.f32 %v1152_v2, %v1153_v6  ;;  %v1168_v15 = vmax.f32 %v1166_v3, %v1167_v7  ;;  %v1148_v30 = vrot.slane %v1147_v18, 2  ;;  %v1162_v31 = vrot.slane %v1161_v19, 2 }
 0x285   : > { %v1221_v8 = vunpack.c.0.s8 %v1220_v59 }
 0x286   : > { %v1155_v24 = vrot.slane %v1154_v14, 2  ;;  %v1169_v25 = vrot.slane %v1168_v15, 2  ;;  %v1149_v49 = vmax.f32 %v1147_v18, %v1148_v30  ;;  %v1163_v50 = vmax.f32 %v1161_v19, %v1162_v31 }
 0x288   : > { %v1156_v39 = vmax.f32 %v1154_v14, %v1155_v24  ;;  %v1170_v40 = vmax.f32 %v1168_v15, %v1169_v25  ;;  %v1150_v1 = vrot.slane %v1149_v49, 1  ;;  %v1164_v2 = vrot.slane %v1163_v50, 1 }
 0x28a   : > { %v1157_v57 = vrot.slane %v1156_v39, 1  ;;  %v1171_v60 = vrot.slane %v1170_v40, 1  ;;  %v1151_v14 = vmax.f32 %v1149_v49, %v1150_v1  ;;  %v1165_v15 = vmax.f32 %v1163_v50, %v1164_v2 }
 0x28c   : > { %v1158_v7 = vmax.f32 %v1156_v39, %v1157_v57  ;;  %v1172_v9 = vmax.f32 %v1170_v40, %v1171_v60 }
 0x295   : > { %v1052_v20 = vpop.f32.mrf.mxu0  ;;  %v1095_v21 = vpop.f32.mrf.mxu1 }
 0x296   : > { %v1053_v26 = vadd.f32 %v1052_v20, %v591_v16  ;;  %v1096_v27 = vadd.f32 %v1095_v21, %v599_v17  ;;  %v1215_v20 = vcombine.low %v1151_v14, %v1158_v7  ;;  %v1224_v21 = vsub.s32 %v1221_v8, %v1824_v36 }
 0x297   : > { %v1054_v28 = vpop.f32.mrf.mxu0  ;;  %v1097_v29 = vpop.f32.mrf.mxu1 }
 0x298   : > { %v1055_v32 = vadd.f32 %v1054_v28, %v595_v22  ;;  %v1098_v33 = vadd.f32 %v1097_v29, %v603_v23  ;;  %v1108_v41 = vmax.f32 %v1053_v26, 0.0  ;;  %v1110_v43 = vmax.f32 %v1096_v27, 0.0 }
 0x299   : > { %v1056_v34 = vpop.f32.mrf.mxu0  ;;  %v1099_v35 = vpop.f32.mrf.mxu1  ;;  %v1225_v29 = vrot.slane %v1215_v20, %v1224_v21 }
 0x29a   : > { %v1057_v37 = vadd.f32 %v1056_v34, %v591_v16  ;;  %v1100_v38 = vadd.f32 %v1099_v35, %v599_v17  ;;  %v1109_v51 = vmax.f32 %v1055_v32, 0.0  ;;  %v1111_v52 = vmax.f32 %v1098_v33, 0.0 }
 0x29b   : > { %v1058_v44 = vpop.f32.mrf.mxu0  ;;  %v1101_v42 = vpop.f32.mrf.mxu1 }
 0x29c   : > { %v1116_v45 = vmax.f32 %v1057_v37, 0.0  ;;  %v1118_v46 = vmax.f32 %v1100_v38, 0.0  ;;  %v1059_v47 = vadd.f32 %v1058_v44, %v595_v22  ;;  %v1102_v48 = vadd.f32 %v1101_v42, %v603_v23 }
 0x29d   : > { %v1216_v22 = vcombine.low %v1165_v15, %v1172_v9 }
 0x29e   : > { %v1173_v53 = vmax.f32 %v1108_v41, %v1116_v45  ;;  %v1187_v54 = vmax.f32 %v1110_v43, %v1118_v46  ;;  %v1117_v55 = vmax.f32 %v1059_v47, 0.0  ;;  %v1119_v56 = vmax.f32 %v1102_v48, 0.0 }
 0x29f   : > { %v1232_v30 = vrot.slane %v1216_v22, %v1224_v21 }
 0x2a0   : > { %v1174_v61 = vrot.slane %v1173_v53, 4  ;;  %v1188_v62 = vrot.slane %v1187_v54, 4  ;;  %v1180_v63 = vmax.f32 %v1109_v51, %v1117_v55  ;;  %v1194_v0 = vmax.f32 %v1111_v52, %v1119_v56 }
 0x2a1   : > { %v1247_v38 = vcombine.low %v1225_v29, %v1232_v30 }
 0x2a2   : > { %v1175_v3 = vmax.f32 %v1173_v53, %v1174_v61  ;;  %v1189_v4 = vmax.f32 %v1187_v54, %v1188_v62  ;;  %v1181_v5 = vrot.slane %v1180_v63, 4  ;;  %v1195_v6 = vrot.slane %v1194_v0, 4 }
 0x2a3   : > { %v1255_v41 = vrot.slane %v1247_v38, %v1224_v21 }
 0x2a4   : > { %v1176_v10 = vrot.slane %v1175_v3, 2  ;;  %v1190_v11 = vrot.slane %v1189_v4, 2  ;;  %v1182_v12 = vmax.f32 %v1180_v63, %v1181_v5  ;;  %v1196_v13 = vmax.f32 %v1194_v0, %v1195_v6 }
 0x2a6   : > { %v1177_v16 = vmax.f32 %v1175_v3, %v1176_v10  ;;  %v1191_v17 = vmax.f32 %v1189_v4, %v1190_v11  ;;  %v1183_v18 = vrot.slane %v1182_v12, 2  ;;  %v1197_v19 = vrot.slane %v1196_v13, 2 }
 0x2a8   : > { %v1178_v23 = vrot.slane %v1177_v16, 1  ;;  %v1192_v24 = vrot.slane %v1191_v17, 1  ;;  %v1184_v25 = vmax.f32 %v1182_v12, %v1183_v18  ;;  %v1198_v26 = vmax.f32 %v1196_v13, %v1197_v19 }
 0x2aa   : > { %v1185_v27 = vrot.slane %v1184_v25, 1  ;;  %v1199_v28 = vrot.slane %v1198_v26, 1  ;;  %v1179_v31 = vmax.f32 %v1177_v16, %v1178_v23  ;;  %v1193_v32 = vmax.f32 %v1191_v17, %v1192_v24 }
 0x2ac   : > { %v1186_v33 = vmax.f32 %v1184_v25, %v1185_v27  ;;  %v1200_v34 = vmax.f32 %v1198_v26, %v1199_v28 }
 0x2ae   : > { %v1217_v35 = vcombine.low %v1179_v31, %v1186_v33  ;;  %v1218_v37 = vcombine.low %v1193_v32, %v1200_v34 }
 0x2b0   : > { %v1239_v39 = vrot.slane %v1217_v35, %v1224_v21  ;;  %v1246_v40 = vrot.slane %v1218_v37, %v1224_v21 }
 0x2b2   : > { %v1248_v36 = vcombine.low %v1239_v39, %v1246_v40 }
 0x2b4   : > { %v1262_v43 = vrot.slane %v1248_v36, %v1224_v21 }
 0x2b6   : > { %v1263_v44 = vcombine.low %v1255_v41, %v1262_v43 }
 0x2b8   : > { %v1265_v42 = vmax.f32 %v1263_v44, 0.0 }
 0x2ba   : > { %1266 = vst [vmem:[%s324_s13] sm:$0xff] %v1265_v42 }
 0x2bb PF: > { %s17_s26 = sadd.s32 1, %s1530_s26   ;;  %s1860_s24 = smov %s1526_s25 }
 0x2bc   : > { %p14_p5 = scmp.ge.s32.totalorder %s17_s26, 4   ;;  %s1861_s25 = smov %s1863_s27 }
 0x2be   :  { %16 = sbr.rel (!%p14_p5) target bundleno = 2 (0x2), region = 85 }

// kernel: pointnet_segmentation_forward.13
= control target key start
LH: loop header
LB: loop body
LE: loop exit
PB: predicated region body
PF: predicated region fallthrough
CT: control target
= control target key end

     0   :  { %s1988_s30 = smov 0   ;;  %s1990_s10 = smov 0   ;;  %s2326_s0 = inlined_call_operand.vmem [shape: bf16[2,16,64], index: 0, kind: input, shape index: {}]   ;;  %s2327_s1 = inlined_call_operand.vmem [shape: bf16[2,64,512], index: 1, kind: input, shape index: {}]   ;;  %s2328_s2 = inlined_call_operand.vmem [shape: f32[2,1,512], index: 2, kind: input, shape index: {}]   ;;  %s2329_s3 = inlined_call_operand.vmem [shape: bf16[512,256], index: 3, kind: input, shape index: {}]   ;;  %s2330_s4 = inlined_call_operand.vmem [shape: f32[1,256], index: 4, kind: input, shape index: {}]   ;;  %s2331_s5 = inlined_call_operand.vmem [shape: bf16[256,128], index: 5, kind: input, shape index: {}]   ;;  %s2332_s6 = inlined_call_operand.vmem [shape: f32[1,128], index: 6, kind: input, shape index: {}]   ;;  %s2333_s7 = inlined_call_operand.vmem [shape: bf16[128,2], index: 7, kind: input, shape index: {}]   ;;  %s2334_s8 = inlined_call_operand.vmem [shape: f32[1,2], index: 8, kind: input, shape index: {}]   ;;  %s2335_s9 = inlined_call_operand.vmem [shape: f32[2,16,2], index: 9, kind: output, shape index: {}]  }
   0x1   :  { %s1992_s11 = smov 0  }
   0x2 LB: > { %s31_s12 = sadd.s32 1, %s1929_s10  ;;  %p1558_p0 = scmp.ge.s32.totalorder %s1933_s11, 1  ;;  %s1933_s11 = sphi %s1992_s11, %s19_s11   ;;  %s1929_s10 = sphi %s1990_s10, %s2337_s10   ;;  %s1925_s30 = sphi %s1988_s30, %s2336_s30  }
   0x3   : > { %p33_p1 = scmp.ge.s32.totalorder %s31_s12, 2  ;;  %p327_p2 = scmp.lt.s32.totalorder %s1933_s11, 3 }
   0x5   : > { %s2339_s12 = smov (%p33_p1, %s31_s12), 0  ;;  %p328_p3 = pnand %p1558_p0, %p327_p2 }
   0x6   : > { %p381_p4 = scmp.lt.s32.totalorder (!%p328_p3), %s1925_s30, 1 }
   0x7   : > { %331 = sbr.rel (%p328_p3) target bundleno = 1167 (0x48f), region = 56 }
   0xc   : > { %v1935_v0 = vmov 0   ;;  %s2341_s30 = smov (!%p381_p4, %s1925_s30), 1  ;;  %v1785_v17 = vld [vmem:[%s2329_s3 + $0x74] ss:$8 sps:$4 sm:$0xff]   ;;  %v1783_v19 = vld [vmem:[%s2329_s3 + $0x70] ss:$8 sps:$4 sm:$0xff]  }
   0xd   : > { %571 = vmatprep.mubr.bf16.mxu0 %v1935_v0  ;;  %614 = vmatprep.mubr.bf16.mxu1 %v1935_v0  ;;  %s1678_s13 = sshll.u32 %s2341_s30, 7  ;;  %s1677_s17 = sshll.u32 %s2341_s30, 3  ;;  %v1788_v18 = vld [vmem:[%s2329_s3 + $0x174] ss:$8 sps:$4 sm:$0xff]   ;;  %vm535_vm0 = vcmask 523264   ;;  %vm1937_vm1 = vmmov 0  }
   0xe   : > { %s394_s16 = scalar_lea.vmem %s2327_s1, %s1678_s13  ;;  %s388_s20 = scalar_lea.vmem %s2326_s0, %s1677_s17  ;;  %v1786_v21 = vld [vmem:[%s2329_s3 + $0x170] ss:$8 sps:$4 sm:$0xff]   ;;  %v1791_v22 = vld [vmem:[%s2329_s3 + $0x64] ss:$8 sps:$4 sm:$0xff]   ;;  %v1789_v24 = vld [vmem:[%s2329_s3 + $0x60] ss:$8 sps:$4 sm:$0xff]  }
   0xf   : > { %v1758_v1 = vld [vmem:[%s394_s16 + $0x64] ss:$16 sps:$4 sm:$0xff]   ;;  %v1760_v2 = vld [vmem:[%s394_s16 + $0x6c] ss:$16 sps:$4 sm:$0xff]   ;;  %v1762_v3 = vld [vmem:[%s394_s16 + $0x60] ss:$16 sps:$4 sm:$0xff]  }
  0x10   : > { %547 = vmatprep.subr.bf16.mxu0 %v1758_v1  ;;  %v1763_v4 = vld [vmem:[%s394_s16 + $0x68] ss:$16 sps:$4 sm:$0xff]   ;;  %590 = vmatprep.subr.bf16.mxu1 %v1760_v2  ;;  %v1764_v5 = vld [vmem:[%s394_s16 + $0x44] ss:$16 sps:$4 sm:$0xff]   ;;  %v1766_v6 = vld [vmem:[%s394_s16 + $0x4c] ss:$16 sps:$4 sm:$0xff]  }
  0x11   : > { %548 = vmatpush1.bf16.msra.mxu0 %v1762_v3  ;;  %591 = vmatpush1.bf16.msra.mxu1 %v1763_v4  ;;  %v1768_v7 = vld [vmem:[%s394_s16 + $0x40] ss:$16 sps:$4 sm:$0xff]   ;;  %v1769_v8 = vld [vmem:[%s394_s16 + $0x48] ss:$16 sps:$4 sm:$0xff]   ;;  %v1770_v9 = vld [vmem:[%s394_s16 + $0x24] ss:$16 sps:$4 sm:$0xff]  }
  0x12   : > { %549 = vmatprep.subr.bf16.mxu0 %v1764_v5  ;;  %592 = vmatprep.subr.bf16.mxu1 %v1766_v6  ;;  %v1772_v10 = vld [vmem:[%s394_s16 + $0x2c] ss:$16 sps:$4 sm:$0xff]   ;;  %v1774_v11 = vld [vmem:[%s394_s16 + $0x20] ss:$16 sps:$4 sm:$0xff]   ;;  %v1775_v12 = vld [vmem:[%s394_s16 + $0x28] ss:$16 sps:$4 sm:$0xff]  }
  0x13   : > { %v1776_v13 = vld [vmem:[%s394_s16 + $0x4] ss:$16 sps:$4 sm:$0xff]   ;;  %v1778_v14 = vld [vmem:[%s394_s16 + $0xc] ss:$16 sps:$4 sm:$0xff]   ;;  %v1780_v15 = vld [vmem:[%s394_s16] ss:$16 sps:$4 sm:$0xff]  }
  0x14   : > { %v1781_v16 = vld [vmem:[%s394_s16 + $0x8] ss:$16 sps:$4 sm:$0xff]   ;;  %v1782_v20 = vld [vmem:[%s388_s20] sm:$0xff]   ;;  %v1797_v26 = vld [vmem:[%s2329_s3 + $0x54] ss:$8 sps:$4 sm:$0xff]   ;;  %s1563_s15 = sshll.u32 %s2341_s30, 2 }
  0x15   : > { %550 = vmatpush1.bf16.msra.mxu0 %v1768_v7  ;;  %593 = vmatpush1.bf16.msra.mxu1 %v1769_v8  ;;  %v1794_v23 = vld [vmem:[%s2329_s3 + $0x164] ss:$8 sps:$4 sm:$0xff]   ;;  %v1792_v25 = vld [vmem:[%s2329_s3 + $0x160] ss:$8 sps:$4 sm:$0xff]   ;;  %v1800_v27 = vld [vmem:[%s2329_s3 + $0x154] ss:$8 sps:$4 sm:$0xff]   ;;  %s398_s18 = scalar_lea.vmem %s2328_s2, %s1563_s15 }
  0x16   : > { %551 = vmatprep.subr.bf16.mxu0 %v1770_v9  ;;  %594 = vmatprep.subr.bf16.mxu1 %v1772_v10  ;;  %v1795_v28 = vld [vmem:[%s2329_s3 + $0x50] ss:$8 sps:$4 sm:$0xff]   ;;  %v1803_v30 = vld [vmem:[%s2329_s3 + $0x44] ss:$8 sps:$4 sm:$0xff]   ;;  %v1801_v32 = vld [vmem:[%s2329_s3 + $0x40] ss:$8 sps:$4 sm:$0xff]  }
  0x17   : > { %v1798_v29 = vld [vmem:[%s2329_s3 + $0x150] ss:$8 sps:$4 sm:$0xff]   ;;  %v1806_v31 = vld [vmem:[%s2329_s3 + $0x144] ss:$8 sps:$4 sm:$0xff]   ;;  %v1804_v33 = vld [vmem:[%s2329_s3 + $0x140] ss:$8 sps:$4 sm:$0xff]  }
  0x18   : > { %v1809_v34 = vld [vmem:[%s2329_s3 + $0x34] ss:$8 sps:$4 sm:$0xff]   ;;  %v1807_v36 = vld [vmem:[%s2329_s3 + $0x30] ss:$8 sps:$4 sm:$0xff]   ;;  %v1815_v38 = vld [vmem:[%s2329_s3 + $0x24] ss:$8 sps:$4 sm:$0xff]  }
  0x19   : > { %552 = vmatpush1.bf16.msra.mxu0 %v1774_v11  ;;  %595 = vmatpush1.bf16.msra.mxu1 %v1775_v12  ;;  %v1812_v35 = vld [vmem:[%s2329_s3 + $0x134] ss:$8 sps:$4 sm:$0xff]   ;;  %v1810_v37 = vld [vmem:[%s2329_s3 + $0x130] ss:$8 sps:$4 sm:$0xff]   ;;  %v1818_v39 = vld [vmem:[%s2329_s3 + $0x124] ss:$8 sps:$4 sm:$0xff]  }
  0x1a   : > { %553 = vmatprep.subr.bf16.mxu0 %v1776_v13  ;;  %596 = vmatprep.subr.bf16.mxu1 %v1778_v14  ;;  %v1813_v40 = vld [vmem:[%s2329_s3 + $0x20] ss:$8 sps:$4 sm:$0xff]   ;;  %v1821_v42 = vld [vmem:[%s2329_s3 + $0x14] ss:$8 sps:$4 sm:$0xff]   ;;  %v1819_v44 = vld [vmem:[%s2329_s3 + $0x10] ss:$8 sps:$4 sm:$0xff]  }
  0x1b   : > { %v1816_v41 = vld [vmem:[%s2329_s3 + $0x120] ss:$8 sps:$4 sm:$0xff]   ;;  %v1824_v43 = vld [vmem:[%s2329_s3 + $0x114] ss:$8 sps:$4 sm:$0xff]   ;;  %v1822_v45 = vld [vmem:[%s2329_s3 + $0x110] ss:$8 sps:$4 sm:$0xff]  }
  0x1c   : > { %v1827_v46 = vld [vmem:[%s2329_s3 + $0x4] ss:$8 sps:$4 sm:$0xff]   ;;  %v1825_v48 = vld [vmem:[%s2329_s3] ss:$8 sps:$4 sm:$0xff]   ;;  %v1833_v50 = vld [vmem:[%s2329_s3 + $0xf4] ss:$8 sps:$4 sm:$0xff]  }
  0x1d   : > { %554 = vmatpush1.bf16.msra.mxu0 %v1780_v15  ;;  %597 = vmatpush1.bf16.msra.mxu1 %v1781_v16  ;;  %v1830_v47 = vld [vmem:[%s2329_s3 + $0x104] ss:$8 sps:$4 sm:$0xff]   ;;  %v1828_v49 = vld [vmem:[%s2329_s3 + $0x100] ss:$8 sps:$4 sm:$0xff]   ;;  %v1836_v51 = vld [vmem:[%s2329_s3 + $0x1f4] ss:$8 sps:$4 sm:$0xff]  }
  0x1e   : > { %1033 = vmatprep.subr.bf16.mxu0 %v1785_v17  ;;  %1076 = vmatprep.subr.bf16.mxu1 %v1788_v18  ;;  %v1831_v52 = vld [vmem:[%s2329_s3 + $0xf0] ss:$8 sps:$4 sm:$0xff]   ;;  %v1839_v54 = vld [vmem:[%s2329_s3 + $0xe4] ss:$8 sps:$4 sm:$0xff]   ;;  %v1837_v56 = vld [vmem:[%s2329_s3 + $0xe0] ss:$8 sps:$4 sm:$0xff]  }
  0x1f   : > { %v1834_v53 = vld [vmem:[%s2329_s3 + $0x1f0] ss:$8 sps:$4 sm:$0xff]   ;;  %v1842_v55 = vld [vmem:[%s2329_s3 + $0x1e4] ss:$8 sps:$4 sm:$0xff]   ;;  %v1840_v57 = vld [vmem:[%s2329_s3 + $0x1e0] ss:$8 sps:$4 sm:$0xff]  }
  0x20   : > { %1583 = vmatmul.mubr.msk.bf16.vlgmr.msra.gmra.mxu0 %vm535_vm0, %v1782_v20  ;;  %1584 = vmatmul.mubr.msk.bf16.vlgmr.msra.gmra.mxu1 %vm535_vm0, %v1782_v20  ;;  %v1845_v58 = vld [vmem:[%s2329_s3 + $0xd4] ss:$8 sps:$4 sm:$0xff]   ;;  %v1843_v60 = vld [vmem:[%s2329_s3 + $0xd0] ss:$8 sps:$4 sm:$0xff]   ;;  %v1851_v62 = vld [vmem:[%s2329_s3 + $0xc4] ss:$8 sps:$4 sm:$0xff]  }
  0x21   : > { %1034 = vmatpush1.bf16.msra.mxu0 %v1783_v19  ;;  %1077 = vmatpush1.bf16.msra.mxu1 %v1786_v21  ;;  %v1848_v59 = vld [vmem:[%s2329_s3 + $0x1d4] ss:$8 sps:$4 sm:$0xff]   ;;  %v1846_v61 = vld [vmem:[%s2329_s3 + $0x1d0] ss:$8 sps:$4 sm:$0xff]   ;;  %v1854_v63 = vld [vmem:[%s2329_s3 + $0x1c4] ss:$8 sps:$4 sm:$0xff]   ;;  %v430_v19 = vlaneseq }
  0x22   : > { %1035 = vmatprep.subr.bf16.mxu0 %v1791_v22  ;;  %1078 = vmatprep.subr.bf16.mxu1 %v1794_v23  ;;  %v1849_v0 = vld [vmem:[%s2329_s3 + $0xc0] ss:$8 sps:$4 sm:$0xff]   ;;  %v1857_v2 = vld [vmem:[%s2329_s3 + $0xb4] ss:$8 sps:$4 sm:$0xff]   ;;  %v1855_v4 = vld [vmem:[%s2329_s3 + $0xb0] ss:$8 sps:$4 sm:$0xff]  }
  0x23   : > { %v1852_v1 = vld [vmem:[%s2329_s3 + $0x1c0] ss:$8 sps:$4 sm:$0xff]   ;;  %v1860_v3 = vld [vmem:[%s2329_s3 + $0x1b4] ss:$8 sps:$4 sm:$0xff]   ;;  %v1858_v5 = vld [vmem:[%s2329_s3 + $0x1b0] ss:$8 sps:$4 sm:$0xff]  }
  0x24   : > { %v1863_v6 = vld [vmem:[%s2329_s3 + $0xa4] ss:$8 sps:$4 sm:$0xff]   ;;  %v1861_v8 = vld [vmem:[%s2329_s3 + $0xa0] ss:$8 sps:$4 sm:$0xff]   ;;  %v1869_v10 = vld [vmem:[%s2329_s3 + $0x94] ss:$8 sps:$4 sm:$0xff]  }
  0x25   : > { %1036 = vmatpush1.bf16.msra.mxu0 %v1789_v24  ;;  %1079 = vmatpush1.bf16.msra.mxu1 %v1792_v25  ;;  %v1866_v7 = vld [vmem:[%s2329_s3 + $0x1a4] ss:$8 sps:$4 sm:$0xff]   ;;  %v1864_v9 = vld [vmem:[%s2329_s3 + $0x1a0] ss:$8 sps:$4 sm:$0xff]   ;;  %v1872_v11 = vld [vmem:[%s2329_s3 + $0x194] ss:$8 sps:$4 sm:$0xff]  }
  0x26   : > { %1037 = vmatprep.subr.bf16.mxu0 %v1797_v26  ;;  %1080 = vmatprep.subr.bf16.mxu1 %v1800_v27  ;;  %v1867_v12 = vld [vmem:[%s2329_s3 + $0x90] ss:$8 sps:$4 sm:$0xff]   ;;  %v1875_v14 = vld [vmem:[%s2329_s3 + $0x84] ss:$8 sps:$4 sm:$0xff]   ;;  %v1873_v16 = vld [vmem:[%s2329_s3 + $0x80] ss:$8 sps:$4 sm:$0xff]  }
  0x27   : > { %v1870_v13 = vld [vmem:[%s2329_s3 + $0x190] ss:$8 sps:$4 sm:$0xff]   ;;  %v1878_v15 = vld [vmem:[%s2329_s3 + $0x184] ss:$8 sps:$4 sm:$0xff]   ;;  %v1876_v17 = vld [vmem:[%s2329_s3 + $0x180] ss:$8 sps:$4 sm:$0xff]  }
  0x28   : > { %v1879_v18 = vld [vmem:[%s2331_s5 + $0x78] sm:$0xff]   ;;  %v2212_v20 = vshrl.u32 %v430_v19, 7  ;;  %v428_v25 = vld [vmem:[%s398_s18] sm:$0xf]  ;;  %vm1416_vm2 = vcmask 15360   ;;  %s1679_s20 = sshll.u32 %s2341_s30, 4 }
  0x29   : > { %1038 = vmatpush1.bf16.msra.mxu0 %v1795_v28  ;;  %1081 = vmatpush1.bf16.msra.mxu1 %v1798_v29  ;;  %s407_s23 = scalar_lea.vmem %s2335_s9, %s1679_s20 }
  0x2a   : > { %1039 = vmatprep.subr.bf16.mxu0 %v1803_v30  ;;  %1082 = vmatprep.subr.bf16.mxu1 %v1806_v31  ;;  %v436_v21 = vsub.s32 1, %v2212_v20  ;;  %v444_v22 = vsub.s32 3, %v2212_v20  ;;  %v432_v23 = vsub.s32 0, %v2212_v20  ;;  %v440_v24 = vsub.s32 2, %v2212_v20 }
  0x2c   : > { %v437_v28 = vrot.slane %v428_v25, %v436_v21  ;;  %v445_v29 = vrot.slane %v428_v25, %v444_v22  ;;  %v433_v30 = vrot.slane %v428_v25, %v432_v23  ;;  %v441_v31 = vrot.slane %v428_v25, %v440_v24 }
  0x2d   : > { %1040 = vmatpush1.bf16.msra.mxu0 %v1801_v32  ;;  %1083 = vmatpush1.bf16.msra.mxu1 %v1804_v33 }
  0x2e   : > { %1041 = vmatprep.subr.bf16.mxu0 %v1809_v34  ;;  %1084 = vmatprep.subr.bf16.mxu1 %v1812_v35 }
  0x31   : > { %1042 = vmatpush1.bf16.msra.mxu0 %v1807_v36  ;;  %1085 = vmatpush1.bf16.msra.mxu1 %v1810_v37 }
  0x32   : > { %1043 = vmatprep.subr.bf16.mxu0 %v1815_v38  ;;  %1086 = vmatprep.subr.bf16.mxu1 %v1818_v39 }
  0x35   : > { %1044 = vmatpush1.bf16.msra.mxu0 %v1813_v40  ;;  %1087 = vmatpush1.bf16.msra.mxu1 %v1816_v41 }
  0x36   : > { %1045 = vmatprep.subr.bf16.mxu0 %v1821_v42  ;;  %1088 = vmatprep.subr.bf16.mxu1 %v1824_v43 }
  0x39   : > { %1046 = vmatpush1.bf16.msra.mxu0 %v1819_v44  ;;  %1089 = vmatpush1.bf16.msra.mxu1 %v1822_v45 }
  0x3a   : > { %1047 = vmatprep.subr.bf16.mxu0 %v1827_v46  ;;  %1090 = vmatprep.subr.bf16.mxu1 %v1830_v47 }
  0x3d   : > { %1048 = vmatpush1.bf16.msra.mxu0 %v1825_v48  ;;  %1091 = vmatpush1.bf16.msra.mxu1 %v1828_v49 }
  0x3e   : > { %1049 = vmatprep.subr.bf16.mxu0 %v1833_v50  ;;  %1092 = vmatprep.subr.bf16.mxu1 %v1836_v51 }
  0x41   : > { %1050 = vmatpush2.bf16.msra.mxu0 %v1831_v52  ;;  %1093 = vmatpush2.bf16.msra.mxu1 %v1834_v53 }
  0x42   : > { %1051 = vmatprep.subr.bf16.mxu0 %v1839_v54  ;;  %1094 = vmatprep.subr.bf16.mxu1 %v1842_v55 }
  0x45   : > { %1052 = vmatpush2.bf16.msra.mxu0 %v1837_v56  ;;  %1095 = vmatpush2.bf16.msra.mxu1 %v1840_v57  ;;  %v1880_v56 = vld [vmem:[%s2331_s5 + $0x38] sm:$0xff]  }
  0x46   : > { %1053 = vmatprep.subr.bf16.mxu0 %v1845_v58  ;;  %1096 = vmatprep.subr.bf16.mxu1 %v1848_v59  ;;  %v1881_v59 = vld [vmem:[%s2331_s5 + $0x70] sm:$0xff]  }
  0x49   : > { %1054 = vmatpush2.bf16.msra.mxu0 %v1843_v60  ;;  %1097 = vmatpush2.bf16.msra.mxu1 %v1846_v61  ;;  %v1882_v60 = vld [vmem:[%s2331_s5 + $0x30] sm:$0xff]   ;;  %v1883_v61 = vld [vmem:[%s2331_s5 + $0x68] sm:$0xff]  }
  0x4a   : > { %1055 = vmatprep.subr.bf16.mxu0 %v1851_v62  ;;  %1098 = vmatprep.subr.bf16.mxu1 %v1854_v63  ;;  %v1884_v62 = vld [vmem:[%s2331_s5 + $0x28] sm:$0xff]   ;;  %v1885_v63 = vld [vmem:[%s2331_s5 + $0x60] sm:$0xff]  }
  0x4d   : > { %1056 = vmatpush2.bf16.msra.mxu0 %v1849_v0  ;;  %1099 = vmatpush2.bf16.msra.mxu1 %v1852_v1  ;;  %v1886_v0 = vld [vmem:[%s2331_s5 + $0x20] sm:$0xff]   ;;  %v1887_v1 = vld [vmem:[%s2331_s5 + $0x58] sm:$0xff]  }
  0x4e   : > { %1057 = vmatprep.subr.bf16.mxu0 %v1857_v2  ;;  %1100 = vmatprep.subr.bf16.mxu1 %v1860_v3  ;;  %v1888_v2 = vld [vmem:[%s2331_s5 + $0x18] sm:$0xff]   ;;  %v1889_v3 = vld [vmem:[%s2331_s5 + $0x50] sm:$0xff]  }
  0x51   : > { %1058 = vmatpush2.bf16.msra.mxu0 %v1855_v4  ;;  %1101 = vmatpush2.bf16.msra.mxu1 %v1858_v5  ;;  %v1890_v4 = vld [vmem:[%s2331_s5 + $0x10] sm:$0xff]   ;;  %v1891_v5 = vld [vmem:[%s2331_s5 + $0x48] sm:$0xff]  }
  0x52   : > { %1059 = vmatprep.subr.bf16.mxu0 %v1863_v6  ;;  %1102 = vmatprep.subr.bf16.mxu1 %v1866_v7  ;;  %v1892_v6 = vld [vmem:[%s2331_s5 + $0x8] sm:$0xff]   ;;  %v1893_v7 = vld [vmem:[%s2331_s5 + $0x40] sm:$0xff]  }
  0x55   : > { %1060 = vmatpush2.bf16.msra.mxu0 %v1861_v8  ;;  %1103 = vmatpush2.bf16.msra.mxu1 %v1864_v9  ;;  %v1894_v8 = vld [vmem:[%s2331_s5] sm:$0xff]   ;;  %v1895_v9 = vld [vmem:[%s2333_s7 + $0x38] sm:$0xff]  }
  0x56   : > { %1061 = vmatprep.subr.bf16.mxu0 %v1869_v10  ;;  %1104 = vmatprep.subr.bf16.mxu1 %v1872_v11  ;;  %v1936_v10 = vmov 0.0   ;;  %v1896_v11 = vld [vmem:[%s2333_s7 + $0x30] sm:$0xff]  }
  0x59   : > { %1062 = vmatpush2.bf16.msra.mxu0 %v1867_v12  ;;  %1105 = vmatpush2.bf16.msra.mxu1 %v1870_v13  ;;  %v1897_v12 = vld [vmem:[%s2333_s7 + $0x28] sm:$0xff]   ;;  %v1898_v13 = vld [vmem:[%s2333_s7 + $0x20] sm:$0xff]  }
  0x5a   : > { %1063 = vmatprep.subr.bf16.mxu0 %v1875_v14  ;;  %1106 = vmatprep.subr.bf16.mxu1 %v1878_v15  ;;  %v701_v14 = vld [vmem:[%s2330_s4] sm:$0x3] }
  0x5b   : > { %v710_v15 = vrot.slane %v701_v14, %v436_v21 }
  0x5d   : > { %1064 = vmatpush2.bf16.msra.mxu0 %v1873_v16  ;;  %1107 = vmatpush2.bf16.msra.mxu1 %v1876_v17  ;;  %v706_v16 = vrot.slane %v701_v14, %v432_v23 }
  0x5e   : > { %1680 = vmatprep.subr.bf16.mxu0 %v1879_v18  ;;  %1711 = vmatprep.subr.bf16.mxu1 %v1936_v10 }
  0xe0   : > { %v573_v26 = vpop.f32.mrf.mxu0  ;;  %v616_v27 = vpop.f32.mrf.mxu1 }
  0xe1   : > { %v574_v40 = vadd.f32 %v573_v26, %v433_v30  ;;  %v617_v41 = vadd.f32 %v616_v27, %v441_v31 }
  0xe2   : > { %v575_v32 = vpop.f32.mrf.mxu0  ;;  %v618_v33 = vpop.f32.mrf.mxu1 }
  0xe3   : > { %v576_v36 = vadd.f32 %v575_v32, %v437_v28  ;;  %v619_v37 = vadd.f32 %v618_v33, %v445_v29  ;;  %v625_v52 = vmax.f32 %v574_v40, 0.0  ;;  %v627_v53 = vmax.f32 %v617_v41, 0.0  ;;  %v1900_v40 = vld [vmem:[%s2333_s7 + $0x10] sm:$0xff]   ;;  %v1901_v41 = vld [vmem:[%s2333_s7 + $0x8] sm:$0xff]  }
  0xe4   : > { %v577_v34 = vpop.f32.mrf.mxu0  ;;  %v620_v35 = vpop.f32.mrf.mxu1 }
  0xe5   : > { %v578_v38 = vadd.f32 %v577_v34, %v433_v30  ;;  %v621_v39 = vadd.f32 %v620_v35, %v441_v31  ;;  %v626_v48 = vmax.f32 %v576_v36, 0.0  ;;  %v628_v49 = vmax.f32 %v619_v37, 0.0 }
  0xe6   : > { %v579_v42 = vpop.f32.mrf.mxu0  ;;  %v622_v43 = vpop.f32.mrf.mxu1 }
  0xe7   : > { %v580_v44 = vadd.f32 %v579_v42, %v437_v28  ;;  %v623_v45 = vadd.f32 %v622_v43, %v445_v29  ;;  %v629_v46 = vmax.f32 %v578_v38, 0.0  ;;  %v631_v47 = vmax.f32 %v621_v39, 0.0  ;;  %v1899_v39 = vld [vmem:[%s2333_s7 + $0x18] sm:$0xff]   ;;  %v1902_v42 = vld [vmem:[%s2333_s7] sm:$0xff]  }
  0xe9   : > { %v630_v50 = vmax.f32 %v580_v44, 0.0  ;;  %v632_v51 = vmax.f32 %v623_v45, 0.0  ;;  %v633_v57 = vpack.c.bf16 %v629_v46, %v625_v52  ;;  %v635_v58 = vpack.c.bf16 %v631_v47, %v627_v53  ;;  %v1649_v46 = vld [vmem:[%s2332_s6] ss:$0 sm:$0xff] }
  0xeb   : > { %v634_v54 = vpack.c.bf16 %v630_v50, %v626_v48  ;;  %v636_v55 = vpack.c.bf16 %v632_v51, %v628_v49 }
  0xed   : > { %1065 = vmatprep.mubr.bf16.mxu0 %v634_v54  ;;  %1108 = vmatprep.mubr.bf16.mxu1 %v636_v55  ;;  %v1666_v55 = vld [vmem:[%s2334_s8] ss:$0 sm:$0xff] }
  0xee   : > { %1066 = vmatmul.mubr.bf16.vlgmr.msra.gmra.mxu0 %v633_v57  ;;  %1109 = vmatmul.mubr.bf16.vlgmr.msra.gmra.mxu1 %v635_v58 }
  0xef   : > { %1681 = vmatpush3.bf16.msra.mxu0 %v1880_v56  ;;  %1712 = vmatpush3.bf16.msra.mxu1 %v1895_v9 }
  0xf0   : > { %1682 = vmatprep.subr.bf16.mxu0 %v1881_v59  ;;  %1713 = vmatprep.subr.bf16.mxu1 %v1936_v10 }
  0xf1   : > { %1727 = vmatprep.mubr.msk.bf16.mxu1 %vm1937_vm1, %v1936_v10 }
  0xf3   : > { %1683 = vmatpush3.bf16.msra.mxu0 %v1882_v60  ;;  %1714 = vmatpush3.bf16.msra.mxu1 %v1896_v11 }
  0xf4   : > { %1684 = vmatprep.subr.bf16.mxu0 %v1883_v61  ;;  %1715 = vmatprep.subr.bf16.mxu1 %v1936_v10 }
  0xf7   : > { %1685 = vmatpush3.bf16.msra.mxu0 %v1884_v62  ;;  %1716 = vmatpush3.bf16.msra.mxu1 %v1897_v12 }
  0xf8   : > { %1686 = vmatprep.subr.bf16.mxu0 %v1885_v63  ;;  %1717 = vmatprep.subr.bf16.mxu1 %v1936_v10 }
  0xfb   : > { %1687 = vmatpush3.bf16.msra.mxu0 %v1886_v0  ;;  %1718 = vmatpush3.bf16.msra.mxu1 %v1898_v13 }
  0xfc   : > { %1688 = vmatprep.subr.bf16.mxu0 %v1887_v1  ;;  %1719 = vmatprep.subr.bf16.mxu1 %v1936_v10 }
  0xff   : > { %1689 = vmatpush3.bf16.msra.mxu0 %v1888_v2  ;;  %1720 = vmatpush3.bf16.msra.mxu1 %v1899_v39 }
 0x100   : > { %1690 = vmatprep.subr.bf16.mxu0 %v1889_v3  ;;  %1721 = vmatprep.subr.bf16.mxu1 %v1936_v10 }
 0x103   : > { %1691 = vmatpush3.bf16.msra.mxu0 %v1890_v4  ;;  %1722 = vmatpush3.bf16.msra.mxu1 %v1900_v40 }
 0x104   : > { %1692 = vmatprep.subr.bf16.mxu0 %v1891_v5  ;;  %1723 = vmatprep.subr.bf16.mxu1 %v1936_v10 }
 0x107   : > { %1693 = vmatpush3.bf16.msra.mxu0 %v1892_v6  ;;  %1724 = vmatpush3.bf16.msra.mxu1 %v1901_v41 }
 0x108   : > { %1694 = vmatprep.subr.bf16.mxu0 %v1893_v7  ;;  %1725 = vmatprep.subr.bf16.mxu1 %v1936_v10 }
 0x10b   : > { %1695 = vmatpush3.bf16.msra.mxu0 %v1894_v8  ;;  %1726 = vmatpush3.bf16.msra.mxu1 %v1902_v42 }
 0x1ae   : > { %v1067_v17 = vpop.f32.mrf.mxu0  ;;  %v1110_v18 = vpop.f32.mrf.mxu1 }
 0x1af   : > { %v1068_v25 = vadd.f32 %v1067_v17, %v706_v16 }
 0x1b0   : > { %v1069_v19 = vpop.f32.mrf.mxu0  ;;  %v1112_v22 = vpop.f32.mrf.mxu1 }
 0x1b1   : > { %v1070_v24 = vadd.f32 %v1069_v19, %v710_v15  ;;  %v1111_v33 = vadd.f32 %v1110_v18, %v1068_v25 }
 0x1b2   : > { %v1071_v26 = vpop.f32.mrf.mxu0  ;;  %v1114_v27 = vpop.f32.mrf.mxu1 }
 0x1b3   : > { %v1072_v28 = vadd.f32 %v1071_v26, %v706_v16  ;;  %v1113_v30 = vadd.f32 %v1112_v22, %v1070_v24  ;;  %v1119_v23 = vmax.f32 %v1111_v33, 0.0 }
 0x1b4   : > { %v1073_v29 = vpop.f32.mrf.mxu0  ;;  %v1116_v34 = vpop.f32.mrf.mxu1 }
 0x1b5   : > { %v1115_v31 = vadd.f32 %v1114_v27, %v1072_v28  ;;  %v1074_v32 = vadd.f32 %v1073_v29, %v710_v15  ;;  %v1120_v36 = vmax.f32 %v1113_v30, 0.0 }
 0x1b7   : > { %v1117_v35 = vadd.f32 %v1116_v34, %v1074_v32  ;;  %v1121_v21 = vmax.f32 %v1115_v31, 0.0 }
 0x1b9   : > { %v1122_v20 = vmax.f32 %v1117_v35, 0.0  ;;  %v1123_v38 = vpack.c.bf16 %v1121_v21, %v1119_v23 }
 0x1bb   : > { %v1124_v37 = vpack.c.bf16 %v1122_v20, %v1120_v36 }
 0x1bd   : > { %1292 = vmatprep.mubr.bf16.mxu0 %v1124_v37 }
 0x1be   : > { %1293 = vmatmul.mubr.bf16.vlgmr.msra.gmra.mxu0 %v1123_v38 }
 0x27e   : > { %v1696_v43 = vpop.f32.mrf.mxu0 }
 0x280   : > { %v1697_v44 = vpop.f32.mrf.mxu0 }
 0x281   : > { %v1698_v45 = vadd.f32 %v1697_v44, %v1696_v43 }
 0x282   : > { %v1699_v47 = vpop.f32.mrf.mxu0 }
 0x283   : > { %v1295_v49 = vadd.f32 %v1698_v45, %v1649_v46 }
 0x284   : > { %v1700_v48 = vpop.f32.mrf.mxu0 }
 0x285   : > { %v1701_v50 = vadd.f32 %v1700_v48, %v1699_v47  ;;  %v1301_v52 = vmax.f32 %v1295_v49, 0.0 }
 0x287   : > { %v1298_v51 = vadd.f32 %v1701_v50, %v1649_v46 }
 0x289   : > { %v1302_v53 = vmax.f32 %v1298_v51, 0.0 }
 0x28b   : > { %v1303_v54 = vpack.c.bf16 %v1302_v53, %v1301_v52 }
 0x28d   : > { %1728 = vmatmul.mubr.bf16.vlgmr.msra.gmra.mxu1 %v1303_v54 }
 0x34d   : > { %v1409_v56 = vpop.f32.mrf.mxu1 }
 0x34e   : > { %v1410_v57 = vadd.f32 %v1666_v55, %v1409_v56 }
 0x34f   : > { %v1729_v58 = vpop.f32.mrf.mxu1 }
 0x350   : > { %v1417_v59 = vsel %vm1416_vm2, %v1410_v57, -inf }
 0x351   : > { %1418 = vmax.xlane.f32.xlu0 %v1417_v59  ;;  %v1412_v60 = vpop.f32.mrf.mxu1 }
 0x352   : > { %v1413_v61 = vadd.f32 %v1666_v55, %v1412_v60 }
 0x353   : > { %v1730_v62 = vpop.f32.mrf.mxu1 }
 0x354   : > { %v1420_v63 = vsel %vm1416_vm2, %v1413_v61, -inf }
 0x355   : > { %1421 = vmax.xlane.f32.xlu0 %v1420_v63 }
 0x3da   : > { %v1419_v0 = vpop.xlane.xlu0 %1418 }
 0x3db   : > { %v1423_v1 = vsub.f32 %v1410_v57, %v1419_v0 }
 0x3dd   : > { %v1425_v2 = vmul.f32 1.442695, %v1423_v1 }
 0x3de   : > { %v1422_v3 = vpop.xlane.xlu0 %1421 }
 0x3df   : > { %1903 = vpow2.f32 %v1425_v2  ;;  %v1424_v4 = vsub.f32 %v1413_v61, %v1422_v3 }
 0x3e1   : > { %v1427_v5 = vmul.f32 1.442695, %v1424_v4 }
 0x3e3   : > { %1905 = vpow2.f32 %v1427_v5 }
 0x3ec   : > { %v1904_v6 = vpop.eup %1903 }
 0x3ed   : > { %v1429_v7 = vsel %vm1416_vm2, %v1904_v6, 0.0 }
 0x3ee   : > { %1430 = vadd.xlane.f32.xlu1 %v1429_v7 }
 0x3f0   : > { %v1906_v8 = vpop.eup %1905 }
 0x3f1   : > { %v1432_v9 = vsel %vm1416_vm2, %v1906_v8, 0.0 }
 0x3f2   : > { %1433 = vadd.xlane.f32.xlu1 %v1432_v9 }
 0x477   : > { %v1431_v10 = vpop.xlane.xlu1 %1430 }
 0x478   : > { %1907 = vlog2.f32 %v1431_v10 }
 0x47b   : > { %v1434_v11 = vpop.xlane.xlu1 %1433 }
 0x47c   : > { %1909 = vlog2.f32 %v1434_v11 }
 0x485   : > { %v1908_v12 = vpop.eup %1907 }
 0x486   : > { %v1436_v13 = vmul.f32 0.6931472, %v1908_v12 }
 0x488   : > { %v1439_v14 = vsub.f32 %v1423_v1, %v1436_v13 }
 0x489   : > { %v1910_v15 = vpop.eup %1909 }
 0x48a   : > { %1441 = vst.msk [vmem:[%s407_s23] sm:$0xff] %vm1416_vm2, %v1439_v14  ;;  %v1438_v16 = vmul.f32 0.6931472, %v1910_v15 }
 0x48c   : > { %v1440_v17 = vsub.f32 %v1424_v4, %v1438_v16 }
 0x48e   : > { %1442 = vst.msk [vmem:[%s407_s23 + $0x8] sm:$0xff] %vm1416_vm2, %v1440_v17 }
 0x48f PF: > { %s19_s11 = sadd.s32 1, %s1933_s11   ;;  %s2336_s30 = smov %s1929_s10 }
 0x490   : > { %p16_p5 = scmp.ge.s32.totalorder %s19_s11, 4   ;;  %s2337_s10 = smov %s2339_s12 }
 0x492   :  { %18 = sbr.rel (!%p16_p5) target bundleno = 2 (0x2), region = 92 }

// kernel: pointnet_segmentation_forward.11
= control target key start
LH: loop header
LB: loop body
LE: loop exit
PB: predicated region body
PF: predicated region fallthrough
CT: control target
= control target key end

     0   :  { %v7855_v36 = vmov 1983009808   ;;  %v34_v38 = vlaneseq  ;;  %s10665_s1 = inlined_call_operand.vmem [shape: bf16[1024,512], index: 1, kind: input, shape index: {}]   ;;  %s10666_s0 = inlined_call_operand.vmem [shape: f32[2,1024], index: 0, kind: input, shape index: {}]   ;;  %s10667_s3 = inlined_call_operand.vmem [shape: bf16[512,256], index: 3, kind: input, shape index: {}]   ;;  %s10668_s2 = inlined_call_operand.vmem [shape: f32[1,512], index: 2, kind: input, shape index: {}]   ;;  %s10669_s5 = inlined_call_operand.vmem [shape: bf16[256,4096], index: 5, kind: input, shape index: {}]   ;;  %s10670_s4 = inlined_call_operand.vmem [shape: f32[1,256], index: 4, kind: input, shape index: {}]   ;;  %s10671_s6 = inlined_call_operand.vmem [shape: f32[1,4096], index: 6, kind: input, shape index: {}]   ;;  %s10672_s7 = inlined_call_operand.vmem [shape: f32[2,4096], index: 7, kind: output, shape index: {}]  }
   0x1   :  { %v7373_v0 = vld [vmem:[%s10665_s1 + $0xe4] ss:$16 sps:$4 sm:$0xff]   ;;  %v7377_v2 = vld [vmem:[%s10665_s1 + $0xe0] ss:$16 sps:$4 sm:$0xff]   ;;  %v32_v37 = vunpack.c.l.s4 %v7855_v36 }
   0x2   :  { %v7375_v1 = vld [vmem:[%s10665_s1 + $0x2e4] ss:$16 sps:$4 sm:$0xff]   ;;  %1638 = vmatprep.subr.bf16.mxu0 %v7373_v0  ;;  %v7378_v3 = vld [vmem:[%s10665_s1 + $0x2e0] ss:$16 sps:$4 sm:$0xff]   ;;  %v8013_v43 = vshrl.u32 %v34_v38, 7 }
   0x3   :  { %1679 = vmatprep.subr.bf16.mxu1 %v7375_v1  ;;  %v7379_v4 = vld [vmem:[%s10665_s1 + $0xc4] ss:$16 sps:$4 sm:$0xff]   ;;  %1639 = vmatpush1.bf16.msra.mxu0 %v7377_v2  ;;  %v7383_v6 = vld [vmem:[%s10665_s1 + $0xc0] ss:$16 sps:$4 sm:$0xff]   ;;  %v33_v42 = vunpack.c.0.s8 %v32_v37 }
   0x4   :  { %1680 = vmatpush1.bf16.msra.mxu1 %v7378_v3  ;;  %v7381_v5 = vld [vmem:[%s10665_s1 + $0x2c4] ss:$16 sps:$4 sm:$0xff]   ;;  %1640 = vmatprep.subr.bf16.mxu0 %v7379_v4  ;;  %v7384_v7 = vld [vmem:[%s10665_s1 + $0x2c0] ss:$16 sps:$4 sm:$0xff]   ;;  %v27_v4 = vld [vmem:[%s10666_s0 + $0x8] sm:$0xff] }
   0x5   :  { %1681 = vmatprep.subr.bf16.mxu1 %v7381_v5  ;;  %v7385_v8 = vld [vmem:[%s10665_s1 + $0xa4] ss:$16 sps:$4 sm:$0xff]   ;;  %v7389_v10 = vld [vmem:[%s10665_s1 + $0xa0] ss:$16 sps:$4 sm:$0xff]   ;;  %v8031_v49 = vsub.s32 %v33_v42, %v8013_v43 }
   0x6   :  { %v7387_v9 = vld [vmem:[%s10665_s1 + $0x2a4] ss:$16 sps:$4 sm:$0xff]   ;;  %v7390_v11 = vld [vmem:[%s10665_s1 + $0x2a0] ss:$16 sps:$4 sm:$0xff]  }
   0x7   :  { %1641 = vmatpush1.bf16.msra.mxu0 %v7383_v6  ;;  %v7391_v12 = vld [vmem:[%s10665_s1 + $0x84] ss:$16 sps:$4 sm:$0xff]   ;;  %v7395_v14 = vld [vmem:[%s10665_s1 + $0x80] ss:$16 sps:$4 sm:$0xff]  }
   0x8   :  { %1682 = vmatpush1.bf16.msra.mxu1 %v7384_v7  ;;  %1642 = vmatprep.subr.bf16.mxu0 %v7385_v8  ;;  %v7393_v13 = vld [vmem:[%s10665_s1 + $0x284] ss:$16 sps:$4 sm:$0xff]   ;;  %v7396_v15 = vld [vmem:[%s10665_s1 + $0x280] ss:$16 sps:$4 sm:$0xff]  }
   0x9   :  { %1683 = vmatprep.subr.bf16.mxu1 %v7387_v9  ;;  %v7397_v16 = vld [vmem:[%s10665_s1 + $0x64] ss:$16 sps:$4 sm:$0xff]   ;;  %v7401_v18 = vld [vmem:[%s10665_s1 + $0x60] ss:$16 sps:$4 sm:$0xff]   ;;  %v47_v9 = vcombine.high %v27_v4, %v27_v4 }
   0xa   :  { %v7399_v17 = vld [vmem:[%s10665_s1 + $0x264] ss:$16 sps:$4 sm:$0xff]   ;;  %v7402_v19 = vld [vmem:[%s10665_s1 + $0x260] ss:$16 sps:$4 sm:$0xff]  }
   0xb   :  { %1643 = vmatpush1.bf16.msra.mxu0 %v7389_v10  ;;  %v7403_v20 = vld [vmem:[%s10665_s1 + $0x44] ss:$16 sps:$4 sm:$0xff]   ;;  %v7407_v22 = vld [vmem:[%s10665_s1 + $0x40] ss:$16 sps:$4 sm:$0xff]  }
   0xc   :  { %1684 = vmatpush1.bf16.msra.mxu1 %v7390_v11  ;;  %1644 = vmatprep.subr.bf16.mxu0 %v7391_v12  ;;  %v7405_v21 = vld [vmem:[%s10665_s1 + $0x244] ss:$16 sps:$4 sm:$0xff]   ;;  %v7408_v23 = vld [vmem:[%s10665_s1 + $0x240] ss:$16 sps:$4 sm:$0xff]  }
   0xd   :  { %1685 = vmatprep.subr.bf16.mxu1 %v7393_v13  ;;  %v7409_v24 = vld [vmem:[%s10665_s1 + $0x24] ss:$16 sps:$4 sm:$0xff]   ;;  %v7413_v26 = vld [vmem:[%s10665_s1 + $0x20] ss:$16 sps:$4 sm:$0xff]  }
   0xe   :  { %v7411_v25 = vld [vmem:[%s10665_s1 + $0x224] ss:$16 sps:$4 sm:$0xff]   ;;  %v7414_v27 = vld [vmem:[%s10665_s1 + $0x220] ss:$16 sps:$4 sm:$0xff]  }
   0xf   :  { %1645 = vmatpush1.bf16.msra.mxu0 %v7395_v14  ;;  %v7415_v28 = vld [vmem:[%s10665_s1 + $0x4] ss:$16 sps:$4 sm:$0xff]   ;;  %v7419_v30 = vld [vmem:[%s10665_s1] ss:$16 sps:$4 sm:$0xff]   ;;  %v8102_v14 = vrot.slane %v27_v4, %v8031_v49 }
  0x10   :  { %1686 = vmatpush1.bf16.msra.mxu1 %v7396_v15  ;;  %1646 = vmatprep.subr.bf16.mxu0 %v7397_v16  ;;  %v7417_v29 = vld [vmem:[%s10665_s1 + $0x204] ss:$16 sps:$4 sm:$0xff]   ;;  %v7420_v31 = vld [vmem:[%s10665_s1 + $0x200] ss:$16 sps:$4 sm:$0xff]   ;;  %v8105_v15 = vrot.slane %v47_v9, %v8031_v49 }
  0x11   :  { %1687 = vmatprep.subr.bf16.mxu1 %v7399_v17  ;;  %v7421_v32 = vld [vmem:[%s10665_s1 + $0x1e4] ss:$16 sps:$4 sm:$0xff]   ;;  %v7425_v34 = vld [vmem:[%s10665_s1 + $0x1e0] ss:$16 sps:$4 sm:$0xff]  }
  0x12   :  { %v7423_v33 = vld [vmem:[%s10665_s1 + $0x3e4] ss:$16 sps:$4 sm:$0xff]   ;;  %v7426_v35 = vld [vmem:[%s10665_s1 + $0x3e0] ss:$16 sps:$4 sm:$0xff]  }
  0x13   :  { %1647 = vmatpush1.bf16.msra.mxu0 %v7401_v18  ;;  %v7427_v39 = vld [vmem:[%s10665_s1 + $0x1c4] ss:$16 sps:$4 sm:$0xff]   ;;  %v7431_v41 = vld [vmem:[%s10665_s1 + $0x1c0] ss:$16 sps:$4 sm:$0xff]  }
  0x14   :  { %1688 = vmatpush1.bf16.msra.mxu1 %v7402_v19  ;;  %1648 = vmatprep.subr.bf16.mxu0 %v7403_v20  ;;  %v7429_v40 = vld [vmem:[%s10665_s1 + $0x3c4] ss:$16 sps:$4 sm:$0xff]   ;;  %v7432_v44 = vld [vmem:[%s10665_s1 + $0x3c0] ss:$16 sps:$4 sm:$0xff]   ;;  %v62_v20 = vcombine.high %v8102_v14, %v8102_v14 }
  0x15   :  { %1689 = vmatprep.subr.bf16.mxu1 %v7405_v21  ;;  %v7433_v45 = vld [vmem:[%s10665_s1 + $0x1a4] ss:$16 sps:$4 sm:$0xff]   ;;  %v7437_v47 = vld [vmem:[%s10665_s1 + $0x1a0] ss:$16 sps:$4 sm:$0xff]   ;;  %v63_v21 = vcombine.high %v8105_v15, %v8105_v15 }
  0x16   :  { %v7435_v46 = vld [vmem:[%s10665_s1 + $0x3a4] ss:$16 sps:$4 sm:$0xff]   ;;  %v7438_v48 = vld [vmem:[%s10665_s1 + $0x3a0] ss:$16 sps:$4 sm:$0xff]  }
  0x17   :  { %1649 = vmatpush1.bf16.msra.mxu0 %v7407_v22  ;;  %v7439_v50 = vld [vmem:[%s10665_s1 + $0x184] ss:$16 sps:$4 sm:$0xff]   ;;  %v7443_v55 = vld [vmem:[%s10665_s1 + $0x180] ss:$16 sps:$4 sm:$0xff]  }
  0x18   :  { %1690 = vmatpush1.bf16.msra.mxu1 %v7408_v23  ;;  %1650 = vmatprep.subr.bf16.mxu0 %v7409_v24  ;;  %v7441_v51 = vld [vmem:[%s10665_s1 + $0x384] ss:$16 sps:$4 sm:$0xff]   ;;  %v7444_v56 = vld [vmem:[%s10665_s1 + $0x380] ss:$16 sps:$4 sm:$0xff]  }
  0x19   :  { %1691 = vmatprep.subr.bf16.mxu1 %v7411_v25  ;;  %v26_v52 = vld [vmem:[%s10666_s0] sm:$0xff] }
  0x1a   :  { %v37_v53 = vrot.slane %v26_v52, %v8031_v49  ;;  %v30_v54 = vcombine.high %v26_v52, %v26_v52  ;;  %v7445_v57 = vld [vmem:[%s10665_s1 + $0x164] ss:$16 sps:$4 sm:$0xff]   ;;  %v7449_v63 = vld [vmem:[%s10665_s1 + $0x160] ss:$16 sps:$4 sm:$0xff]  }
  0x1b   :  { %1651 = vmatpush1.bf16.msra.mxu0 %v7413_v26  ;;  %v7447_v58 = vld [vmem:[%s10665_s1 + $0x364] ss:$16 sps:$4 sm:$0xff]   ;;  %v7450_v0 = vld [vmem:[%s10665_s1 + $0x360] ss:$16 sps:$4 sm:$0xff]  }
  0x1c   :  { %1692 = vmatpush1.bf16.msra.mxu1 %v7414_v27  ;;  %1652 = vmatprep.subr.bf16.mxu0 %v7415_v28  ;;  %v45_v59 = vcombine.high %v37_v53, %v37_v53  ;;  %v44_v60 = vrot.slane %v30_v54, %v8031_v49  ;;  %v7451_v1 = vld [vmem:[%s10665_s1 + $0x144] ss:$16 sps:$4 sm:$0xff]   ;;  %v7455_v5 = vld [vmem:[%s10665_s1 + $0x140] ss:$16 sps:$4 sm:$0xff]   ;;  %v8123_v22 = vpack.c.bf16 %v37_v53, %v37_v53 }
  0x1d   :  { %1693 = vmatprep.subr.bf16.mxu1 %v7417_v29  ;;  %v7453_v2 = vld [vmem:[%s10665_s1 + $0x344] ss:$16 sps:$4 sm:$0xff]   ;;  %v7456_v6 = vld [vmem:[%s10665_s1 + $0x340] ss:$16 sps:$4 sm:$0xff]   ;;  %v8139_v28 = vpack.c.bf16 %v62_v20, %v62_v20  ;;  %v8141_v29 = vpack.c.bf16 %v63_v21, %v63_v21 }
  0x1e   :  { %v8056_v61 = vpack.c.bf16 %v45_v59, %v45_v59  ;;  %v46_v62 = vcombine.high %v44_v60, %v44_v60  ;;  %v7457_v7 = vld [vmem:[%s10665_s1 + $0x124] ss:$16 sps:$4 sm:$0xff]   ;;  %v7461_v10 = vld [vmem:[%s10665_s1 + $0x120] ss:$16 sps:$4 sm:$0xff]   ;;  %v8125_v23 = vpack.c.bf16 %v44_v60, %v44_v60 }
  0x1f   :  { %1653 = vmatpush1.bf16.msra.mxu0 %v7419_v30  ;;  %v7459_v8 = vld [vmem:[%s10665_s1 + $0x324] ss:$16 sps:$4 sm:$0xff]   ;;  %v7462_v11 = vld [vmem:[%s10665_s1 + $0x320] ss:$16 sps:$4 sm:$0xff]  }
  0x20   :  { %1694 = vmatpush1.bf16.msra.mxu1 %v7420_v31  ;;  %1654 = vmatprep.subr.bf16.mxu0 %v7421_v32  ;;  %v8070_v3 = vpack.c.bf16 %v46_v62, %v46_v62  ;;  %v7463_v12 = vld [vmem:[%s10665_s1 + $0x104] ss:$16 sps:$4 sm:$0xff]   ;;  %v7467_v16 = vld [vmem:[%s10665_s1 + $0x100] ss:$16 sps:$4 sm:$0xff]  }
  0x21   :  { %1695 = vmatprep.subr.bf16.mxu1 %v7423_v33  ;;  %1670 = vmatprep.mubr.bf16.mxu0 %v8056_v61  ;;  %v7465_v13 = vld [vmem:[%s10665_s1 + $0x304] ss:$16 sps:$4 sm:$0xff]   ;;  %v7468_v17 = vld [vmem:[%s10665_s1 + $0x300] ss:$16 sps:$4 sm:$0xff]  }
  0x22   :  { %1711 = vmatprep.mubr.bf16.mxu1 %v8070_v3  ;;  %v7473_v18 = vld [vmem:[%s10665_s1 + $0x4e4] ss:$16 sps:$4 sm:$0xff]   ;;  %v7471_v24 = vld [vmem:[%s10665_s1 + $0x4e0] ss:$16 sps:$4 sm:$0xff]  }
  0x23   :  { %1655 = vmatpush2.bf16.msra.mxu0 %v7425_v34  ;;  %v7476_v19 = vld [vmem:[%s10665_s1 + $0x6e4] ss:$16 sps:$4 sm:$0xff]   ;;  %v7474_v25 = vld [vmem:[%s10665_s1 + $0x6e0] ss:$16 sps:$4 sm:$0xff]  }
  0x24   :  { %1696 = vmatpush2.bf16.msra.mxu1 %v7426_v35  ;;  %1656 = vmatprep.subr.bf16.mxu0 %v7427_v39  ;;  %v7479_v26 = vld [vmem:[%s10665_s1 + $0x4c4] ss:$16 sps:$4 sm:$0xff]   ;;  %v7477_v30 = vld [vmem:[%s10665_s1 + $0x4c0] ss:$16 sps:$4 sm:$0xff]  }
  0x25   :  { %1697 = vmatprep.subr.bf16.mxu1 %v7429_v40  ;;  %v7482_v27 = vld [vmem:[%s10665_s1 + $0x6c4] ss:$16 sps:$4 sm:$0xff]   ;;  %v7480_v31 = vld [vmem:[%s10665_s1 + $0x6c0] ss:$16 sps:$4 sm:$0xff]  }
  0x26   :  { %v7485_v32 = vld [vmem:[%s10665_s1 + $0x4a4] ss:$16 sps:$4 sm:$0xff]   ;;  %v7483_v34 = vld [vmem:[%s10665_s1 + $0x4a0] ss:$16 sps:$4 sm:$0xff]  }
  0x27   :  { %1657 = vmatpush2.bf16.msra.mxu0 %v7431_v41  ;;  %v7488_v33 = vld [vmem:[%s10665_s1 + $0x6a4] ss:$16 sps:$4 sm:$0xff]   ;;  %v7486_v35 = vld [vmem:[%s10665_s1 + $0x6a0] ss:$16 sps:$4 sm:$0xff]  }
  0x28   :  { %1698 = vmatpush2.bf16.msra.mxu1 %v7432_v44  ;;  %1658 = vmatprep.subr.bf16.mxu0 %v7433_v45  ;;  %v7491_v36 = vld [vmem:[%s10665_s1 + $0x484] ss:$16 sps:$4 sm:$0xff]   ;;  %v7489_v38 = vld [vmem:[%s10665_s1 + $0x480] ss:$16 sps:$4 sm:$0xff]  }
  0x29   :  { %1699 = vmatprep.subr.bf16.mxu1 %v7435_v46  ;;  %v7494_v37 = vld [vmem:[%s10665_s1 + $0x684] ss:$16 sps:$4 sm:$0xff]   ;;  %v7492_v39 = vld [vmem:[%s10665_s1 + $0x680] ss:$16 sps:$4 sm:$0xff]  }
  0x2a   :  { %v7497_v40 = vld [vmem:[%s10665_s1 + $0x464] ss:$16 sps:$4 sm:$0xff]   ;;  %v7495_v42 = vld [vmem:[%s10665_s1 + $0x460] ss:$16 sps:$4 sm:$0xff]  }
  0x2b   :  { %1659 = vmatpush2.bf16.msra.mxu0 %v7437_v47  ;;  %v7500_v41 = vld [vmem:[%s10665_s1 + $0x664] ss:$16 sps:$4 sm:$0xff]   ;;  %v7498_v44 = vld [vmem:[%s10665_s1 + $0x660] ss:$16 sps:$4 sm:$0xff]  }
  0x2c   :  { %1700 = vmatpush2.bf16.msra.mxu1 %v7438_v48  ;;  %1660 = vmatprep.subr.bf16.mxu0 %v7439_v50  ;;  %v7503_v45 = vld [vmem:[%s10665_s1 + $0x444] ss:$16 sps:$4 sm:$0xff]   ;;  %v7501_v47 = vld [vmem:[%s10665_s1 + $0x440] ss:$16 sps:$4 sm:$0xff]  }
  0x2d   :  { %1701 = vmatprep.subr.bf16.mxu1 %v7441_v51  ;;  %v7506_v46 = vld [vmem:[%s10665_s1 + $0x644] ss:$16 sps:$4 sm:$0xff]   ;;  %v7504_v48 = vld [vmem:[%s10665_s1 + $0x640] ss:$16 sps:$4 sm:$0xff]  }
  0x2e   :  { %v7509_v50 = vld [vmem:[%s10665_s1 + $0x424] ss:$16 sps:$4 sm:$0xff]   ;;  %v7507_v52 = vld [vmem:[%s10665_s1 + $0x420] ss:$16 sps:$4 sm:$0xff]  }
  0x2f   :  { %1661 = vmatpush2.bf16.msra.mxu0 %v7443_v55  ;;  %v7512_v51 = vld [vmem:[%s10665_s1 + $0x624] ss:$16 sps:$4 sm:$0xff]   ;;  %v7510_v53 = vld [vmem:[%s10665_s1 + $0x620] ss:$16 sps:$4 sm:$0xff]  }
  0x30   :  { %1702 = vmatpush2.bf16.msra.mxu1 %v7444_v56  ;;  %1662 = vmatprep.subr.bf16.mxu0 %v7445_v57  ;;  %v7515_v54 = vld [vmem:[%s10665_s1 + $0x404] ss:$16 sps:$4 sm:$0xff]   ;;  %v7513_v56 = vld [vmem:[%s10665_s1 + $0x400] ss:$16 sps:$4 sm:$0xff]  }
  0x31   :  { %1703 = vmatprep.subr.bf16.mxu1 %v7447_v58  ;;  %v7518_v55 = vld [vmem:[%s10665_s1 + $0x604] ss:$16 sps:$4 sm:$0xff]   ;;  %v7516_v57 = vld [vmem:[%s10665_s1 + $0x600] ss:$16 sps:$4 sm:$0xff]  }
  0x32   :  { %v7521_v58 = vld [vmem:[%s10665_s1 + $0x5e4] ss:$16 sps:$4 sm:$0xff]   ;;  %v7519_v60 = vld [vmem:[%s10665_s1 + $0x5e0] ss:$16 sps:$4 sm:$0xff]  }
  0x33   :  { %1663 = vmatpush2.bf16.msra.mxu0 %v7449_v63  ;;  %v7524_v59 = vld [vmem:[%s10665_s1 + $0x7e4] ss:$16 sps:$4 sm:$0xff]   ;;  %v7522_v62 = vld [vmem:[%s10665_s1 + $0x7e0] ss:$16 sps:$4 sm:$0xff]  }
  0x34   :  { %1704 = vmatpush2.bf16.msra.mxu1 %v7450_v0  ;;  %1664 = vmatprep.subr.bf16.mxu0 %v7451_v1  ;;  %v7527_v63 = vld [vmem:[%s10665_s1 + $0x5c4] ss:$16 sps:$4 sm:$0xff]   ;;  %v7525_v1 = vld [vmem:[%s10665_s1 + $0x5c0] ss:$16 sps:$4 sm:$0xff]  }
  0x35   :  { %1705 = vmatprep.subr.bf16.mxu1 %v7453_v2  ;;  %v7530_v0 = vld [vmem:[%s10665_s1 + $0x7c4] ss:$16 sps:$4 sm:$0xff]   ;;  %v7528_v2 = vld [vmem:[%s10665_s1 + $0x7c0] ss:$16 sps:$4 sm:$0xff]  }
  0x36   :  { %v7533_v4 = vld [vmem:[%s10665_s1 + $0x5a4] ss:$16 sps:$4 sm:$0xff]   ;;  %v7549_v20 = vld [vmem:[%s10665_s1 + $0x540] ss:$16 sps:$4 sm:$0xff]  }
  0x37   :  { %1665 = vmatpush2.bf16.msra.mxu0 %v7455_v5  ;;  %v7536_v5 = vld [vmem:[%s10665_s1 + $0x7a4] ss:$16 sps:$4 sm:$0xff]   ;;  %v7552_v21 = vld [vmem:[%s10665_s1 + $0x740] ss:$16 sps:$4 sm:$0xff]  }
  0x38   :  { %1706 = vmatpush2.bf16.msra.mxu1 %v7456_v6  ;;  %1666 = vmatprep.subr.bf16.mxu0 %v7457_v7  ;;  %v7531_v6 = vld [vmem:[%s10665_s1 + $0x5a0] ss:$16 sps:$4 sm:$0xff]   ;;  %v7542_v9 = vld [vmem:[%s10665_s1 + $0x784] ss:$16 sps:$4 sm:$0xff]  }
  0x39   :  { %1707 = vmatprep.subr.bf16.mxu1 %v7459_v8  ;;  %v7534_v7 = vld [vmem:[%s10665_s1 + $0x7a0] ss:$16 sps:$4 sm:$0xff]   ;;  %v7539_v8 = vld [vmem:[%s10665_s1 + $0x584] ss:$16 sps:$4 sm:$0xff]  }
  0x3b   :  { %1667 = vmatpush2.bf16.msra.mxu0 %v7461_v10  ;;  %v7537_v10 = vld [vmem:[%s10665_s1 + $0x580] ss:$16 sps:$4 sm:$0xff]  }
  0x3c   :  { %1708 = vmatpush2.bf16.msra.mxu1 %v7462_v11  ;;  %1668 = vmatprep.subr.bf16.mxu0 %v7463_v12  ;;  %v7540_v11 = vld [vmem:[%s10665_s1 + $0x780] ss:$16 sps:$4 sm:$0xff]   ;;  %v7545_v12 = vld [vmem:[%s10665_s1 + $0x564] ss:$16 sps:$4 sm:$0xff]  }
  0x3d   :  { %1709 = vmatprep.subr.bf16.mxu1 %v7465_v13  ;;  %v7548_v13 = vld [vmem:[%s10665_s1 + $0x764] ss:$16 sps:$4 sm:$0xff]  }
  0x3f   :  { %1669 = vmatpush2.bf16.msra.mxu0 %v7467_v16  ;;  %v7543_v16 = vld [vmem:[%s10665_s1 + $0x560] ss:$16 sps:$4 sm:$0xff]  }
  0x40   :  { %1710 = vmatpush2.bf16.msra.mxu1 %v7468_v17  ;;  %1720 = vmatprep.subr.bf16.mxu0 %v7473_v18  ;;  %v7546_v17 = vld [vmem:[%s10665_s1 + $0x760] ss:$16 sps:$4 sm:$0xff]   ;;  %v7551_v18 = vld [vmem:[%s10665_s1 + $0x544] ss:$16 sps:$4 sm:$0xff]  }
  0x41   :  { %1761 = vmatprep.subr.bf16.mxu1 %v7476_v19  ;;  %v7554_v19 = vld [vmem:[%s10665_s1 + $0x744] ss:$16 sps:$4 sm:$0xff]  }
  0x42   :  { %1671 = vmatmul.mubr.bf16.vlgmr.msra.gmra.mxu0 %v8123_v22 }
  0x43   :  { %1712 = vmatmul.mubr.bf16.vlgmr.msra.gmra.mxu1 %v8125_v23  ;;  %1721 = vmatpush1.bf16.msra.mxu0 %v7471_v24  ;;  %v7557_v24 = vld [vmem:[%s10665_s1 + $0x524] ss:$16 sps:$4 sm:$0xff]  }
  0x44   :  { %1762 = vmatpush1.bf16.msra.mxu1 %v7474_v25  ;;  %1722 = vmatprep.subr.bf16.mxu0 %v7479_v26  ;;  %v7560_v25 = vld [vmem:[%s10665_s1 + $0x724] ss:$16 sps:$4 sm:$0xff]   ;;  %v7555_v26 = vld [vmem:[%s10665_s1 + $0x520] ss:$16 sps:$4 sm:$0xff]  }
  0x45   :  { %1763 = vmatprep.subr.bf16.mxu1 %v7482_v27  ;;  %1752 = vmatprep.mubr.bf16.mxu0 %v8139_v28  ;;  %v7558_v27 = vld [vmem:[%s10665_s1 + $0x720] ss:$16 sps:$4 sm:$0xff]  }
  0x46   :  { %1793 = vmatprep.mubr.bf16.mxu1 %v8141_v29 }
  0x47   :  { %1723 = vmatpush1.bf16.msra.mxu0 %v7477_v30  ;;  %v7563_v30 = vld [vmem:[%s10665_s1 + $0x504] ss:$16 sps:$4 sm:$0xff]  }
  0x48   :  { %1764 = vmatpush1.bf16.msra.mxu1 %v7480_v31  ;;  %1724 = vmatprep.subr.bf16.mxu0 %v7485_v32  ;;  %v7566_v31 = vld [vmem:[%s10665_s1 + $0x704] ss:$16 sps:$4 sm:$0xff]   ;;  %v7561_v32 = vld [vmem:[%s10665_s1 + $0x500] ss:$16 sps:$4 sm:$0xff]  }
  0x49   :  { %1765 = vmatprep.subr.bf16.mxu1 %v7488_v33  ;;  %v7564_v33 = vld [vmem:[%s10665_s1 + $0x700] ss:$16 sps:$4 sm:$0xff]  }
  0x4b   :  { %1725 = vmatpush1.bf16.msra.mxu0 %v7483_v34  ;;  %v7569_v34 = vld [vmem:[%s10665_s1 + $0xec] ss:$16 sps:$4 sm:$0xff]  }
  0x4c   :  { %1766 = vmatpush1.bf16.msra.mxu1 %v7486_v35  ;;  %1726 = vmatprep.subr.bf16.mxu0 %v7491_v36  ;;  %v7572_v35 = vld [vmem:[%s10665_s1 + $0x2ec] ss:$16 sps:$4 sm:$0xff]   ;;  %v8329_v36 = vpack.c.bf16 %v8102_v14, %v8102_v14 }
  0x4d   :  { %1767 = vmatprep.subr.bf16.mxu1 %v7494_v37  ;;  %v8333_v37 = vpack.c.bf16 %v8105_v15, %v8105_v15  ;;  %v7575_v14 = vld [vmem:[%s10665_s1 + $0xcc] ss:$16 sps:$4 sm:$0xff]  }
  0x4e   :  { %v7578_v15 = vld [vmem:[%s10665_s1 + $0x2cc] ss:$16 sps:$4 sm:$0xff]  }
  0x4f   :  { %1727 = vmatpush1.bf16.msra.mxu0 %v7489_v38  ;;  %v7567_v38 = vld [vmem:[%s10665_s1 + $0xe8] ss:$16 sps:$4 sm:$0xff]  }
  0x50   :  { %1768 = vmatpush1.bf16.msra.mxu1 %v7492_v39  ;;  %1728 = vmatprep.subr.bf16.mxu0 %v7497_v40  ;;  %v7570_v39 = vld [vmem:[%s10665_s1 + $0x2e8] ss:$16 sps:$4 sm:$0xff]  }
  0x51   :  { %1769 = vmatprep.subr.bf16.mxu1 %v7500_v41  ;;  %v7573_v40 = vld [vmem:[%s10665_s1 + $0xc8] ss:$16 sps:$4 sm:$0xff]  }
  0x52   :  { %v7576_v41 = vld [vmem:[%s10665_s1 + $0x2c8] ss:$16 sps:$4 sm:$0xff]  }
  0x53   :  { %1729 = vmatpush1.bf16.msra.mxu0 %v7495_v42  ;;  %v7581_v42 = vld [vmem:[%s10665_s1 + $0xac] ss:$16 sps:$4 sm:$0xff]  }
  0x54   :  { %1770 = vmatpush1.bf16.msra.mxu1 %v7498_v44  ;;  %1730 = vmatprep.subr.bf16.mxu0 %v7503_v45  ;;  %v7584_v44 = vld [vmem:[%s10665_s1 + $0x2ac] ss:$16 sps:$4 sm:$0xff]   ;;  %v7579_v45 = vld [vmem:[%s10665_s1 + $0xa8] ss:$16 sps:$4 sm:$0xff]  }
  0x55   :  { %1771 = vmatprep.subr.bf16.mxu1 %v7506_v46  ;;  %v7582_v46 = vld [vmem:[%s10665_s1 + $0x2a8] ss:$16 sps:$4 sm:$0xff]  }
  0x57   :  { %1731 = vmatpush1.bf16.msra.mxu0 %v7501_v47  ;;  %v7587_v47 = vld [vmem:[%s10665_s1 + $0x8c] ss:$16 sps:$4 sm:$0xff]  }
  0x58   :  { %1772 = vmatpush1.bf16.msra.mxu1 %v7504_v48  ;;  %1732 = vmatprep.subr.bf16.mxu0 %v7509_v50  ;;  %v7588_v48 = vld [vmem:[%s10665_s1 + $0x288] ss:$16 sps:$4 sm:$0xff]   ;;  %v7593_v50 = vld [vmem:[%s10665_s1 + $0x6c] ss:$16 sps:$4 sm:$0xff]  }
  0x59   :  { %1773 = vmatprep.subr.bf16.mxu1 %v7512_v51  ;;  %v7596_v51 = vld [vmem:[%s10665_s1 + $0x26c] ss:$16 sps:$4 sm:$0xff]  }
  0x5b   :  { %1733 = vmatpush1.bf16.msra.mxu0 %v7507_v52  ;;  %v7591_v52 = vld [vmem:[%s10665_s1 + $0x68] ss:$16 sps:$4 sm:$0xff]  }
  0x5c   :  { %1774 = vmatpush1.bf16.msra.mxu1 %v7510_v53  ;;  %1734 = vmatprep.subr.bf16.mxu0 %v7515_v54  ;;  %v7594_v53 = vld [vmem:[%s10665_s1 + $0x268] ss:$16 sps:$4 sm:$0xff]   ;;  %v7599_v54 = vld [vmem:[%s10665_s1 + $0x4c] ss:$16 sps:$4 sm:$0xff]  }
  0x5d   :  { %1775 = vmatprep.subr.bf16.mxu1 %v7518_v55  ;;  %v7602_v55 = vld [vmem:[%s10665_s1 + $0x24c] ss:$16 sps:$4 sm:$0xff]  }
  0x5f   :  { %1735 = vmatpush1.bf16.msra.mxu0 %v7513_v56  ;;  %v7597_v56 = vld [vmem:[%s10665_s1 + $0x48] ss:$16 sps:$4 sm:$0xff]  }
  0x60   :  { %1776 = vmatpush1.bf16.msra.mxu1 %v7516_v57  ;;  %1736 = vmatprep.subr.bf16.mxu0 %v7521_v58  ;;  %v7600_v57 = vld [vmem:[%s10665_s1 + $0x248] ss:$16 sps:$4 sm:$0xff]   ;;  %v7605_v58 = vld [vmem:[%s10665_s1 + $0x2c] ss:$16 sps:$4 sm:$0xff]  }
  0x61   :  { %1777 = vmatprep.subr.bf16.mxu1 %v7524_v59  ;;  %v7608_v59 = vld [vmem:[%s10665_s1 + $0x22c] ss:$16 sps:$4 sm:$0xff]  }
  0x63   :  { %1737 = vmatpush2.bf16.msra.mxu0 %v7519_v60  ;;  %v7603_v60 = vld [vmem:[%s10665_s1 + $0x28] ss:$16 sps:$4 sm:$0xff]  }
  0x64   :  { %1778 = vmatpush2.bf16.msra.mxu1 %v7522_v62  ;;  %1738 = vmatprep.subr.bf16.mxu0 %v7527_v63  ;;  %v7606_v62 = vld [vmem:[%s10665_s1 + $0x228] ss:$16 sps:$4 sm:$0xff]   ;;  %v7611_v63 = vld [vmem:[%s10665_s1 + $0xc] ss:$16 sps:$4 sm:$0xff]  }
  0x65   :  { %1779 = vmatprep.subr.bf16.mxu1 %v7530_v0  ;;  %v7614_v0 = vld [vmem:[%s10665_s1 + $0x20c] ss:$16 sps:$4 sm:$0xff]  }
  0x67   :  { %1739 = vmatpush2.bf16.msra.mxu0 %v7525_v1  ;;  %v7609_v1 = vld [vmem:[%s10665_s1 + $0x8] ss:$16 sps:$4 sm:$0xff]  }
  0x68   :  { %1780 = vmatpush2.bf16.msra.mxu1 %v7528_v2  ;;  %1740 = vmatprep.subr.bf16.mxu0 %v7533_v4  ;;  %v7612_v2 = vld [vmem:[%s10665_s1 + $0x208] ss:$16 sps:$4 sm:$0xff]   ;;  %v7617_v4 = vld [vmem:[%s10665_s1 + $0x1ec] ss:$16 sps:$4 sm:$0xff]  }
  0x69   :  { %1781 = vmatprep.subr.bf16.mxu1 %v7536_v5  ;;  %v7620_v5 = vld [vmem:[%s10665_s1 + $0x3ec] ss:$16 sps:$4 sm:$0xff]  }
  0x6b   :  { %1741 = vmatpush2.bf16.msra.mxu0 %v7531_v6  ;;  %v7615_v6 = vld [vmem:[%s10665_s1 + $0x1e8] ss:$16 sps:$4 sm:$0xff]  }
  0x6c   :  { %1782 = vmatpush2.bf16.msra.mxu1 %v7534_v7  ;;  %1742 = vmatprep.subr.bf16.mxu0 %v7539_v8  ;;  %v7618_v7 = vld [vmem:[%s10665_s1 + $0x3e8] ss:$16 sps:$4 sm:$0xff]   ;;  %v7623_v8 = vld [vmem:[%s10665_s1 + $0x1cc] ss:$16 sps:$4 sm:$0xff]  }
  0x6d   :  { %1783 = vmatprep.subr.bf16.mxu1 %v7542_v9  ;;  %v7626_v9 = vld [vmem:[%s10665_s1 + $0x3cc] ss:$16 sps:$4 sm:$0xff]  }
  0x6f   :  { %1743 = vmatpush2.bf16.msra.mxu0 %v7537_v10  ;;  %v7621_v10 = vld [vmem:[%s10665_s1 + $0x1c8] ss:$16 sps:$4 sm:$0xff]  }
  0x70   :  { %1784 = vmatpush2.bf16.msra.mxu1 %v7540_v11  ;;  %1744 = vmatprep.subr.bf16.mxu0 %v7545_v12  ;;  %v7624_v11 = vld [vmem:[%s10665_s1 + $0x3c8] ss:$16 sps:$4 sm:$0xff]   ;;  %v7629_v12 = vld [vmem:[%s10665_s1 + $0x1ac] ss:$16 sps:$4 sm:$0xff]  }
  0x71   :  { %1785 = vmatprep.subr.bf16.mxu1 %v7548_v13  ;;  %v7632_v13 = vld [vmem:[%s10665_s1 + $0x3ac] ss:$16 sps:$4 sm:$0xff]  }
  0x73   :  { %1745 = vmatpush2.bf16.msra.mxu0 %v7543_v16  ;;  %v7627_v16 = vld [vmem:[%s10665_s1 + $0x1a8] ss:$16 sps:$4 sm:$0xff]  }
  0x74   :  { %1786 = vmatpush2.bf16.msra.mxu1 %v7546_v17  ;;  %1746 = vmatprep.subr.bf16.mxu0 %v7551_v18  ;;  %v7630_v17 = vld [vmem:[%s10665_s1 + $0x3a8] ss:$16 sps:$4 sm:$0xff]   ;;  %v7635_v18 = vld [vmem:[%s10665_s1 + $0x18c] ss:$16 sps:$4 sm:$0xff]  }
  0x75   :  { %1787 = vmatprep.subr.bf16.mxu1 %v7554_v19  ;;  %v7638_v19 = vld [vmem:[%s10665_s1 + $0x38c] ss:$16 sps:$4 sm:$0xff]  }
  0x77   :  { %1747 = vmatpush2.bf16.msra.mxu0 %v7549_v20  ;;  %v7633_v20 = vld [vmem:[%s10665_s1 + $0x188] ss:$16 sps:$4 sm:$0xff]  }
  0x78   :  { %1788 = vmatpush2.bf16.msra.mxu1 %v7552_v21  ;;  %1748 = vmatprep.subr.bf16.mxu0 %v7557_v24  ;;  %v7636_v21 = vld [vmem:[%s10665_s1 + $0x388] ss:$16 sps:$4 sm:$0xff]   ;;  %v7641_v24 = vld [vmem:[%s10665_s1 + $0x16c] ss:$16 sps:$4 sm:$0xff]  }
  0x79   :  { %1789 = vmatprep.subr.bf16.mxu1 %v7560_v25  ;;  %v7644_v25 = vld [vmem:[%s10665_s1 + $0x36c] ss:$16 sps:$4 sm:$0xff]  }
  0x7b   :  { %1749 = vmatpush2.bf16.msra.mxu0 %v7555_v26  ;;  %v7639_v26 = vld [vmem:[%s10665_s1 + $0x168] ss:$16 sps:$4 sm:$0xff]  }
  0x7c   :  { %1790 = vmatpush2.bf16.msra.mxu1 %v7558_v27  ;;  %1750 = vmatprep.subr.bf16.mxu0 %v7563_v30  ;;  %v7642_v27 = vld [vmem:[%s10665_s1 + $0x368] ss:$16 sps:$4 sm:$0xff]   ;;  %v7647_v30 = vld [vmem:[%s10665_s1 + $0x14c] ss:$16 sps:$4 sm:$0xff]  }
  0x7d   :  { %1791 = vmatprep.subr.bf16.mxu1 %v7566_v31  ;;  %v7650_v31 = vld [vmem:[%s10665_s1 + $0x34c] ss:$16 sps:$4 sm:$0xff]  }
  0x7f   :  { %1751 = vmatpush2.bf16.msra.mxu0 %v7561_v32  ;;  %v7645_v32 = vld [vmem:[%s10665_s1 + $0x148] ss:$16 sps:$4 sm:$0xff]  }
  0x80   :  { %1792 = vmatpush2.bf16.msra.mxu1 %v7564_v33  ;;  %1802 = vmatprep.subr.bf16.mxu0 %v7569_v34  ;;  %v7648_v33 = vld [vmem:[%s10665_s1 + $0x348] ss:$16 sps:$4 sm:$0xff]   ;;  %v7653_v34 = vld [vmem:[%s10665_s1 + $0x12c] ss:$16 sps:$4 sm:$0xff]  }
  0x81   :  { %1843 = vmatprep.subr.bf16.mxu1 %v7572_v35  ;;  %v7656_v35 = vld [vmem:[%s10665_s1 + $0x32c] ss:$16 sps:$4 sm:$0xff]  }
  0x82   :  { %1753 = vmatmul.mubr.bf16.vlgmr.msra.gmra.mxu0 %v8329_v36 }
  0x83   :  { %1794 = vmatmul.mubr.bf16.vlgmr.msra.gmra.mxu1 %v8333_v37  ;;  %1803 = vmatpush1.bf16.msra.mxu0 %v7567_v38  ;;  %v7651_v38 = vld [vmem:[%s10665_s1 + $0x128] ss:$16 sps:$4 sm:$0xff]  }
  0x84   :  { %1844 = vmatpush1.bf16.msra.mxu1 %v7570_v39  ;;  %1804 = vmatprep.subr.bf16.mxu0 %v7575_v14  ;;  %v7654_v39 = vld [vmem:[%s10665_s1 + $0x328] ss:$16 sps:$4 sm:$0xff]   ;;  %v7659_v14 = vld [vmem:[%s10665_s1 + $0x10c] ss:$16 sps:$4 sm:$0xff]  }
  0x85   :  { %1845 = vmatprep.subr.bf16.mxu1 %v7578_v15  ;;  %1834 = vmatprep.mubr.bf16.mxu0 %v8056_v61  ;;  %v7590_v61 = vld [vmem:[%s10665_s1 + $0x28c] ss:$16 sps:$4 sm:$0xff]  }
  0x86   :  { %1875 = vmatprep.mubr.bf16.mxu1 %v8070_v3  ;;  %v7585_v3 = vld [vmem:[%s10665_s1 + $0x88] ss:$16 sps:$4 sm:$0xff]   ;;  %v7662_v15 = vld [vmem:[%s10665_s1 + $0x30c] ss:$16 sps:$4 sm:$0xff]  }
  0x87   :  { %1805 = vmatpush1.bf16.msra.mxu0 %v7573_v40  ;;  %v7657_v40 = vld [vmem:[%s10665_s1 + $0x108] ss:$16 sps:$4 sm:$0xff]  }
  0x88   :  { %1846 = vmatpush1.bf16.msra.mxu1 %v7576_v41  ;;  %1806 = vmatprep.subr.bf16.mxu0 %v7581_v42  ;;  %v7660_v41 = vld [vmem:[%s10665_s1 + $0x308] ss:$16 sps:$4 sm:$0xff]   ;;  %v7665_v42 = vld [vmem:[%s10665_s1 + $0x4ec] ss:$16 sps:$4 sm:$0xff]  }
  0x89   :  { %1847 = vmatprep.subr.bf16.mxu1 %v7584_v44  ;;  %v7668_v44 = vld [vmem:[%s10665_s1 + $0x6ec] ss:$16 sps:$4 sm:$0xff]  }
  0x8b   :  { %1807 = vmatpush1.bf16.msra.mxu0 %v7579_v45  ;;  %v7663_v45 = vld [vmem:[%s10665_s1 + $0x4e8] ss:$16 sps:$4 sm:$0xff]  }
  0x8c   :  { %1848 = vmatpush1.bf16.msra.mxu1 %v7582_v46  ;;  %1808 = vmatprep.subr.bf16.mxu0 %v7587_v47  ;;  %v7666_v46 = vld [vmem:[%s10665_s1 + $0x6e8] ss:$16 sps:$4 sm:$0xff]   ;;  %v7671_v47 = vld [vmem:[%s10665_s1 + $0x4cc] ss:$16 sps:$4 sm:$0xff]  }
  0x8d   :  { %1849 = vmatprep.subr.bf16.mxu1 %v7590_v61  ;;  %v7674_v61 = vld [vmem:[%s10665_s1 + $0x6cc] ss:$16 sps:$4 sm:$0xff]  }
  0x8f   :  { %1809 = vmatpush1.bf16.msra.mxu0 %v7585_v3  ;;  %v7669_v3 = vld [vmem:[%s10665_s1 + $0x4c8] ss:$16 sps:$4 sm:$0xff]  }
  0x90   :  { %1850 = vmatpush1.bf16.msra.mxu1 %v7588_v48  ;;  %1810 = vmatprep.subr.bf16.mxu0 %v7593_v50  ;;  %v7672_v48 = vld [vmem:[%s10665_s1 + $0x6c8] ss:$16 sps:$4 sm:$0xff]   ;;  %v7677_v50 = vld [vmem:[%s10665_s1 + $0x4ac] ss:$16 sps:$4 sm:$0xff]  }
  0x91   :  { %1851 = vmatprep.subr.bf16.mxu1 %v7596_v51  ;;  %v7680_v51 = vld [vmem:[%s10665_s1 + $0x6ac] ss:$16 sps:$4 sm:$0xff]  }
  0x93   :  { %1811 = vmatpush1.bf16.msra.mxu0 %v7591_v52  ;;  %v7675_v52 = vld [vmem:[%s10665_s1 + $0x4a8] ss:$16 sps:$4 sm:$0xff]  }
  0x94   :  { %1852 = vmatpush1.bf16.msra.mxu1 %v7594_v53  ;;  %1812 = vmatprep.subr.bf16.mxu0 %v7599_v54  ;;  %v7686_v53 = vld [vmem:[%s10665_s1 + $0x68c] ss:$16 sps:$4 sm:$0xff]  }
  0x95   :  { %1853 = vmatprep.subr.bf16.mxu1 %v7602_v55  ;;  %v7689_v54 = vld [vmem:[%s10665_s1 + $0x46c] ss:$16 sps:$4 sm:$0xff]  }
  0x96   :  { %v7692_v55 = vld [vmem:[%s10665_s1 + $0x66c] ss:$16 sps:$4 sm:$0xff]  }
  0x97   :  { %1813 = vmatpush1.bf16.msra.mxu0 %v7597_v56  ;;  %v7687_v56 = vld [vmem:[%s10665_s1 + $0x468] ss:$16 sps:$4 sm:$0xff]  }
  0x98   :  { %1854 = vmatpush1.bf16.msra.mxu1 %v7600_v57  ;;  %1814 = vmatprep.subr.bf16.mxu0 %v7605_v58  ;;  %v7690_v57 = vld [vmem:[%s10665_s1 + $0x668] ss:$16 sps:$4 sm:$0xff]   ;;  %v7695_v58 = vld [vmem:[%s10665_s1 + $0x44c] ss:$16 sps:$4 sm:$0xff]  }
  0x99   :  { %1855 = vmatprep.subr.bf16.mxu1 %v7608_v59  ;;  %v7698_v59 = vld [vmem:[%s10665_s1 + $0x64c] ss:$16 sps:$4 sm:$0xff]  }
  0x9b   :  { %1815 = vmatpush1.bf16.msra.mxu0 %v7603_v60  ;;  %v7693_v60 = vld [vmem:[%s10665_s1 + $0x448] ss:$16 sps:$4 sm:$0xff]  }
  0x9c   :  { %1856 = vmatpush1.bf16.msra.mxu1 %v7606_v62  ;;  %1816 = vmatprep.subr.bf16.mxu0 %v7611_v63  ;;  %v7696_v62 = vld [vmem:[%s10665_s1 + $0x648] ss:$16 sps:$4 sm:$0xff]   ;;  %v7701_v63 = vld [vmem:[%s10665_s1 + $0x42c] ss:$16 sps:$4 sm:$0xff]  }
  0x9d   :  { %1857 = vmatprep.subr.bf16.mxu1 %v7614_v0  ;;  %v7704_v0 = vld [vmem:[%s10665_s1 + $0x62c] ss:$16 sps:$4 sm:$0xff]  }
  0x9f   :  { %1817 = vmatpush1.bf16.msra.mxu0 %v7609_v1  ;;  %v7699_v1 = vld [vmem:[%s10665_s1 + $0x428] ss:$16 sps:$4 sm:$0xff]  }
  0xa0   :  { %1858 = vmatpush1.bf16.msra.mxu1 %v7612_v2  ;;  %1818 = vmatprep.subr.bf16.mxu0 %v7617_v4  ;;  %v7702_v2 = vld [vmem:[%s10665_s1 + $0x628] ss:$16 sps:$4 sm:$0xff]   ;;  %v7707_v4 = vld [vmem:[%s10665_s1 + $0x40c] ss:$16 sps:$4 sm:$0xff]  }
  0xa1   :  { %1859 = vmatprep.subr.bf16.mxu1 %v7620_v5  ;;  %v7710_v5 = vld [vmem:[%s10665_s1 + $0x60c] ss:$16 sps:$4 sm:$0xff]  }
  0xa3   :  { %1819 = vmatpush2.bf16.msra.mxu0 %v7615_v6  ;;  %v7705_v6 = vld [vmem:[%s10665_s1 + $0x408] ss:$16 sps:$4 sm:$0xff]  }
  0xa4   :  { %1860 = vmatpush2.bf16.msra.mxu1 %v7618_v7  ;;  %1820 = vmatprep.subr.bf16.mxu0 %v7623_v8  ;;  %v7708_v7 = vld [vmem:[%s10665_s1 + $0x608] ss:$16 sps:$4 sm:$0xff]   ;;  %v7713_v8 = vld [vmem:[%s10665_s1 + $0x5ec] ss:$16 sps:$4 sm:$0xff]  }
  0xa5   :  { %1861 = vmatprep.subr.bf16.mxu1 %v7626_v9  ;;  %v7716_v9 = vld [vmem:[%s10665_s1 + $0x7ec] ss:$16 sps:$4 sm:$0xff]  }
  0xa7   :  { %1821 = vmatpush2.bf16.msra.mxu0 %v7621_v10  ;;  %v7711_v10 = vld [vmem:[%s10665_s1 + $0x5e8] ss:$16 sps:$4 sm:$0xff]  }
  0xa8   :  { %1862 = vmatpush2.bf16.msra.mxu1 %v7624_v11  ;;  %1822 = vmatprep.subr.bf16.mxu0 %v7629_v12  ;;  %v7714_v11 = vld [vmem:[%s10665_s1 + $0x7e8] ss:$16 sps:$4 sm:$0xff]   ;;  %v7719_v12 = vld [vmem:[%s10665_s1 + $0x5cc] ss:$16 sps:$4 sm:$0xff]  }
  0xa9   :  { %1863 = vmatprep.subr.bf16.mxu1 %v7632_v13  ;;  %v7722_v13 = vld [vmem:[%s10665_s1 + $0x7cc] ss:$16 sps:$4 sm:$0xff]  }
  0xab   :  { %1823 = vmatpush2.bf16.msra.mxu0 %v7627_v16  ;;  %v7717_v16 = vld [vmem:[%s10665_s1 + $0x5c8] ss:$16 sps:$4 sm:$0xff]  }
  0xac   :  { %1864 = vmatpush2.bf16.msra.mxu1 %v7630_v17  ;;  %1824 = vmatprep.subr.bf16.mxu0 %v7635_v18  ;;  %v7720_v17 = vld [vmem:[%s10665_s1 + $0x7c8] ss:$16 sps:$4 sm:$0xff]   ;;  %v7725_v18 = vld [vmem:[%s10665_s1 + $0x5ac] ss:$16 sps:$4 sm:$0xff]  }
  0xad   :  { %1865 = vmatprep.subr.bf16.mxu1 %v7638_v19  ;;  %v7728_v19 = vld [vmem:[%s10665_s1 + $0x7ac] ss:$16 sps:$4 sm:$0xff]  }
  0xaf   :  { %1825 = vmatpush2.bf16.msra.mxu0 %v7633_v20  ;;  %v7723_v20 = vld [vmem:[%s10665_s1 + $0x5a8] ss:$16 sps:$4 sm:$0xff]  }
  0xb0   :  { %1866 = vmatpush2.bf16.msra.mxu1 %v7636_v21  ;;  %1826 = vmatprep.subr.bf16.mxu0 %v7641_v24  ;;  %v7726_v21 = vld [vmem:[%s10665_s1 + $0x7a8] ss:$16 sps:$4 sm:$0xff]   ;;  %v7731_v24 = vld [vmem:[%s10665_s1 + $0x58c] ss:$16 sps:$4 sm:$0xff]  }
  0xb1   :  { %1867 = vmatprep.subr.bf16.mxu1 %v7644_v25  ;;  %v7734_v25 = vld [vmem:[%s10665_s1 + $0x78c] ss:$16 sps:$4 sm:$0xff]  }
  0xb3   :  { %1827 = vmatpush2.bf16.msra.mxu0 %v7639_v26  ;;  %v7729_v26 = vld [vmem:[%s10665_s1 + $0x588] ss:$16 sps:$4 sm:$0xff]  }
  0xb4   :  { %1868 = vmatpush2.bf16.msra.mxu1 %v7642_v27  ;;  %1828 = vmatprep.subr.bf16.mxu0 %v7647_v30  ;;  %v7732_v27 = vld [vmem:[%s10665_s1 + $0x788] ss:$16 sps:$4 sm:$0xff]   ;;  %v7737_v30 = vld [vmem:[%s10665_s1 + $0x56c] ss:$16 sps:$4 sm:$0xff]  }
  0xb5   :  { %1869 = vmatprep.subr.bf16.mxu1 %v7650_v31  ;;  %v7740_v31 = vld [vmem:[%s10665_s1 + $0x76c] ss:$16 sps:$4 sm:$0xff]  }
  0xb7   :  { %1829 = vmatpush2.bf16.msra.mxu0 %v7645_v32  ;;  %v7735_v32 = vld [vmem:[%s10665_s1 + $0x568] ss:$16 sps:$4 sm:$0xff]  }
  0xb8   :  { %1870 = vmatpush2.bf16.msra.mxu1 %v7648_v33  ;;  %1830 = vmatprep.subr.bf16.mxu0 %v7653_v34  ;;  %v7738_v33 = vld [vmem:[%s10665_s1 + $0x768] ss:$16 sps:$4 sm:$0xff]   ;;  %v7743_v34 = vld [vmem:[%s10665_s1 + $0x54c] ss:$16 sps:$4 sm:$0xff]  }
  0xb9   :  { %1871 = vmatprep.subr.bf16.mxu1 %v7656_v35  ;;  %v7746_v35 = vld [vmem:[%s10665_s1 + $0x74c] ss:$16 sps:$4 sm:$0xff]  }
  0xbb   :  { %1831 = vmatpush2.bf16.msra.mxu0 %v7651_v38  ;;  %v7741_v38 = vld [vmem:[%s10665_s1 + $0x548] ss:$16 sps:$4 sm:$0xff]  }
  0xbc   :  { %1872 = vmatpush2.bf16.msra.mxu1 %v7654_v39  ;;  %1832 = vmatprep.subr.bf16.mxu0 %v7659_v14  ;;  %v7744_v39 = vld [vmem:[%s10665_s1 + $0x748] ss:$16 sps:$4 sm:$0xff]   ;;  %v7749_v14 = vld [vmem:[%s10665_s1 + $0x52c] ss:$16 sps:$4 sm:$0xff]  }
  0xbd   :  { %1873 = vmatprep.subr.bf16.mxu1 %v7662_v15  ;;  %v7752_v15 = vld [vmem:[%s10665_s1 + $0x72c] ss:$16 sps:$4 sm:$0xff]  }
  0xbf   :  { %1833 = vmatpush2.bf16.msra.mxu0 %v7657_v40  ;;  %v7747_v40 = vld [vmem:[%s10665_s1 + $0x528] ss:$16 sps:$4 sm:$0xff]  }
  0xc0   :  { %1874 = vmatpush2.bf16.msra.mxu1 %v7660_v41  ;;  %1884 = vmatprep.subr.bf16.mxu0 %v7665_v42  ;;  %v7750_v41 = vld [vmem:[%s10665_s1 + $0x728] ss:$16 sps:$4 sm:$0xff]   ;;  %v7755_v42 = vld [vmem:[%s10665_s1 + $0x50c] ss:$16 sps:$4 sm:$0xff]  }
  0xc1   :  { %1925 = vmatprep.subr.bf16.mxu1 %v7668_v44  ;;  %v7758_v44 = vld [vmem:[%s10665_s1 + $0x70c] ss:$16 sps:$4 sm:$0xff]  }
  0xc2   :  { %1835 = vmatmul.mubr.bf16.vlgmr.msra.gmra.mxu0 %v8123_v22  ;;  %v7678_v22 = vld [vmem:[%s10665_s1 + $0x6a8] ss:$16 sps:$4 sm:$0xff]  }
  0xc3   :  { %1876 = vmatmul.mubr.bf16.vlgmr.msra.gmra.mxu1 %v8125_v23  ;;  %1885 = vmatpush1.bf16.msra.mxu0 %v7663_v45  ;;  %v7683_v23 = vld [vmem:[%s10665_s1 + $0x48c] ss:$16 sps:$4 sm:$0xff]   ;;  %v7753_v45 = vld [vmem:[%s10665_s1 + $0x508] ss:$16 sps:$4 sm:$0xff]  }
  0xc4   :  { %1926 = vmatpush1.bf16.msra.mxu1 %v7666_v46  ;;  %1886 = vmatprep.subr.bf16.mxu0 %v7671_v47  ;;  %v7756_v46 = vld [vmem:[%s10665_s1 + $0x708] ss:$16 sps:$4 sm:$0xff]   ;;  %v7761_v47 = vld [vmem:[%s10667_s3 + $0x74] ss:$8 sps:$4 sm:$0xff]  }
  0xc5   :  { %1927 = vmatprep.subr.bf16.mxu1 %v7674_v61  ;;  %1916 = vmatprep.mubr.bf16.mxu0 %v8139_v28  ;;  %v7681_v28 = vld [vmem:[%s10665_s1 + $0x488] ss:$16 sps:$4 sm:$0xff]  }
  0xc6   :  { %1957 = vmatprep.mubr.bf16.mxu1 %v8141_v29  ;;  %v7684_v29 = vld [vmem:[%s10665_s1 + $0x688] ss:$16 sps:$4 sm:$0xff]  }
  0xc7   :  { %1887 = vmatpush1.bf16.msra.mxu0 %v7669_v3  ;;  %v7759_v61 = vld [vmem:[%s10667_s3 + $0x70] ss:$8 sps:$4 sm:$0xff]   ;;  %v7764_v3 = vld [vmem:[%s10667_s3 + $0x64] ss:$8 sps:$4 sm:$0xff]  }
  0xc8   :  { %1928 = vmatpush1.bf16.msra.mxu1 %v7672_v48  ;;  %1888 = vmatprep.subr.bf16.mxu0 %v7677_v50 }
  0xc9   :  { %1929 = vmatprep.subr.bf16.mxu1 %v7680_v51  ;;  %v7762_v51 = vld [vmem:[%s10667_s3 + $0x60] ss:$8 sps:$4 sm:$0xff]  }
  0xcb   :  { %1889 = vmatpush1.bf16.msra.mxu0 %v7675_v52 }
  0xcc   :  { %1930 = vmatpush1.bf16.msra.mxu1 %v7678_v22  ;;  %1890 = vmatprep.subr.bf16.mxu0 %v7683_v23  ;;  %v7767_v23 = vld [vmem:[%s10667_s3 + $0x54] ss:$8 sps:$4 sm:$0xff]  }
  0xcd   :  { %1931 = vmatprep.subr.bf16.mxu1 %v7686_v53 }
  0xcf   :  { %1891 = vmatpush1.bf16.msra.mxu0 %v7681_v28 }
  0xd0   :  { %1932 = vmatpush1.bf16.msra.mxu1 %v7684_v29  ;;  %1892 = vmatprep.subr.bf16.mxu0 %v7689_v54  ;;  %v7770_v54 = vld [vmem:[%s10667_s3 + $0x44] ss:$8 sps:$4 sm:$0xff]  }
  0xd1   :  { %1933 = vmatprep.subr.bf16.mxu1 %v7692_v55  ;;  %v7807_v55 = vld [vmem:[%s10667_s3 + $0x170] ss:$8 sps:$4 sm:$0xff]  }
  0xd3   :  { %1893 = vmatpush1.bf16.msra.mxu0 %v7687_v56  ;;  %v7809_v56 = vld [vmem:[%s10667_s3 + $0x174] ss:$8 sps:$4 sm:$0xff]  }
  0xd4   :  { %1934 = vmatpush1.bf16.msra.mxu1 %v7690_v57  ;;  %1894 = vmatprep.subr.bf16.mxu0 %v7695_v58  ;;  %v7812_v57 = vld [vmem:[%s10667_s3 + $0x164] ss:$8 sps:$4 sm:$0xff]   ;;  %v7768_v58 = vld [vmem:[%s10667_s3 + $0x40] ss:$8 sps:$4 sm:$0xff]  }
  0xd5   :  { %1935 = vmatprep.subr.bf16.mxu1 %v7698_v59  ;;  %v7810_v59 = vld [vmem:[%s10667_s3 + $0x160] ss:$8 sps:$4 sm:$0xff]  }
  0xd7   :  { %1895 = vmatpush1.bf16.msra.mxu0 %v7693_v60  ;;  %v7773_v60 = vld [vmem:[%s10667_s3 + $0x34] ss:$8 sps:$4 sm:$0xff]  }
  0xd8   :  { %1936 = vmatpush1.bf16.msra.mxu1 %v7696_v62  ;;  %1896 = vmatprep.subr.bf16.mxu0 %v7701_v63  ;;  %v7815_v62 = vld [vmem:[%s10667_s3 + $0x154] ss:$8 sps:$4 sm:$0xff]   ;;  %v7771_v63 = vld [vmem:[%s10667_s3 + $0x30] ss:$8 sps:$4 sm:$0xff]  }
  0xd9   :  { %1937 = vmatprep.subr.bf16.mxu1 %v7704_v0  ;;  %v7813_v0 = vld [vmem:[%s10667_s3 + $0x150] ss:$8 sps:$4 sm:$0xff]  }
  0xdb   :  { %1897 = vmatpush1.bf16.msra.mxu0 %v7699_v1  ;;  %v7776_v1 = vld [vmem:[%s10667_s3 + $0x24] ss:$8 sps:$4 sm:$0xff]  }
  0xdc   :  { %1938 = vmatpush1.bf16.msra.mxu1 %v7702_v2  ;;  %1898 = vmatprep.subr.bf16.mxu0 %v7707_v4  ;;  %v7818_v2 = vld [vmem:[%s10667_s3 + $0x144] ss:$8 sps:$4 sm:$0xff]   ;;  %v7774_v4 = vld [vmem:[%s10667_s3 + $0x20] ss:$8 sps:$4 sm:$0xff]  }
  0xdd   :  { %1939 = vmatprep.subr.bf16.mxu1 %v7710_v5  ;;  %v7816_v5 = vld [vmem:[%s10667_s3 + $0x140] ss:$8 sps:$4 sm:$0xff]  }
  0xdf   :  { %1899 = vmatpush1.bf16.msra.mxu0 %v7705_v6  ;;  %v7779_v6 = vld [vmem:[%s10667_s3 + $0x14] ss:$8 sps:$4 sm:$0xff]  }
  0xe0   :  { %1940 = vmatpush1.bf16.msra.mxu1 %v7708_v7  ;;  %1900 = vmatprep.subr.bf16.mxu0 %v7713_v8  ;;  %v7821_v7 = vld [vmem:[%s10667_s3 + $0x134] ss:$8 sps:$4 sm:$0xff]   ;;  %v7777_v8 = vld [vmem:[%s10667_s3 + $0x10] ss:$8 sps:$4 sm:$0xff]  }
  0xe1   :  { %1941 = vmatprep.subr.bf16.mxu1 %v7716_v9  ;;  %v7819_v9 = vld [vmem:[%s10667_s3 + $0x130] ss:$8 sps:$4 sm:$0xff]  }
  0xe3   :  { %1901 = vmatpush2.bf16.msra.mxu0 %v7711_v10  ;;  %v7782_v10 = vld [vmem:[%s10667_s3 + $0x4] ss:$8 sps:$4 sm:$0xff]  }
  0xe4   :  { %1942 = vmatpush2.bf16.msra.mxu1 %v7714_v11  ;;  %1902 = vmatprep.subr.bf16.mxu0 %v7719_v12  ;;  %v7824_v11 = vld [vmem:[%s10667_s3 + $0x124] ss:$8 sps:$4 sm:$0xff]   ;;  %v7780_v12 = vld [vmem:[%s10667_s3] ss:$8 sps:$4 sm:$0xff]  }
  0xe5   :  { %1943 = vmatprep.subr.bf16.mxu1 %v7722_v13  ;;  %v7822_v13 = vld [vmem:[%s10667_s3 + $0x120] ss:$8 sps:$4 sm:$0xff]  }
  0xe7   :  { %1903 = vmatpush2.bf16.msra.mxu0 %v7717_v16  ;;  %v7785_v16 = vld [vmem:[%s10667_s3 + $0xf4] ss:$8 sps:$4 sm:$0xff]  }
  0xe8   :  { %1944 = vmatpush2.bf16.msra.mxu1 %v7720_v17  ;;  %1904 = vmatprep.subr.bf16.mxu0 %v7725_v18  ;;  %v7827_v17 = vld [vmem:[%s10667_s3 + $0x114] ss:$8 sps:$4 sm:$0xff]   ;;  %v7783_v18 = vld [vmem:[%s10667_s3 + $0xf0] ss:$8 sps:$4 sm:$0xff]  }
  0xe9   :  { %1945 = vmatprep.subr.bf16.mxu1 %v7728_v19  ;;  %v7825_v19 = vld [vmem:[%s10667_s3 + $0x110] ss:$8 sps:$4 sm:$0xff]  }
  0xeb   :  { %1905 = vmatpush2.bf16.msra.mxu0 %v7723_v20  ;;  %v7788_v20 = vld [vmem:[%s10667_s3 + $0xe4] ss:$8 sps:$4 sm:$0xff]  }
  0xec   :  { %1946 = vmatpush2.bf16.msra.mxu1 %v7726_v21  ;;  %1906 = vmatprep.subr.bf16.mxu0 %v7731_v24  ;;  %v7830_v21 = vld [vmem:[%s10667_s3 + $0x104] ss:$8 sps:$4 sm:$0xff]   ;;  %v7786_v24 = vld [vmem:[%s10667_s3 + $0xe0] ss:$8 sps:$4 sm:$0xff]  }
  0xed   :  { %1947 = vmatprep.subr.bf16.mxu1 %v7734_v25  ;;  %v7828_v25 = vld [vmem:[%s10667_s3 + $0x100] ss:$8 sps:$4 sm:$0xff]  }
  0xef   :  { %1907 = vmatpush2.bf16.msra.mxu0 %v7729_v26  ;;  %v7791_v26 = vld [vmem:[%s10667_s3 + $0xd4] ss:$8 sps:$4 sm:$0xff]  }
  0xf0   :  { %1948 = vmatpush2.bf16.msra.mxu1 %v7732_v27  ;;  %1908 = vmatprep.subr.bf16.mxu0 %v7737_v30  ;;  %v7833_v27 = vld [vmem:[%s10667_s3 + $0x1f4] ss:$8 sps:$4 sm:$0xff]   ;;  %v7789_v30 = vld [vmem:[%s10667_s3 + $0xd0] ss:$8 sps:$4 sm:$0xff]  }
  0xf1   :  { %1949 = vmatprep.subr.bf16.mxu1 %v7740_v31  ;;  %v7831_v31 = vld [vmem:[%s10667_s3 + $0x1f0] ss:$8 sps:$4 sm:$0xff]  }
  0xf3   :  { %1909 = vmatpush2.bf16.msra.mxu0 %v7735_v32  ;;  %v7794_v32 = vld [vmem:[%s10667_s3 + $0xc4] ss:$8 sps:$4 sm:$0xff]  }
  0xf4   :  { %1950 = vmatpush2.bf16.msra.mxu1 %v7738_v33  ;;  %1910 = vmatprep.subr.bf16.mxu0 %v7743_v34  ;;  %v7836_v33 = vld [vmem:[%s10667_s3 + $0x1e4] ss:$8 sps:$4 sm:$0xff]   ;;  %v7792_v34 = vld [vmem:[%s10667_s3 + $0xc0] ss:$8 sps:$4 sm:$0xff]  }
  0xf5   :  { %1951 = vmatprep.subr.bf16.mxu1 %v7746_v35  ;;  %v7834_v35 = vld [vmem:[%s10667_s3 + $0x1e0] ss:$8 sps:$4 sm:$0xff]  }
  0xf7   :  { %1911 = vmatpush2.bf16.msra.mxu0 %v7741_v38  ;;  %v7797_v38 = vld [vmem:[%s10667_s3 + $0xb4] ss:$8 sps:$4 sm:$0xff]  }
  0xf8   :  { %1952 = vmatpush2.bf16.msra.mxu1 %v7744_v39  ;;  %1912 = vmatprep.subr.bf16.mxu0 %v7749_v14  ;;  %v7839_v39 = vld [vmem:[%s10667_s3 + $0x1d4] ss:$8 sps:$4 sm:$0xff]   ;;  %v7795_v14 = vld [vmem:[%s10667_s3 + $0xb0] ss:$8 sps:$4 sm:$0xff]  }
  0xf9   :  { %1953 = vmatprep.subr.bf16.mxu1 %v7752_v15  ;;  %v7837_v15 = vld [vmem:[%s10667_s3 + $0x1d0] ss:$8 sps:$4 sm:$0xff]  }
  0xfb   :  { %1913 = vmatpush2.bf16.msra.mxu0 %v7747_v40  ;;  %v7800_v40 = vld [vmem:[%s10667_s3 + $0xa4] ss:$8 sps:$4 sm:$0xff]  }
  0xfc   :  { %1954 = vmatpush2.bf16.msra.mxu1 %v7750_v41  ;;  %1914 = vmatprep.subr.bf16.mxu0 %v7755_v42  ;;  %v7842_v41 = vld [vmem:[%s10667_s3 + $0x1c4] ss:$8 sps:$4 sm:$0xff]   ;;  %v7798_v42 = vld [vmem:[%s10667_s3 + $0xa0] ss:$8 sps:$4 sm:$0xff]  }
  0xfd   :  { %1955 = vmatprep.subr.bf16.mxu1 %v7758_v44  ;;  %v7840_v44 = vld [vmem:[%s10667_s3 + $0x1c0] ss:$8 sps:$4 sm:$0xff]  }
  0xff   :  { %1915 = vmatpush2.bf16.msra.mxu0 %v7753_v45  ;;  %v7803_v45 = vld [vmem:[%s10667_s3 + $0x94] ss:$8 sps:$4 sm:$0xff]  }
 0x100   :  { %1956 = vmatpush2.bf16.msra.mxu1 %v7756_v46  ;;  %2370 = vmatprep.subr.bf16.mxu0 %v7761_v47  ;;  %v7845_v46 = vld [vmem:[%s10667_s3 + $0x1b4] ss:$8 sps:$4 sm:$0xff]   ;;  %v8894_v47 = vsub.s32 0, %v8013_v43 }
 0x101   :  { %2411 = vmatprep.subr.bf16.mxu1 %v7809_v56 }
 0x102   :  { %v8730_v48 = vpop.f32.mrf.mxu0  ;;  %1917 = vmatmul.mubr.bf16.vlgmr.msra.gmra.mxu0 %v8329_v36  ;;  %v7765_v36 = vld [vmem:[%s10667_s3 + $0x50] ss:$8 sps:$4 sm:$0xff]  }
 0x103   :  { %v8732_v50 = vpop.f32.mrf.mxu1  ;;  %1958 = vmatmul.mubr.bf16.vlgmr.msra.gmra.mxu1 %v8333_v37  ;;  %2371 = vmatpush1.bf16.msra.mxu0 %v7759_v61  ;;  %v8899_v61 = vld [vmem:[%s10668_s2] sm:$0xf] }
 0x104   :  { %v8739_v52 = vpop.f32.mrf.mxu0  ;;  %2372 = vmatprep.subr.bf16.mxu0 %v7764_v3  ;;  %2412 = vmatpush1.bf16.msra.mxu1 %v7807_v55  ;;  %v8902_v3 = vsub.s32 1, %v8013_v43  ;;  %v7848_v55 = vld [vmem:[%s10667_s3 + $0x1a4] ss:$8 sps:$4 sm:$0xff]  }
 0x105   :  { %v8741_v22 = vpop.f32.mrf.mxu1  ;;  %2413 = vmatprep.subr.bf16.mxu1 %v7812_v57  ;;  %v7846_v57 = vld [vmem:[%s10667_s3 + $0x1a0] ss:$8 sps:$4 sm:$0xff]  }
 0x106   :  { %v1676_v53 = vpop.f32.mrf.mxu0 }
 0x107   :  { %v1717_v28 = vpop.f32.mrf.mxu1  ;;  %2373 = vmatpush1.bf16.msra.mxu0 %v7762_v51  ;;  %v7801_v51 = vld [vmem:[%s10667_s3 + $0x90] ss:$8 sps:$4 sm:$0xff]   ;;  %v7806_v53 = vld [vmem:[%s10667_s3 + $0x84] ss:$8 sps:$4 sm:$0xff]  }
 0x108   :  { %v1677_v37 = vpop.f32.mrf.mxu0  ;;  %2374 = vmatprep.subr.bf16.mxu0 %v7767_v23  ;;  %2414 = vmatpush1.bf16.msra.mxu1 %v7810_v59  ;;  %v7843_v23 = vld [vmem:[%s10667_s3 + $0x1b0] ss:$8 sps:$4 sm:$0xff]   ;;  %v341_v28 = vrot.slane %v8899_v61, %v8894_v47 }
 0x109   :  { %v1718_v29 = vpop.f32.mrf.mxu1  ;;  %2415 = vmatprep.subr.bf16.mxu1 %v7815_v62  ;;  %v7804_v37 = vld [vmem:[%s10667_s3 + $0x80] ss:$8 sps:$4 sm:$0xff]  }
 0x10a   :  { %v1673_v29 = vadd.f32 %v8730_v48, %v341_v28  ;;  %v2520_v28 = vld [vmem:[%s10669_s5 + $0x200] sm:$0xff] }
 0x10b   :  { %2375 = vmatpush1.bf16.msra.mxu0 %v7765_v36  ;;  %v345_v36 = vrot.slane %v8899_v61, %v8902_v3 }
 0x10c   :  { %2376 = vmatprep.subr.bf16.mxu0 %v7770_v54  ;;  %2416 = vmatpush1.bf16.msra.mxu1 %v7813_v0  ;;  %v1714_v56 = vadd.f32 %v8732_v50, %v1673_v29  ;;  %v7849_v50 = vld [vmem:[%s10667_s3 + $0x190] ss:$8 sps:$4 sm:$0xff]  }
 0x10d   :  { %2417 = vmatprep.subr.bf16.mxu1 %v7818_v2  ;;  %v1675_v54 = vadd.f32 %v8739_v52, %v345_v36  ;;  %v2536_v36 = vld [vmem:[%s10669_s5 + $0x280] sm:$0xff] }
 0x10e   :  { %v6925_v29 = vcombine.high %v2520_v28, %v2536_v36 }
 0x10f   :  { %2377 = vmatpush1.bf16.msra.mxu0 %v7768_v58 }
 0x110   :  { %2378 = vmatprep.subr.bf16.mxu0 %v7773_v60  ;;  %2418 = vmatpush1.bf16.msra.mxu1 %v7816_v5  ;;  %v1716_v60 = vadd.f32 %v8741_v22, %v1675_v54  ;;  %v2488_v54 = vld [vmem:[%s10669_s5 + $0x100] sm:$0xff] }
 0x111   :  { %2419 = vmatprep.subr.bf16.mxu1 %v7821_v7 }
 0x113   :  { %2379 = vmatpush1.bf16.msra.mxu0 %v7771_v63  ;;  %v7851_v63 = vld [vmem:[%s10667_s3 + $0x194] ss:$8 sps:$4 sm:$0xff]  }
 0x114   :  { %2380 = vmatprep.subr.bf16.mxu0 %v7776_v1  ;;  %2420 = vmatpush1.bf16.msra.mxu1 %v7819_v9 }
 0x115   :  { %2421 = vmatprep.subr.bf16.mxu1 %v7824_v11 }
 0x117   :  { %2381 = vmatpush1.bf16.msra.mxu0 %v7774_v4 }
 0x118   :  { %2382 = vmatprep.subr.bf16.mxu0 %v7779_v6  ;;  %2422 = vmatpush1.bf16.msra.mxu1 %v7822_v13 }
 0x119   :  { %2423 = vmatprep.subr.bf16.mxu1 %v7827_v17 }
 0x11b   :  { %2383 = vmatpush1.bf16.msra.mxu0 %v7777_v8  ;;  %v7854_v8 = vld [vmem:[%s10667_s3 + $0x184] ss:$8 sps:$4 sm:$0xff]  }
 0x11c   :  { %2384 = vmatprep.subr.bf16.mxu0 %v7782_v10  ;;  %2424 = vmatpush1.bf16.msra.mxu1 %v7825_v19  ;;  %v7852_v10 = vld [vmem:[%s10667_s3 + $0x180] ss:$8 sps:$4 sm:$0xff]  }
 0x11d   :  { %2425 = vmatprep.subr.bf16.mxu1 %v7830_v21 }
 0x11f   :  { %2385 = vmatpush1.bf16.msra.mxu0 %v7780_v12 }
 0x120   :  { %2386 = vmatprep.subr.bf16.mxu0 %v7785_v16  ;;  %2426 = vmatpush1.bf16.msra.mxu1 %v7828_v25  ;;  %v2680_v25 = vld [vmem:[%s10669_s5 + $0x700] sm:$0xff] }
 0x121   :  { %2427 = vmatprep.subr.bf16.mxu1 %v7833_v27  ;;  %v8959_v27 = vld [vmem:[%s10669_s5 + $0x708] sm:$0xff] }
 0x123   :  { %2387 = vmatpush2.bf16.msra.mxu0 %v7783_v18 }
 0x124   :  { %2388 = vmatprep.subr.bf16.mxu0 %v7788_v20  ;;  %2428 = vmatpush2.bf16.msra.mxu1 %v7831_v31 }
 0x125   :  { %2429 = vmatprep.subr.bf16.mxu1 %v7836_v33  ;;  %v2648_v33 = vld [vmem:[%s10669_s5 + $0x600] sm:$0xff] }
 0x127   :  { %2389 = vmatpush2.bf16.msra.mxu0 %v7786_v24 }
 0x128   :  { %2390 = vmatprep.subr.bf16.mxu0 %v7791_v26  ;;  %2430 = vmatpush2.bf16.msra.mxu1 %v7834_v35  ;;  %v2696_v26 = vld [vmem:[%s10669_s5 + $0x780] sm:$0xff] }
 0x129   :  { %2431 = vmatprep.subr.bf16.mxu1 %v7839_v39  ;;  %v7085_v31 = vcombine.high %v2680_v25, %v2696_v26  ;;  %v2616_v39 = vld [vmem:[%s10669_s5 + $0x500] sm:$0xff] }
 0x12b   :  { %2391 = vmatpush2.bf16.msra.mxu0 %v7789_v30  ;;  %v7084_v30 = vcombine.low %v2680_v25, %v2696_v26  ;;  %v2824_v26 = vld [vmem:[%s10669_s5 + $0xb80] sm:$0xff] }
 0x12c   :  { %2392 = vmatprep.subr.bf16.mxu0 %v7794_v32  ;;  %2432 = vmatpush2.bf16.msra.mxu1 %v7837_v15  ;;  %v8964_v32 = vld [vmem:[%s10669_s5 + $0x788] sm:$0xff] }
 0x12d   :  { %2433 = vmatprep.subr.bf16.mxu1 %v7842_v41  ;;  %v7087_v35 = vcombine.high %v8959_v27, %v8964_v32  ;;  %v2584_v41 = vld [vmem:[%s10669_s5 + $0x400] sm:$0xff] }
 0x12f   :  { %2393 = vmatpush2.bf16.msra.mxu0 %v7792_v34  ;;  %v2664_v34 = vld [vmem:[%s10669_s5 + $0x680] sm:$0xff] }
 0x130   :  { %2394 = vmatprep.subr.bf16.mxu0 %v7797_v38  ;;  %2434 = vmatpush2.bf16.msra.mxu1 %v7840_v44  ;;  %v7053_v38 = vcombine.high %v2648_v33, %v2664_v34  ;;  %v7052_v15 = vcombine.low %v2648_v33, %v2664_v34 }
 0x131   :  { %2435 = vmatprep.subr.bf16.mxu1 %v7845_v46  ;;  %v2552_v46 = vld [vmem:[%s10669_s5 + $0x300] sm:$0xff] }
 0x133   :  { %2395 = vmatpush2.bf16.msra.mxu0 %v7795_v14  ;;  %v2632_v14 = vld [vmem:[%s10669_s5 + $0x580] sm:$0xff] }
 0x134   :  { %2396 = vmatprep.subr.bf16.mxu0 %v7800_v40  ;;  %2436 = vmatpush2.bf16.msra.mxu1 %v7843_v23  ;;  %v7021_v40 = vcombine.high %v2616_v39, %v2632_v14  ;;  %v7020_v44 = vcombine.low %v2616_v39, %v2632_v14  ;;  %v2792_v39 = vld [vmem:[%s10669_s5 + $0xa80] sm:$0xff] }
 0x135   :  { %2437 = vmatprep.subr.bf16.mxu1 %v7848_v55  ;;  %v2504_v55 = vld [vmem:[%s10669_s5 + $0x180] sm:$0xff] }
 0x137   :  { %2397 = vmatpush2.bf16.msra.mxu0 %v7798_v42  ;;  %v2600_v42 = vld [vmem:[%s10669_s5 + $0x480] sm:$0xff] }
 0x138   :  { %2398 = vmatprep.subr.bf16.mxu0 %v7803_v45  ;;  %2438 = vmatpush2.bf16.msra.mxu1 %v7846_v57  ;;  %v6989_v45 = vcombine.high %v2584_v41, %v2600_v42  ;;  %v6988_v23 = vcombine.low %v2584_v41, %v2600_v42  ;;  %v6893_v57 = vcombine.high %v2488_v54, %v2504_v55 }
 0x139   :  { %2439 = vmatprep.subr.bf16.mxu1 %v7851_v63 }
 0x13b   :  { %2399 = vmatpush2.bf16.msra.mxu0 %v7801_v51  ;;  %v2568_v51 = vld [vmem:[%s10669_s5 + $0x380] sm:$0xff] }
 0x13c   :  { %2400 = vmatprep.subr.bf16.mxu0 %v7806_v53  ;;  %2440 = vmatpush2.bf16.msra.mxu1 %v7849_v50  ;;  %v6957_v53 = vcombine.high %v2552_v46, %v2568_v51  ;;  %v2920_v50 = vld [vmem:[%s10669_s5 + $0xe80] sm:$0xff] }
 0x13d   :  { %2441 = vmatprep.subr.bf16.mxu1 %v7854_v8 }
 0x13f   :  { %2401 = vmatpush2.bf16.msra.mxu0 %v7804_v37  ;;  %v6956_v37 = vcombine.low %v2552_v46, %v2568_v51 }
 0x140   :  { %2442 = vmatpush2.bf16.msra.mxu1 %v7852_v10  ;;  %5696 = vmatprep.subr.bf16.mxu0 %v7085_v31 }
 0x141   :  { %5737 = vmatprep.subr.bf16.mxu1 %v7087_v35 }
 0x142   :  { %v1754_v58 = vpop.f32.mrf.mxu0 }
 0x143   :  { %v1795_v59 = vpop.f32.mrf.mxu1  ;;  %v1755_v62 = vadd.f32 %v1754_v58, %v1714_v56  ;;  %v6924_v56 = vcombine.low %v2520_v28, %v2536_v36  ;;  %v2456_v58 = vld [vmem:[%s10669_s5] sm:$0xff]  ;;  %v2649_v28 = vld [vmem:[%s10669_s5 + $0x608] sm:$0xff] }
 0x144   :  { %v1756_v48 = vpop.f32.mrf.mxu0  ;;  %v2665_v36 = vld [vmem:[%s10669_s5 + $0x688] sm:$0xff] }
 0x145   :  { %v1797_v52 = vpop.f32.mrf.mxu1  ;;  %v1796_v0 = vadd.f32 %v1795_v59, %v1755_v62  ;;  %v1757_v1 = vadd.f32 %v1756_v48, %v1716_v60  ;;  %v2472_v59 = vld [vmem:[%s10669_s5 + $0x80] sm:$0xff]  ;;  %v6892_v60 = vcombine.low %v2488_v54, %v2504_v55  ;;  %v7086_v54 = vcombine.low %v8959_v27, %v8964_v32  ;;  %v2585_v27 = vld [vmem:[%s10669_s5 + $0x408] sm:$0xff] }
 0x146   :  { %v1758_v2 = vpop.f32.mrf.mxu0  ;;  %v6861_v62 = vcombine.high %v2456_v58, %v2472_v59  ;;  %v2936_v48 = vld [vmem:[%s10669_s5 + $0xf00] sm:$0xff]  ;;  %v6860_v63 = vcombine.low %v2456_v58, %v2472_v59  ;;  %v2633_v58 = vld [vmem:[%s10669_s5 + $0x588] sm:$0xff]  ;;  %v7054_v59 = vcombine.low %v2649_v28, %v2665_v36 }
 0x147   :  { %v1799_v4 = vpop.f32.mrf.mxu1  ;;  %v1798_v5 = vadd.f32 %v1797_v52, %v1757_v1  ;;  %v1966_v22 = vmax.f32 %v1796_v0, 0.0  ;;  %v2952_v52 = vld [vmem:[%s10669_s5 + $0xf80] sm:$0xff]  ;;  %v9023_v2 = vsub.s32 2, %v8013_v43  ;;  %v2601_v32 = vld [vmem:[%s10669_s5 + $0x488] sm:$0xff] }
 0x148   :  { %v1759_v6 = vpop.f32.mrf.mxu0  ;;  %v7341_v0 = vcombine.high %v2936_v48, %v2952_v52  ;;  %v2904_v1 = vld [vmem:[%s10669_s5 + $0xe00] sm:$0xff]  ;;  %v7340_v4 = vcombine.low %v2936_v48, %v2952_v52  ;;  %v6991_v48 = vcombine.high %v2585_v27, %v2601_v32  ;;  %v2553_v52 = vld [vmem:[%s10669_s5 + $0x308] sm:$0xff] }
 0x149   :  { %v1800_v7 = vpop.f32.mrf.mxu1  ;;  %v1967_v9 = vmax.f32 %v1798_v5, 0.0  ;;  %v1970_v12 = vpack.c.bf16 %v1966_v22, %v1966_v22  ;;  %v7309_v5 = vcombine.high %v2904_v1, %v2920_v50  ;;  %v9026_v22 = vsub.s32 3, %v8013_v43  ;;  %v2872_v6 = vld [vmem:[%s10669_s5 + $0xd00] sm:$0xff] }
 0x14a   :  { %v2888_v7 = vld [vmem:[%s10669_s5 + $0xd80] sm:$0xff]  ;;  %v349_v8 = vrot.slane %v8899_v61, %v9023_v2 }
 0x14b   :  { %v1971_v11 = vpack.c.bf16 %v1967_v9, %v1967_v9  ;;  %v7308_v9 = vcombine.low %v2904_v1, %v2920_v50  ;;  %v7277_v10 = vcombine.high %v2872_v6, %v2888_v7  ;;  %v2521_v50 = vld [vmem:[%s10669_s5 + $0x208] sm:$0xff] }
 0x14d   :  { %2402 = vmatprep.mubr.bf16.mxu0 %v1971_v11  ;;  %v353_v11 = vrot.slane %v8899_v61, %v9026_v22  ;;  %v2808_v61 = vld [vmem:[%s10669_s5 + $0xb00] sm:$0xff] }
 0x14e   :  { %2403 = vmatmul.mubr.bf16.vlgmr.msra.gmra.mxu0 %v1970_v12  ;;  %v2840_v12 = vld [vmem:[%s10669_s5 + $0xc00] sm:$0xff]  ;;  %v7213_v34 = vcombine.high %v2808_v61, %v2824_v26  ;;  %v7212_v41 = vcombine.low %v2808_v61, %v2824_v26  ;;  %v2905_v26 = vld [vmem:[%s10669_s5 + $0xe08] sm:$0xff] }
 0x14f   :  { %5697 = vmatpush1.bf16.msra.mxu0 %v7084_v30 }
 0x150   :  { %5698 = vmatprep.subr.bf16.mxu0 %v7053_v38 }
 0x153   :  { %5699 = vmatpush1.bf16.msra.mxu0 %v7052_v15 }
 0x154   :  { %5700 = vmatprep.subr.bf16.mxu0 %v7021_v40 }
 0x157   :  { %5701 = vmatpush1.bf16.msra.mxu0 %v7020_v44 }
 0x158   :  { %5702 = vmatprep.subr.bf16.mxu0 %v6989_v45 }
 0x15b   :  { %5703 = vmatpush1.bf16.msra.mxu0 %v6988_v23 }
 0x15c   :  { %5704 = vmatprep.subr.bf16.mxu0 %v6957_v53 }
 0x15f   :  { %5705 = vmatpush1.bf16.msra.mxu0 %v6956_v37 }
 0x160   :  { %5706 = vmatprep.subr.bf16.mxu0 %v6925_v29 }
 0x163   :  { %5707 = vmatpush1.bf16.msra.mxu0 %v6924_v56  ;;  %v7055_v56 = vcombine.high %v2649_v28, %v2665_v36  ;;  %v2745_v28 = vld [vmem:[%s10669_s5 + $0x908] sm:$0xff] }
 0x164   :  { %5708 = vmatprep.subr.bf16.mxu0 %v6893_v57  ;;  %v2617_v57 = vld [vmem:[%s10669_s5 + $0x508] sm:$0xff] }
 0x167   :  { %5709 = vmatpush1.bf16.msra.mxu0 %v6892_v60  ;;  %v7023_v60 = vcombine.high %v2617_v57, %v2633_v58 }
 0x168   :  { %5710 = vmatprep.subr.bf16.mxu0 %v6861_v62  ;;  %v7022_v62 = vcombine.low %v2617_v57, %v2633_v58  ;;  %v2712_v58 = vld [vmem:[%s10669_s5 + $0x800] sm:$0xff] }
 0x16b   :  { %5711 = vmatpush1.bf16.msra.mxu0 %v6860_v63  ;;  %v2569_v63 = vld [vmem:[%s10669_s5 + $0x388] sm:$0xff] }
 0x16c   :  { %5712 = vmatprep.subr.bf16.mxu0 %v7341_v0  ;;  %v6990_v0 = vcombine.low %v2585_v27, %v2601_v32  ;;  %v6959_v1 = vcombine.high %v2553_v52, %v2569_v63  ;;  %v2729_v32 = vld [vmem:[%s10669_s5 + $0x888] sm:$0xff] }
 0x16f   :  { %5713 = vmatpush2.bf16.msra.mxu0 %v7340_v4  ;;  %v2537_v4 = vld [vmem:[%s10669_s5 + $0x288] sm:$0xff] }
 0x170   :  { %5714 = vmatprep.subr.bf16.mxu0 %v7309_v5  ;;  %v6958_v5 = vcombine.low %v2553_v52, %v2569_v63 }
 0x173   :  { %5715 = vmatpush2.bf16.msra.mxu0 %v7308_v9  ;;  %v6926_v9 = vcombine.low %v2521_v50, %v2537_v4 }
 0x174   :  { %5716 = vmatprep.subr.bf16.mxu0 %v7277_v10 }
 0x182   :  { %v8942_v13 = vpop.f32.mrf.mxu0 }
 0x183   :  { %v8944_v16 = vpop.f32.mrf.mxu1 }
 0x184   :  { %v8946_v17 = vpop.f32.mrf.mxu0 }
 0x185   :  { %v8948_v18 = vpop.f32.mrf.mxu1  ;;  %v1839_v25 = vadd.f32 %v8946_v17, %v353_v11  ;;  %v2776_v17 = vld [vmem:[%s10669_s5 + $0xa00] sm:$0xff]  ;;  %v2457_v11 = vld [vmem:[%s10669_s5 + $0x8] sm:$0xff] }
 0x186   :  { %v1840_v19 = vpop.f32.mrf.mxu0  ;;  %v7181_v45 = vcombine.high %v2776_v17, %v2792_v39  ;;  %v7180_v37 = vcombine.low %v2776_v17, %v2792_v39  ;;  %v2841_v17 = vld [vmem:[%s10669_s5 + $0xc08] sm:$0xff] }
 0x187   :  { %v1881_v20 = vpop.f32.mrf.mxu1  ;;  %v2856_v19 = vld [vmem:[%s10669_s5 + $0xc80] sm:$0xff]  ;;  %v1880_v35 = vadd.f32 %v8948_v18, %v1839_v25  ;;  %v2857_v39 = vld [vmem:[%s10669_s5 + $0xc88] sm:$0xff] }
 0x188   :  { %v1841_v21 = vpop.f32.mrf.mxu0  ;;  %v1837_v20 = vadd.f32 %v8942_v13, %v349_v8  ;;  %v7244_v31 = vcombine.low %v2840_v12, %v2856_v19  ;;  %v2505_v8 = vld [vmem:[%s10669_s5 + $0x188] sm:$0xff] }
 0x189   :  { %v1882_v24 = vpop.f32.mrf.mxu1  ;;  %v7276_v21 = vcombine.low %v2872_v6, %v2888_v7  ;;  %v6927_v6 = vcombine.high %v2521_v50, %v2537_v4  ;;  %v2489_v7 = vld [vmem:[%s10669_s5 + $0x108] sm:$0xff]  ;;  %v2698_v50 = vld [vmem:[%s10669_s5 + $0x790] sm:$0xff]  ;;  %v2683_v4 = vld [vmem:[%s10669_s5 + $0x718] sm:$0xff] }
 0x18a   :  { %v7245_v24 = vcombine.high %v2840_v12, %v2856_v19  ;;  %v1878_v30 = vadd.f32 %v8944_v16, %v1837_v20  ;;  %v6895_v10 = vcombine.high %v2489_v7, %v2505_v8  ;;  %v2473_v12 = vld [vmem:[%s10669_s5 + $0x88] sm:$0xff]  ;;  %v6894_v19 = vcombine.low %v2489_v7, %v2505_v8 }
 0x18b   :  { %5717 = vmatpush2.bf16.msra.mxu0 %v7276_v21  ;;  %v6863_v20 = vcombine.high %v2457_v11, %v2473_v12  ;;  %v2937_v21 = vld [vmem:[%s10669_s5 + $0xf08] sm:$0xff]  ;;  %v6862_v25 = vcombine.low %v2457_v11, %v2473_v12 }
 0x18c   :  { %5718 = vmatprep.subr.bf16.mxu0 %v7245_v24  ;;  %v2953_v24 = vld [vmem:[%s10669_s5 + $0xf88] sm:$0xff] }
 0x18d   :  { %v7343_v61 = vcombine.high %v2937_v21, %v2953_v24 }
 0x18f   :  { %5719 = vmatpush2.bf16.msra.mxu0 %v7244_v31  ;;  %v7342_v31 = vcombine.low %v2937_v21, %v2953_v24 }
 0x190   :  { %5720 = vmatprep.subr.bf16.mxu0 %v7213_v34  ;;  %v2889_v34 = vld [vmem:[%s10669_s5 + $0xd88] sm:$0xff] }
 0x193   :  { %5721 = vmatpush2.bf16.msra.mxu0 %v7212_v41  ;;  %v7246_v41 = vcombine.low %v2841_v17, %v2857_v39 }
 0x194   :  { %5722 = vmatprep.subr.bf16.mxu0 %v7181_v45  ;;  %v2793_v45 = vld [vmem:[%s10669_s5 + $0xa88] sm:$0xff] }
 0x197   :  { %5723 = vmatpush2.bf16.msra.mxu0 %v7180_v37  ;;  %v2761_v37 = vld [vmem:[%s10669_s5 + $0x988] sm:$0xff] }
 0x1c2   :  { %v1918_v33 = vpop.f32.mrf.mxu0 }
 0x1c3   :  { %v1959_v13 = vpop.f32.mrf.mxu1  ;;  %v1919_v38 = vadd.f32 %v1918_v33, %v1878_v30  ;;  %v2921_v30 = vld [vmem:[%s10669_s5 + $0xe88] sm:$0xff] }
 0x1c4   :  { %v1920_v14 = vpop.f32.mrf.mxu0  ;;  %v7311_v33 = vcombine.high %v2905_v26, %v2921_v30 }
 0x1c5   :  { %v1961_v15 = vpop.f32.mrf.mxu1  ;;  %v1960_v16 = vadd.f32 %v1959_v13, %v1919_v38  ;;  %v1921_v40 = vadd.f32 %v1920_v14, %v1880_v35  ;;  %v2873_v13 = vld [vmem:[%s10669_s5 + $0xd08] sm:$0xff]  ;;  %v7310_v35 = vcombine.low %v2905_v26, %v2921_v30 }
 0x1c6   :  { %v1922_v42 = vpop.f32.mrf.mxu0  ;;  %v7279_v38 = vcombine.high %v2873_v13, %v2889_v34  ;;  %v7278_v14 = vcombine.low %v2873_v13, %v2889_v34  ;;  %v2666_v34 = vld [vmem:[%s10669_s5 + $0x690] sm:$0xff] }
 0x1c7   :  { %v1963_v44 = vpop.f32.mrf.mxu1  ;;  %v1962_v18 = vadd.f32 %v1961_v15, %v1921_v40  ;;  %v1968_v46 = vmax.f32 %v1960_v16, 0.0  ;;  %v7247_v15 = vcombine.high %v2841_v17, %v2857_v39  ;;  %v2809_v16 = vld [vmem:[%s10669_s5 + $0xb08] sm:$0xff] }
 0x1c8   :  { %v1923_v51 = vpop.f32.mrf.mxu0  ;;  %v2825_v40 = vld [vmem:[%s10669_s5 + $0xb88] sm:$0xff] }
 0x1c9   :  { %v1964_v23 = vpop.f32.mrf.mxu1  ;;  %v1969_v53 = vmax.f32 %v1962_v18, 0.0  ;;  %v1972_v55 = vpack.c.bf16 %v1968_v46, %v1968_v46  ;;  %v7215_v42 = vcombine.high %v2809_v16, %v2825_v40  ;;  %v2777_v44 = vld [vmem:[%s10669_s5 + $0xa08] sm:$0xff]  ;;  %v7214_v18 = vcombine.low %v2809_v16, %v2825_v40  ;;  %v2634_v40 = vld [vmem:[%s10669_s5 + $0x590] sm:$0xff] }
 0x1ca   :  { %v7183_v46 = vcombine.high %v2777_v44, %v2793_v45  ;;  %v7182_v51 = vcombine.low %v2777_v44, %v2793_v45  ;;  %v2744_v23 = vld [vmem:[%s10669_s5 + $0x900] sm:$0xff] }
 0x1cb   :  { %v1973_v29 = vpack.c.bf16 %v1969_v53, %v1969_v53  ;;  %v2760_v53 = vld [vmem:[%s10669_s5 + $0x980] sm:$0xff] }
 0x1cc   :  { %v7149_v36 = vcombine.high %v2744_v23, %v2760_v53 }
 0x1cd   :  { %2443 = vmatprep.mubr.bf16.mxu1 %v1973_v29 }
 0x1ce   :  { %2444 = vmatmul.mubr.bf16.vlgmr.msra.gmra.mxu1 %v1972_v55  ;;  %v7150_v55 = vcombine.low %v2745_v28, %v2761_v37  ;;  %5724 = vmatprep.subr.bf16.mxu0 %v7149_v36 }
 0x1cf   :  { %5738 = vmatpush1.bf16.msra.mxu1 %v7086_v54  ;;  %v7148_v54 = vcombine.low %v2744_v23, %v2760_v53  ;;  %v2602_v23 = vld [vmem:[%s10669_s5 + $0x490] sm:$0xff]  ;;  %v2587_v53 = vld [vmem:[%s10669_s5 + $0x418] sm:$0xff] }
 0x1d0   :  { %5739 = vmatprep.subr.bf16.mxu1 %v7055_v56  ;;  %v7151_v56 = vcombine.high %v2745_v28, %v2761_v37  ;;  %v2603_v28 = vld [vmem:[%s10669_s5 + $0x498] sm:$0xff] }
 0x1d1   :  { %5725 = vmatpush2.bf16.msra.mxu0 %v7148_v54  ;;  %v6995_v54 = vcombine.high %v2587_v53, %v2603_v28 }
 0x1d3   :  { %5740 = vmatpush1.bf16.msra.mxu1 %v7054_v59  ;;  %v2728_v59 = vld [vmem:[%s10669_s5 + $0x880] sm:$0xff] }
 0x1d4   :  { %5741 = vmatprep.subr.bf16.mxu1 %v7023_v60  ;;  %v2713_v60 = vld [vmem:[%s10669_s5 + $0x808] sm:$0xff]  ;;  %v7117_v27 = vcombine.high %v2712_v58, %v2728_v59 }
 0x1d5   :  { %v7118_v52 = vcombine.low %v2713_v60, %v2729_v32  ;;  %v7119_v63 = vcombine.high %v2713_v60, %v2729_v32  ;;  %v6994_v60 = vcombine.low %v2587_v53, %v2603_v28  ;;  %v2875_v53 = vld [vmem:[%s10669_s5 + $0xd18] sm:$0xff] }
 0x1d6   :  { %5726 = vmatprep.subr.bf16.mxu0 %v7117_v27  ;;  %v2891_v28 = vld [vmem:[%s10669_s5 + $0xd98] sm:$0xff] }
 0x1d7   :  { %5742 = vmatpush1.bf16.msra.mxu1 %v7022_v62 }
 0x1d8   :  { %5743 = vmatprep.subr.bf16.mxu1 %v6991_v48  ;;  %v7116_v48 = vcombine.low %v2712_v58, %v2728_v59  ;;  %v2571_v58 = vld [vmem:[%s10669_s5 + $0x398] sm:$0xff] }
 0x1da   :  { %5727 = vmatpush2.bf16.msra.mxu0 %v7116_v48  ;;  %v2538_v48 = vld [vmem:[%s10669_s5 + $0x290] sm:$0xff] }
 0x1db   :  { %5744 = vmatpush1.bf16.msra.mxu1 %v6990_v0 }
 0x1dc   :  { %5745 = vmatprep.subr.bf16.mxu1 %v6959_v1  ;;  %v2682_v1 = vld [vmem:[%s10669_s5 + $0x710] sm:$0xff] }
 0x1dd   :  { %v7088_v7 = vcombine.low %v2682_v1, %v2698_v50 }
 0x1df   :  { %5746 = vmatpush1.bf16.msra.mxu1 %v6958_v5  ;;  %v7089_v5 = vcombine.high %v2682_v1, %v2698_v50 }
 0x1e0   :  { %5747 = vmatprep.subr.bf16.mxu1 %v6927_v6  ;;  %v2699_v6 = vld [vmem:[%s10669_s5 + $0x798] sm:$0xff] }
 0x1e1   :  { %v7090_v8 = vcombine.low %v2683_v4, %v2699_v6  ;;  %5778 = vmatprep.subr.bf16.mxu0 %v7089_v5  ;;  %v2490_v5 = vld [vmem:[%s10669_s5 + $0x110] sm:$0xff] }
 0x1e3   :  { %5748 = vmatpush1.bf16.msra.mxu1 %v6926_v9  ;;  %v7091_v9 = vcombine.high %v2683_v4, %v2699_v6  ;;  %v2506_v6 = vld [vmem:[%s10669_s5 + $0x190] sm:$0xff] }
 0x1e4   :  { %5749 = vmatprep.subr.bf16.mxu1 %v6895_v10  ;;  %v2038_v10 = vld [vmem:[%s10670_s4] sm:$0x3] }
 0x1e5   :  { %v2043_v11 = vrot.slane %v2038_v10, %v8894_v47  ;;  %v2047_v12 = vrot.slane %v2038_v10, %v8902_v3 }
 0x1e7   :  { %5750 = vmatpush1.bf16.msra.mxu1 %v6894_v19 }
 0x1e8   :  { %5751 = vmatprep.subr.bf16.mxu1 %v6863_v20 }
 0x1eb   :  { %5752 = vmatpush1.bf16.msra.mxu1 %v6862_v25 }
 0x1ec   :  { %5753 = vmatprep.subr.bf16.mxu1 %v7343_v61 }
 0x1ef   :  { %5754 = vmatpush2.bf16.msra.mxu1 %v7342_v31 }
 0x1f0   :  { %5755 = vmatprep.subr.bf16.mxu1 %v7311_v33  ;;  %v2650_v33 = vld [vmem:[%s10669_s5 + $0x610] sm:$0xff] }
 0x1f1   :  { %v7056_v44 = vcombine.low %v2650_v33, %v2666_v34 }
 0x1f3   :  { %5756 = vmatpush2.bf16.msra.mxu1 %v7310_v35  ;;  %v2651_v35 = vld [vmem:[%s10669_s5 + $0x618] sm:$0xff] }
 0x1f4   :  { %5757 = vmatprep.subr.bf16.mxu1 %v7279_v38  ;;  %v2667_v38 = vld [vmem:[%s10669_s5 + $0x698] sm:$0xff] }
 0x1f5   :  { %v7059_v16 = vcombine.high %v2651_v35, %v2667_v38  ;;  %v7058_v45 = vcombine.low %v2651_v35, %v2667_v38 }
 0x1f7   :  { %5758 = vmatpush2.bf16.msra.mxu1 %v7278_v14  ;;  %v2618_v14 = vld [vmem:[%s10669_s5 + $0x510] sm:$0xff] }
 0x1f8   :  { %5759 = vmatprep.subr.bf16.mxu1 %v7247_v15  ;;  %v7057_v15 = vcombine.high %v2650_v33, %v2666_v34  ;;  %v7024_v36 = vcombine.low %v2618_v14, %v2634_v40  ;;  %v2954_v33 = vld [vmem:[%s10669_s5 + $0xf90] sm:$0xff]  ;;  %v2955_v34 = vld [vmem:[%s10669_s5 + $0xf98] sm:$0xff] }
 0x1fb   :  { %5760 = vmatpush2.bf16.msra.mxu1 %v7246_v41  ;;  %v2619_v41 = vld [vmem:[%s10669_s5 + $0x518] sm:$0xff] }
 0x1fc   :  { %5761 = vmatprep.subr.bf16.mxu1 %v7215_v42  ;;  %v2635_v42 = vld [vmem:[%s10669_s5 + $0x598] sm:$0xff] }
 0x1fd   :  { %v7026_v37 = vcombine.low %v2619_v41, %v2635_v42 }
 0x1ff   :  { %5762 = vmatpush2.bf16.msra.mxu1 %v7214_v18  ;;  %v7025_v18 = vcombine.high %v2618_v14, %v2634_v40  ;;  %v2922_v40 = vld [vmem:[%s10669_s5 + $0xe90] sm:$0xff] }
 0x200   :  { %5763 = vmatprep.subr.bf16.mxu1 %v7183_v46  ;;  %v7027_v46 = vcombine.high %v2619_v41, %v2635_v42  ;;  %v2907_v41 = vld [vmem:[%s10669_s5 + $0xe18] sm:$0xff] }
 0x201   :  { %v2923_v42 = vld [vmem:[%s10669_s5 + $0xe98] sm:$0xff] }
 0x203   :  { %5764 = vmatpush2.bf16.msra.mxu1 %v7182_v51  ;;  %v2586_v51 = vld [vmem:[%s10669_s5 + $0x410] sm:$0xff] }
 0x204   :  { %5765 = vmatprep.subr.bf16.mxu1 %v7151_v56  ;;  %v2570_v56 = vld [vmem:[%s10669_s5 + $0x390] sm:$0xff]  ;;  %v6992_v59 = vcombine.low %v2586_v51, %v2602_v23 }
 0x207   :  { %5766 = vmatpush2.bf16.msra.mxu1 %v7150_v55  ;;  %v2554_v55 = vld [vmem:[%s10669_s5 + $0x310] sm:$0xff] }
 0x208   :  { %5767 = vmatprep.subr.bf16.mxu1 %v7119_v63  ;;  %v6961_v27 = vcombine.high %v2554_v55, %v2570_v56  ;;  %v2539_v63 = vld [vmem:[%s10669_s5 + $0x298] sm:$0xff] }
 0x20b   :  { %5768 = vmatpush2.bf16.msra.mxu1 %v7118_v52  ;;  %v2523_v52 = vld [vmem:[%s10669_s5 + $0x218] sm:$0xff] }
 0x20c   :  { %5819 = vmatprep.subr.bf16.mxu1 %v7091_v9  ;;  %v6931_v4 = vcombine.high %v2523_v52, %v2539_v63  ;;  %v6930_v10 = vcombine.low %v2523_v52, %v2539_v63  ;;  %v2811_v52 = vld [vmem:[%s10669_s5 + $0xb18] sm:$0xff] }
 0x20d   :  { %v2827_v63 = vld [vmem:[%s10669_s5 + $0xb98] sm:$0xff] }
 0x20e   :  { %v2404_v29 = vpop.f32.mrf.mxu0 }
 0x20f   :  { %v2405_v19 = vadd.f32 %v2404_v29, %v2043_v11  ;;  %v6993_v29 = vcombine.high %v2586_v51, %v2602_v23  ;;  %v6897_v11 = vcombine.high %v2490_v5, %v2506_v6  ;;  %v2874_v51 = vld [vmem:[%s10669_s5 + $0xd10] sm:$0xff] }
 0x210   :  { %v2406_v57 = vpop.f32.mrf.mxu0  ;;  %v2890_v23 = vld [vmem:[%s10669_s5 + $0xd90] sm:$0xff] }
 0x211   :  { %v2407_v21 = vadd.f32 %v2406_v57, %v2047_v12  ;;  %v2555_v57 = vld [vmem:[%s10669_s5 + $0x318] sm:$0xff] }
 0x212   :  { %v2408_v62 = vpop.f32.mrf.mxu0  ;;  %v6963_v32 = vcombine.high %v2555_v57, %v2571_v58  ;;  %v6962_v1 = vcombine.low %v2555_v57, %v2571_v58  ;;  %v2843_v57 = vld [vmem:[%s10669_s5 + $0xc18] sm:$0xff] }
 0x213   :  { %v2522_v62 = vld [vmem:[%s10669_s5 + $0x210] sm:$0xff]  ;;  %v2859_v58 = vld [vmem:[%s10669_s5 + $0xc98] sm:$0xff] }
 0x214   :  { %v2409_v0 = vpop.f32.mrf.mxu0  ;;  %v6929_v50 = vcombine.high %v2522_v62, %v2538_v48  ;;  %v6928_v9 = vcombine.low %v2522_v62, %v2538_v48  ;;  %v2810_v62 = vld [vmem:[%s10669_s5 + $0xb10] sm:$0xff] }
 0x215   :  { %v6960_v0 = vcombine.low %v2554_v55, %v2570_v56  ;;  %v2842_v55 = vld [vmem:[%s10669_s5 + $0xc10] sm:$0xff] }
 0x216   :  { %v2858_v56 = vld [vmem:[%s10669_s5 + $0xc90] sm:$0xff] }
 0x217   :  { %v2826_v48 = vld [vmem:[%s10669_s5 + $0xb90] sm:$0xff] }
 0x28e   :  { %v2445_v20 = vpop.f32.mrf.mxu1 }
 0x28f   :  { %v2446_v24 = vadd.f32 %v2445_v20, %v2405_v19  ;;  %v2458_v19 = vld [vmem:[%s10669_s5 + $0x10] sm:$0xff] }
 0x290   :  { %v2447_v25 = vpop.f32.mrf.mxu1  ;;  %v2474_v20 = vld [vmem:[%s10669_s5 + $0x90] sm:$0xff] }
 0x291   :  { %v2448_v61 = vadd.f32 %v2447_v25, %v2407_v21  ;;  %v2452_v26 = vmax.f32 %v2446_v24, 0.0  ;;  %v2459_v21 = vld [vmem:[%s10669_s5 + $0x18] sm:$0xff]  ;;  %v6896_v25 = vcombine.low %v2490_v5, %v2506_v6  ;;  %v6864_v35 = vcombine.low %v2458_v19, %v2474_v20  ;;  %v2778_v5 = vld [vmem:[%s10669_s5 + $0xa10] sm:$0xff] }
 0x292   :  { %v2449_v30 = vpop.f32.mrf.mxu1  ;;  %v2475_v24 = vld [vmem:[%s10669_s5 + $0x98] sm:$0xff]  ;;  %v2794_v6 = vld [vmem:[%s10669_s5 + $0xa90] sm:$0xff] }
 0x293   :  { %v2453_v31 = vmax.f32 %v2448_v61, 0.0  ;;  %v9195_v39 = vpack.c.bf16 %v2452_v26, %v2452_v26  ;;  %v6865_v26 = vcombine.high %v2458_v19, %v2474_v20  ;;  %v6867_v30 = vcombine.high %v2459_v21, %v2475_v24  ;;  %v2746_v19 = vld [vmem:[%s10669_s5 + $0x910] sm:$0xff] }
 0x294   :  { %v2450_v13 = vpop.f32.mrf.mxu1  ;;  %v6866_v38 = vcombine.low %v2459_v21, %v2475_v24  ;;  %v2762_v20 = vld [vmem:[%s10669_s5 + $0x990] sm:$0xff]  ;;  %v2747_v21 = vld [vmem:[%s10669_s5 + $0x918] sm:$0xff] }
 0x295   :  { %v9193_v17 = vpack.c.bf16 %v2453_v31, %v2453_v31  ;;  %v2938_v31 = vld [vmem:[%s10669_s5 + $0xf10] sm:$0xff]  ;;  %v2939_v13 = vld [vmem:[%s10669_s5 + $0xf18] sm:$0xff] }
 0x296   :  { %v7345_v14 = vcombine.high %v2938_v31, %v2954_v33  ;;  %v2763_v24 = vld [vmem:[%s10669_s5 + $0x998] sm:$0xff] }
 0x297   :  { %5728 = vmatprep.mubr.bf16.mxu0 %v9193_v17  ;;  %5769 = vmatprep.mubr.bf16.mxu1 %v9193_v17 }
 0x298   :  { %5729 = vmatmul.mubr.bf16.vlgmr.msra.gmra.mxu0 %v9195_v39  ;;  %5770 = vmatmul.mubr.bf16.vlgmr.msra.gmra.mxu1 %v9195_v39 }
 0x299   :  { %5779 = vmatpush1.bf16.msra.mxu0 %v7088_v7  ;;  %5820 = vmatpush1.bf16.msra.mxu1 %v7090_v8  ;;  %v2491_v7 = vld [vmem:[%s10669_s5 + $0x118] sm:$0xff] }
 0x29a   :  { %5810 = vmatprep.mubr.bf16.mxu0 %v9193_v17  ;;  %5851 = vmatprep.mubr.bf16.mxu1 %v9193_v17  ;;  %v2507_v8 = vld [vmem:[%s10669_s5 + $0x198] sm:$0xff] }
 0x29b   :  { %5780 = vmatprep.subr.bf16.mxu0 %v7057_v15  ;;  %5821 = vmatprep.subr.bf16.mxu1 %v7059_v16  ;;  %v6899_v12 = vcombine.high %v2491_v7, %v2507_v8  ;;  %v6898_v61 = vcombine.low %v2491_v7, %v2507_v8  ;;  %v7347_v15 = vcombine.high %v2939_v13, %v2955_v34  ;;  %v2906_v16 = vld [vmem:[%s10669_s5 + $0xe10] sm:$0xff]  ;;  %v2779_v7 = vld [vmem:[%s10669_s5 + $0xa18] sm:$0xff] }
 0x29c   :  { %v2795_v8 = vld [vmem:[%s10669_s5 + $0xa98] sm:$0xff] }
 0x29d   :  { %5781 = vmatpush1.bf16.msra.mxu0 %v7056_v44  ;;  %5822 = vmatpush1.bf16.msra.mxu1 %v7058_v45  ;;  %v7344_v44 = vcombine.low %v2938_v31, %v2954_v33  ;;  %v7346_v45 = vcombine.low %v2939_v13, %v2955_v34  ;;  %v2714_v31 = vld [vmem:[%s10669_s5 + $0x810] sm:$0xff]  ;;  %v2715_v13 = vld [vmem:[%s10669_s5 + $0x818] sm:$0xff] }
 0x29e   :  { %5782 = vmatprep.subr.bf16.mxu0 %v7025_v18  ;;  %5823 = vmatprep.subr.bf16.mxu1 %v7027_v46  ;;  %v7313_v18 = vcombine.high %v2906_v16, %v2922_v40  ;;  %v7315_v46 = vcombine.high %v2907_v41, %v2923_v42  ;;  %v2730_v33 = vld [vmem:[%s10669_s5 + $0x890] sm:$0xff]  ;;  %v2731_v34 = vld [vmem:[%s10669_s5 + $0x898] sm:$0xff] }
 0x2a1   :  { %5783 = vmatpush1.bf16.msra.mxu0 %v7024_v36  ;;  %5824 = vmatpush1.bf16.msra.mxu1 %v7026_v37  ;;  %v7312_v36 = vcombine.low %v2906_v16, %v2922_v40  ;;  %v7314_v37 = vcombine.low %v2907_v41, %v2923_v42  ;;  %v2684_v16 = vld [vmem:[%s10669_s5 + $0x720] sm:$0xff]  ;;  %v2685_v41 = vld [vmem:[%s10669_s5 + $0x728] sm:$0xff] }
 0x2a2   :  { %5784 = vmatprep.subr.bf16.mxu0 %v6993_v29  ;;  %5825 = vmatprep.subr.bf16.mxu1 %v6995_v54  ;;  %v7281_v29 = vcombine.high %v2874_v51, %v2890_v23  ;;  %v7283_v54 = vcombine.high %v2875_v53, %v2891_v28  ;;  %v2700_v40 = vld [vmem:[%s10669_s5 + $0x7a0] sm:$0xff]  ;;  %v2701_v42 = vld [vmem:[%s10669_s5 + $0x7a8] sm:$0xff] }
 0x2a5   :  { %5785 = vmatpush1.bf16.msra.mxu0 %v6992_v59  ;;  %5826 = vmatpush1.bf16.msra.mxu1 %v6994_v60  ;;  %v7280_v59 = vcombine.low %v2874_v51, %v2890_v23  ;;  %v7282_v60 = vcombine.low %v2875_v53, %v2891_v28  ;;  %v2652_v51 = vld [vmem:[%s10669_s5 + $0x620] sm:$0xff]  ;;  %v2653_v53 = vld [vmem:[%s10669_s5 + $0x628] sm:$0xff] }
 0x2a6   :  { %5786 = vmatprep.subr.bf16.mxu0 %v6961_v27  ;;  %5827 = vmatprep.subr.bf16.mxu1 %v6963_v32  ;;  %v7249_v27 = vcombine.high %v2842_v55, %v2858_v56  ;;  %v7251_v32 = vcombine.high %v2843_v57, %v2859_v58  ;;  %v2668_v23 = vld [vmem:[%s10669_s5 + $0x6a0] sm:$0xff]  ;;  %v2669_v28 = vld [vmem:[%s10669_s5 + $0x6a8] sm:$0xff] }
 0x2a9   :  { %5787 = vmatpush1.bf16.msra.mxu0 %v6960_v0  ;;  %5828 = vmatpush1.bf16.msra.mxu1 %v6962_v1  ;;  %v7248_v0 = vcombine.low %v2842_v55, %v2858_v56  ;;  %v7250_v1 = vcombine.low %v2843_v57, %v2859_v58  ;;  %v2620_v55 = vld [vmem:[%s10669_s5 + $0x520] sm:$0xff]  ;;  %v2621_v57 = vld [vmem:[%s10669_s5 + $0x528] sm:$0xff] }
 0x2aa   :  { %5788 = vmatprep.subr.bf16.mxu0 %v6929_v50  ;;  %5829 = vmatprep.subr.bf16.mxu1 %v6931_v4  ;;  %v7217_v50 = vcombine.high %v2810_v62, %v2826_v48  ;;  %v7219_v4 = vcombine.high %v2811_v52, %v2827_v63  ;;  %v2636_v56 = vld [vmem:[%s10669_s5 + $0x5a0] sm:$0xff]  ;;  %v2637_v58 = vld [vmem:[%s10669_s5 + $0x5a8] sm:$0xff] }
 0x2ad   :  { %5789 = vmatpush1.bf16.msra.mxu0 %v6928_v9  ;;  %5830 = vmatpush1.bf16.msra.mxu1 %v6930_v10  ;;  %v7216_v9 = vcombine.low %v2810_v62, %v2826_v48  ;;  %v7218_v10 = vcombine.low %v2811_v52, %v2827_v63  ;;  %v2588_v62 = vld [vmem:[%s10669_s5 + $0x420] sm:$0xff]  ;;  %v2589_v52 = vld [vmem:[%s10669_s5 + $0x428] sm:$0xff] }
 0x2ae   :  { %5790 = vmatprep.subr.bf16.mxu0 %v6897_v11  ;;  %5831 = vmatprep.subr.bf16.mxu1 %v6899_v12  ;;  %v7185_v11 = vcombine.high %v2778_v5, %v2794_v6  ;;  %v7187_v12 = vcombine.high %v2779_v7, %v2795_v8  ;;  %v2604_v48 = vld [vmem:[%s10669_s5 + $0x4a0] sm:$0xff]  ;;  %v2605_v63 = vld [vmem:[%s10669_s5 + $0x4a8] sm:$0xff] }
 0x2b1   :  { %5791 = vmatpush1.bf16.msra.mxu0 %v6896_v25  ;;  %5832 = vmatpush1.bf16.msra.mxu1 %v6898_v61  ;;  %v7184_v25 = vcombine.low %v2778_v5, %v2794_v6  ;;  %v7186_v61 = vcombine.low %v2779_v7, %v2795_v8  ;;  %v2556_v5 = vld [vmem:[%s10669_s5 + $0x320] sm:$0xff]  ;;  %v2557_v7 = vld [vmem:[%s10669_s5 + $0x328] sm:$0xff] }
 0x2b2   :  { %5792 = vmatprep.subr.bf16.mxu0 %v6865_v26  ;;  %5833 = vmatprep.subr.bf16.mxu1 %v6867_v30  ;;  %v7153_v26 = vcombine.high %v2746_v19, %v2762_v20  ;;  %v7155_v30 = vcombine.high %v2747_v21, %v2763_v24  ;;  %v2572_v6 = vld [vmem:[%s10669_s5 + $0x3a0] sm:$0xff]  ;;  %v2573_v8 = vld [vmem:[%s10669_s5 + $0x3a8] sm:$0xff] }
 0x2b5   :  { %5793 = vmatpush1.bf16.msra.mxu0 %v6864_v35  ;;  %5834 = vmatpush1.bf16.msra.mxu1 %v6866_v38  ;;  %v7152_v35 = vcombine.low %v2746_v19, %v2762_v20  ;;  %v7154_v38 = vcombine.low %v2747_v21, %v2763_v24  ;;  %v2524_v19 = vld [vmem:[%s10669_s5 + $0x220] sm:$0xff]  ;;  %v2525_v21 = vld [vmem:[%s10669_s5 + $0x228] sm:$0xff] }
 0x2b6   :  { %5794 = vmatprep.subr.bf16.mxu0 %v7345_v14  ;;  %5835 = vmatprep.subr.bf16.mxu1 %v7347_v15  ;;  %v7121_v14 = vcombine.high %v2714_v31, %v2730_v33  ;;  %v7123_v15 = vcombine.high %v2715_v13, %v2731_v34  ;;  %v2540_v20 = vld [vmem:[%s10669_s5 + $0x2a0] sm:$0xff]  ;;  %v2541_v24 = vld [vmem:[%s10669_s5 + $0x2a8] sm:$0xff] }
 0x2b9   :  { %5795 = vmatpush2.bf16.msra.mxu0 %v7344_v44  ;;  %5836 = vmatpush2.bf16.msra.mxu1 %v7346_v45  ;;  %v7120_v44 = vcombine.low %v2714_v31, %v2730_v33  ;;  %v7122_v45 = vcombine.low %v2715_v13, %v2731_v34  ;;  %v2492_v31 = vld [vmem:[%s10669_s5 + $0x120] sm:$0xff]  ;;  %v2493_v13 = vld [vmem:[%s10669_s5 + $0x128] sm:$0xff] }
 0x2ba   :  { %5796 = vmatprep.subr.bf16.mxu0 %v7313_v18  ;;  %5837 = vmatprep.subr.bf16.mxu1 %v7315_v46  ;;  %v7093_v18 = vcombine.high %v2684_v16, %v2700_v40  ;;  %v7095_v46 = vcombine.high %v2685_v41, %v2701_v42  ;;  %v2508_v33 = vld [vmem:[%s10669_s5 + $0x1a0] sm:$0xff]  ;;  %v2509_v34 = vld [vmem:[%s10669_s5 + $0x1a8] sm:$0xff] }
 0x2bd   :  { %5797 = vmatpush2.bf16.msra.mxu0 %v7312_v36  ;;  %5838 = vmatpush2.bf16.msra.mxu1 %v7314_v37  ;;  %v7092_v36 = vcombine.low %v2684_v16, %v2700_v40  ;;  %v7094_v37 = vcombine.low %v2685_v41, %v2701_v42  ;;  %v2460_v16 = vld [vmem:[%s10669_s5 + $0x20] sm:$0xff]  ;;  %v2461_v41 = vld [vmem:[%s10669_s5 + $0x28] sm:$0xff] }
 0x2be   :  { %5798 = vmatprep.subr.bf16.mxu0 %v7281_v29  ;;  %5839 = vmatprep.subr.bf16.mxu1 %v7283_v54  ;;  %v7061_v29 = vcombine.high %v2652_v51, %v2668_v23  ;;  %v7063_v54 = vcombine.high %v2653_v53, %v2669_v28  ;;  %v2476_v40 = vld [vmem:[%s10669_s5 + $0xa0] sm:$0xff]  ;;  %v2477_v42 = vld [vmem:[%s10669_s5 + $0xa8] sm:$0xff] }
 0x2c1   :  { %5799 = vmatpush2.bf16.msra.mxu0 %v7280_v59  ;;  %5840 = vmatpush2.bf16.msra.mxu1 %v7282_v60  ;;  %v7060_v59 = vcombine.low %v2652_v51, %v2668_v23  ;;  %v7062_v60 = vcombine.low %v2653_v53, %v2669_v28  ;;  %v2940_v51 = vld [vmem:[%s10669_s5 + $0xf20] sm:$0xff]  ;;  %v2941_v53 = vld [vmem:[%s10669_s5 + $0xf28] sm:$0xff] }
 0x2c2   :  { %5800 = vmatprep.subr.bf16.mxu0 %v7249_v27  ;;  %5841 = vmatprep.subr.bf16.mxu1 %v7251_v32  ;;  %v7029_v27 = vcombine.high %v2620_v55, %v2636_v56  ;;  %v7031_v32 = vcombine.high %v2621_v57, %v2637_v58  ;;  %v2956_v23 = vld [vmem:[%s10669_s5 + $0xfa0] sm:$0xff]  ;;  %v2957_v28 = vld [vmem:[%s10669_s5 + $0xfa8] sm:$0xff] }
 0x2c5   :  { %5801 = vmatpush2.bf16.msra.mxu0 %v7248_v0  ;;  %5842 = vmatpush2.bf16.msra.mxu1 %v7250_v1  ;;  %v7028_v0 = vcombine.low %v2620_v55, %v2636_v56  ;;  %v7030_v1 = vcombine.low %v2621_v57, %v2637_v58  ;;  %v2908_v55 = vld [vmem:[%s10669_s5 + $0xe20] sm:$0xff]  ;;  %v2909_v57 = vld [vmem:[%s10669_s5 + $0xe28] sm:$0xff] }
 0x2c6   :  { %5802 = vmatprep.subr.bf16.mxu0 %v7217_v50  ;;  %5843 = vmatprep.subr.bf16.mxu1 %v7219_v4  ;;  %v6997_v50 = vcombine.high %v2588_v62, %v2604_v48  ;;  %v6999_v4 = vcombine.high %v2589_v52, %v2605_v63  ;;  %v2924_v56 = vld [vmem:[%s10669_s5 + $0xea0] sm:$0xff]  ;;  %v2925_v58 = vld [vmem:[%s10669_s5 + $0xea8] sm:$0xff] }
 0x2c9   :  { %5803 = vmatpush2.bf16.msra.mxu0 %v7216_v9  ;;  %5844 = vmatpush2.bf16.msra.mxu1 %v7218_v10  ;;  %v6996_v9 = vcombine.low %v2588_v62, %v2604_v48  ;;  %v6998_v10 = vcombine.low %v2589_v52, %v2605_v63  ;;  %v2876_v62 = vld [vmem:[%s10669_s5 + $0xd20] sm:$0xff]  ;;  %v2877_v52 = vld [vmem:[%s10669_s5 + $0xd28] sm:$0xff] }
 0x2ca   :  { %5804 = vmatprep.subr.bf16.mxu0 %v7185_v11  ;;  %5845 = vmatprep.subr.bf16.mxu1 %v7187_v12  ;;  %v6965_v11 = vcombine.high %v2556_v5, %v2572_v6  ;;  %v6967_v12 = vcombine.high %v2557_v7, %v2573_v8  ;;  %v2892_v48 = vld [vmem:[%s10669_s5 + $0xda0] sm:$0xff]  ;;  %v2893_v63 = vld [vmem:[%s10669_s5 + $0xda8] sm:$0xff] }
 0x2cd   :  { %5805 = vmatpush2.bf16.msra.mxu0 %v7184_v25  ;;  %5846 = vmatpush2.bf16.msra.mxu1 %v7186_v61  ;;  %v6964_v25 = vcombine.low %v2556_v5, %v2572_v6  ;;  %v6966_v61 = vcombine.low %v2557_v7, %v2573_v8  ;;  %v2844_v5 = vld [vmem:[%s10669_s5 + $0xc20] sm:$0xff]  ;;  %v2845_v7 = vld [vmem:[%s10669_s5 + $0xc28] sm:$0xff] }
 0x2ce   :  { %5806 = vmatprep.subr.bf16.mxu0 %v7153_v26  ;;  %5847 = vmatprep.subr.bf16.mxu1 %v7155_v30  ;;  %v6933_v26 = vcombine.high %v2524_v19, %v2540_v20  ;;  %v6935_v30 = vcombine.high %v2525_v21, %v2541_v24  ;;  %v2860_v6 = vld [vmem:[%s10669_s5 + $0xca0] sm:$0xff]  ;;  %v2861_v8 = vld [vmem:[%s10669_s5 + $0xca8] sm:$0xff] }
 0x2d1   :  { %5807 = vmatpush2.bf16.msra.mxu0 %v7152_v35  ;;  %5848 = vmatpush2.bf16.msra.mxu1 %v7154_v38  ;;  %v6932_v35 = vcombine.low %v2524_v19, %v2540_v20  ;;  %v6934_v38 = vcombine.low %v2525_v21, %v2541_v24  ;;  %v2812_v19 = vld [vmem:[%s10669_s5 + $0xb20] sm:$0xff]  ;;  %v2813_v21 = vld [vmem:[%s10669_s5 + $0xb28] sm:$0xff] }
 0x2d2   :  { %5808 = vmatprep.subr.bf16.mxu0 %v7121_v14  ;;  %5849 = vmatprep.subr.bf16.mxu1 %v7123_v15  ;;  %v6901_v14 = vcombine.high %v2492_v31, %v2508_v33  ;;  %v6903_v15 = vcombine.high %v2493_v13, %v2509_v34  ;;  %v2828_v20 = vld [vmem:[%s10669_s5 + $0xba0] sm:$0xff]  ;;  %v2829_v24 = vld [vmem:[%s10669_s5 + $0xba8] sm:$0xff] }
 0x2d5   :  { %5809 = vmatpush2.bf16.msra.mxu0 %v7120_v44  ;;  %5850 = vmatpush2.bf16.msra.mxu1 %v7122_v45  ;;  %v6900_v44 = vcombine.low %v2492_v31, %v2508_v33  ;;  %v6902_v45 = vcombine.low %v2493_v13, %v2509_v34  ;;  %v2780_v31 = vld [vmem:[%s10669_s5 + $0xa20] sm:$0xff]  ;;  %v2781_v13 = vld [vmem:[%s10669_s5 + $0xa28] sm:$0xff] }
 0x2d6   :  { %5860 = vmatprep.subr.bf16.mxu0 %v7093_v18  ;;  %5901 = vmatprep.subr.bf16.mxu1 %v7095_v46  ;;  %v6869_v18 = vcombine.high %v2460_v16, %v2476_v40  ;;  %v6871_v46 = vcombine.high %v2461_v41, %v2477_v42  ;;  %v2796_v33 = vld [vmem:[%s10669_s5 + $0xaa0] sm:$0xff]  ;;  %v2797_v34 = vld [vmem:[%s10669_s5 + $0xaa8] sm:$0xff] }
 0x2d8   :  { %5811 = vmatmul.mubr.bf16.vlgmr.msra.gmra.mxu0 %v9195_v39  ;;  %5852 = vmatmul.mubr.bf16.vlgmr.msra.gmra.mxu1 %v9195_v39 }
 0x2d9   :  { %5861 = vmatpush1.bf16.msra.mxu0 %v7092_v36  ;;  %5892 = vmatprep.mubr.bf16.mxu0 %v9193_v17  ;;  %v6868_v36 = vcombine.low %v2460_v16, %v2476_v40  ;;  %v2748_v16 = vld [vmem:[%s10669_s5 + $0x920] sm:$0xff] }
 0x2da   :  { %5902 = vmatpush1.bf16.msra.mxu1 %v7094_v37  ;;  %5933 = vmatprep.mubr.bf16.mxu1 %v9193_v17  ;;  %v6870_v37 = vcombine.low %v2461_v41, %v2477_v42  ;;  %v2764_v40 = vld [vmem:[%s10669_s5 + $0x9a0] sm:$0xff]  ;;  %v2749_v41 = vld [vmem:[%s10669_s5 + $0x928] sm:$0xff] }
 0x2db   :  { %5862 = vmatprep.subr.bf16.mxu0 %v7061_v29  ;;  %5903 = vmatprep.subr.bf16.mxu1 %v7063_v54  ;;  %v7349_v29 = vcombine.high %v2940_v51, %v2956_v23  ;;  %v7351_v54 = vcombine.high %v2941_v53, %v2957_v28  ;;  %v2765_v42 = vld [vmem:[%s10669_s5 + $0x9a8] sm:$0xff] }
 0x2dd   :  { %5863 = vmatpush1.bf16.msra.mxu0 %v7060_v59  ;;  %v7348_v59 = vcombine.low %v2940_v51, %v2956_v23  ;;  %v2716_v51 = vld [vmem:[%s10669_s5 + $0x820] sm:$0xff] }
 0x2de   :  { %5904 = vmatpush1.bf16.msra.mxu1 %v7062_v60  ;;  %5864 = vmatprep.subr.bf16.mxu0 %v7029_v27  ;;  %v7350_v60 = vcombine.low %v2941_v53, %v2957_v28  ;;  %v7317_v27 = vcombine.high %v2908_v55, %v2924_v56  ;;  %v2732_v23 = vld [vmem:[%s10669_s5 + $0x8a0] sm:$0xff]  ;;  %v2717_v53 = vld [vmem:[%s10669_s5 + $0x828] sm:$0xff] }
 0x2df   :  { %5905 = vmatprep.subr.bf16.mxu1 %v7031_v32  ;;  %v7319_v32 = vcombine.high %v2909_v57, %v2925_v58  ;;  %v2733_v28 = vld [vmem:[%s10669_s5 + $0x8a8] sm:$0xff] }
 0x2e1   :  { %5865 = vmatpush1.bf16.msra.mxu0 %v7028_v0  ;;  %v7316_v0 = vcombine.low %v2908_v55, %v2924_v56  ;;  %v2686_v55 = vld [vmem:[%s10669_s5 + $0x730] sm:$0xff] }
 0x2e2   :  { %5906 = vmatpush1.bf16.msra.mxu1 %v7030_v1  ;;  %5866 = vmatprep.subr.bf16.mxu0 %v6997_v50  ;;  %v7318_v1 = vcombine.low %v2909_v57, %v2925_v58  ;;  %v7285_v50 = vcombine.high %v2876_v62, %v2892_v48  ;;  %v2702_v56 = vld [vmem:[%s10669_s5 + $0x7b0] sm:$0xff]  ;;  %v2687_v57 = vld [vmem:[%s10669_s5 + $0x738] sm:$0xff] }
 0x2e3   :  { %5907 = vmatprep.subr.bf16.mxu1 %v6999_v4  ;;  %v7287_v4 = vcombine.high %v2877_v52, %v2893_v63  ;;  %v2703_v58 = vld [vmem:[%s10669_s5 + $0x7b8] sm:$0xff] }
 0x2e5   :  { %5867 = vmatpush1.bf16.msra.mxu0 %v6996_v9  ;;  %v7284_v9 = vcombine.low %v2876_v62, %v2892_v48  ;;  %v2654_v62 = vld [vmem:[%s10669_s5 + $0x630] sm:$0xff] }
 0x2e6   :  { %5908 = vmatpush1.bf16.msra.mxu1 %v6998_v10  ;;  %5868 = vmatprep.subr.bf16.mxu0 %v6965_v11  ;;  %v7286_v10 = vcombine.low %v2877_v52, %v2893_v63  ;;  %v7253_v11 = vcombine.high %v2844_v5, %v2860_v6  ;;  %v2670_v48 = vld [vmem:[%s10669_s5 + $0x6b0] sm:$0xff]  ;;  %v7096_v52 = vcombine.low %v2686_v55, %v2702_v56  ;;  %v2655_v63 = vld [vmem:[%s10669_s5 + $0x638] sm:$0xff] }
 0x2e7   :  { %5909 = vmatprep.subr.bf16.mxu1 %v6967_v12  ;;  %v7255_v12 = vcombine.high %v2845_v7, %v2861_v8 }
 0x2e9   :  { %5869 = vmatpush1.bf16.msra.mxu0 %v6964_v25  ;;  %v7252_v25 = vcombine.low %v2844_v5, %v2860_v6  ;;  %v2638_v5 = vld [vmem:[%s10669_s5 + $0x5b0] sm:$0xff] }
 0x2ea   :  { %5910 = vmatpush1.bf16.msra.mxu1 %v6966_v61  ;;  %5870 = vmatprep.subr.bf16.mxu0 %v6933_v26  ;;  %v7254_v61 = vcombine.low %v2845_v7, %v2861_v8  ;;  %v7221_v26 = vcombine.high %v2812_v19, %v2828_v20  ;;  %v2623_v7 = vld [vmem:[%s10669_s5 + $0x538] sm:$0xff] }
 0x2eb   :  { %5911 = vmatprep.subr.bf16.mxu1 %v6935_v30  ;;  %v7223_v30 = vcombine.high %v2813_v21, %v2829_v24  ;;  %v2639_v8 = vld [vmem:[%s10669_s5 + $0x5b8] sm:$0xff] }
 0x2ed   :  { %5871 = vmatpush1.bf16.msra.mxu0 %v6932_v35  ;;  %v7220_v35 = vcombine.low %v2812_v19, %v2828_v20  ;;  %v2590_v19 = vld [vmem:[%s10669_s5 + $0x430] sm:$0xff] }
 0x2ee   :  { %5912 = vmatpush1.bf16.msra.mxu1 %v6934_v38  ;;  %5872 = vmatprep.subr.bf16.mxu0 %v6901_v14  ;;  %v7222_v38 = vcombine.low %v2813_v21, %v2829_v24  ;;  %v7189_v14 = vcombine.high %v2780_v31, %v2796_v33  ;;  %v2606_v20 = vld [vmem:[%s10669_s5 + $0x4b0] sm:$0xff]  ;;  %v2591_v21 = vld [vmem:[%s10669_s5 + $0x438] sm:$0xff] }
 0x2ef   :  { %5913 = vmatprep.subr.bf16.mxu1 %v6903_v15  ;;  %v7191_v15 = vcombine.high %v2781_v13, %v2797_v34  ;;  %v2607_v24 = vld [vmem:[%s10669_s5 + $0x4b8] sm:$0xff] }
 0x2f1   :  { %5873 = vmatpush1.bf16.msra.mxu0 %v6900_v44  ;;  %v7188_v44 = vcombine.low %v2780_v31, %v2796_v33  ;;  %v2558_v31 = vld [vmem:[%s10669_s5 + $0x330] sm:$0xff] }
 0x2f2   :  { %5914 = vmatpush1.bf16.msra.mxu1 %v6902_v45  ;;  %5874 = vmatprep.subr.bf16.mxu0 %v6869_v18  ;;  %v7190_v45 = vcombine.low %v2781_v13, %v2797_v34  ;;  %v7157_v18 = vcombine.high %v2748_v16, %v2764_v40  ;;  %v2574_v33 = vld [vmem:[%s10669_s5 + $0x3b0] sm:$0xff]  ;;  %v2559_v13 = vld [vmem:[%s10669_s5 + $0x338] sm:$0xff] }
 0x2f3   :  { %5915 = vmatprep.subr.bf16.mxu1 %v6871_v46  ;;  %v7159_v46 = vcombine.high %v2749_v41, %v2765_v42  ;;  %v2575_v34 = vld [vmem:[%s10669_s5 + $0x3b8] sm:$0xff] }
 0x2f5   :  { %5875 = vmatpush1.bf16.msra.mxu0 %v6868_v36  ;;  %v7156_v36 = vcombine.low %v2748_v16, %v2764_v40  ;;  %v2526_v16 = vld [vmem:[%s10669_s5 + $0x230] sm:$0xff] }
 0x2f6   :  { %5916 = vmatpush1.bf16.msra.mxu1 %v6870_v37  ;;  %5876 = vmatprep.subr.bf16.mxu0 %v7349_v29  ;;  %v7158_v37 = vcombine.low %v2749_v41, %v2765_v42  ;;  %v7125_v29 = vcombine.high %v2716_v51, %v2732_v23  ;;  %v2542_v40 = vld [vmem:[%s10669_s5 + $0x2b0] sm:$0xff]  ;;  %v2527_v41 = vld [vmem:[%s10669_s5 + $0x238] sm:$0xff] }
 0x2f7   :  { %5917 = vmatprep.subr.bf16.mxu1 %v7351_v54  ;;  %v7127_v54 = vcombine.high %v2717_v53, %v2733_v28  ;;  %v2543_v42 = vld [vmem:[%s10669_s5 + $0x2b8] sm:$0xff] }
 0x2f9   :  { %5877 = vmatpush2.bf16.msra.mxu0 %v7348_v59  ;;  %v7124_v59 = vcombine.low %v2716_v51, %v2732_v23  ;;  %v2494_v51 = vld [vmem:[%s10669_s5 + $0x130] sm:$0xff] }
 0x2fa   :  { %5918 = vmatpush2.bf16.msra.mxu1 %v7350_v60  ;;  %5878 = vmatprep.subr.bf16.mxu0 %v7317_v27  ;;  %v7126_v60 = vcombine.low %v2717_v53, %v2733_v28  ;;  %v7097_v27 = vcombine.high %v2686_v55, %v2702_v56  ;;  %v2510_v23 = vld [vmem:[%s10669_s5 + $0x1b0] sm:$0xff]  ;;  %v2495_v53 = vld [vmem:[%s10669_s5 + $0x138] sm:$0xff] }
 0x2fb   :  { %5919 = vmatprep.subr.bf16.mxu1 %v7319_v32  ;;  %v7099_v32 = vcombine.high %v2687_v57, %v2703_v58  ;;  %v2511_v28 = vld [vmem:[%s10669_s5 + $0x1b8] sm:$0xff]  ;;  %v2462_v55 = vld [vmem:[%s10669_s5 + $0x30] sm:$0xff] }
 0x2fc   :  { %v2478_v56 = vld [vmem:[%s10669_s5 + $0xb0] sm:$0xff] }
 0x2fd   :  { %5879 = vmatpush2.bf16.msra.mxu0 %v7316_v0  ;;  %v2671_v0 = vld [vmem:[%s10669_s5 + $0x6b8] sm:$0xff] }
 0x2fe   :  { %5920 = vmatpush2.bf16.msra.mxu1 %v7318_v1  ;;  %5880 = vmatprep.subr.bf16.mxu0 %v7285_v50  ;;  %v7098_v1 = vcombine.low %v2687_v57, %v2703_v58  ;;  %v7065_v50 = vcombine.high %v2654_v62, %v2670_v48  ;;  %v7067_v6 = vcombine.high %v2655_v63, %v2671_v0  ;;  %v2463_v57 = vld [vmem:[%s10669_s5 + $0x38] sm:$0xff] }
 0x2ff   :  { %5921 = vmatprep.subr.bf16.mxu1 %v7287_v4  ;;  %v2622_v4 = vld [vmem:[%s10669_s5 + $0x530] sm:$0xff]  ;;  %v2479_v58 = vld [vmem:[%s10669_s5 + $0xb8] sm:$0xff] }
 0x301   :  { %5881 = vmatpush2.bf16.msra.mxu0 %v7284_v9  ;;  %v7064_v9 = vcombine.low %v2654_v62, %v2670_v48  ;;  %v2942_v62 = vld [vmem:[%s10669_s5 + $0xf30] sm:$0xff] }
 0x302   :  { %5922 = vmatpush2.bf16.msra.mxu1 %v7286_v10  ;;  %5882 = vmatprep.subr.bf16.mxu0 %v7253_v11  ;;  %v7066_v10 = vcombine.low %v2655_v63, %v2671_v0  ;;  %v7033_v11 = vcombine.high %v2622_v4, %v2638_v5  ;;  %v2958_v48 = vld [vmem:[%s10669_s5 + $0xfb0] sm:$0xff]  ;;  %v2959_v63 = vld [vmem:[%s10669_s5 + $0xfb8] sm:$0xff]  ;;  %v6872_v0 = vcombine.low %v2462_v55, %v2478_v56 }
 0x303   :  { %5923 = vmatprep.subr.bf16.mxu1 %v7255_v12  ;;  %v7035_v12 = vcombine.high %v2623_v7, %v2639_v8 }
 0x305   :  { %5883 = vmatpush2.bf16.msra.mxu0 %v7252_v25  ;;  %v7032_v25 = vcombine.low %v2622_v4, %v2638_v5  ;;  %v2910_v5 = vld [vmem:[%s10669_s5 + $0xe30] sm:$0xff] }
 0x306   :  { %5924 = vmatpush2.bf16.msra.mxu1 %v7254_v61  ;;  %5884 = vmatprep.subr.bf16.mxu0 %v7221_v26  ;;  %v7034_v61 = vcombine.low %v2623_v7, %v2639_v8  ;;  %v7001_v26 = vcombine.high %v2590_v19, %v2606_v20  ;;  %v2911_v7 = vld [vmem:[%s10669_s5 + $0xe38] sm:$0xff] }
 0x307   :  { %5925 = vmatprep.subr.bf16.mxu1 %v7223_v30  ;;  %v7003_v30 = vcombine.high %v2591_v21, %v2607_v24  ;;  %v2927_v8 = vld [vmem:[%s10669_s5 + $0xeb8] sm:$0xff] }
 0x309   :  { %5885 = vmatpush2.bf16.msra.mxu0 %v7220_v35  ;;  %v7000_v35 = vcombine.low %v2590_v19, %v2606_v20  ;;  %v2878_v19 = vld [vmem:[%s10669_s5 + $0xd30] sm:$0xff] }
 0x30a   :  { %5926 = vmatpush2.bf16.msra.mxu1 %v7222_v38  ;;  %5886 = vmatprep.subr.bf16.mxu0 %v7189_v14  ;;  %v7002_v38 = vcombine.low %v2591_v21, %v2607_v24  ;;  %v6969_v14 = vcombine.high %v2558_v31, %v2574_v33  ;;  %v2894_v20 = vld [vmem:[%s10669_s5 + $0xdb0] sm:$0xff]  ;;  %v2879_v21 = vld [vmem:[%s10669_s5 + $0xd38] sm:$0xff] }
 0x30b   :  { %5927 = vmatprep.subr.bf16.mxu1 %v7191_v15  ;;  %v6971_v15 = vcombine.high %v2559_v13, %v2575_v34  ;;  %v2895_v24 = vld [vmem:[%s10669_s5 + $0xdb8] sm:$0xff] }
 0x30d   :  { %5887 = vmatpush2.bf16.msra.mxu0 %v7188_v44  ;;  %v6968_v44 = vcombine.low %v2558_v31, %v2574_v33  ;;  %v2846_v31 = vld [vmem:[%s10669_s5 + $0xc30] sm:$0xff] }
 0x30e   :  { %5928 = vmatpush2.bf16.msra.mxu1 %v7190_v45  ;;  %5888 = vmatprep.subr.bf16.mxu0 %v7157_v18  ;;  %v6970_v45 = vcombine.low %v2559_v13, %v2575_v34  ;;  %v6937_v18 = vcombine.high %v2526_v16, %v2542_v40  ;;  %v2862_v33 = vld [vmem:[%s10669_s5 + $0xcb0] sm:$0xff]  ;;  %v2847_v13 = vld [vmem:[%s10669_s5 + $0xc38] sm:$0xff] }
 0x30f   :  { %5929 = vmatprep.subr.bf16.mxu1 %v7159_v46  ;;  %v6939_v46 = vcombine.high %v2527_v41, %v2543_v42  ;;  %v2863_v34 = vld [vmem:[%s10669_s5 + $0xcb8] sm:$0xff] }
 0x311   :  { %5889 = vmatpush2.bf16.msra.mxu0 %v7156_v36  ;;  %v6936_v36 = vcombine.low %v2526_v16, %v2542_v40  ;;  %v2814_v16 = vld [vmem:[%s10669_s5 + $0xb30] sm:$0xff] }
 0x312   :  { %5930 = vmatpush2.bf16.msra.mxu1 %v7158_v37  ;;  %5890 = vmatprep.subr.bf16.mxu0 %v7125_v29  ;;  %v6938_v37 = vcombine.low %v2527_v41, %v2543_v42  ;;  %v6905_v29 = vcombine.high %v2494_v51, %v2510_v23  ;;  %v2830_v40 = vld [vmem:[%s10669_s5 + $0xbb0] sm:$0xff]  ;;  %v2815_v41 = vld [vmem:[%s10669_s5 + $0xb38] sm:$0xff] }
 0x313   :  { %5931 = vmatprep.subr.bf16.mxu1 %v7127_v54  ;;  %v6907_v54 = vcombine.high %v2495_v53, %v2511_v28  ;;  %v2831_v42 = vld [vmem:[%s10669_s5 + $0xbb8] sm:$0xff] }
 0x315   :  { %5891 = vmatpush2.bf16.msra.mxu0 %v7124_v59  ;;  %v6904_v59 = vcombine.low %v2494_v51, %v2510_v23  ;;  %v2782_v51 = vld [vmem:[%s10669_s5 + $0xa30] sm:$0xff] }
 0x316   :  { %5932 = vmatpush2.bf16.msra.mxu1 %v7126_v60  ;;  %5942 = vmatprep.subr.bf16.mxu0 %v7097_v27  ;;  %v6906_v60 = vcombine.low %v2495_v53, %v2511_v28  ;;  %v6873_v27 = vcombine.high %v2462_v55, %v2478_v56  ;;  %v2798_v23 = vld [vmem:[%s10669_s5 + $0xab0] sm:$0xff]  ;;  %v2783_v53 = vld [vmem:[%s10669_s5 + $0xa38] sm:$0xff] }
 0x317   :  { %5983 = vmatprep.subr.bf16.mxu1 %v7099_v32  ;;  %v6875_v32 = vcombine.high %v2463_v57, %v2479_v58  ;;  %v2799_v28 = vld [vmem:[%s10669_s5 + $0xab8] sm:$0xff]  ;;  %v2750_v55 = vld [vmem:[%s10669_s5 + $0x930] sm:$0xff] }
 0x318   :  { %5893 = vmatmul.mubr.bf16.vlgmr.msra.gmra.mxu0 %v9195_v39  ;;  %v2766_v56 = vld [vmem:[%s10669_s5 + $0x9b0] sm:$0xff] }
 0x319   :  { %5934 = vmatmul.mubr.bf16.vlgmr.msra.gmra.mxu1 %v9195_v39  ;;  %5943 = vmatpush1.bf16.msra.mxu0 %v7096_v52  ;;  %v2943_v52 = vld [vmem:[%s10669_s5 + $0xf38] sm:$0xff] }
 0x31a   :  { %5974 = vmatprep.mubr.bf16.mxu0 %v9193_v17  ;;  %5984 = vmatpush1.bf16.msra.mxu1 %v7098_v1  ;;  %v6874_v1 = vcombine.low %v2463_v57, %v2479_v58  ;;  %v7355_v4 = vcombine.high %v2943_v52, %v2959_v63  ;;  %v2751_v57 = vld [vmem:[%s10669_s5 + $0x938] sm:$0xff] }
 0x31b   :  { %6015 = vmatprep.mubr.bf16.mxu1 %v9193_v17  ;;  %5944 = vmatprep.subr.bf16.mxu0 %v7065_v50  ;;  %v7353_v50 = vcombine.high %v2942_v62, %v2958_v48  ;;  %v2767_v58 = vld [vmem:[%s10669_s5 + $0x9b8] sm:$0xff] }
 0x31c   :  { %5985 = vmatprep.subr.bf16.mxu1 %v7067_v6  ;;  %v2926_v6 = vld [vmem:[%s10669_s5 + $0xeb0] sm:$0xff] }
 0x31d   :  { %5945 = vmatpush1.bf16.msra.mxu0 %v7064_v9  ;;  %v7352_v9 = vcombine.low %v2942_v62, %v2958_v48  ;;  %v2718_v62 = vld [vmem:[%s10669_s5 + $0x830] sm:$0xff] }
 0x31e   :  { %5986 = vmatpush1.bf16.msra.mxu1 %v7066_v10  ;;  %5946 = vmatprep.subr.bf16.mxu0 %v7033_v11  ;;  %v7354_v10 = vcombine.low %v2943_v52, %v2959_v63  ;;  %v7321_v11 = vcombine.high %v2910_v5, %v2926_v6  ;;  %v2734_v48 = vld [vmem:[%s10669_s5 + $0x8b0] sm:$0xff]  ;;  %v2719_v52 = vld [vmem:[%s10669_s5 + $0x838] sm:$0xff] }
 0x31f   :  { %5987 = vmatprep.subr.bf16.mxu1 %v7035_v12  ;;  %v7323_v12 = vcombine.high %v2911_v7, %v2927_v8  ;;  %v2735_v63 = vld [vmem:[%s10669_s5 + $0x8b8] sm:$0xff] }
 0x321   :  { %5947 = vmatpush1.bf16.msra.mxu0 %v7032_v25  ;;  %v7320_v25 = vcombine.low %v2910_v5, %v2926_v6  ;;  %v2688_v5 = vld [vmem:[%s10669_s5 + $0x740] sm:$0xff] }
 0x322   :  { %5988 = vmatpush1.bf16.msra.mxu1 %v7034_v61  ;;  %5948 = vmatprep.subr.bf16.mxu0 %v7001_v26  ;;  %v7322_v61 = vcombine.low %v2911_v7, %v2927_v8  ;;  %v7289_v26 = vcombine.high %v2878_v19, %v2894_v20  ;;  %v2704_v6 = vld [vmem:[%s10669_s5 + $0x7c0] sm:$0xff]  ;;  %v2689_v7 = vld [vmem:[%s10669_s5 + $0x748] sm:$0xff] }
 0x323   :  { %5989 = vmatprep.subr.bf16.mxu1 %v7003_v30  ;;  %v7291_v30 = vcombine.high %v2879_v21, %v2895_v24  ;;  %v2705_v8 = vld [vmem:[%s10669_s5 + $0x7c8] sm:$0xff] }
 0x325   :  { %5949 = vmatpush1.bf16.msra.mxu0 %v7000_v35  ;;  %v7288_v35 = vcombine.low %v2878_v19, %v2894_v20  ;;  %v9778_v19 = vld [vmem:[%s10671_s6] sm:$0xff] }
 0x326   :  { %5990 = vmatpush1.bf16.msra.mxu1 %v7002_v38  ;;  %5950 = vmatprep.subr.bf16.mxu0 %v6969_v14  ;;  %v7290_v38 = vcombine.low %v2879_v21, %v2895_v24  ;;  %v7257_v14 = vcombine.high %v2846_v31, %v2862_v33  ;;  %v2656_v20 = vld [vmem:[%s10669_s5 + $0x640] sm:$0xff]  ;;  %v7100_v24 = vcombine.low %v2688_v5, %v2704_v6 }
 0x327   :  { %5991 = vmatprep.subr.bf16.mxu1 %v6971_v15  ;;  %v7259_v15 = vcombine.high %v2847_v13, %v2863_v34  ;;  %v2672_v21 = vld [vmem:[%s10669_s5 + $0x6c0] sm:$0xff] }
 0x329   :  { %5951 = vmatpush1.bf16.msra.mxu0 %v6968_v44  ;;  %v7256_v44 = vcombine.low %v2846_v31, %v2862_v33  ;;  %v2624_v31 = vld [vmem:[%s10669_s5 + $0x540] sm:$0xff]  ;;  %v2987_v33 = vrot.slane %v9778_v19, %v9023_v2 }
 0x32a   :  { %5992 = vmatpush1.bf16.msra.mxu1 %v6970_v45  ;;  %5952 = vmatprep.subr.bf16.mxu0 %v6937_v18  ;;  %v7258_v45 = vcombine.low %v2847_v13, %v2863_v34  ;;  %v7225_v18 = vcombine.high %v2814_v16, %v2830_v40  ;;  %v2983_v13 = vrot.slane %v9778_v19, %v8902_v3 }
 0x32b   :  { %5993 = vmatprep.subr.bf16.mxu1 %v6939_v46  ;;  %v7227_v46 = vcombine.high %v2815_v41, %v2831_v42  ;;  %v2991_v34 = vrot.slane %v9778_v19, %v9026_v22 }
 0x32d   :  { %5953 = vmatpush1.bf16.msra.mxu0 %v6936_v36  ;;  %v7224_v36 = vcombine.low %v2814_v16, %v2830_v40 }
 0x32e   :  { %5994 = vmatpush1.bf16.msra.mxu1 %v6938_v37  ;;  %5954 = vmatprep.subr.bf16.mxu0 %v6905_v29  ;;  %v7226_v37 = vcombine.low %v2815_v41, %v2831_v42  ;;  %v7193_v29 = vcombine.high %v2782_v51, %v2798_v23  ;;  %v7068_v42 = vcombine.low %v2656_v20, %v2672_v21 }
 0x32f   :  { %5995 = vmatprep.subr.bf16.mxu1 %v6907_v54  ;;  %v7195_v54 = vcombine.high %v2783_v53, %v2799_v28 }
 0x331   :  { %5955 = vmatpush1.bf16.msra.mxu0 %v6904_v59  ;;  %v7192_v59 = vcombine.low %v2782_v51, %v2798_v23 }
 0x332   :  { %5996 = vmatpush1.bf16.msra.mxu1 %v6906_v60  ;;  %5956 = vmatprep.subr.bf16.mxu0 %v6873_v27  ;;  %v7194_v60 = vcombine.low %v2783_v53, %v2799_v28  ;;  %v7161_v27 = vcombine.high %v2750_v55, %v2766_v56 }
 0x333   :  { %5997 = vmatprep.subr.bf16.mxu1 %v6875_v32  ;;  %v7163_v32 = vcombine.high %v2751_v57, %v2767_v58 }
 0x335   :  { %5957 = vmatpush1.bf16.msra.mxu0 %v6872_v0  ;;  %v7160_v0 = vcombine.low %v2750_v55, %v2766_v56  ;;  %v2593_v56 = vld [vmem:[%s10669_s5 + $0x448] sm:$0xff] }
 0x336   :  { %5998 = vmatpush1.bf16.msra.mxu1 %v6874_v1  ;;  %5958 = vmatprep.subr.bf16.mxu0 %v7353_v50  ;;  %v7162_v1 = vcombine.low %v2751_v57, %v2767_v58  ;;  %v7129_v50 = vcombine.high %v2718_v62, %v2734_v48  ;;  %v2609_v57 = vld [vmem:[%s10669_s5 + $0x4c8] sm:$0xff] }
 0x337   :  { %5999 = vmatprep.subr.bf16.mxu1 %v7355_v4  ;;  %v7131_v4 = vcombine.high %v2719_v52, %v2735_v63 }
 0x339   :  { %5959 = vmatpush2.bf16.msra.mxu0 %v7352_v9  ;;  %v7128_v9 = vcombine.low %v2718_v62, %v2734_v48 }
 0x33a   :  { %6000 = vmatpush2.bf16.msra.mxu1 %v7354_v10  ;;  %5960 = vmatprep.subr.bf16.mxu0 %v7321_v11  ;;  %v7130_v10 = vcombine.low %v2719_v52, %v2735_v63  ;;  %v7101_v11 = vcombine.high %v2688_v5, %v2704_v6  ;;  %v2577_v5 = vld [vmem:[%s10669_s5 + $0x3c8] sm:$0xff] }
 0x33b   :  { %6001 = vmatprep.subr.bf16.mxu1 %v7323_v12  ;;  %v7103_v12 = vcombine.high %v2689_v7, %v2705_v8 }
 0x33d   :  { %5961 = vmatpush2.bf16.msra.mxu0 %v7320_v25  ;;  %v2657_v25 = vld [vmem:[%s10669_s5 + $0x648] sm:$0xff] }
 0x33e   :  { %6002 = vmatpush2.bf16.msra.mxu1 %v7322_v61  ;;  %5962 = vmatprep.subr.bf16.mxu0 %v7289_v26  ;;  %v2673_v61 = vld [vmem:[%s10669_s5 + $0x6c8] sm:$0xff]  ;;  %v7102_v26 = vcombine.low %v2689_v7, %v2705_v8  ;;  %v7006_v8 = vcombine.low %v2593_v56, %v2609_v57 }
 0x33f   :  { %6003 = vmatprep.subr.bf16.mxu1 %v7291_v30  ;;  %v2979_v30 = vrot.slane %v9778_v19, %v8894_v47  ;;  %v7071_v41 = vcombine.high %v2657_v25, %v2673_v61 }
 0x341   :  { %5963 = vmatpush2.bf16.msra.mxu0 %v7288_v35  ;;  %v7069_v35 = vcombine.high %v2656_v20, %v2672_v21  ;;  %v2529_v20 = vld [vmem:[%s10669_s5 + $0x248] sm:$0xff] }
 0x342   :  { %6004 = vmatpush2.bf16.msra.mxu1 %v7290_v38  ;;  %5964 = vmatprep.subr.bf16.mxu0 %v7257_v14  ;;  %v2640_v38 = vld [vmem:[%s10669_s5 + $0x5c0] sm:$0xff]  ;;  %v2625_v14 = vld [vmem:[%s10669_s5 + $0x548] sm:$0xff] }
 0x343   :  { %6005 = vmatprep.subr.bf16.mxu1 %v7259_v15  ;;  %v2641_v15 = vld [vmem:[%s10669_s5 + $0x5c8] sm:$0xff]  ;;  %v7037_v51 = vcombine.high %v2624_v31, %v2640_v38 }
 0x344   :  { %v7039_v23 = vcombine.high %v2625_v14, %v2641_v15  ;;  %v7038_v62 = vcombine.low %v2625_v14, %v2641_v15  ;;  %v2545_v21 = vld [vmem:[%s10669_s5 + $0x2c8] sm:$0xff]  ;;  %v2464_v15 = vld [vmem:[%s10669_s5 + $0x40] sm:$0xff] }
 0x345   :  { %5965 = vmatpush2.bf16.msra.mxu0 %v7256_v44  ;;  %v7070_v44 = vcombine.low %v2657_v25, %v2673_v61 }
 0x346   :  { %6006 = vmatpush2.bf16.msra.mxu1 %v7258_v45  ;;  %5966 = vmatprep.subr.bf16.mxu0 %v7225_v18 }
 0x347   :  { %6007 = vmatprep.subr.bf16.mxu1 %v7227_v46 }
 0x349   :  { %5967 = vmatpush2.bf16.msra.mxu0 %v7224_v36 }
 0x34a   :  { %6008 = vmatpush2.bf16.msra.mxu1 %v7226_v37  ;;  %5968 = vmatprep.subr.bf16.mxu0 %v7193_v29  ;;  %v2592_v37 = vld [vmem:[%s10669_s5 + $0x440] sm:$0xff] }
 0x34b   :  { %6009 = vmatprep.subr.bf16.mxu1 %v7195_v54  ;;  %v2608_v29 = vld [vmem:[%s10669_s5 + $0x4c0] sm:$0xff] }
 0x34c   :  { %v7005_v48 = vcombine.high %v2592_v37, %v2608_v29  ;;  %v7004_v7 = vcombine.low %v2592_v37, %v2608_v29 }
 0x34d   :  { %5969 = vmatpush2.bf16.msra.mxu0 %v7192_v59 }
 0x34e   :  { %6010 = vmatpush2.bf16.msra.mxu1 %v7194_v60  ;;  %5970 = vmatprep.subr.bf16.mxu0 %v7161_v27  ;;  %v7036_v60 = vcombine.low %v2624_v31, %v2640_v38  ;;  %v2512_v31 = vld [vmem:[%s10669_s5 + $0x1c0] sm:$0xff] }
 0x34f   :  { %6011 = vmatprep.subr.bf16.mxu1 %v7163_v32 }
 0x351   :  { %5971 = vmatpush2.bf16.msra.mxu0 %v7160_v0  ;;  %v7007_v0 = vcombine.high %v2593_v56, %v2609_v57  ;;  %v2913_v56 = vld [vmem:[%s10669_s5 + $0xe48] sm:$0xff] }
 0x352   :  { %6012 = vmatpush2.bf16.msra.mxu1 %v7162_v1  ;;  %5972 = vmatprep.subr.bf16.mxu0 %v7129_v50  ;;  %v2560_v1 = vld [vmem:[%s10669_s5 + $0x340] sm:$0xff]  ;;  %v2929_v57 = vld [vmem:[%s10669_s5 + $0xec8] sm:$0xff] }
 0x353   :  { %6013 = vmatprep.subr.bf16.mxu1 %v7131_v4  ;;  %v2576_v50 = vld [vmem:[%s10669_s5 + $0x3c0] sm:$0xff]  ;;  %v2561_v4 = vld [vmem:[%s10669_s5 + $0x348] sm:$0xff] }
 0x354   :  { %v6974_v25 = vcombine.low %v2561_v4, %v2577_v5 }
 0x355   :  { %5973 = vmatpush2.bf16.msra.mxu0 %v7128_v9  ;;  %v6973_v9 = vcombine.high %v2560_v1, %v2576_v50 }
 0x356   :  { %6014 = vmatpush2.bf16.msra.mxu1 %v7130_v10  ;;  %6024 = vmatprep.subr.bf16.mxu0 %v7101_v11  ;;  %v6975_v10 = vcombine.high %v2561_v4, %v2577_v5  ;;  %v2528_v11 = vld [vmem:[%s10669_s5 + $0x240] sm:$0xff] }
 0x357   :  { %6065 = vmatprep.subr.bf16.mxu1 %v7103_v12  ;;  %v2544_v12 = vld [vmem:[%s10669_s5 + $0x2c0] sm:$0xff] }
 0x358   :  { %5975 = vmatmul.mubr.bf16.vlgmr.msra.gmra.mxu0 %v9195_v39  ;;  %v5730_v16 = vpop.f32.mrf.mxu0  ;;  %v5771_v40 = vpop.f32.mrf.mxu1  ;;  %v6941_v61 = vcombine.high %v2528_v11, %v2544_v12  ;;  %v2848_v4 = vld [vmem:[%s10669_s5 + $0xc40] sm:$0xff] }
 0x359   :  { %6016 = vmatmul.mubr.bf16.vlgmr.msra.gmra.mxu1 %v9195_v39  ;;  %6025 = vmatpush1.bf16.msra.mxu0 %v7100_v24  ;;  %v5731_v45 = vadd.f32 %v5730_v16, %v2979_v30  ;;  %v5772_v53 = vadd.f32 %v5771_v40, %v2987_v33  ;;  %v6972_v24 = vcombine.low %v2560_v1, %v2576_v50  ;;  %v2496_v30 = vld [vmem:[%s10669_s5 + $0x140] sm:$0xff]  ;;  %v2497_v33 = vld [vmem:[%s10669_s5 + $0x148] sm:$0xff] }
 0x35a   :  { %6056 = vmatprep.mubr.bf16.mxu0 %v9193_v17  ;;  %6066 = vmatpush1.bf16.msra.mxu1 %v7102_v26  ;;  %v5732_v18 = vpop.f32.mrf.mxu0  ;;  %v5773_v46 = vpop.f32.mrf.mxu1  ;;  %v6943_v26 = vcombine.high %v2529_v20, %v2545_v21  ;;  %v6909_v38 = vcombine.high %v2496_v30, %v2512_v31  ;;  %v2480_v16 = vld [vmem:[%s10669_s5 + $0xc0] sm:$0xff]  ;;  %v2465_v40 = vld [vmem:[%s10669_s5 + $0x48] sm:$0xff] }
 0x35b   :  { %6097 = vmatprep.mubr.bf16.mxu1 %v9193_v17  ;;  %v5733_v28 = vadd.f32 %v5732_v18, %v2983_v13  ;;  %v5774_v36 = vadd.f32 %v5773_v46, %v2991_v34  ;;  %6026 = vmatprep.subr.bf16.mxu0 %v7069_v35  ;;  %v2513_v13 = vld [vmem:[%s10669_s5 + $0x1c8] sm:$0xff]  ;;  %v6940_v34 = vcombine.low %v2528_v11, %v2544_v12  ;;  %v2944_v46 = vld [vmem:[%s10669_s5 + $0xf40] sm:$0xff] }
 0x35c   :  { %6067 = vmatprep.subr.bf16.mxu1 %v7071_v41  ;;  %v5734_v54 = vpop.f32.mrf.mxu0  ;;  %v5775_v55 = vpop.f32.mrf.mxu1  ;;  %v6942_v35 = vcombine.low %v2529_v20, %v2545_v21  ;;  %v6911_v14 = vcombine.high %v2497_v33, %v2513_v13  ;;  %v2481_v41 = vld [vmem:[%s10669_s5 + $0xc8] sm:$0xff]  ;;  %v2864_v5 = vld [vmem:[%s10669_s5 + $0xcc0] sm:$0xff] }
 0x35d   :  { %v6384_v58 = vcombine.low %v5731_v45, %v5733_v28  ;;  %v6385_v59 = vcombine.low %v5772_v53, %v5774_v36  ;;  %6027 = vmatpush1.bf16.msra.mxu0 %v7068_v42  ;;  %v6908_v42 = vcombine.low %v2496_v30, %v2512_v31  ;;  %v6877_v45 = vcombine.high %v2464_v15, %v2480_v16  ;;  %v2961_v53 = vld [vmem:[%s10669_s5 + $0xfc8] sm:$0xff]  ;;  %v2912_v54 = vld [vmem:[%s10669_s5 + $0xe40] sm:$0xff] }
 0x35e   :  { %6068 = vmatpush1.bf16.msra.mxu1 %v7070_v44  ;;  %v5735_v27 = vpop.f32.mrf.mxu0  ;;  %v5776_v32 = vpop.f32.mrf.mxu1  ;;  %6028 = vmatprep.subr.bf16.mxu0 %v7037_v51  ;;  %v6910_v44 = vcombine.low %v2497_v33, %v2513_v13  ;;  %v6879_v18 = vcombine.high %v2465_v40, %v2481_v41  ;;  %v2960_v51 = vld [vmem:[%s10669_s5 + $0xfc0] sm:$0xff]  ;;  %v6876_v28 = vcombine.low %v2464_v15, %v2480_v16  ;;  %v2817_v21 = vld [vmem:[%s10669_s5 + $0xb48] sm:$0xff] }
 0x35f   :  { %v6392_v52 = vrot.slane %v6384_v58, %v8031_v49  ;;  %v6399_v63 = vrot.slane %v6385_v59, %v8031_v49  ;;  %6069 = vmatprep.subr.bf16.mxu1 %v7039_v23  ;;  %v2945_v23 = vld [vmem:[%s10669_s5 + $0xf48] sm:$0xff]  ;;  %v6878_v36 = vcombine.low %v2465_v40, %v2481_v41  ;;  %v7357_v37 = vcombine.high %v2944_v46, %v2960_v51  ;;  %v2928_v55 = vld [vmem:[%s10669_s5 + $0xec0] sm:$0xff] }
 0x360   :  { %v7359_v29 = vcombine.high %v2945_v23, %v2961_v53  ;;  %v7356_v58 = vcombine.low %v2944_v46, %v2960_v51  ;;  %v7358_v59 = vcombine.low %v2945_v23, %v2961_v53  ;;  %v7327_v27 = vcombine.high %v2913_v56, %v2929_v57  ;;  %v2880_v32 = vld [vmem:[%s10669_s5 + $0xd40] sm:$0xff]  ;;  %v2785_v13 = vld [vmem:[%s10669_s5 + $0xa48] sm:$0xff] }
 0x361   :  { %v6400_v6 = vcombine.low %v6392_v52, %v6399_v63  ;;  %6029 = vmatpush1.bf16.msra.mxu0 %v7036_v60  ;;  %v7325_v60 = vcombine.high %v2912_v54, %v2928_v55  ;;  %v2897_v52 = vld [vmem:[%s10669_s5 + $0xdc8] sm:$0xff]  ;;  %v7324_v63 = vcombine.low %v2912_v54, %v2928_v55  ;;  %v2816_v12 = vld [vmem:[%s10669_s5 + $0xb40] sm:$0xff]  ;;  %v2690_v55 = vld [vmem:[%s10669_s5 + $0x750] sm:$0xff] }
 0x362   :  { %6070 = vmatpush1.bf16.msra.mxu1 %v7038_v62  ;;  %6030 = vmatprep.subr.bf16.mxu0 %v7005_v48  ;;  %v2896_v62 = vld [vmem:[%s10669_s5 + $0xdc0] sm:$0xff]  ;;  %v2881_v48 = vld [vmem:[%s10669_s5 + $0xd48] sm:$0xff] }
 0x363   :  { %6528 = vst [vmem:[%s10672_s7] sm:$0xff] %v6400_v6  ;;  %6071 = vmatprep.subr.bf16.mxu1 %v7007_v0  ;;  %v7326_v0 = vcombine.low %v2913_v56, %v2929_v57  ;;  %v7293_v1 = vcombine.high %v2880_v32, %v2896_v62  ;;  %v7295_v50 = vcombine.high %v2881_v48, %v2897_v52  ;;  %v2849_v6 = vld [vmem:[%s10669_s5 + $0xc48] sm:$0xff]  ;;  %v2832_v20 = vld [vmem:[%s10669_s5 + $0xbc0] sm:$0xff]  ;;  %v2706_v56 = vld [vmem:[%s10669_s5 + $0x7d0] sm:$0xff] }
 0x364   :  { %v2784_v31 = vld [vmem:[%s10669_s5 + $0xa40] sm:$0xff]  ;;  %v2753_v41 = vld [vmem:[%s10669_s5 + $0x948] sm:$0xff]  ;;  %v2691_v57 = vld [vmem:[%s10669_s5 + $0x758] sm:$0xff] }
 0x365   :  { %6031 = vmatpush1.bf16.msra.mxu0 %v7004_v7  ;;  %v2865_v7 = vld [vmem:[%s10669_s5 + $0xcc8] sm:$0xff]  ;;  %v2800_v33 = vld [vmem:[%s10669_s5 + $0xac0] sm:$0xff] }
 0x366   :  { %6072 = vmatpush1.bf16.msra.mxu1 %v7006_v8  ;;  %6032 = vmatprep.subr.bf16.mxu0 %v6973_v9  ;;  %v7292_v8 = vcombine.low %v2880_v32, %v2896_v62  ;;  %v7294_v9 = vcombine.low %v2881_v48, %v2897_v52  ;;  %v7263_v11 = vcombine.high %v2849_v6, %v2865_v7  ;;  %v2752_v16 = vld [vmem:[%s10669_s5 + $0x940] sm:$0xff]  ;;  %v2721_v53 = vld [vmem:[%s10669_s5 + $0x848] sm:$0xff]  ;;  %v9993_v62 = vsub.s32 6, %v8013_v43 }
 0x367   :  { %6073 = vmatprep.subr.bf16.mxu1 %v6975_v10  ;;  %v7261_v10 = vcombine.high %v2848_v4, %v2864_v5  ;;  %v2768_v40 = vld [vmem:[%s10669_s5 + $0x9c0] sm:$0xff]  ;;  %v7105_v32 = vcombine.high %v2690_v55, %v2706_v56  ;;  %v9996_v52 = vsub.s32 5, %v8013_v43 }
 0x368   :  { %v2720_v51 = vld [vmem:[%s10669_s5 + $0x840] sm:$0xff] }
 0x369   :  { %6033 = vmatpush1.bf16.msra.mxu0 %v6972_v24  ;;  %v2833_v24 = vld [vmem:[%s10669_s5 + $0xbc8] sm:$0xff]  ;;  %v2736_v23 = vld [vmem:[%s10669_s5 + $0x8c0] sm:$0xff] }
 0x36a   :  { %6074 = vmatpush1.bf16.msra.mxu1 %v6974_v25  ;;  %6034 = vmatprep.subr.bf16.mxu0 %v6941_v61  ;;  %v7260_v25 = vcombine.low %v2848_v4, %v2864_v5  ;;  %v7262_v61 = vcombine.low %v2849_v6, %v2865_v7  ;;  %v7231_v30 = vcombine.high %v2817_v21, %v2833_v24  ;;  %v2659_v4 = vld [vmem:[%s10669_s5 + $0x658] sm:$0xff]  ;;  %v2626_v7 = vld [vmem:[%s10669_s5 + $0x550] sm:$0xff] }
 0x36b   :  { %6075 = vmatprep.subr.bf16.mxu1 %v6943_v26  ;;  %v7229_v26 = vcombine.high %v2816_v12, %v2832_v20  ;;  %v2675_v5 = vld [vmem:[%s10669_s5 + $0x6d8] sm:$0xff] }
 0x36d   :  { %6035 = vmatpush1.bf16.msra.mxu0 %v6940_v34  ;;  %v2801_v34 = vld [vmem:[%s10669_s5 + $0xac8] sm:$0xff] }
 0x36e   :  { %6076 = vmatpush1.bf16.msra.mxu1 %v6942_v35  ;;  %6036 = vmatprep.subr.bf16.mxu0 %v6909_v38  ;;  %v7228_v35 = vcombine.low %v2816_v12, %v2832_v20  ;;  %v7230_v38 = vcombine.low %v2817_v21, %v2833_v24  ;;  %v7199_v15 = vcombine.high %v2785_v13, %v2801_v34  ;;  %v2642_v12 = vld [vmem:[%s10669_s5 + $0x5d0] sm:$0xff]  ;;  %v2627_v20 = vld [vmem:[%s10669_s5 + $0x558] sm:$0xff] }
 0x36f   :  { %6077 = vmatprep.subr.bf16.mxu1 %v6911_v14  ;;  %v7197_v14 = vcombine.high %v2784_v31, %v2800_v33  ;;  %v2643_v21 = vld [vmem:[%s10669_s5 + $0x5d8] sm:$0xff] }
 0x371   :  { %6037 = vmatpush1.bf16.msra.mxu0 %v6908_v42  ;;  %v2769_v42 = vld [vmem:[%s10669_s5 + $0x9c8] sm:$0xff] }
 0x372   :  { %6078 = vmatpush1.bf16.msra.mxu1 %v6910_v44  ;;  %6038 = vmatprep.subr.bf16.mxu0 %v6877_v45  ;;  %v7196_v44 = vcombine.low %v2784_v31, %v2800_v33  ;;  %v7198_v45 = vcombine.low %v2785_v13, %v2801_v34  ;;  %v7167_v46 = vcombine.high %v2753_v41, %v2769_v42 }
 0x373   :  { %6079 = vmatprep.subr.bf16.mxu1 %v6879_v18  ;;  %v7165_v18 = vcombine.high %v2752_v16, %v2768_v40  ;;  %v7041_v13 = vcombine.high %v2626_v7, %v2642_v12  ;;  %v7043_v34 = vcombine.high %v2627_v20, %v2643_v21 }
 0x375   :  { %6039 = vmatpush1.bf16.msra.mxu0 %v6876_v28  ;;  %v2737_v28 = vld [vmem:[%s10669_s5 + $0x8c8] sm:$0xff] }
 0x376   :  { %6080 = vmatpush1.bf16.msra.mxu1 %v6878_v36  ;;  %6040 = vmatprep.subr.bf16.mxu0 %v7357_v37  ;;  %v7164_v36 = vcombine.low %v2752_v16, %v2768_v40  ;;  %v7166_v37 = vcombine.low %v2753_v41, %v2769_v42  ;;  %v7135_v54 = vcombine.high %v2721_v53, %v2737_v28  ;;  %v2610_v16 = vld [vmem:[%s10669_s5 + $0x4d0] sm:$0xff]  ;;  %v2595_v42 = vld [vmem:[%s10669_s5 + $0x458] sm:$0xff] }
 0x377   :  { %6081 = vmatprep.subr.bf16.mxu1 %v7359_v29  ;;  %v7133_v29 = vcombine.high %v2720_v51, %v2736_v23 }
 0x379   :  { %6041 = vmatpush2.bf16.msra.mxu0 %v7356_v58  ;;  %v2707_v58 = vld [vmem:[%s10669_s5 + $0x7d8] sm:$0xff] }
 0x37a   :  { %6082 = vmatpush2.bf16.msra.mxu1 %v7358_v59  ;;  %6042 = vmatprep.subr.bf16.mxu0 %v7325_v60  ;;  %v7132_v59 = vcombine.low %v2720_v51, %v2736_v23  ;;  %v7134_v60 = vcombine.low %v2721_v53, %v2737_v28  ;;  %v7107_v48 = vcombine.high %v2691_v57, %v2707_v58 }
 0x37b   :  { %6083 = vmatprep.subr.bf16.mxu1 %v7327_v27  ;;  %v9990_v27 = vsub.s32 4, %v8013_v43  ;;  %v7106_v6 = vcombine.low %v2691_v57, %v2707_v58  ;;  %v7042_v53 = vcombine.low %v2627_v20, %v2643_v21  ;;  %v2579_v57 = vld [vmem:[%s10669_s5 + $0x3d8] sm:$0xff] }
 0x37d   :  { %6043 = vmatpush2.bf16.msra.mxu0 %v7324_v63  ;;  %v9999_v63 = vsub.s32 7, %v8013_v43  ;;  %v2995_v43 = vrot.slane %v9778_v19, %v9990_v27 }
 0x37e   :  { %6084 = vmatpush2.bf16.msra.mxu1 %v7326_v0  ;;  %6044 = vmatprep.subr.bf16.mxu0 %v7293_v1  ;;  %v2658_v0 = vld [vmem:[%s10669_s5 + $0x650] sm:$0xff] }
 0x37f   :  { %6085 = vmatprep.subr.bf16.mxu1 %v7295_v50  ;;  %v2674_v1 = vld [vmem:[%s10669_s5 + $0x6d0] sm:$0xff]  ;;  %v7104_v50 = vcombine.low %v2690_v55, %v2706_v56  ;;  %v2563_v56 = vld [vmem:[%s10669_s5 + $0x358] sm:$0xff] }
 0x380   :  { %v2578_v55 = vld [vmem:[%s10669_s5 + $0x3d0] sm:$0xff] }
 0x381   :  { %6045 = vmatpush2.bf16.msra.mxu0 %v7292_v8  ;;  %v3003_v8 = vrot.slane %v9778_v19, %v9993_v62 }
 0x382   :  { %6086 = vmatpush2.bf16.msra.mxu1 %v7294_v9  ;;  %6046 = vmatprep.subr.bf16.mxu0 %v7261_v10  ;;  %v2999_v9 = vrot.slane %v9778_v19, %v9996_v52  ;;  %v3007_v10 = vrot.slane %v9778_v19, %v9999_v63  ;;  %v7072_v19 = vcombine.low %v2658_v0, %v2674_v1 }
 0x383   :  { %6087 = vmatprep.subr.bf16.mxu1 %v7263_v11  ;;  %v7073_v11 = vcombine.high %v2658_v0, %v2674_v1  ;;  %v2530_v0 = vld [vmem:[%s10669_s5 + $0x250] sm:$0xff] }
 0x384   :  { %v2546_v1 = vld [vmem:[%s10669_s5 + $0x2d0] sm:$0xff] }
 0x385   :  { %6047 = vmatpush2.bf16.msra.mxu0 %v7260_v25 }
 0x386   :  { %6088 = vmatpush2.bf16.msra.mxu1 %v7262_v61  ;;  %6048 = vmatprep.subr.bf16.mxu0 %v7229_v26  ;;  %v7075_v61 = vcombine.high %v2659_v4, %v2675_v5  ;;  %v7074_v26 = vcombine.low %v2659_v4, %v2675_v5  ;;  %v2547_v4 = vld [vmem:[%s10669_s5 + $0x2d8] sm:$0xff] }
 0x387   :  { %6089 = vmatprep.subr.bf16.mxu1 %v7231_v30 }
 0x389   :  { %6049 = vmatpush2.bf16.msra.mxu0 %v7228_v35 }
 0x38a   :  { %6090 = vmatpush2.bf16.msra.mxu1 %v7230_v38  ;;  %6050 = vmatprep.subr.bf16.mxu0 %v7197_v14 }
 0x38b   :  { %6091 = vmatprep.subr.bf16.mxu1 %v7199_v15  ;;  %v2594_v15 = vld [vmem:[%s10669_s5 + $0x450] sm:$0xff] }
 0x38c   :  { %v7009_v28 = vcombine.high %v2594_v15, %v2610_v16 }
 0x38d   :  { %6051 = vmatpush2.bf16.msra.mxu0 %v7196_v44  ;;  %v2611_v44 = vld [vmem:[%s10669_s5 + $0x4d8] sm:$0xff] }
 0x38e   :  { %6092 = vmatpush2.bf16.msra.mxu1 %v7198_v45  ;;  %6052 = vmatprep.subr.bf16.mxu0 %v7165_v18 }
 0x38f   :  { %6093 = vmatprep.subr.bf16.mxu1 %v7167_v46  ;;  %v7040_v46 = vcombine.low %v2626_v7, %v2642_v12  ;;  %v6944_v12 = vcombine.low %v2530_v0, %v2546_v1 }
 0x391   :  { %6053 = vmatpush2.bf16.msra.mxu0 %v7164_v36 }
 0x392   :  { %6094 = vmatpush2.bf16.msra.mxu1 %v7166_v37  ;;  %6054 = vmatprep.subr.bf16.mxu0 %v7133_v29  ;;  %v7011_v29 = vcombine.high %v2595_v42, %v2611_v44 }
 0x393   :  { %6095 = vmatprep.subr.bf16.mxu1 %v7135_v54  ;;  %v2562_v54 = vld [vmem:[%s10669_s5 + $0x350] sm:$0xff] }
 0x394   :  { %v6976_v5 = vcombine.low %v2562_v54, %v2578_v55 }
 0x395   :  { %6055 = vmatpush2.bf16.msra.mxu0 %v7132_v59  ;;  %v7008_v59 = vcombine.low %v2594_v15, %v2610_v16 }
 0x396   :  { %6096 = vmatpush2.bf16.msra.mxu1 %v7134_v60  ;;  %6106 = vmatprep.subr.bf16.mxu0 %v7105_v32  ;;  %v7010_v60 = vcombine.low %v2595_v42, %v2611_v44  ;;  %v6977_v32 = vcombine.high %v2562_v54, %v2578_v55  ;;  %v2914_v42 = vld [vmem:[%s10669_s5 + $0xe50] sm:$0xff] }
 0x397   :  { %6147 = vmatprep.subr.bf16.mxu1 %v7107_v48  ;;  %v6979_v48 = vcombine.high %v2563_v56, %v2579_v57  ;;  %v2930_v44 = vld [vmem:[%s10669_s5 + $0xed0] sm:$0xff] }
 0x398   :  { %v5812_v24 = vpop.f32.mrf.mxu0  ;;  %v5853_v25 = vpop.f32.mrf.mxu1  ;;  %6057 = vmatmul.mubr.bf16.vlgmr.msra.gmra.mxu0 %v9195_v39  ;;  %v7328_v54 = vcombine.low %v2914_v42, %v2930_v44 }
 0x399   :  { %6098 = vmatmul.mubr.bf16.vlgmr.msra.gmra.mxu1 %v9195_v39  ;;  %6107 = vmatpush1.bf16.msra.mxu0 %v7104_v50  ;;  %v5813_v30 = vadd.f32 %v5812_v24, %v2995_v43  ;;  %v5854_v35 = vadd.f32 %v5853_v25, %v3003_v8  ;;  %v2531_v50 = vld [vmem:[%s10669_s5 + $0x258] sm:$0xff]  ;;  %v6978_v43 = vcombine.low %v2563_v56, %v2579_v57  ;;  %v2498_v8 = vld [vmem:[%s10669_s5 + $0x150] sm:$0xff] }
 0x39a   :  { %6138 = vmatprep.mubr.bf16.mxu0 %v9193_v17  ;;  %6148 = vmatpush1.bf16.msra.mxu1 %v7106_v6  ;;  %v5814_v31 = vpop.f32.mrf.mxu0  ;;  %v5855_v33 = vpop.f32.mrf.mxu1  ;;  %v6945_v6 = vcombine.high %v2530_v0, %v2546_v1  ;;  %v6947_v7 = vcombine.high %v2531_v50, %v2547_v4  ;;  %v6946_v20 = vcombine.low %v2531_v50, %v2547_v4  ;;  %v2466_v25 = vld [vmem:[%s10669_s5 + $0x50] sm:$0xff] }
 0x39b   :  { %6179 = vmatprep.mubr.bf16.mxu1 %v9193_v17  ;;  %v5815_v38 = vadd.f32 %v5814_v31, %v2999_v9  ;;  %v5856_v14 = vadd.f32 %v5855_v33, %v3007_v10  ;;  %6108 = vmatprep.subr.bf16.mxu0 %v7073_v11  ;;  %v2514_v9 = vld [vmem:[%s10669_s5 + $0x1d0] sm:$0xff]  ;;  %v2499_v10 = vld [vmem:[%s10669_s5 + $0x158] sm:$0xff] }
 0x39c   :  { %v5816_v40 = vpop.f32.mrf.mxu0  ;;  %v5857_v41 = vpop.f32.mrf.mxu1  ;;  %6149 = vmatprep.subr.bf16.mxu1 %v7075_v61  ;;  %v2515_v11 = vld [vmem:[%s10669_s5 + $0x1d8] sm:$0xff]  ;;  %v6913_v21 = vcombine.high %v2498_v8, %v2514_v9  ;;  %v2482_v61 = vld [vmem:[%s10669_s5 + $0xd0] sm:$0xff] }
 0x39d   :  { %v6401_v45 = vcombine.low %v5813_v30, %v5815_v38  ;;  %v6402_v18 = vcombine.low %v5854_v35, %v5856_v14  ;;  %6109 = vmatpush1.bf16.msra.mxu0 %v7072_v19  ;;  %v6915_v24 = vcombine.high %v2499_v10, %v2515_v11  ;;  %v2467_v19 = vld [vmem:[%s10669_s5 + $0x58] sm:$0xff]  ;;  %v6912_v30 = vcombine.low %v2498_v8, %v2514_v9  ;;  %v2962_v35 = vld [vmem:[%s10669_s5 + $0xfd0] sm:$0xff] }
 0x39e   :  { %6150 = vmatpush1.bf16.msra.mxu1 %v7074_v26  ;;  %v5817_v51 = vpop.f32.mrf.mxu0  ;;  %v5858_v23 = vpop.f32.mrf.mxu1  ;;  %6110 = vmatprep.subr.bf16.mxu0 %v7041_v13  ;;  %v2483_v26 = vld [vmem:[%s10669_s5 + $0xd8] sm:$0xff]  ;;  %v6914_v31 = vcombine.low %v2499_v10, %v2515_v11  ;;  %v6881_v33 = vcombine.high %v2466_v25, %v2482_v61  ;;  %v6880_v15 = vcombine.low %v2466_v25, %v2482_v61  ;;  %v2818_v4 = vld [vmem:[%s10669_s5 + $0xb50] sm:$0xff] }
 0x39f   :  { %v6409_v36 = vrot.slane %v6401_v45, %v8031_v49  ;;  %v6416_v37 = vrot.slane %v6402_v18, %v8031_v49  ;;  %6151 = vmatprep.subr.bf16.mxu1 %v7043_v34  ;;  %v6883_v13 = vcombine.high %v2467_v19, %v2483_v26  ;;  %v2946_v34 = vld [vmem:[%s10669_s5 + $0xf50] sm:$0xff]  ;;  %v2947_v38 = vld [vmem:[%s10669_s5 + $0xf58] sm:$0xff]  ;;  %v6882_v16 = vcombine.low %v2467_v19, %v2483_v26 }
 0x3a0   :  { %v2963_v14 = vld [vmem:[%s10669_s5 + $0xfd8] sm:$0xff]  ;;  %v7361_v40 = vcombine.high %v2946_v34, %v2962_v35  ;;  %v7329_v23 = vcombine.high %v2914_v42, %v2930_v44  ;;  %v2786_v11 = vld [vmem:[%s10669_s5 + $0xa50] sm:$0xff] }
 0x3a1   :  { %v6417_v58 = vcombine.low %v6409_v36, %v6416_v37  ;;  %6111 = vmatpush1.bf16.msra.mxu0 %v7040_v46  ;;  %v7363_v41 = vcombine.high %v2947_v38, %v2963_v14  ;;  %v2915_v45 = vld [vmem:[%s10669_s5 + $0xe58] sm:$0xff]  ;;  %v7360_v46 = vcombine.low %v2946_v34, %v2962_v35  ;;  %v7362_v51 = vcombine.low %v2947_v38, %v2963_v14  ;;  %v2898_v36 = vld [vmem:[%s10669_s5 + $0xdd0] sm:$0xff] }
 0x3a2   :  { %6152 = vmatpush1.bf16.msra.mxu1 %v7042_v53  ;;  %6112 = vmatprep.subr.bf16.mxu0 %v7009_v28  ;;  %v2931_v18 = vld [vmem:[%s10669_s5 + $0xed8] sm:$0xff]  ;;  %v2882_v28 = vld [vmem:[%s10669_s5 + $0xd50] sm:$0xff] }
 0x3a3   :  { %6529 = vst [vmem:[%s10672_s7 + $0x8] sm:$0xff] %v6417_v58  ;;  %6153 = vmatprep.subr.bf16.mxu1 %v7011_v29  ;;  %v7331_v53 = vcombine.high %v2915_v45, %v2931_v18  ;;  %v2883_v37 = vld [vmem:[%s10669_s5 + $0xd58] sm:$0xff]  ;;  %v7330_v55 = vcombine.low %v2915_v45, %v2931_v18  ;;  %v7297_v56 = vcombine.high %v2882_v28, %v2898_v36  ;;  %v2850_v58 = vld [vmem:[%s10669_s5 + $0xc50] sm:$0xff]  ;;  %v2692_v18 = vld [vmem:[%s10669_s5 + $0x760] sm:$0xff] }
 0x3a4   :  { %v2899_v29 = vld [vmem:[%s10669_s5 + $0xdd8] sm:$0xff]  ;;  %v2754_v26 = vld [vmem:[%s10669_s5 + $0x950] sm:$0xff] }
 0x3a5   :  { %6113 = vmatpush1.bf16.msra.mxu0 %v7008_v59  ;;  %v7299_v57 = vcombine.high %v2883_v37, %v2899_v29  ;;  %v2866_v59 = vld [vmem:[%s10669_s5 + $0xcd0] sm:$0xff]  ;;  %v7298_v0 = vcombine.low %v2883_v37, %v2899_v29  ;;  %v10213_v29 = vld [vmem:[%s10671_s6 + $0x8] sm:$0xff] }
 0x3a6   :  { %6154 = vmatpush1.bf16.msra.mxu1 %v7010_v60  ;;  %6114 = vmatprep.subr.bf16.mxu0 %v6977_v32  ;;  %v2851_v60 = vld [vmem:[%s10669_s5 + $0xc58] sm:$0xff]  ;;  %v7265_v1 = vcombine.high %v2850_v58, %v2866_v59  ;;  %v2722_v14 = vld [vmem:[%s10669_s5 + $0x850] sm:$0xff] }
 0x3a7   :  { %6155 = vmatprep.subr.bf16.mxu1 %v6979_v48  ;;  %v2867_v32 = vld [vmem:[%s10669_s5 + $0xcd8] sm:$0xff]  ;;  %v7296_v48 = vcombine.low %v2882_v28, %v2898_v36 }
 0x3a8   :  { %v7267_v50 = vcombine.high %v2851_v60, %v2867_v32  ;;  %v7266_v8 = vcombine.low %v2851_v60, %v2867_v32  ;;  %v3011_v60 = vrot.slane %v10213_v29, %v8894_v47  ;;  %v3015_v32 = vrot.slane %v10213_v29, %v8902_v3 }
 0x3a9   :  { %6115 = vmatpush1.bf16.msra.mxu0 %v6976_v5  ;;  %v2834_v5 = vld [vmem:[%s10669_s5 + $0xbd0] sm:$0xff] }
 0x3aa   :  { %6156 = vmatpush1.bf16.msra.mxu1 %v6978_v43  ;;  %6116 = vmatprep.subr.bf16.mxu0 %v6945_v6  ;;  %v2819_v43 = vld [vmem:[%s10669_s5 + $0xb58] sm:$0xff]  ;;  %v7233_v9 = vcombine.high %v2818_v4, %v2834_v5 }
 0x3ab   :  { %6157 = vmatprep.subr.bf16.mxu1 %v6947_v7  ;;  %v2835_v6 = vld [vmem:[%s10669_s5 + $0xbd8] sm:$0xff]  ;;  %v7264_v7 = vcombine.low %v2850_v58, %v2866_v59  ;;  %v2677_v58 = vld [vmem:[%s10669_s5 + $0x6e8] sm:$0xff] }
 0x3ac   :  { %v7235_v10 = vcombine.high %v2819_v43, %v2835_v6  ;;  %v7234_v25 = vcombine.low %v2819_v43, %v2835_v6  ;;  %v2629_v6 = vld [vmem:[%s10669_s5 + $0x568] sm:$0xff] }
 0x3ad   :  { %6117 = vmatpush1.bf16.msra.mxu0 %v6944_v12  ;;  %v2802_v12 = vld [vmem:[%s10669_s5 + $0xad0] sm:$0xff] }
 0x3ae   :  { %6158 = vmatpush1.bf16.msra.mxu1 %v6946_v20  ;;  %6118 = vmatprep.subr.bf16.mxu0 %v6913_v21  ;;  %v2787_v20 = vld [vmem:[%s10669_s5 + $0xa58] sm:$0xff]  ;;  %v7201_v61 = vcombine.high %v2786_v11, %v2802_v12 }
 0x3af   :  { %6159 = vmatprep.subr.bf16.mxu1 %v6915_v24  ;;  %v2803_v21 = vld [vmem:[%s10669_s5 + $0xad8] sm:$0xff]  ;;  %v7232_v24 = vcombine.low %v2818_v4, %v2834_v5  ;;  %v3019_v4 = vrot.slane %v10213_v29, %v9023_v2  ;;  %v3023_v5 = vrot.slane %v10213_v29, %v9026_v22 }
 0x3b0   :  { %v7203_v19 = vcombine.high %v2787_v20, %v2803_v21  ;;  %v7202_v34 = vcombine.low %v2787_v20, %v2803_v21 }
 0x3b1   :  { %6119 = vmatpush1.bf16.msra.mxu0 %v6912_v30  ;;  %v2770_v30 = vld [vmem:[%s10669_s5 + $0x9d0] sm:$0xff] }
 0x3b2   :  { %6160 = vmatpush1.bf16.msra.mxu1 %v6914_v31  ;;  %6120 = vmatprep.subr.bf16.mxu0 %v6881_v33  ;;  %v2755_v31 = vld [vmem:[%s10669_s5 + $0x958] sm:$0xff]  ;;  %v7169_v35 = vcombine.high %v2754_v26, %v2770_v30 }
 0x3b3   :  { %6161 = vmatprep.subr.bf16.mxu1 %v6883_v13  ;;  %v2771_v33 = vld [vmem:[%s10669_s5 + $0x9d8] sm:$0xff]  ;;  %v7200_v13 = vcombine.low %v2786_v11, %v2802_v12 }
 0x3b4   :  { %v7171_v38 = vcombine.high %v2755_v31, %v2771_v33  ;;  %v7170_v42 = vcombine.low %v2755_v31, %v2771_v33  ;;  %v2597_v33 = vld [vmem:[%s10669_s5 + $0x468] sm:$0xff] }
 0x3b5   :  { %6121 = vmatpush1.bf16.msra.mxu0 %v6880_v15  ;;  %v2738_v15 = vld [vmem:[%s10669_s5 + $0x8d0] sm:$0xff] }
 0x3b6   :  { %6162 = vmatpush1.bf16.msra.mxu1 %v6882_v16  ;;  %6122 = vmatprep.subr.bf16.mxu0 %v7361_v40  ;;  %v2723_v16 = vld [vmem:[%s10669_s5 + $0x858] sm:$0xff]  ;;  %v7137_v44 = vcombine.high %v2722_v14, %v2738_v15 }
 0x3b7   :  { %6163 = vmatprep.subr.bf16.mxu1 %v7363_v41  ;;  %v2739_v40 = vld [vmem:[%s10669_s5 + $0x8d8] sm:$0xff]  ;;  %v7168_v41 = vcombine.low %v2754_v26, %v2770_v30 }
 0x3b8   :  { %v7139_v45 = vcombine.high %v2723_v16, %v2739_v40  ;;  %v7138_v28 = vcombine.low %v2723_v16, %v2739_v40 }
 0x3b9   :  { %6123 = vmatpush2.bf16.msra.mxu0 %v7360_v46  ;;  %v2708_v46 = vld [vmem:[%s10669_s5 + $0x7e0] sm:$0xff] }
 0x3ba   :  { %6164 = vmatpush2.bf16.msra.mxu1 %v7362_v51  ;;  %6124 = vmatprep.subr.bf16.mxu0 %v7329_v23  ;;  %v2693_v51 = vld [vmem:[%s10669_s5 + $0x768] sm:$0xff]  ;;  %v7109_v36 = vcombine.high %v2692_v18, %v2708_v46 }
 0x3bb   :  { %6165 = vmatprep.subr.bf16.mxu1 %v7331_v53  ;;  %v2709_v23 = vld [vmem:[%s10669_s5 + $0x7e8] sm:$0xff]  ;;  %v7136_v53 = vcombine.low %v2722_v14, %v2738_v15 }
 0x3bc   :  { %v7111_v37 = vcombine.high %v2693_v51, %v2709_v23  ;;  %v7110_v59 = vcombine.low %v2693_v51, %v2709_v23  ;;  %v2565_v51 = vld [vmem:[%s10669_s5 + $0x368] sm:$0xff] }
 0x3bd   :  { %6125 = vmatpush2.bf16.msra.mxu0 %v7328_v54  ;;  %v2660_v54 = vld [vmem:[%s10669_s5 + $0x660] sm:$0xff]  ;;  %v2581_v23 = vld [vmem:[%s10669_s5 + $0x3e8] sm:$0xff] }
 0x3be   :  { %6166 = vmatpush2.bf16.msra.mxu1 %v7330_v55  ;;  %6126 = vmatprep.subr.bf16.mxu0 %v7297_v56  ;;  %v2676_v55 = vld [vmem:[%s10669_s5 + $0x6e0] sm:$0xff]  ;;  %v7108_v56 = vcombine.low %v2692_v18, %v2708_v46 }
 0x3bf   :  { %6167 = vmatprep.subr.bf16.mxu1 %v7299_v57  ;;  %v2661_v57 = vld [vmem:[%s10669_s5 + $0x668] sm:$0xff]  ;;  %v2580_v18 = vld [vmem:[%s10669_s5 + $0x3e0] sm:$0xff] }
 0x3c0   :  { %v7079_v43 = vcombine.high %v2661_v57, %v2677_v58  ;;  %v7078_v11 = vcombine.low %v2661_v57, %v2677_v58  ;;  %v2533_v57 = vld [vmem:[%s10669_s5 + $0x268] sm:$0xff] }
 0x3c1   :  { %6127 = vmatpush2.bf16.msra.mxu0 %v7296_v48  ;;  %v7077_v48 = vcombine.high %v2660_v54, %v2676_v55  ;;  %v2549_v58 = vld [vmem:[%s10669_s5 + $0x2e8] sm:$0xff] }
 0x3c2   :  { %6168 = vmatpush2.bf16.msra.mxu1 %v7298_v0  ;;  %6128 = vmatprep.subr.bf16.mxu0 %v7265_v1  ;;  %v2628_v0 = vld [vmem:[%s10669_s5 + $0x560] sm:$0xff] }
 0x3c3   :  { %6169 = vmatprep.subr.bf16.mxu1 %v7267_v50  ;;  %v2644_v1 = vld [vmem:[%s10669_s5 + $0x5e0] sm:$0xff] }
 0x3c4   :  { %v7045_v12 = vcombine.high %v2628_v0, %v2644_v1 }
 0x3c5   :  { %6129 = vmatpush2.bf16.msra.mxu0 %v7264_v7  ;;  %v2645_v7 = vld [vmem:[%s10669_s5 + $0x5e8] sm:$0xff] }
 0x3c6   :  { %6170 = vmatpush2.bf16.msra.mxu1 %v7266_v8  ;;  %6130 = vmatprep.subr.bf16.mxu0 %v7233_v9  ;;  %v7076_v9 = vcombine.low %v2660_v54, %v2676_v55  ;;  %v7046_v16 = vcombine.low %v2629_v6, %v2645_v7  ;;  %v6983_v54 = vcombine.high %v2565_v51, %v2581_v23  ;;  %v2532_v55 = vld [vmem:[%s10669_s5 + $0x260] sm:$0xff] }
 0x3c7   :  { %6171 = vmatprep.subr.bf16.mxu1 %v7235_v10 }
 0x3c9   :  { %6131 = vmatpush2.bf16.msra.mxu0 %v7232_v24 }
 0x3ca   :  { %6172 = vmatpush2.bf16.msra.mxu1 %v7234_v25  ;;  %6132 = vmatprep.subr.bf16.mxu0 %v7201_v61  ;;  %v7047_v25 = vcombine.high %v2629_v6, %v2645_v7  ;;  %v2596_v61 = vld [vmem:[%s10669_s5 + $0x460] sm:$0xff] }
 0x3cb   :  { %6173 = vmatprep.subr.bf16.mxu1 %v7203_v19  ;;  %v2612_v19 = vld [vmem:[%s10669_s5 + $0x4e0] sm:$0xff] }
 0x3cc   :  { %v7013_v40 = vcombine.high %v2596_v61, %v2612_v19 }
 0x3cd   :  { %6133 = vmatpush2.bf16.msra.mxu0 %v7200_v13  ;;  %v2613_v13 = vld [vmem:[%s10669_s5 + $0x4e8] sm:$0xff] }
 0x3ce   :  { %6174 = vmatpush2.bf16.msra.mxu1 %v7202_v34  ;;  %6134 = vmatprep.subr.bf16.mxu0 %v7169_v35 }
 0x3cf   :  { %6175 = vmatprep.subr.bf16.mxu1 %v7171_v38  ;;  %v7044_v38 = vcombine.low %v2628_v0, %v2644_v1  ;;  %v2500_v0 = vld [vmem:[%s10669_s5 + $0x160] sm:$0xff] }
 0x3d0   :  { %v2516_v1 = vld [vmem:[%s10669_s5 + $0x1e0] sm:$0xff] }
 0x3d1   :  { %6135 = vmatpush2.bf16.msra.mxu0 %v7168_v41  ;;  %v6917_v6 = vcombine.high %v2500_v0, %v2516_v1 }
 0x3d2   :  { %6176 = vmatpush2.bf16.msra.mxu1 %v7170_v42  ;;  %6136 = vmatprep.subr.bf16.mxu0 %v7137_v44  ;;  %v7015_v44 = vcombine.high %v2597_v33, %v2613_v13 }
 0x3d3   :  { %6177 = vmatprep.subr.bf16.mxu1 %v7139_v45  ;;  %v2564_v45 = vld [vmem:[%s10669_s5 + $0x360] sm:$0xff] }
 0x3d5   :  { %6137 = vmatpush2.bf16.msra.mxu0 %v7136_v53  ;;  %v7012_v53 = vcombine.low %v2596_v61, %v2612_v19  ;;  %v2964_v61 = vld [vmem:[%s10669_s5 + $0xfe0] sm:$0xff]  ;;  %v2949_v19 = vld [vmem:[%s10669_s5 + $0xf68] sm:$0xff] }
 0x3d6   :  { %6178 = vmatpush2.bf16.msra.mxu1 %v7138_v28  ;;  %6188 = vmatprep.subr.bf16.mxu0 %v7109_v36  ;;  %v7014_v36 = vcombine.low %v2597_v33, %v2613_v13 }
 0x3d7   :  { %6229 = vmatprep.subr.bf16.mxu1 %v7111_v37  ;;  %v6981_v37 = vcombine.high %v2564_v45, %v2580_v18 }
 0x3d8   :  { %v5894_v50 = vpop.f32.mrf.mxu0  ;;  %6139 = vmatmul.mubr.bf16.vlgmr.msra.gmra.mxu0 %v9195_v39 }
 0x3d9   :  { %v5935_v8 = vpop.f32.mrf.mxu1  ;;  %6180 = vmatmul.mubr.bf16.vlgmr.msra.gmra.mxu1 %v9195_v39  ;;  %6189 = vmatpush1.bf16.msra.mxu0 %v7108_v56  ;;  %v5895_v20 = vadd.f32 %v5894_v50, %v3011_v60  ;;  %v2548_v56 = vld [vmem:[%s10669_s5 + $0x2e0] sm:$0xff]  ;;  %v6982_v60 = vcombine.low %v2565_v51, %v2581_v23  ;;  %v2501_v50 = vld [vmem:[%s10669_s5 + $0x168] sm:$0xff] }
 0x3da   :  { %6220 = vmatprep.mubr.bf16.mxu0 %v9193_v17  ;;  %6230 = vmatpush1.bf16.msra.mxu1 %v7110_v59  ;;  %v5896_v10 = vpop.f32.mrf.mxu0  ;;  %v5936_v26 = vadd.f32 %v5935_v8, %v3019_v4  ;;  %v6980_v59 = vcombine.low %v2564_v45, %v2580_v18  ;;  %v2517_v4 = vld [vmem:[%s10669_s5 + $0x1e8] sm:$0xff]  ;;  %v2468_v8 = vld [vmem:[%s10669_s5 + $0x60] sm:$0xff] }
 0x3db   :  { %6261 = vmatprep.mubr.bf16.mxu1 %v9193_v17  ;;  %v5897_v21 = vadd.f32 %v5896_v10, %v3015_v32  ;;  %v5937_v24 = vpop.f32.mrf.mxu1  ;;  %6190 = vmatprep.subr.bf16.mxu0 %v7077_v48  ;;  %v6949_v32 = vcombine.high %v2532_v55, %v2548_v56  ;;  %v6951_v48 = vcombine.high %v2533_v57, %v2549_v58  ;;  %v2469_v10 = vld [vmem:[%s10669_s5 + $0x68] sm:$0xff] }
 0x3dc   :  { %v5938_v30 = vadd.f32 %v5937_v24, %v3023_v5  ;;  %v5898_v31 = vpop.f32.mrf.mxu0  ;;  %6231 = vmatprep.subr.bf16.mxu1 %v7079_v43  ;;  %v6948_v5 = vcombine.low %v2532_v55, %v2548_v56  ;;  %v6950_v43 = vcombine.low %v2533_v57, %v2549_v58  ;;  %v6919_v7 = vcombine.high %v2501_v50, %v2517_v4  ;;  %v2885_v45 = vld [vmem:[%s10669_s5 + $0xd68] sm:$0xff] }
 0x3dd   :  { %v6418_v34 = vcombine.low %v5895_v20, %v5897_v21  ;;  %v5939_v35 = vpop.f32.mrf.mxu1  ;;  %6191 = vmatpush1.bf16.msra.mxu0 %v7076_v9  ;;  %v2484_v9 = vld [vmem:[%s10669_s5 + $0xe0] sm:$0xff]  ;;  %v6918_v20 = vcombine.low %v2501_v50, %v2517_v4  ;;  %v2901_v18 = vld [vmem:[%s10669_s5 + $0xde8] sm:$0xff] }
 0x3de   :  { %v6419_v14 = vcombine.low %v5936_v26, %v5938_v30  ;;  %6232 = vmatpush1.bf16.msra.mxu1 %v7078_v11  ;;  %v5899_v15 = vpop.f32.mrf.mxu0  ;;  %6192 = vmatprep.subr.bf16.mxu0 %v7045_v12  ;;  %v2485_v11 = vld [vmem:[%s10669_s5 + $0xe8] sm:$0xff]  ;;  %v6916_v12 = vcombine.low %v2500_v0, %v2516_v1  ;;  %v6885_v21 = vcombine.high %v2468_v8, %v2484_v9  ;;  %v2932_v35 = vld [vmem:[%s10669_s5 + $0xee0] sm:$0xff] }
 0x3df   :  { %v6426_v41 = vrot.slane %v6418_v34, %v8031_v49  ;;  %v5940_v42 = vpop.f32.mrf.mxu1  ;;  %6233 = vmatprep.subr.bf16.mxu1 %v7047_v25  ;;  %v6887_v24 = vcombine.high %v2469_v10, %v2485_v11  ;;  %v2948_v25 = vld [vmem:[%s10669_s5 + $0xf60] sm:$0xff]  ;;  %v2965_v26 = vld [vmem:[%s10669_s5 + $0xfe8] sm:$0xff]  ;;  %v6884_v30 = vcombine.low %v2468_v8, %v2484_v9  ;;  %v6886_v31 = vcombine.low %v2469_v10, %v2485_v11 }
 0x3e0   :  { %v6433_v46 = vrot.slane %v6419_v14, %v8031_v49  ;;  %v7365_v33 = vcombine.high %v2948_v25, %v2964_v61  ;;  %v7367_v13 = vcombine.high %v2949_v19, %v2965_v26  ;;  %v2916_v34 = vld [vmem:[%s10669_s5 + $0xe60] sm:$0xff]  ;;  %v2933_v14 = vld [vmem:[%s10669_s5 + $0xee8] sm:$0xff]  ;;  %v7364_v15 = vcombine.low %v2948_v25, %v2964_v61 }
 0x3e1   :  { %6193 = vmatpush1.bf16.msra.mxu0 %v7044_v38  ;;  %v2917_v38 = vld [vmem:[%s10669_s5 + $0xe68] sm:$0xff]  ;;  %v2884_v42 = vld [vmem:[%s10669_s5 + $0xd60] sm:$0xff]  ;;  %v7302_v56 = vcombine.low %v2885_v45, %v2901_v18 }
 0x3e2   :  { %v6434_v28 = vcombine.low %v6426_v41, %v6433_v46  ;;  %6234 = vmatpush1.bf16.msra.mxu1 %v7046_v16  ;;  %6194 = vmatprep.subr.bf16.mxu0 %v7013_v40  ;;  %v7366_v16 = vcombine.low %v2949_v19, %v2965_v26  ;;  %v7333_v40 = vcombine.high %v2916_v34, %v2932_v35 }
 0x3e3   :  { %6235 = vmatprep.subr.bf16.mxu1 %v7015_v44  ;;  %v7335_v41 = vcombine.high %v2917_v38, %v2933_v14  ;;  %v2900_v44 = vld [vmem:[%s10669_s5 + $0xde0] sm:$0xff]  ;;  %v7332_v46 = vcombine.low %v2916_v34, %v2932_v35  ;;  %v7334_v51 = vcombine.low %v2917_v38, %v2933_v14 }
 0x3e4   :  { %6530 = vst [vmem:[%s10672_s7 + $0x10] sm:$0xff] %v6434_v28  ;;  %v7301_v23 = vcombine.high %v2884_v42, %v2900_v44  ;;  %v2852_v28 = vld [vmem:[%s10669_s5 + $0xc60] sm:$0xff]  ;;  %v7300_v55 = vcombine.low %v2884_v42, %v2900_v44 }
 0x3e5   :  { %6195 = vmatpush1.bf16.msra.mxu0 %v7012_v53  ;;  %v7303_v53 = vcombine.high %v2885_v45, %v2901_v18 }
 0x3e6   :  { %6236 = vmatpush1.bf16.msra.mxu1 %v7014_v36  ;;  %6196 = vmatprep.subr.bf16.mxu0 %v6981_v37  ;;  %v2868_v36 = vld [vmem:[%s10669_s5 + $0xce0] sm:$0xff]  ;;  %v2853_v37 = vld [vmem:[%s10669_s5 + $0xc68] sm:$0xff] }
 0x3e7   :  { %6237 = vmatprep.subr.bf16.mxu1 %v6983_v54  ;;  %v2869_v54 = vld [vmem:[%s10669_s5 + $0xce8] sm:$0xff]  ;;  %v7269_v57 = vcombine.high %v2852_v28, %v2868_v36  ;;  %v7268_v0 = vcombine.low %v2852_v28, %v2868_v36  ;;  %v2679_v28 = vld [vmem:[%s10669_s5 + $0x6f8] sm:$0xff] }
 0x3e8   :  { %v7271_v58 = vcombine.high %v2853_v37, %v2869_v54  ;;  %v7270_v1 = vcombine.low %v2853_v37, %v2869_v54  ;;  %v3027_v37 = vrot.slane %v10213_v29, %v9990_v27  ;;  %v3031_v54 = vrot.slane %v10213_v29, %v9996_v52 }
 0x3e9   :  { %6197 = vmatpush1.bf16.msra.mxu0 %v6980_v59  ;;  %v2820_v59 = vld [vmem:[%s10669_s5 + $0xb60] sm:$0xff] }
 0x3ea   :  { %6238 = vmatpush1.bf16.msra.mxu1 %v6982_v60  ;;  %6198 = vmatprep.subr.bf16.mxu0 %v6949_v32  ;;  %v2836_v60 = vld [vmem:[%s10669_s5 + $0xbe0] sm:$0xff]  ;;  %v2821_v32 = vld [vmem:[%s10669_s5 + $0xb68] sm:$0xff] }
 0x3eb   :  { %6239 = vmatprep.subr.bf16.mxu1 %v6951_v48  ;;  %v2837_v48 = vld [vmem:[%s10669_s5 + $0xbe8] sm:$0xff]  ;;  %v7237_v50 = vcombine.high %v2820_v59, %v2836_v60  ;;  %v7236_v8 = vcombine.low %v2820_v59, %v2836_v60  ;;  %v3035_v59 = vrot.slane %v10213_v29, %v9993_v62  ;;  %v3039_v60 = vrot.slane %v10213_v29, %v9999_v63 }
 0x3ec   :  { %v7239_v4 = vcombine.high %v2821_v32, %v2837_v48  ;;  %v7238_v9 = vcombine.low %v2821_v32, %v2837_v48  ;;  %v2631_v48 = vld [vmem:[%s10669_s5 + $0x578] sm:$0xff] }
 0x3ed   :  { %6199 = vmatpush1.bf16.msra.mxu0 %v6948_v5  ;;  %v2788_v5 = vld [vmem:[%s10669_s5 + $0xa60] sm:$0xff] }
 0x3ee   :  { %6240 = vmatpush1.bf16.msra.mxu1 %v6950_v43  ;;  %6200 = vmatprep.subr.bf16.mxu0 %v6917_v6  ;;  %v2804_v43 = vld [vmem:[%s10669_s5 + $0xae0] sm:$0xff]  ;;  %v2789_v6 = vld [vmem:[%s10669_s5 + $0xa68] sm:$0xff] }
 0x3ef   :  { %6241 = vmatprep.subr.bf16.mxu1 %v6919_v7  ;;  %v2805_v7 = vld [vmem:[%s10669_s5 + $0xae8] sm:$0xff]  ;;  %v7205_v10 = vcombine.high %v2788_v5, %v2804_v43  ;;  %v7204_v25 = vcombine.low %v2788_v5, %v2804_v43 }
 0x3f0   :  { %v7207_v11 = vcombine.high %v2789_v6, %v2805_v7  ;;  %v7206_v61 = vcombine.low %v2789_v6, %v2805_v7 }
 0x3f1   :  { %6201 = vmatpush1.bf16.msra.mxu0 %v6916_v12  ;;  %v2756_v12 = vld [vmem:[%s10669_s5 + $0x960] sm:$0xff] }
 0x3f2   :  { %6242 = vmatpush1.bf16.msra.mxu1 %v6918_v20  ;;  %6202 = vmatprep.subr.bf16.mxu0 %v6885_v21  ;;  %v2772_v20 = vld [vmem:[%s10669_s5 + $0x9e0] sm:$0xff]  ;;  %v2757_v21 = vld [vmem:[%s10669_s5 + $0x968] sm:$0xff] }
 0x3f3   :  { %6243 = vmatprep.subr.bf16.mxu1 %v6887_v24  ;;  %v2773_v24 = vld [vmem:[%s10669_s5 + $0x9e8] sm:$0xff]  ;;  %v7173_v19 = vcombine.high %v2756_v12, %v2772_v20  ;;  %v7172_v34 = vcombine.low %v2756_v12, %v2772_v20 }
 0x3f4   :  { %v7175_v26 = vcombine.high %v2757_v21, %v2773_v24  ;;  %v7174_v35 = vcombine.low %v2757_v21, %v2773_v24  ;;  %v2615_v21 = vld [vmem:[%s10669_s5 + $0x4f8] sm:$0xff] }
 0x3f5   :  { %6203 = vmatpush1.bf16.msra.mxu0 %v6884_v30  ;;  %v2724_v30 = vld [vmem:[%s10669_s5 + $0x860] sm:$0xff] }
 0x3f6   :  { %6244 = vmatpush1.bf16.msra.mxu1 %v6886_v31  ;;  %6204 = vmatprep.subr.bf16.mxu0 %v7365_v33  ;;  %v2740_v31 = vld [vmem:[%s10669_s5 + $0x8e0] sm:$0xff]  ;;  %v2725_v33 = vld [vmem:[%s10669_s5 + $0x868] sm:$0xff] }
 0x3f7   :  { %6245 = vmatprep.subr.bf16.mxu1 %v7367_v13  ;;  %v2741_v13 = vld [vmem:[%s10669_s5 + $0x8e8] sm:$0xff]  ;;  %v7141_v38 = vcombine.high %v2724_v30, %v2740_v31  ;;  %v7140_v42 = vcombine.low %v2724_v30, %v2740_v31 }
 0x3f8   :  { %v7143_v14 = vcombine.high %v2725_v33, %v2741_v13  ;;  %v7142_v44 = vcombine.low %v2725_v33, %v2741_v13 }
 0x3f9   :  { %6205 = vmatpush2.bf16.msra.mxu0 %v7364_v15  ;;  %v2694_v15 = vld [vmem:[%s10669_s5 + $0x770] sm:$0xff] }
 0x3fa   :  { %6246 = vmatpush2.bf16.msra.mxu1 %v7366_v16  ;;  %6206 = vmatprep.subr.bf16.mxu0 %v7333_v40  ;;  %v2710_v16 = vld [vmem:[%s10669_s5 + $0x7f0] sm:$0xff]  ;;  %v2695_v40 = vld [vmem:[%s10669_s5 + $0x778] sm:$0xff] }
 0x3fb   :  { %6247 = vmatprep.subr.bf16.mxu1 %v7335_v41  ;;  %v2711_v41 = vld [vmem:[%s10669_s5 + $0x7f8] sm:$0xff]  ;;  %v7113_v45 = vcombine.high %v2694_v15, %v2710_v16 }
 0x3fc   :  { %v7115_v18 = vcombine.high %v2695_v40, %v2711_v41  ;;  %v7114_v36 = vcombine.low %v2695_v40, %v2711_v41 }
 0x3fd   :  { %6207 = vmatpush2.bf16.msra.mxu0 %v7332_v46  ;;  %v2662_v46 = vld [vmem:[%s10669_s5 + $0x670] sm:$0xff] }
 0x3fe   :  { %6248 = vmatpush2.bf16.msra.mxu1 %v7334_v51  ;;  %6208 = vmatprep.subr.bf16.mxu0 %v7301_v23  ;;  %v2678_v51 = vld [vmem:[%s10669_s5 + $0x6f0] sm:$0xff]  ;;  %v7112_v23 = vcombine.low %v2694_v15, %v2710_v16  ;;  %v2567_v15 = vld [vmem:[%s10669_s5 + $0x378] sm:$0xff] }
 0x3ff   :  { %6249 = vmatprep.subr.bf16.mxu1 %v7303_v53  ;;  %v2663_v53 = vld [vmem:[%s10669_s5 + $0x678] sm:$0xff] }
 0x400   :  { %v7083_v32 = vcombine.high %v2663_v53, %v2679_v28  ;;  %v7082_v5 = vcombine.low %v2663_v53, %v2679_v28  ;;  %v2583_v16 = vld [vmem:[%s10669_s5 + $0x3f8] sm:$0xff] }
 0x401   :  { %6209 = vmatpush2.bf16.msra.mxu0 %v7300_v55  ;;  %v7081_v55 = vcombine.high %v2662_v46, %v2678_v51  ;;  %v6986_v28 = vcombine.low %v2567_v15, %v2583_v16 }
 0x402   :  { %6250 = vmatpush2.bf16.msra.mxu1 %v7302_v56  ;;  %6210 = vmatprep.subr.bf16.mxu0 %v7269_v57  ;;  %v2630_v56 = vld [vmem:[%s10669_s5 + $0x570] sm:$0xff] }
 0x403   :  { %6251 = vmatprep.subr.bf16.mxu1 %v7271_v58  ;;  %v2646_v57 = vld [vmem:[%s10669_s5 + $0x5f0] sm:$0xff] }
 0x404   :  { %v7049_v29 = vcombine.high %v2630_v56, %v2646_v57 }
 0x405   :  { %6211 = vmatpush2.bf16.msra.mxu0 %v7268_v0  ;;  %v2647_v0 = vld [vmem:[%s10669_s5 + $0x5f8] sm:$0xff] }
 0x406   :  { %6252 = vmatpush2.bf16.msra.mxu1 %v7270_v1  ;;  %6212 = vmatprep.subr.bf16.mxu0 %v7237_v50  ;;  %v7080_v50 = vcombine.low %v2662_v46, %v2678_v51  ;;  %v7050_v30 = vcombine.low %v2631_v48, %v2647_v0  ;;  %v2550_v46 = vld [vmem:[%s10669_s5 + $0x2f0] sm:$0xff]  ;;  %v2535_v51 = vld [vmem:[%s10669_s5 + $0x278] sm:$0xff] }
 0x407   :  { %6253 = vmatprep.subr.bf16.mxu1 %v7239_v4 }
 0x409   :  { %6213 = vmatpush2.bf16.msra.mxu0 %v7236_v8  ;;  %v7051_v8 = vcombine.high %v2631_v48, %v2647_v0  ;;  %v2470_v48 = vld [vmem:[%s10669_s5 + $0x70] sm:$0xff] }
 0x40a   :  { %6254 = vmatpush2.bf16.msra.mxu1 %v7238_v9  ;;  %6214 = vmatprep.subr.bf16.mxu0 %v7205_v10  ;;  %v2598_v9 = vld [vmem:[%s10669_s5 + $0x470] sm:$0xff] }
 0x40b   :  { %6255 = vmatprep.subr.bf16.mxu1 %v7207_v11  ;;  %v2614_v10 = vld [vmem:[%s10669_s5 + $0x4f0] sm:$0xff] }
 0x40c   :  { %v7017_v31 = vcombine.high %v2598_v9, %v2614_v10  ;;  %v7016_v40 = vcombine.low %v2598_v9, %v2614_v10  ;;  %v2486_v0 = vld [vmem:[%s10669_s5 + $0xf0] sm:$0xff]  ;;  %v2967_v9 = vld [vmem:[%s10669_s5 + $0xff8] sm:$0xff] }
 0x40d   :  { %6215 = vmatpush2.bf16.msra.mxu0 %v7204_v25  ;;  %v6888_v10 = vcombine.low %v2470_v48, %v2486_v0 }
 0x40e   :  { %6256 = vmatpush2.bf16.msra.mxu1 %v7206_v61  ;;  %6216 = vmatprep.subr.bf16.mxu0 %v7173_v19  ;;  %v7048_v61 = vcombine.low %v2630_v56, %v2646_v57  ;;  %v2503_v56 = vld [vmem:[%s10669_s5 + $0x178] sm:$0xff] }
 0x40f   :  { %6257 = vmatprep.subr.bf16.mxu1 %v7175_v26  ;;  %v2519_v57 = vld [vmem:[%s10669_s5 + $0x1f8] sm:$0xff] }
 0x411   :  { %6217 = vmatpush2.bf16.msra.mxu0 %v7172_v34 }
 0x412   :  { %6258 = vmatpush2.bf16.msra.mxu1 %v7174_v35  ;;  %6218 = vmatprep.subr.bf16.mxu0 %v7141_v38  ;;  %v2566_v35 = vld [vmem:[%s10669_s5 + $0x370] sm:$0xff] }
 0x413   :  { %6259 = vmatprep.subr.bf16.mxu1 %v7143_v14  ;;  %v2582_v38 = vld [vmem:[%s10669_s5 + $0x3f0] sm:$0xff] }
 0x414   :  { %v6984_v53 = vcombine.low %v2566_v35, %v2582_v38 }
 0x415   :  { %6219 = vmatpush2.bf16.msra.mxu0 %v7140_v42 }
 0x416   :  { %6260 = vmatpush2.bf16.msra.mxu1 %v7142_v44  ;;  %6270 = vmatprep.subr.bf16.mxu0 %v7113_v45  ;;  %v6985_v44 = vcombine.high %v2566_v35, %v2582_v38  ;;  %v6987_v45 = vcombine.high %v2567_v15, %v2583_v16  ;;  %v2854_v16 = vld [vmem:[%s10669_s5 + $0xc70] sm:$0xff] }
 0x417   :  { %6311 = vmatprep.subr.bf16.mxu1 %v7115_v18  ;;  %v2534_v18 = vld [vmem:[%s10669_s5 + $0x270] sm:$0xff] }
 0x418   :  { %v5976_v58 = vpop.f32.mrf.mxu0  ;;  %6221 = vmatmul.mubr.bf16.vlgmr.msra.gmra.mxu0 %v9195_v39 }
 0x419   :  { %v6017_v1 = vpop.f32.mrf.mxu1  ;;  %6262 = vmatmul.mubr.bf16.vlgmr.msra.gmra.mxu1 %v9195_v39  ;;  %6271 = vmatpush1.bf16.msra.mxu0 %v7112_v23  ;;  %v5977_v43 = vadd.f32 %v5976_v58, %v3027_v37  ;;  %v2551_v23 = vld [vmem:[%s10669_s5 + $0x2f8] sm:$0xff]  ;;  %v6952_v58 = vcombine.low %v2534_v18, %v2550_v46 }
 0x41a   :  { %6302 = vmatprep.mubr.bf16.mxu0 %v9193_v17  ;;  %6312 = vmatpush1.bf16.msra.mxu1 %v7114_v36  ;;  %v5978_v4 = vpop.f32.mrf.mxu0  ;;  %v6018_v11 = vadd.f32 %v6017_v1, %v3035_v59  ;;  %v6953_v36 = vcombine.high %v2534_v18, %v2550_v46  ;;  %v6955_v37 = vcombine.high %v2535_v51, %v2551_v23  ;;  %v2471_v1 = vld [vmem:[%s10669_s5 + $0x78] sm:$0xff] }
 0x41b   :  { %6343 = vmatprep.mubr.bf16.mxu1 %v9193_v17  ;;  %v5979_v6 = vadd.f32 %v5978_v4, %v3031_v54  ;;  %v6019_v7 = vpop.f32.mrf.mxu1  ;;  %6272 = vmatprep.subr.bf16.mxu0 %v7081_v55  ;;  %v2599_v17 = vld [vmem:[%s10669_s5 + $0x478] sm:$0xff]  ;;  %v2502_v54 = vld [vmem:[%s10669_s5 + $0x170] sm:$0xff]  ;;  %v6954_v59 = vcombine.low %v2535_v51, %v2551_v23 }
 0x41c   :  { %v6020_v12 = vadd.f32 %v6019_v7, %v3039_v60  ;;  %v5980_v20 = vpop.f32.mrf.mxu0  ;;  %6313 = vmatprep.subr.bf16.mxu1 %v7083_v32  ;;  %v7019_v34 = vcombine.high %v2599_v17, %v2615_v21  ;;  %v7018_v42 = vcombine.low %v2599_v17, %v2615_v21  ;;  %v2518_v55 = vld [vmem:[%s10669_s5 + $0x1f0] sm:$0xff]  ;;  %v6923_v32 = vcombine.high %v2503_v56, %v2519_v57 }
 0x41d   :  { %v6435_v24 = vcombine.low %v5977_v43, %v5979_v6  ;;  %v6021_v25 = vpop.f32.mrf.mxu1  ;;  %6273 = vmatpush1.bf16.msra.mxu0 %v7080_v50  ;;  %v6921_v60 = vcombine.high %v2502_v54, %v2518_v55  ;;  %v2487_v50 = vld [vmem:[%s10669_s5 + $0xf8] sm:$0xff]  ;;  %v6920_v4 = vcombine.low %v2502_v54, %v2518_v55  ;;  %v2950_v6 = vld [vmem:[%s10669_s5 + $0xf70] sm:$0xff] }
 0x41e   :  { %v6436_v19 = vcombine.low %v6018_v11, %v6020_v12  ;;  %6314 = vmatpush1.bf16.msra.mxu1 %v7082_v5  ;;  %v5981_v26 = vpop.f32.mrf.mxu0  ;;  %6274 = vmatprep.subr.bf16.mxu0 %v7049_v29  ;;  %v6922_v5 = vcombine.low %v2503_v56, %v2519_v57  ;;  %v6889_v29 = vcombine.high %v2470_v48, %v2486_v0  ;;  %v2966_v7 = vld [vmem:[%s10669_s5 + $0xff0] sm:$0xff]  ;;  %v2935_v25 = vld [vmem:[%s10669_s5 + $0xef8] sm:$0xff] }
 0x41f   :  { %v6443_v33 = vrot.slane %v6435_v24, %v8031_v49  ;;  %v6022_v13 = vpop.f32.mrf.mxu1  ;;  %6315 = vmatprep.subr.bf16.mxu1 %v7051_v8  ;;  %v6891_v43 = vcombine.high %v2471_v1, %v2487_v50  ;;  %v2951_v8 = vld [vmem:[%s10669_s5 + $0xf78] sm:$0xff]  ;;  %v6890_v11 = vcombine.low %v2471_v1, %v2487_v50  ;;  %v7369_v12 = vcombine.high %v2950_v6, %v2966_v7  ;;  %v2918_v17 = vld [vmem:[%s10669_s5 + $0xe70] sm:$0xff] }
 0x420   :  { %v6450_v14 = vrot.slane %v6436_v19, %v8031_v49  ;;  %v7371_v20 = vcombine.high %v2951_v8, %v2967_v9  ;;  %v2934_v21 = vld [vmem:[%s10669_s5 + $0xef0] sm:$0xff]  ;;  %v2919_v24 = vld [vmem:[%s10669_s5 + $0xe78] sm:$0xff]  ;;  %v7370_v19 = vcombine.low %v2951_v8, %v2967_v9 }
 0x421   :  { %6275 = vmatpush1.bf16.msra.mxu0 %v7048_v61  ;;  %v7368_v61 = vcombine.low %v2950_v6, %v2966_v7  ;;  %v7337_v26 = vcombine.high %v2918_v17, %v2934_v21  ;;  %v2887_v13 = vld [vmem:[%s10669_s5 + $0xd78] sm:$0xff]  ;;  %v7336_v35 = vcombine.low %v2918_v17, %v2934_v21  ;;  %v7338_v38 = vcombine.low %v2919_v24, %v2935_v25  ;;  %v2822_v51 = vld [vmem:[%s10669_s5 + $0xb70] sm:$0xff] }
 0x422   :  { %v6451_v41 = vcombine.low %v6443_v33, %v6450_v14  ;;  %6316 = vmatpush1.bf16.msra.mxu1 %v7050_v30  ;;  %6276 = vmatprep.subr.bf16.mxu0 %v7017_v31  ;;  %v7339_v30 = vcombine.high %v2919_v24, %v2935_v25  ;;  %v2886_v31 = vld [vmem:[%s10669_s5 + $0xd70] sm:$0xff] }
 0x423   :  { %6317 = vmatprep.subr.bf16.mxu1 %v7019_v34  ;;  %v2902_v33 = vld [vmem:[%s10669_s5 + $0xdf0] sm:$0xff]  ;;  %v2903_v34 = vld [vmem:[%s10669_s5 + $0xdf8] sm:$0xff] }
 0x424   :  { %6531 = vst [vmem:[%s10672_s7 + $0x18] sm:$0xff] %v6451_v41  ;;  %v7305_v14 = vcombine.high %v2886_v31, %v2902_v33  ;;  %v7307_v15 = vcombine.high %v2887_v13, %v2903_v34  ;;  %v2855_v41 = vld [vmem:[%s10669_s5 + $0xc78] sm:$0xff]  ;;  %v2838_v23 = vld [vmem:[%s10669_s5 + $0xbf0] sm:$0xff] }
 0x425   :  { %6277 = vmatpush1.bf16.msra.mxu0 %v7016_v40  ;;  %v2870_v40 = vld [vmem:[%s10669_s5 + $0xcf0] sm:$0xff]  ;;  %v7241_v54 = vcombine.high %v2822_v51, %v2838_v23 }
 0x426   :  { %6318 = vmatpush1.bf16.msra.mxu1 %v7018_v42  ;;  %6278 = vmatprep.subr.bf16.mxu0 %v6985_v44  ;;  %v2871_v42 = vld [vmem:[%s10669_s5 + $0xcf8] sm:$0xff]  ;;  %v7304_v44 = vcombine.low %v2886_v31, %v2902_v33  ;;  %v7273_v18 = vcombine.high %v2854_v16, %v2870_v40  ;;  %v2790_v56 = vld [vmem:[%s10669_s5 + $0xa70] sm:$0xff] }
 0x427   :  { %6319 = vmatprep.subr.bf16.mxu1 %v6987_v45  ;;  %v7306_v45 = vcombine.low %v2887_v13, %v2903_v34  ;;  %v7275_v46 = vcombine.high %v2855_v41, %v2871_v42  ;;  %v2806_v57 = vld [vmem:[%s10669_s5 + $0xaf0] sm:$0xff] }
 0x428   :  { %v7209_v48 = vcombine.high %v2790_v56, %v2806_v57  ;;  %v2758_v1 = vld [vmem:[%s10669_s5 + $0x970] sm:$0xff] }
 0x429   :  { %6279 = vmatpush1.bf16.msra.mxu0 %v6984_v53  ;;  %v2823_v53 = vld [vmem:[%s10669_s5 + $0xb78] sm:$0xff]  ;;  %v2774_v50 = vld [vmem:[%s10669_s5 + $0x9f0] sm:$0xff] }
 0x42a   :  { %6320 = vmatpush1.bf16.msra.mxu1 %v6986_v28  ;;  %6280 = vmatprep.subr.bf16.mxu0 %v6953_v36  ;;  %v2839_v28 = vld [vmem:[%s10669_s5 + $0xbf8] sm:$0xff]  ;;  %v7272_v36 = vcombine.low %v2854_v16, %v2870_v40  ;;  %v7177_v6 = vcombine.high %v2758_v1, %v2774_v50  ;;  %v2726_v8 = vld [vmem:[%s10669_s5 + $0x870] sm:$0xff] }
 0x42b   :  { %6321 = vmatprep.subr.bf16.mxu1 %v6955_v37  ;;  %v7274_v37 = vcombine.low %v2855_v41, %v2871_v42  ;;  %v7243_v55 = vcombine.high %v2823_v53, %v2839_v28  ;;  %v2742_v9 = vld [vmem:[%s10669_s5 + $0x8f0] sm:$0xff] }
 0x42c   :  { %v7145_v17 = vcombine.high %v2726_v8, %v2742_v9  ;;  %v7144_v24 = vcombine.low %v2726_v8, %v2742_v9 }
 0x42d   :  { %6281 = vmatpush1.bf16.msra.mxu0 %v6952_v58  ;;  %v2791_v58 = vld [vmem:[%s10669_s5 + $0xa78] sm:$0xff] }
 0x42e   :  { %6322 = vmatpush1.bf16.msra.mxu1 %v6954_v59  ;;  %6282 = vmatprep.subr.bf16.mxu0 %v6921_v60  ;;  %v2807_v59 = vld [vmem:[%s10669_s5 + $0xaf8] sm:$0xff]  ;;  %v7240_v60 = vcombine.low %v2822_v51, %v2838_v23 }
 0x42f   :  { %6323 = vmatprep.subr.bf16.mxu1 %v6923_v32  ;;  %v7242_v32 = vcombine.low %v2823_v53, %v2839_v28  ;;  %v7211_v0 = vcombine.high %v2791_v58, %v2807_v59 }
 0x431   :  { %6283 = vmatpush1.bf16.msra.mxu0 %v6920_v4  ;;  %v2759_v4 = vld [vmem:[%s10669_s5 + $0x978] sm:$0xff] }
 0x432   :  { %6324 = vmatpush1.bf16.msra.mxu1 %v6922_v5  ;;  %6284 = vmatprep.subr.bf16.mxu0 %v6889_v29  ;;  %v2775_v5 = vld [vmem:[%s10669_s5 + $0x9f8] sm:$0xff]  ;;  %v7208_v29 = vcombine.low %v2790_v56, %v2806_v57 }
 0x433   :  { %6325 = vmatprep.subr.bf16.mxu1 %v6891_v43  ;;  %v7210_v43 = vcombine.low %v2791_v58, %v2807_v59  ;;  %v7179_v7 = vcombine.high %v2759_v4, %v2775_v5 }
 0x435   :  { %6285 = vmatpush1.bf16.msra.mxu0 %v6888_v10  ;;  %v2727_v10 = vld [vmem:[%s10669_s5 + $0x878] sm:$0xff] }
 0x436   :  { %6326 = vmatpush1.bf16.msra.mxu1 %v6890_v11  ;;  %6286 = vmatprep.subr.bf16.mxu0 %v7369_v12  ;;  %v2743_v11 = vld [vmem:[%s10669_s5 + $0x8f8] sm:$0xff]  ;;  %v7176_v12 = vcombine.low %v2758_v1, %v2774_v50 }
 0x437   :  { %6327 = vmatprep.subr.bf16.mxu1 %v7371_v20  ;;  %v7178_v20 = vcombine.low %v2759_v4, %v2775_v5  ;;  %v7147_v21 = vcombine.high %v2727_v10, %v2743_v11  ;;  %v7146_v25 = vcombine.low %v2727_v10, %v2743_v11 }
 0x439   :  { %6287 = vmatpush2.bf16.msra.mxu0 %v7368_v61  ;;  %v2970_v61 = vld [vmem:[%s10671_s6 + $0x10] sm:$0xff] }
 0x43a   :  { %6328 = vmatpush2.bf16.msra.mxu1 %v7370_v19  ;;  %6288 = vmatprep.subr.bf16.mxu0 %v7337_v26  ;;  %v3043_v19 = vrot.slane %v2970_v61, %v8894_v47  ;;  %v3047_v26 = vrot.slane %v2970_v61, %v8902_v3  ;;  %v3051_v31 = vrot.slane %v2970_v61, %v9023_v2 }
 0x43b   :  { %6329 = vmatprep.subr.bf16.mxu1 %v7339_v30  ;;  %v3055_v33 = vrot.slane %v2970_v61, %v9026_v22  ;;  %v3063_v53 = vrot.slane %v2970_v61, %v9996_v52 }
 0x43d   :  { %6289 = vmatpush2.bf16.msra.mxu0 %v7336_v35 }
 0x43e   :  { %6330 = vmatpush2.bf16.msra.mxu1 %v7338_v38  ;;  %6290 = vmatprep.subr.bf16.mxu0 %v7305_v14 }
 0x43f   :  { %6331 = vmatprep.subr.bf16.mxu1 %v7307_v15 }
 0x441   :  { %6291 = vmatpush2.bf16.msra.mxu0 %v7304_v44 }
 0x442   :  { %6332 = vmatpush2.bf16.msra.mxu1 %v7306_v45  ;;  %6292 = vmatprep.subr.bf16.mxu0 %v7273_v18 }
 0x443   :  { %6333 = vmatprep.subr.bf16.mxu1 %v7275_v46 }
 0x445   :  { %6293 = vmatpush2.bf16.msra.mxu0 %v7272_v36  ;;  %v3067_v36 = vrot.slane %v2970_v61, %v9993_v62 }
 0x446   :  { %6334 = vmatpush2.bf16.msra.mxu1 %v7274_v37  ;;  %6294 = vmatprep.subr.bf16.mxu0 %v7241_v54  ;;  %v3071_v37 = vrot.slane %v2970_v61, %v9999_v63 }
 0x447   :  { %6335 = vmatprep.subr.bf16.mxu1 %v7243_v55 }
 0x449   :  { %6295 = vmatpush2.bf16.msra.mxu0 %v7240_v60 }
 0x44a   :  { %6336 = vmatpush2.bf16.msra.mxu1 %v7242_v32  ;;  %6296 = vmatprep.subr.bf16.mxu0 %v7209_v48 }
 0x44b   :  { %6337 = vmatprep.subr.bf16.mxu1 %v7211_v0 }
 0x44d   :  { %6297 = vmatpush2.bf16.msra.mxu0 %v7208_v29 }
 0x44e   :  { %6338 = vmatpush2.bf16.msra.mxu1 %v7210_v43  ;;  %6298 = vmatprep.subr.bf16.mxu0 %v7177_v6  ;;  %v2971_v6 = vld [vmem:[%s10671_s6 + $0x18] sm:$0xff] }
 0x44f   :  { %6339 = vmatprep.subr.bf16.mxu1 %v7179_v7  ;;  %v3075_v7 = vrot.slane %v2971_v6, %v8894_v47  ;;  %v3079_v8 = vrot.slane %v2971_v6, %v8902_v3  ;;  %v3083_v10 = vrot.slane %v2971_v6, %v9023_v2  ;;  %v3087_v11 = vrot.slane %v2971_v6, %v9026_v22 }
 0x450   :  { %v3091_v22 = vrot.slane %v2971_v6, %v9990_v27 }
 0x451   :  { %6299 = vmatpush2.bf16.msra.mxu0 %v7176_v12 }
 0x452   :  { %6340 = vmatpush2.bf16.msra.mxu1 %v7178_v20  ;;  %6300 = vmatprep.subr.bf16.mxu0 %v7145_v17 }
 0x453   :  { %6341 = vmatprep.subr.bf16.mxu1 %v7147_v21 }
 0x455   :  { %6301 = vmatpush2.bf16.msra.mxu0 %v7144_v24 }
 0x456   :  { %6342 = vmatpush2.bf16.msra.mxu1 %v7146_v25 }
 0x458   :  { %v6058_v30 = vpop.f32.mrf.mxu0  ;;  %6303 = vmatmul.mubr.bf16.vlgmr.msra.gmra.mxu0 %v9195_v39 }
 0x459   :  { %v6099_v13 = vpop.f32.mrf.mxu1  ;;  %6344 = vmatmul.mubr.bf16.vlgmr.msra.gmra.mxu1 %v9195_v39  ;;  %v6059_v35 = vadd.f32 %v6058_v30, %v3043_v19  ;;  %v3059_v39 = vrot.slane %v2970_v61, %v9990_v27 }
 0x45a   :  { %v6060_v34 = vpop.f32.mrf.mxu0  ;;  %v6100_v15 = vadd.f32 %v6099_v13, %v3051_v31 }
 0x45b   :  { %v6061_v38 = vadd.f32 %v6060_v34, %v3047_v26  ;;  %v6101_v14 = vpop.f32.mrf.mxu1  ;;  %v3095_v34 = vrot.slane %v2971_v6, %v9996_v52 }
 0x45c   :  { %v6102_v16 = vadd.f32 %v6101_v14, %v3055_v33  ;;  %v6062_v40 = vpop.f32.mrf.mxu0  ;;  %v3103_v14 = vrot.slane %v2971_v6, %v9999_v63 }
 0x45d   :  { %v6452_v41 = vcombine.low %v6059_v35, %v6061_v38  ;;  %v6103_v42 = vpop.f32.mrf.mxu1  ;;  %v3099_v38 = vrot.slane %v2971_v6, %v9993_v62 }
 0x45e   :  { %v6453_v44 = vcombine.low %v6100_v15, %v6102_v16  ;;  %v6063_v45 = vpop.f32.mrf.mxu0 }
 0x45f   :  { %v6460_v18 = vrot.slane %v6452_v41, %v8031_v49  ;;  %v6104_v46 = vpop.f32.mrf.mxu1 }
 0x460   :  { %v6467_v51 = vrot.slane %v6453_v44, %v8031_v49 }
 0x462   :  { %v6468_v23 = vcombine.low %v6460_v18, %v6467_v51 }
 0x464   :  { %6532 = vst [vmem:[%s10672_s7 + $0x20] sm:$0xff] %v6468_v23 }
 0x498   :  { %v6140_v28 = vpop.f32.mrf.mxu0 }
 0x499   :  { %v6181_v54 = vpop.f32.mrf.mxu1  ;;  %v6141_v56 = vadd.f32 %v6140_v28, %v3059_v39 }
 0x49a   :  { %v6142_v55 = vpop.f32.mrf.mxu0  ;;  %v6182_v59 = vadd.f32 %v6181_v54, %v3067_v36 }
 0x49b   :  { %v6143_v57 = vadd.f32 %v6142_v55, %v3063_v53  ;;  %v6183_v58 = vpop.f32.mrf.mxu1 }
 0x49c   :  { %v6184_v60 = vadd.f32 %v6183_v58, %v3071_v37  ;;  %v6144_v32 = vpop.f32.mrf.mxu0 }
 0x49d   :  { %v6469_v48 = vcombine.low %v6141_v56, %v6143_v57  ;;  %v6185_v0 = vpop.f32.mrf.mxu1 }
 0x49e   :  { %v6470_v1 = vcombine.low %v6182_v59, %v6184_v60  ;;  %v6145_v50 = vpop.f32.mrf.mxu0 }
 0x49f   :  { %v6477_v4 = vrot.slane %v6469_v48, %v8031_v49  ;;  %v6186_v5 = vpop.f32.mrf.mxu1 }
 0x4a0   :  { %v6484_v29 = vrot.slane %v6470_v1, %v8031_v49 }
 0x4a2   :  { %v6485_v43 = vcombine.low %v6477_v4, %v6484_v29 }
 0x4a4   :  { %6533 = vst [vmem:[%s10672_s7 + $0x28] sm:$0xff] %v6485_v43 }
 0x4d8   :  { %v6222_v9 = vpop.f32.mrf.mxu0 }
 0x4d9   :  { %v6263_v12 = vpop.f32.mrf.mxu1  ;;  %v6223_v17 = vadd.f32 %v6222_v9, %v3075_v7 }
 0x4da   :  { %v6224_v20 = vpop.f32.mrf.mxu0  ;;  %v6264_v25 = vadd.f32 %v6263_v12, %v3083_v10 }
 0x4db   :  { %v6225_v21 = vadd.f32 %v6224_v20, %v3079_v8  ;;  %v6265_v24 = vpop.f32.mrf.mxu1 }
 0x4dc   :  { %v6266_v61 = vadd.f32 %v6265_v24, %v3087_v11  ;;  %v6226_v19 = vpop.f32.mrf.mxu0 }
 0x4dd   :  { %v6486_v26 = vcombine.low %v6223_v17, %v6225_v21  ;;  %v6267_v30 = vpop.f32.mrf.mxu1 }
 0x4de   :  { %v6487_v31 = vcombine.low %v6264_v25, %v6266_v61  ;;  %v6227_v33 = vpop.f32.mrf.mxu0 }
 0x4df   :  { %v6494_v47 = vrot.slane %v6486_v26, %v8031_v49  ;;  %v6268_v3 = vpop.f32.mrf.mxu1 }
 0x4e0   :  { %v6501_v13 = vrot.slane %v6487_v31, %v8031_v49 }
 0x4e2   :  { %v6502_v2 = vcombine.low %v6494_v47, %v6501_v13 }
 0x4e4   :  { %6534 = vst [vmem:[%s10672_s7 + $0x30] sm:$0xff] %v6502_v2 }
 0x518   :  { %v6304_v35 = vpop.f32.mrf.mxu0 }
 0x519   :  { %v6345_v15 = vpop.f32.mrf.mxu1  ;;  %v6305_v40 = vadd.f32 %v6304_v35, %v3091_v22 }
 0x51a   :  { %v6306_v16 = vpop.f32.mrf.mxu0  ;;  %v6346_v44 = vadd.f32 %v6345_v15, %v3099_v38 }
 0x51b   :  { %v6307_v41 = vadd.f32 %v6306_v16, %v3095_v34  ;;  %v6347_v42 = vpop.f32.mrf.mxu1 }
 0x51c   :  { %v6348_v45 = vadd.f32 %v6347_v42, %v3103_v14  ;;  %v6308_v18 = vpop.f32.mrf.mxu0 }
 0x51d   :  { %v6503_v46 = vcombine.low %v6305_v40, %v6307_v41  ;;  %v6349_v51 = vpop.f32.mrf.mxu1 }
 0x51e   :  { %v6504_v23 = vcombine.low %v6346_v44, %v6348_v45  ;;  %v6309_v39 = vpop.f32.mrf.mxu0 }
 0x51f   :  { %v6511_v27 = vrot.slane %v6503_v46, %v8031_v49  ;;  %v6350_v52 = vpop.f32.mrf.mxu1 }
 0x520   :  { %v6518_v53 = vrot.slane %v6504_v23, %v8031_v49 }
 0x522   :  { %v6519_v62 = vcombine.low %v6511_v27, %v6518_v53 }
 0x524   :  { %6535 = vst [vmem:[%s10672_s7 + $0x38] sm:$0xff] %v6519_v62 }

</bundles_post_ra>
